<compile_context>
chip_gen: v5e
topology: v5e:2x2
jax: 0.10.0
libtpu: 0.0.40
codegen_flags: <defaults>
</compile_context>

<pallas_src>
import functools

import jax
import jax.numpy as jnp
from jax.experimental import pallas as pl
from jax.experimental.pallas import tpu as pltpu

HIGH = jax.lax.Precision.HIGHEST


# ----------------------------- fused Pallas kernel --------------------------------

def _fused_block_kernel(x1_ref, x2_ref, wt_ref, bt_ref,
                        w1_ref, a1_ref, c1_ref, w2_ref, a2_ref, c2_ref,
                        o_ref, cat4, mid4, *, H1, W1, placement, zero_up_interior):
    # x1_ref : (1, H1*W1, Ci)      flattened low-res input
    # x2_ref : (1, 4, P, Q, Cc)    skip connection split by (row, col) parity, P = H2//2
    # wt_ref : (Ci, 4*Cu), bt_ref (1, 4*Cu)   ConvTranspose weight, cols ordered (a, b, cu)
    # w1_ref : (9*Ct, Cm), a1/c1 (1, Cm)      conv1 rows (ky, kx, [x2 ch, up ch]) + folded BN
    # w2_ref : (9*Cm, Co), a2/c2 (1, Co)      conv2 rows (ky, kx, cm) + folded BN
    # o_ref  : (1, P*Q, 4*Co)      output, lane order (a, b, co)
    # cat4   : (4, P+2, Q+2, Ct)   padded parity slabs of concat(x2, up)   (VMEM scratch)
    # mid4   : (4, P+2, Q+2, Cm)   padded parity slabs of the mid activation
    f32 = jnp.float32
    P = cat4.shape[1] - 2
    Q = cat4.shape[2] - 2
    Ct = cat4.shape[3]
    Cc = x2_ref.shape[4]
    Cu = Ct - Cc
    Cm = mid4.shape[3]

    # ---- zero only the conv halos (2-wide strips; the clobbered interior row/col is fully
    #      rewritten below).  Done every step so megacore grid splitting stays correct.
    cat4[:, 0:2, :, :] = jnp.zeros((4, 2, Q + 2, Ct), f32)
    cat4[:, P:P + 2, :, :] = jnp.zeros((4, 2, Q + 2, Ct), f32)
    cat4[:, :, 0:2, :] = jnp.zeros((4, P + 2, 2, Ct), f32)
    cat4[:, :, Q:Q + 2, :] = jnp.zeros((4, P + 2, 2, Ct), f32)
    mid4[:, 0:2, :, :] = jnp.zeros((4, 2, Q + 2, Cm), f32)
    mid4[:, P:P + 2, :, :] = jnp.zeros((4, 2, Q + 2, Cm), f32)
    mid4[:, :, 0:2, :] = jnp.zeros((4, P + 2, 2, Cm), f32)
    mid4[:, :, Q:Q + 2, :] = jnp.zeros((4, P + 2, 2, Cm), f32)
    if zero_up_interior:   # module's F.pad leaves interior zeros (not the common U-Net path)
        cat4[:, 1:1 + P, 1:1 + Q, Cc:Ct] = jnp.zeros((4, P, Q, Cu), f32)

    # ---- ConvTranspose2d(k=2, s=2): one MXU matmul; the four (a, b) taps live on lanes
    taps = jnp.dot(x1_ref[0], wt_ref[...], precision=HIGH,
                   preferred_element_type=f32) + bt_ref[...]          # (H1*W1, 4*Cu)

    # ---- build the parity slabs of the padded concat(x2, upsampled) frame (VMEM-resident)
    for ab in range(4):
        cat4[ab, 1:1 + P, 1:1 + Q, 0:Cc] = x2_ref[0, ab]              # skip connection
        src_ab, dp, dq, sp, sq, nr, nc = placement[ab]
        if nr > 0 and nc > 0:
            tap = taps[:, src_ab * Cu:(src_ab + 1) * Cu].reshape(H1, W1, Cu)
            cat4[ab, 1 + dp:1 + dp + nr, 1 + dq:1 + dq + nc, Cc:Ct] = \
                tap[sp:sp + nr, sq:sq + nc, :]

    # ---- conv1 (3x3, dilation=2) == an independent 3x3 dilation-1 conv on each parity slab
    for ab in range(4):
        cols = [cat4[ab, ky:ky + P, kx:kx + Q, :].reshape(P * Q, Ct)
                for ky in range(3) for kx in range(3)]
        im1 = jnp.concatenate(cols, axis=-1)                          # (P*Q, 9*Ct)
        h = jnp.dot(im1, w1_ref[...], precision=HIGH, preferred_element_type=f32)
        h = jnp.maximum(h * a1_ref[...] + c1_ref[...], 0.0)           # folded bias + BN + ReLU
        mid4[ab, 1:1 + P, 1:1 + Q, :] = h.reshape(P, Q, Cm)

    # ---- conv2 (3x3, dilation=1): polyphase mix of the four mid slabs
    outs = []
    for a in range(2):
        for b in range(2):
            cols = []
            for ky in range(3):
                for kx in range(3):
                    sa, oa = (a + ky - 1) % 2, (a + ky - 1) // 2
                    sb, ob = (b + kx - 1) % 2, (b + kx - 1) // 2
                    cols.append(mid4[2 * sa + sb, 1 + oa:1 + oa + P,
                                     1 + ob:1 + ob + Q, :].reshape(P * Q, Cm))
            im2 = jnp.concatenate(cols, axis=-1)                      # (P*Q, 9*Cm)
            y = jnp.dot(im2, w2_ref[...], precision=HIGH, preferred_element_type=f32)
            outs.append(jnp.maximum(y * a2_ref[...] + c2_ref[...], 0.0))
    o_ref[0] = jnp.concatenate(outs, axis=-1)                         # lane-packed (P*Q, 4*Co)


# ------------------------------ parameter packing ------------------------------

def _fold_bn(gamma, beta, rmean, rvar, eps=1e-5):
    scale = gamma / jnp.sqrt(rvar + eps)
    shift = beta - rmean * scale
    return scale, shift


def pack_params(p):
    """One-time weight re-layout + bias/BN folding (hoisted out of the forward path)."""
    Ci_t, Co_t = p['wt'].shape[0], p['wt'].shape[1]
    wt_mat = jnp.transpose(p['wt'], (0, 2, 3, 1)).reshape(Ci_t, 4 * Co_t)  # cols (a, b, co)
    bt4 = jnp.tile(p['bt'], 4).reshape(1, 4 * Co_t)

    Cm, Ct = p['w1'].shape[0], p['w1'].shape[1]
    Co = p['w2'].shape[0]
    w1_mat = jnp.transpose(p['w1'], (2, 3, 1, 0)).reshape(9 * Ct, Cm)      # rows (ky, kx, ci)
    w2_mat = jnp.transpose(p['w2'], (2, 3, 1, 0)).reshape(9 * Cm, Co)

    s1, t1 = _fold_bn(p['gamma1'], p['beta1'], p['rm1'], p['rv1'])
    s2, t2 = _fold_bn(p['gamma2'], p['beta2'], p['rm2'], p['rv2'])
    a1 = s1.reshape(1, Cm)
    c1 = (p['b1'] * s1 + t1).reshape(1, Cm)
    a2 = s2.reshape(1, Co)
    c2 = (p['b2'] * s2 + t2).reshape(1, Co)
    return dict(wt=wt_mat, bt=bt4, w1=w1_mat, a1=a1, c1=c1, w2=w2_mat, a2=a2, c2=c2)


# ------------------------------ forward (wrapper) ------------------------------

def create_up_conv_block(x1_nchw, x2_nchw, pp):
    """Forward pass of CreateUpConvBlock.  Inputs/outputs NCHW (PyTorch convention)."""
    N, Ci, H1, W1 = x1_nchw.shape
    _, Cc, H2, W2 = x2_nchw.shape
    Cu = pp['wt'].shape[1] // 4                      # ConvTranspose output channels
    Ct = Cc + Cu
    Cm = pp['w1'].shape[1]
    Co = pp['w2'].shape[1]
    assert pp['wt'].shape[0] == Ci and pp['w1'].shape[0] == 9 * Ct
    assert H2 % 2 == 0 and W2 % 2 == 0               # polyphase split needs even skip sizes
    P, Q = H2 // 2, W2 // 2

    # ---- module's F.pad bookkeeping (static ints; preserves the module's quirk of feeding
    #      the H difference to the W pads and vice versa).  Negative pads == crops.
    c0 = H2 - 2 * H1
    c1 = W2 - 2 * W1
    wl, wr = c0 // 2, (c0 * 2 + 1) // 2
    ht, hb = c1 // 2, (c1 * 2 + 1) // 2
    assert 2 * H1 + ht + hb == H2 and 2 * W1 + wl + wr == W2, \
        "padded upsample does not match skip-connection spatial size"

    def axis_place(pad_before, n_src, n_dst):
        # For each destination-frame parity: (source tap parity, dst start, src start, count).
        res = []
        for a in range(2):
            src_par = (a - pad_before) % 2
            off = (a - pad_before) // 2              # src_idx = dst_idx + off
            lo = max(0, -off)
            hi = min(n_dst - 1, n_src - 1 - off)
            res.append((src_par, lo, lo + off, hi - lo + 1))
        return res

    hp = axis_place(ht, H1, P)
    wp = axis_place(wl, W1, Q)
    placement, full = [], True
    for a in range(2):
        for b in range(2):
            sa, dp, sp, nr = hp[a]
            sb, dq, sq, nc = wp[b]
            placement.append((2 * sa + sb, dp, dq, sp, sq, nr, nc))
            full = full and nr == P and nc == Q
    placement = tuple(placement)

    # ---- input relayouts (single XLA copies; they replace the NCHW->NHWC transposes the
    #      un-fused version needed anyway)
    x1 = jnp.transpose(x1_nchw, (0, 2, 3, 1)).reshape(N, H1 * W1, Ci)
    x2 = jnp.transpose(x2_nchw.reshape(N, Cc, P, 2, Q, 2),
                       (0, 3, 5, 2, 4, 1)).reshape(N, 4, P, Q, Cc)

    kernel = functools.partial(_fused_block_kernel, H1=H1, W1=W1,
                               placement=placement, zero_up_interior=not full)
    out = pl.pallas_call(
        kernel,
        out_shape=jax.ShapeDtypeStruct((N, P * Q, 4 * Co), jnp.float32),
        grid_spec=pltpu.PrefetchScalarGridSpec(
            num_scalar_prefetch=0, grid=(N,),
            in_specs=[
                pl.BlockSpec((1, H1 * W1, Ci), lambda n: (n, 0, 0)),
                pl.BlockSpec((1, 4, P, Q, Cc), lambda n: (n, 0, 0, 0, 0)),
                pl.BlockSpec((Ci, 4 * Cu), lambda n: (0, 0)),
                pl.BlockSpec((1, 4 * Cu), lambda n: (0, 0)),
                pl.BlockSpec((9 * Ct, Cm), lambda n: (0, 0)),
                pl.BlockSpec((1, Cm), lambda n: (0, 0)),
                pl.BlockSpec((1, Cm), lambda n: (0, 0)),
                pl.BlockSpec((9 * Cm, Co), lambda n: (0, 0)),
                pl.BlockSpec((1, Co), lambda n: (0, 0)),
                pl.BlockSpec((1, Co), lambda n: (0, 0)),
            ],
            out_specs=pl.BlockSpec((1, P * Q, 4 * Co), lambda n: (n, 0, 0)),
            scratch_shapes=[
                pltpu.VMEM((4, P + 2, Q + 2, Ct), jnp.float32),
                pltpu.VMEM((4, P + 2, Q + 2, Cm), jnp.float32),
            ],
        ),
        compiler_params=pltpu.CompilerParams(
            dimension_semantics=("parallel",), vmem_limit_bytes=32 * 1024 * 1024),
    )(x1, x2, pp['wt'], pp['bt'], pp['w1'], pp['a1'], pp['c1'],
      pp['w2'], pp['a2'], pp['c2'])

    # ---- un-interleave the parity lanes back to NCHW (single post-kernel XLA op)
    out = out.reshape(N, P, Q, 2, 2, Co)
    out = jnp.transpose(out, (0, 5, 1, 3, 2, 4)).reshape(N, Co, H2, W2)
    return out


# --------------------------- pure-JAX reference --------------------------------

def _ref_conv_bn_relu(x_nhwc, w_oihw, b, scale, shift, dil):
    y = jax.lax.conv_general_dilated(
        x_nhwc, jnp.transpose(w_oihw, (2, 3, 1, 0)),
        window_strides=(1, 1), padding=((dil, dil), (dil, dil)),
        rhs_dilation=(dil, dil), dimension_numbers=('NHWC', 'HWIO', 'NHWC'),
        precision=HIGH)
    y = y + b
    y = y * scale + shift
    return jnp.maximum(y, 0.0)


def reference_forward(x1_nchw, x2_nchw, p):
    x1 = jnp.transpose(x1_nchw, (0, 2, 3, 1))
    x2 = jnp.transpose(x2_nchw, (0, 2, 3, 1))
    N, H, W, Cin = x1.shape
    Cout = p['wt'].shape[1]
    t = jnp.einsum('nhwi,iokl->nhwklo', x1, p['wt'], precision=HIGH)
    up = t.transpose(0, 1, 3, 2, 4, 5).reshape(N, 2 * H, 2 * W, Cout) + p['bt']
    c = [x2.shape[1] - up.shape[1], x2.shape[2] - up.shape[2]]
    up = jnp.pad(up, ((0, 0), (c[1] // 2, (c[1] * 2 + 1) // 2),
                      (c[0] // 2, (c[0] * 2 + 1) // 2), (0, 0)))
    x = jnp.concatenate([x2, up], axis=-1)
    s1, t1 = _fold_bn(p['gamma1'], p['beta1'], p['rm1'], p['rv1'])
    s2, t2 = _fold_bn(p['gamma2'], p['beta2'], p['rm2'], p['rv2'])
    x = _ref_conv_bn_relu(x, p['w1'], p['b1'], s1, t1, 2)
    x = _ref_conv_bn_relu(x, p['w2'], p['b2'], s2, t2, 1)
    return jnp.transpose(x, (0, 3, 1, 2))


# ----------------------------------- main ---------------------------------------

if __name__ == "__main__":
    key = jax.random.PRNGKey(0)
    ks = jax.random.split(key, 20)

    N = 2
    in_ch, concat_ch, mid_ch, out_ch = 4, 4, 8, 8
    H1 = W1 = 8
    H2 = W2 = 16                       # x2 spatial == 2 * x1 spatial (U-Net skip)

    x1 = jax.random.normal(ks[0], (N, in_ch, H1, W1), jnp.float32)      # NCHW
    x2 = jax.random.normal(ks[1], (N, concat_ch, H2, W2), jnp.float32)  # NCHW

    params = {
        # ConvTranspose2d(in_ch, in_ch, 2, stride=2) : weight (Cin, Cout, 2, 2)
        'wt': 0.1 * jax.random.normal(ks[2], (in_ch, in_ch, 2, 2), jnp.float32),
        'bt': 0.1 * jax.random.normal(ks[3], (in_ch,), jnp.float32),
        # Conv2d(in_ch+concat_ch, mid_ch, 3, padding=2, dilation=2)
        'w1': 0.1 * jax.random.normal(ks[4], (mid_ch, in_ch + concat_ch, 3, 3), jnp.float32),
        'b1': 0.1 * jax.random.normal(ks[5], (mid_ch,), jnp.float32),
        'gamma1': 1.0 + 0.1 * jax.random.normal(ks[6], (mid_ch,), jnp.float32),
        'beta1': 0.1 * jax.random.normal(ks[7], (mid_ch,), jnp.float32),
        'rm1': 0.1 * jax.random.normal(ks[8], (mid_ch,), jnp.float32),
        'rv1': 1.0 + 0.1 * jnp.abs(jax.random.normal(ks[9], (mid_ch,), jnp.float32)),
        # Conv2d(mid_ch, out_ch, 3, padding=1, dilation=1)
        'w2': 0.1 * jax.random.normal(ks[10], (out_ch, mid_ch, 3, 3), jnp.float32),
        'b2': 0.1 * jax.random.normal(ks[11], (out_ch,), jnp.float32),
        'gamma2': 1.0 + 0.1 * jax.random.normal(ks[12], (out_ch,), jnp.float32),
        'beta2': 0.1 * jax.random.normal(ks[13], (out_ch,), jnp.float32),
        'rm2': 0.1 * jax.random.normal(ks[14], (out_ch,), jnp.float32),
        'rv2': 1.0 + 0.1 * jnp.abs(jax.random.normal(ks[15], (out_ch,), jnp.float32)),
    }

    packed = pack_params(params)                      # one-time re-layout (hoisted)
    fwd = jax.jit(create_up_conv_block)

    out = jax.block_until_ready(fwd(x1, x2, packed))
    ref = jax.block_until_ready(reference_forward(x1, x2, params))

    assert out.shape == (N, out_ch, H2, W2), out.shape
    max_err = float(jnp.max(jnp.abs(out - ref)))
    assert jnp.allclose(out, ref, rtol=1e-4, atol=1e-4), f"max abs err {max_err}"
    print("KERNEL_OK")
</pallas_src>

<mosaic_0001>
module attributes {stable_mosaic.version = 11 : i64} {
  func.func @_fused_block_kernel(%arg0: i32, %arg1: memref<1x64x4xf32, #tpu.memory_space<vmem>>, %arg2: memref<1x4x8x8x4xf32, #tpu.memory_space<vmem>>, %arg3: memref<4x16xf32, #tpu.memory_space<vmem>>, %arg4: memref<1x16xf32, #tpu.memory_space<vmem>>, %arg5: memref<72x8xf32, #tpu.memory_space<vmem>>, %arg6: memref<1x8xf32, #tpu.memory_space<vmem>>, %arg7: memref<1x8xf32, #tpu.memory_space<vmem>>, %arg8: memref<72x8xf32, #tpu.memory_space<vmem>>, %arg9: memref<1x8xf32, #tpu.memory_space<vmem>>, %arg10: memref<1x8xf32, #tpu.memory_space<vmem>>, %arg11: memref<1x64x32xf32, #tpu.memory_space<vmem>>, %arg12: memref<4x10x10x8xf32, #tpu.memory_space<vmem>>, %arg13: memref<4x10x10x8xf32, #tpu.memory_space<vmem>>) attributes {dimension_semantics = [#tpu.dimension_semantics<parallel>], iteration_bounds = array<i64: 2>, scalar_prefetch = 0 : i64, scratch_operands = 2 : i64, tpu.core_type = #tpu.core_type<tc>, window_params = [{transform_indices = @transform_0, window_bounds = array<i64: 1, 64, 4>}, {transform_indices = @transform_1, window_bounds = array<i64: 1, 4, 8, 8, 4>}, {pipeline_mode = #tpu.pipeline_mode<synchronous>, transform_indices = @transform_2, window_bounds = array<i64: 4, 16>}, {pipeline_mode = #tpu.pipeline_mode<synchronous>, transform_indices = @transform_3, window_bounds = array<i64: 1, 16>}, {pipeline_mode = #tpu.pipeline_mode<synchronous>, transform_indices = @transform_4, window_bounds = array<i64: 72, 8>}, {pipeline_mode = #tpu.pipeline_mode<synchronous>, transform_indices = @transform_5, window_bounds = array<i64: 1, 8>}, {pipeline_mode = #tpu.pipeline_mode<synchronous>, transform_indices = @transform_6, window_bounds = array<i64: 1, 8>}, {pipeline_mode = #tpu.pipeline_mode<synchronous>, transform_indices = @transform_7, window_bounds = array<i64: 72, 8>}, {pipeline_mode = #tpu.pipeline_mode<synchronous>, transform_indices = @transform_8, window_bounds = array<i64: 1, 8>}, {pipeline_mode = #tpu.pipeline_mode<synchronous>, transform_indices = @transform_9, window_bounds = array<i64: 1, 8>}, {transform_indices = @transform_10, window_bounds = array<i64: 1, 64, 32>}]} {
    %cst = arith.constant 0.000000e+00 : f32
    %0 = vector.broadcast %cst : f32 to vector<4x2x10x8xf32>
    %c0 = arith.constant 0 : index
    %c0_0 = arith.constant 0 : index
    %c0_1 = arith.constant 0 : index
    %c0_2 = arith.constant 0 : index
    %1 = vector.load %arg12[%c0, %c0_0, %c0_1, %c0_2] : memref<4x10x10x8xf32, #tpu.memory_space<vmem>>, vector<4x2x10x8xf32>
    tpu.vector_store %arg12[%c0, %c0_0, %c0_1, %c0_2], %0 {strides = array<i32>} : memref<4x10x10x8xf32, #tpu.memory_space<vmem>>, vector<4x2x10x8xf32>,
    %cst_3 = arith.constant 0.000000e+00 : f32
    %2 = vector.broadcast %cst_3 : f32 to vector<4x2x10x8xf32>
    %c0_4 = arith.constant 0 : index
    %c8 = arith.constant 8 : index
    %c0_5 = arith.constant 0 : index
    %c0_6 = arith.constant 0 : index
    %3 = vector.load %arg12[%c0_4, %c8, %c0_5, %c0_6] : memref<4x10x10x8xf32, #tpu.memory_space<vmem>>, vector<4x2x10x8xf32>
    tpu.vector_store %arg12[%c0_4, %c8, %c0_5, %c0_6], %2 {strides = array<i32>} : memref<4x10x10x8xf32, #tpu.memory_space<vmem>>, vector<4x2x10x8xf32>,
    %cst_7 = arith.constant 0.000000e+00 : f32
    %4 = vector.broadcast %cst_7 : f32 to vector<4x10x2x8xf32>
    %c0_8 = arith.constant 0 : index
    %c0_9 = arith.constant 0 : index
    %c0_10 = arith.constant 0 : index
    %c0_11 = arith.constant 0 : index
    %5 = vector.load %arg12[%c0_8, %c0_9, %c0_10, %c0_11] : memref<4x10x10x8xf32, #tpu.memory_space<vmem>>, vector<4x10x2x8xf32>
    tpu.vector_store %arg12[%c0_8, %c0_9, %c0_10, %c0_11], %4 {strides = array<i32>} : memref<4x10x10x8xf32, #tpu.memory_space<vmem>>, vector<4x10x2x8xf32>,
    %cst_12 = arith.constant 0.000000e+00 : f32
    %6 = vector.broadcast %cst_12 : f32 to vector<4x10x2x8xf32>
    %c0_13 = arith.constant 0 : index
    %c0_14 = arith.constant 0 : index
    %c8_15 = arith.constant 8 : index
    %c0_16 = arith.constant 0 : index
    %7 = vector.load %arg12[%c0_13, %c0_14, %c8_15, %c0_16] : memref<4x10x10x8xf32, #tpu.memory_space<vmem>>, vector<4x10x2x8xf32>
    tpu.vector_store %arg12[%c0_13, %c0_14, %c8_15, %c0_16], %6 {strides = array<i32>} : memref<4x10x10x8xf32, #tpu.memory_space<vmem>>, vector<4x10x2x8xf32>,
    %cst_17 = arith.constant 0.000000e+00 : f32
    %8 = vector.broadcast %cst_17 : f32 to vector<4x2x10x8xf32>
    %c0_18 = arith.constant 0 : index
    %c0_19 = arith.constant 0 : index
    %c0_20 = arith.constant 0 : index
    %c0_21 = arith.constant 0 : index
    %9 = vector.load %arg13[%c0_18, %c0_19, %c0_20, %c0_21] : memref<4x10x10x8xf32, #tpu.memory_space<vmem>>, vector<4x2x10x8xf32>
    tpu.vector_store %arg13[%c0_18, %c0_19, %c0_20, %c0_21], %8 {strides = array<i32>} : memref<4x10x10x8xf32, #tpu.memory_space<vmem>>, vector<4x2x10x8xf32>,
    %cst_22 = arith.constant 0.000000e+00 : f32
    %10 = vector.broadcast %cst_22 : f32 to vector<4x2x10x8xf32>
    %c0_23 = arith.constant 0 : index
    %c8_24 = arith.constant 8 : index
    %c0_25 = arith.constant 0 : index
    %c0_26 = arith.constant 0 : index
    %11 = vector.load %arg13[%c0_23, %c8_24, %c0_25, %c0_26] : memref<4x10x10x8xf32, #tpu.memory_space<vmem>>, vector<4x2x10x8xf32>
    tpu.vector_store %arg13[%c0_23, %c8_24, %c0_25, %c0_26], %10 {strides = array<i32>} : memref<4x10x10x8xf32, #tpu.memory_space<vmem>>, vector<4x2x10x8xf32>,
    %cst_27 = arith.constant 0.000000e+00 : f32
    %12 = vector.broadcast %cst_27 : f32 to vector<4x10x2x8xf32>
    %c0_28 = arith.constant 0 : index
    %c0_29 = arith.constant 0 : index
    %c0_30 = arith.constant 0 : index
    %c0_31 = arith.constant 0 : index
    %13 = vector.load %arg13[%c0_28, %c0_29, %c0_30, %c0_31] : memref<4x10x10x8xf32, #tpu.memory_space<vmem>>, vector<4x10x2x8xf32>
    tpu.vector_store %arg13[%c0_28, %c0_29, %c0_30, %c0_31], %12 {strides = array<i32>} : memref<4x10x10x8xf32, #tpu.memory_space<vmem>>, vector<4x10x2x8xf32>,
    %cst_32 = arith.constant 0.000000e+00 : f32
    %14 = vector.broadcast %cst_32 : f32 to vector<4x10x2x8xf32>
    %c0_33 = arith.constant 0 : index
    %c0_34 = arith.constant 0 : index
    %c8_35 = arith.constant 8 : index
    %c0_36 = arith.constant 0 : index
    %15 = vector.load %arg13[%c0_33, %c0_34, %c8_35, %c0_36] : memref<4x10x10x8xf32, #tpu.memory_space<vmem>>, vector<4x10x2x8xf32>
    tpu.vector_store %arg13[%c0_33, %c0_34, %c8_35, %c0_36], %14 {strides = array<i32>} : memref<4x10x10x8xf32, #tpu.memory_space<vmem>>, vector<4x10x2x8xf32>,
    %c0_37 = arith.constant 0 : index
    %c0_38 = arith.constant 0 : index
    %c0_39 = arith.constant 0 : index
    %16 = vector.load %arg1[%c0_37, %c0_38, %c0_39] : memref<1x64x4xf32, #tpu.memory_space<vmem>>, vector<1x64x4xf32>
    %17 = vector.shape_cast %16 : vector<1x64x4xf32> to vector<64x4xf32>
    %c0_40 = arith.constant 0 : index
    %c0_41 = arith.constant 0 : index
    %18 = vector.load %arg3[%c0_40, %c0_41] : memref<4x16xf32, #tpu.memory_space<vmem>>, vector<4x16xf32>
    %cst_42 = arith.constant dense<0.000000e+00> : vector<64x16xf32>
    %19 = tpu.matmul %17, %18, %cst_42 {dimension_numbers = #tpu.dot_dimension_numbers<[1], [0], [0], [1], [0, 0, 1, 1], [], []>, precision = #tpu.contract_precision<fp32>} : vector<64x4xf32>, vector<4x16xf32>, vector<64x16xf32> -> vector<64x16xf32>
    %c0_43 = arith.constant 0 : index
    %c0_44 = arith.constant 0 : index
    %20 = vector.load %arg4[%c0_43, %c0_44] : memref<1x16xf32, #tpu.memory_space<vmem>>, vector<1x16xf32>
    %21 = vector.broadcast %20 : vector<1x16xf32> to vector<64x16xf32>
    %22 = arith.addf %19, %21 : vector<64x16xf32>
    %c0_45 = arith.constant 0 : index
    %c0_46 = arith.constant 0 : index
    %c0_47 = arith.constant 0 : index
    %c0_48 = arith.constant 0 : index
    %c0_49 = arith.constant 0 : index
    %23 = vector.load %arg2[%c0_45, %c0_46, %c0_47, %c0_48, %c0_49] : memref<1x4x8x8x4xf32, #tpu.memory_space<vmem>>, vector<1x1x8x8x4xf32>
    %24 = vector.shape_cast %23 : vector<1x1x8x8x4xf32> to vector<8x8x4xf32>
    %c0_50 = arith.constant 0 : index
    %c1 = arith.constant 1 : index
    %c1_51 = arith.constant 1 : index
    %c0_52 = arith.constant 0 : index
    %25 = vector.load %arg12[%c0_50, %c1, %c1_51, %c0_52] : memref<4x10x10x8xf32, #tpu.memory_space<vmem>>, vector<1x8x8x4xf32>
    %26 = vector.shape_cast %25 : vector<1x8x8x4xf32> to vector<8x8x4xf32>
    %27 = vector.shape_cast %24 : vector<8x8x4xf32> to vector<1x8x8x4xf32>
    tpu.vector_store %arg12[%c0_50, %c1, %c1_51, %c0_52], %27 {strides = array<i32>} : memref<4x10x10x8xf32, #tpu.memory_space<vmem>>, vector<1x8x8x4xf32>,
    %28 = vector.extract_strided_slice %22 {offsets = [0, 0], sizes = [64, 4], strides = [1, 1]} : vector<64x16xf32> to vector<64x4xf32>
    %29 = vector.shape_cast %28 : vector<64x4xf32> to vector<8x8x4xf32>
    %c0_53 = arith.constant 0 : index
    %c1_54 = arith.constant 1 : index
    %c1_55 = arith.constant 1 : index
    %c4 = arith.constant 4 : index
    %30 = vector.load %arg12[%c0_53, %c1_54, %c1_55, %c4] : memref<4x10x10x8xf32, #tpu.memory_space<vmem>>, vector<1x8x8x4xf32>
    %31 = vector.shape_cast %30 : vector<1x8x8x4xf32> to vector<8x8x4xf32>
    %32 = vector.shape_cast %29 : vector<8x8x4xf32> to vector<1x8x8x4xf32>
    tpu.vector_store %arg12[%c0_53, %c1_54, %c1_55, %c4], %32 {strides = array<i32>} : memref<4x10x10x8xf32, #tpu.memory_space<vmem>>, vector<1x8x8x4xf32>,
    %c0_56 = arith.constant 0 : index
    %c1_57 = arith.constant 1 : index
    %c0_58 = arith.constant 0 : index
    %c0_59 = arith.constant 0 : index
    %c0_60 = arith.constant 0 : index
    %33 = vector.load %arg2[%c0_56, %c1_57, %c0_58, %c0_59, %c0_60] : memref<1x4x8x8x4xf32, #tpu.memory_space<vmem>>, vector<1x1x8x8x4xf32>
    %34 = vector.shape_cast %33 : vector<1x1x8x8x4xf32> to vector<8x8x4xf32>
    %c1_61 = arith.constant 1 : index
    %c1_62 = arith.constant 1 : index
    %c1_63 = arith.constant 1 : index
    %c0_64 = arith.constant 0 : index
    %35 = vector.load %arg12[%c1_61, %c1_62, %c1_63, %c0_64] : memref<4x10x10x8xf32, #tpu.memory_space<vmem>>, vector<1x8x8x4xf32>
    %36 = vector.shape_cast %35 : vector<1x8x8x4xf32> to vector<8x8x4xf32>
    %37 = vector.shape_cast %34 : vector<8x8x4xf32> to vector<1x8x8x4xf32>
    tpu.vector_store %arg12[%c1_61, %c1_62, %c1_63, %c0_64], %37 {strides = array<i32>} : memref<4x10x10x8xf32, #tpu.memory_space<vmem>>, vector<1x8x8x4xf32>,
    %38 = vector.extract_strided_slice %22 {offsets = [0, 4], sizes = [64, 4], strides = [1, 1]} : vector<64x16xf32> to vector<64x4xf32>
    %39 = vector.shape_cast %38 : vector<64x4xf32> to vector<8x8x4xf32>
    %c1_65 = arith.constant 1 : index
    %c1_66 = arith.constant 1 : index
    %c1_67 = arith.constant 1 : index
    %c4_68 = arith.constant 4 : index
    %40 = vector.load %arg12[%c1_65, %c1_66, %c1_67, %c4_68] : memref<4x10x10x8xf32, #tpu.memory_space<vmem>>, vector<1x8x8x4xf32>
    %41 = vector.shape_cast %40 : vector<1x8x8x4xf32> to vector<8x8x4xf32>
    %42 = vector.shape_cast %39 : vector<8x8x4xf32> to vector<1x8x8x4xf32>
    tpu.vector_store %arg12[%c1_65, %c1_66, %c1_67, %c4_68], %42 {strides = array<i32>} : memref<4x10x10x8xf32, #tpu.memory_space<vmem>>, vector<1x8x8x4xf32>,
    %c0_69 = arith.constant 0 : index
    %c2 = arith.constant 2 : index
    %c0_70 = arith.constant 0 : index
    %c0_71 = arith.constant 0 : index
    %c0_72 = arith.constant 0 : index
    %43 = vector.load %arg2[%c0_69, %c2, %c0_70, %c0_71, %c0_72] : memref<1x4x8x8x4xf32, #tpu.memory_space<vmem>>, vector<1x1x8x8x4xf32>
    %44 = vector.shape_cast %43 : vector<1x1x8x8x4xf32> to vector<8x8x4xf32>
    %c2_73 = arith.constant 2 : index
    %c1_74 = arith.constant 1 : index
    %c1_75 = arith.constant 1 : index
    %c0_76 = arith.constant 0 : index
    %45 = vector.load %arg12[%c2_73, %c1_74, %c1_75, %c0_76] : memref<4x10x10x8xf32, #tpu.memory_space<vmem>>, vector<1x8x8x4xf32>
    %46 = vector.shape_cast %45 : vector<1x8x8x4xf32> to vector<8x8x4xf32>
    %47 = vector.shape_cast %44 : vector<8x8x4xf32> to vector<1x8x8x4xf32>
    tpu.vector_store %arg12[%c2_73, %c1_74, %c1_75, %c0_76], %47 {strides = array<i32>} : memref<4x10x10x8xf32, #tpu.memory_space<vmem>>, vector<1x8x8x4xf32>,
    %48 = vector.extract_strided_slice %22 {offsets = [0, 8], sizes = [64, 4], strides = [1, 1]} : vector<64x16xf32> to vector<64x4xf32>
    %49 = vector.shape_cast %48 : vector<64x4xf32> to vector<8x8x4xf32>
    %c2_77 = arith.constant 2 : index
    %c1_78 = arith.constant 1 : index
    %c1_79 = arith.constant 1 : index
    %c4_80 = arith.constant 4 : index
    %50 = vector.load %arg12[%c2_77, %c1_78, %c1_79, %c4_80] : memref<4x10x10x8xf32, #tpu.memory_space<vmem>>, vector<1x8x8x4xf32>
    %51 = vector.shape_cast %50 : vector<1x8x8x4xf32> to vector<8x8x4xf32>
    %52 = vector.shape_cast %49 : vector<8x8x4xf32> to vector<1x8x8x4xf32>
    tpu.vector_store %arg12[%c2_77, %c1_78, %c1_79, %c4_80], %52 {strides = array<i32>} : memref<4x10x10x8xf32, #tpu.memory_space<vmem>>, vector<1x8x8x4xf32>,
    %c0_81 = arith.constant 0 : index
    %c3 = arith.constant 3 : index
    %c0_82 = arith.constant 0 : index
    %c0_83 = arith.constant 0 : index
    %c0_84 = arith.constant 0 : index
    %53 = vector.load %arg2[%c0_81, %c3, %c0_82, %c0_83, %c0_84] : memref<1x4x8x8x4xf32, #tpu.memory_space<vmem>>, vector<1x1x8x8x4xf32>
    %54 = vector.shape_cast %53 : vector<1x1x8x8x4xf32> to vector<8x8x4xf32>
    %c3_85 = arith.constant 3 : index
    %c1_86 = arith.constant 1 : index
    %c1_87 = arith.constant 1 : index
    %c0_88 = arith.constant 0 : index
    %55 = vector.load %arg12[%c3_85, %c1_86, %c1_87, %c0_88] : memref<4x10x10x8xf32, #tpu.memory_space<vmem>>, vector<1x8x8x4xf32>
    %56 = vector.shape_cast %55 : vector<1x8x8x4xf32> to vector<8x8x4xf32>
    %57 = vector.shape_cast %54 : vector<8x8x4xf32> to vector<1x8x8x4xf32>
    tpu.vector_store %arg12[%c3_85, %c1_86, %c1_87, %c0_88], %57 {strides = array<i32>} : memref<4x10x10x8xf32, #tpu.memory_space<vmem>>, vector<1x8x8x4xf32>,
    %58 = vector.extract_strided_slice %22 {offsets = [0, 12], sizes = [64, 4], strides = [1, 1]} : vector<64x16xf32> to vector<64x4xf32>
    %59 = vector.shape_cast %58 : vector<64x4xf32> to vector<8x8x4xf32>
    %c3_89 = arith.constant 3 : index
    %c1_90 = arith.constant 1 : index
    %c1_91 = arith.constant 1 : index
    %c4_92 = arith.constant 4 : index
    %60 = vector.load %arg12[%c3_89, %c1_90, %c1_91, %c4_92] : memref<4x10x10x8xf32, #tpu.memory_space<vmem>>, vector<1x8x8x4xf32>
    %61 = vector.shape_cast %60 : vector<1x8x8x4xf32> to vector<8x8x4xf32>
    %62 = vector.shape_cast %59 : vector<8x8x4xf32> to vector<1x8x8x4xf32>
    tpu.vector_store %arg12[%c3_89, %c1_90, %c1_91, %c4_92], %62 {strides = array<i32>} : memref<4x10x10x8xf32, #tpu.memory_space<vmem>>, vector<1x8x8x4xf32>,
    %c0_93 = arith.constant 0 : index
    %c0_94 = arith.constant 0 : index
    %c0_95 = arith.constant 0 : index
    %c0_96 = arith.constant 0 : index
    %63 = vector.load %arg12[%c0_93, %c0_94, %c0_95, %c0_96] : memref<4x10x10x8xf32, #tpu.memory_space<vmem>>, vector<1x8x8x8xf32>
    %64 = vector.shape_cast %63 : vector<1x8x8x8xf32> to vector<8x8x8xf32>
    %65 = vector.shape_cast %64 : vector<8x8x8xf32> to vector<64x8xf32>
    %c0_97 = arith.constant 0 : index
    %c0_98 = arith.constant 0 : index
    %c1_99 = arith.constant 1 : index
    %c0_100 = arith.constant 0 : index
    %66 = vector.load %arg12[%c0_97, %c0_98, %c1_99, %c0_100] : memref<4x10x10x8xf32, #tpu.memory_space<vmem>>, vector<1x8x8x8xf32>
    %67 = vector.shape_cast %66 : vector<1x8x8x8xf32> to vector<8x8x8xf32>
    %68 = vector.shape_cast %67 : vector<8x8x8xf32> to vector<64x8xf32>
    %c0_101 = arith.constant 0 : index
    %c0_102 = arith.constant 0 : index
    %c2_103 = arith.constant 2 : index
    %c0_104 = arith.constant 0 : index
    %69 = vector.load %arg12[%c0_101, %c0_102, %c2_103, %c0_104] : memref<4x10x10x8xf32, #tpu.memory_space<vmem>>, vector<1x8x8x8xf32>
    %70 = vector.shape_cast %69 : vector<1x8x8x8xf32> to vector<8x8x8xf32>
    %71 = vector.shape_cast %70 : vector<8x8x8xf32> to vector<64x8xf32>
    %c0_105 = arith.constant 0 : index
    %c1_106 = arith.constant 1 : index
    %c0_107 = arith.constant 0 : index
    %c0_108 = arith.constant 0 : index
    %72 = vector.load %arg12[%c0_105, %c1_106, %c0_107, %c0_108] : memref<4x10x10x8xf32, #tpu.memory_space<vmem>>, vector<1x8x8x8xf32>
    %73 = vector.shape_cast %72 : vector<1x8x8x8xf32> to vector<8x8x8xf32>
    %74 = vector.shape_cast %73 : vector<8x8x8xf32> to vector<64x8xf32>
    %c0_109 = arith.constant 0 : index
    %c1_110 = arith.constant 1 : index
    %c1_111 = arith.constant 1 : index
    %c0_112 = arith.constant 0 : index
    %75 = vector.load %arg12[%c0_109, %c1_110, %c1_111, %c0_112] : memref<4x10x10x8xf32, #tpu.memory_space<vmem>>, vector<1x8x8x8xf32>
    %76 = vector.shape_cast %75 : vector<1x8x8x8xf32> to vector<8x8x8xf32>
    %77 = vector.shape_cast %76 : vector<8x8x8xf32> to vector<64x8xf32>
    %c0_113 = arith.constant 0 : index
    %c1_114 = arith.constant 1 : index
    %c2_115 = arith.constant 2 : index
    %c0_116 = arith.constant 0 : index
    %78 = vector.load %arg12[%c0_113, %c1_114, %c2_115, %c0_116] : memref<4x10x10x8xf32, #tpu.memory_space<vmem>>, vector<1x8x8x8xf32>
    %79 = vector.shape_cast %78 : vector<1x8x8x8xf32> to vector<8x8x8xf32>
    %80 = vector.shape_cast %79 : vector<8x8x8xf32> to vector<64x8xf32>
    %c0_117 = arith.constant 0 : index
    %c2_118 = arith.constant 2 : index
    %c0_119 = arith.constant 0 : index
    %c0_120 = arith.constant 0 : index
    %81 = vector.load %arg12[%c0_117, %c2_118, %c0_119, %c0_120] : memref<4x10x10x8xf32, #tpu.memory_space<vmem>>, vector<1x8x8x8xf32>
    %82 = vector.shape_cast %81 : vector<1x8x8x8xf32> to vector<8x8x8xf32>
    %83 = vector.shape_cast %82 : vector<8x8x8xf32> to vector<64x8xf32>
    %c0_121 = arith.constant 0 : index
    %c2_122 = arith.constant 2 : index
    %c1_123 = arith.constant 1 : index
    %c0_124 = arith.constant 0 : index
    %84 = vector.load %arg12[%c0_121, %c2_122, %c1_123, %c0_124] : memref<4x10x10x8xf32, #tpu.memory_space<vmem>>, vector<1x8x8x8xf32>
    %85 = vector.shape_cast %84 : vector<1x8x8x8xf32> to vector<8x8x8xf32>
    %86 = vector.shape_cast %85 : vector<8x8x8xf32> to vector<64x8xf32>
    %c0_125 = arith.constant 0 : index
    %c2_126 = arith.constant 2 : index
    %c2_127 = arith.constant 2 : index
    %c0_128 = arith.constant 0 : index
    %87 = vector.load %arg12[%c0_125, %c2_126, %c2_127, %c0_128] : memref<4x10x10x8xf32, #tpu.memory_space<vmem>>, vector<1x8x8x8xf32>
    %88 = vector.shape_cast %87 : vector<1x8x8x8xf32> to vector<8x8x8xf32>
    %89 = vector.shape_cast %88 : vector<8x8x8xf32> to vector<64x8xf32>
    %90 = tpu.concatenate %65, %68, %71, %74, %77, %80, %83, %86, %89 in 1 : vector<64x8xf32>, vector<64x8xf32>, vector<64x8xf32>, vector<64x8xf32>, vector<64x8xf32>, vector<64x8xf32>, vector<64x8xf32>, vector<64x8xf32>, vector<64x8xf32> -> vector<64x72xf32>
    %c0_129 = arith.constant 0 : index
    %c0_130 = arith.constant 0 : index
    %91 = vector.load %arg5[%c0_129, %c0_130] : memref<72x8xf32, #tpu.memory_space<vmem>>, vector<72x8xf32>
    %cst_131 = arith.constant dense<0.000000e+00> : vector<64x8xf32>
    %92 = tpu.matmul %90, %91, %cst_131 {dimension_numbers = #tpu.dot_dimension_numbers<[1], [0], [0], [1], [0, 0, 1, 1], [], []>, precision = #tpu.contract_precision<fp32>} : vector<64x72xf32>, vector<72x8xf32>, vector<64x8xf32> -> vector<64x8xf32>
    %c0_132 = arith.constant 0 : index
    %c0_133 = arith.constant 0 : index
    %93 = vector.load %arg6[%c0_132, %c0_133] : memref<1x8xf32, #tpu.memory_space<vmem>>, vector<1x8xf32>
    %94 = vector.broadcast %93 : vector<1x8xf32> to vector<64x8xf32>
    %95 = arith.mulf %92, %94 : vector<64x8xf32>
    %c0_134 = arith.constant 0 : index
    %c0_135 = arith.constant 0 : index
    %96 = vector.load %arg7[%c0_134, %c0_135] : memref<1x8xf32, #tpu.memory_space<vmem>>, vector<1x8xf32>
    %97 = vector.broadcast %96 : vector<1x8xf32> to vector<64x8xf32>
    %98 = arith.addf %95, %97 : vector<64x8xf32>
    %cst_136 = arith.constant 0.000000e+00 : f32
    %99 = vector.broadcast %cst_136 : f32 to vector<64x8xf32>
    %100 = arith.maximumf %98, %99 : vector<64x8xf32>
    %101 = vector.shape_cast %100 : vector<64x8xf32> to vector<8x8x8xf32>
    %c0_137 = arith.constant 0 : index
    %c1_138 = arith.constant 1 : index
    %c1_139 = arith.constant 1 : index
    %c0_140 = arith.constant 0 : index
    %102 = vector.load %arg13[%c0_137, %c1_138, %c1_139, %c0_140] : memref<4x10x10x8xf32, #tpu.memory_space<vmem>>, vector<1x8x8x8xf32>
    %103 = vector.shape_cast %102 : vector<1x8x8x8xf32> to vector<8x8x8xf32>
    %104 = vector.shape_cast %101 : vector<8x8x8xf32> to vector<1x8x8x8xf32>
    tpu.vector_store %arg13[%c0_137, %c1_138, %c1_139, %c0_140], %104 {strides = array<i32>} : memref<4x10x10x8xf32, #tpu.memory_space<vmem>>, vector<1x8x8x8xf32>,
    %c1_141 = arith.constant 1 : index
    %c0_142 = arith.constant 0 : index
    %c0_143 = arith.constant 0 : index
    %c0_144 = arith.constant 0 : index
    %105 = vector.load %arg12[%c1_141, %c0_142, %c0_143, %c0_144] : memref<4x10x10x8xf32, #tpu.memory_space<vmem>>, vector<1x8x8x8xf32>
    %106 = vector.shape_cast %105 : vector<1x8x8x8xf32> to vector<8x8x8xf32>
    %107 = vector.shape_cast %106 : vector<8x8x8xf32> to vector<64x8xf32>
    %c1_145 = arith.constant 1 : index
    %c0_146 = arith.constant 0 : index
    %c1_147 = arith.constant 1 : index
    %c0_148 = arith.constant 0 : index
    %108 = vector.load %arg12[%c1_145, %c0_146, %c1_147, %c0_148] : memref<4x10x10x8xf32, #tpu.memory_space<vmem>>, vector<1x8x8x8xf32>
    %109 = vector.shape_cast %108 : vector<1x8x8x8xf32> to vector<8x8x8xf32>
    %110 = vector.shape_cast %109 : vector<8x8x8xf32> to vector<64x8xf32>
    %c1_149 = arith.constant 1 : index
    %c0_150 = arith.constant 0 : index
    %c2_151 = arith.constant 2 : index
    %c0_152 = arith.constant 0 : index
    %111 = vector.load %arg12[%c1_149, %c0_150, %c2_151, %c0_152] : memref<4x10x10x8xf32, #tpu.memory_space<vmem>>, vector<1x8x8x8xf32>
    %112 = vector.shape_cast %111 : vector<1x8x8x8xf32> to vector<8x8x8xf32>
    %113 = vector.shape_cast %112 : vector<8x8x8xf32> to vector<64x8xf32>
    %c1_153 = arith.constant 1 : index
    %c1_154 = arith.constant 1 : index
    %c0_155 = arith.constant 0 : index
    %c0_156 = arith.constant 0 : index
    %114 = vector.load %arg12[%c1_153, %c1_154, %c0_155, %c0_156] : memref<4x10x10x8xf32, #tpu.memory_space<vmem>>, vector<1x8x8x8xf32>
    %115 = vector.shape_cast %114 : vector<1x8x8x8xf32> to vector<8x8x8xf32>
    %116 = vector.shape_cast %115 : vector<8x8x8xf32> to vector<64x8xf32>
    %c1_157 = arith.constant 1 : index
    %c1_158 = arith.constant 1 : index
    %c1_159 = arith.constant 1 : index
    %c0_160 = arith.constant 0 : index
    %117 = vector.load %arg12[%c1_157, %c1_158, %c1_159, %c0_160] : memref<4x10x10x8xf32, #tpu.memory_space<vmem>>, vector<1x8x8x8xf32>
    %118 = vector.shape_cast %117 : vector<1x8x8x8xf32> to vector<8x8x8xf32>
    %119 = vector.shape_cast %118 : vector<8x8x8xf32> to vector<64x8xf32>
    %c1_161 = arith.constant 1 : index
    %c1_162 = arith.constant 1 : index
    %c2_163 = arith.constant 2 : index
    %c0_164 = arith.constant 0 : index
    %120 = vector.load %arg12[%c1_161, %c1_162, %c2_163, %c0_164] : memref<4x10x10x8xf32, #tpu.memory_space<vmem>>, vector<1x8x8x8xf32>
    %121 = vector.shape_cast %120 : vector<1x8x8x8xf32> to vector<8x8x8xf32>
    %122 = vector.shape_cast %121 : vector<8x8x8xf32> to vector<64x8xf32>
    %c1_165 = arith.constant 1 : index
    %c2_166 = arith.constant 2 : index
    %c0_167 = arith.constant 0 : index
    %c0_168 = arith.constant 0 : index
    %123 = vector.load %arg12[%c1_165, %c2_166, %c0_167, %c0_168] : memref<4x10x10x8xf32, #tpu.memory_space<vmem>>, vector<1x8x8x8xf32>
    %124 = vector.shape_cast %123 : vector<1x8x8x8xf32> to vector<8x8x8xf32>
    %125 = vector.shape_cast %124 : vector<8x8x8xf32> to vector<64x8xf32>
    %c1_169 = arith.constant 1 : index
    %c2_170 = arith.constant 2 : index
    %c1_171 = arith.constant 1 : index
    %c0_172 = arith.constant 0 : index
    %126 = vector.load %arg12[%c1_169, %c2_170, %c1_171, %c0_172] : memref<4x10x10x8xf32, #tpu.memory_space<vmem>>, vector<1x8x8x8xf32>
    %127 = vector.shape_cast %126 : vector<1x8x8x8xf32> to vector<8x8x8xf32>
    %128 = vector.shape_cast %127 : vector<8x8x8xf32> to vector<64x8xf32>
    %c1_173 = arith.constant 1 : index
    %c2_174 = arith.constant 2 : index
    %c2_175 = arith.constant 2 : index
    %c0_176 = arith.constant 0 : index
    %129 = vector.load %arg12[%c1_173, %c2_174, %c2_175, %c0_176] : memref<4x10x10x8xf32, #tpu.memory_space<vmem>>, vector<1x8x8x8xf32>
    %130 = vector.shape_cast %129 : vector<1x8x8x8xf32> to vector<8x8x8xf32>
    %131 = vector.shape_cast %130 : vector<8x8x8xf32> to vector<64x8xf32>
    %132 = tpu.concatenate %107, %110, %113, %116, %119, %122, %125, %128, %131 in 1 : vector<64x8xf32>, vector<64x8xf32>, vector<64x8xf32>, vector<64x8xf32>, vector<64x8xf32>, vector<64x8xf32>, vector<64x8xf32>, vector<64x8xf32>, vector<64x8xf32> -> vector<64x72xf32>
    %c0_177 = arith.constant 0 : index
    %c0_178 = arith.constant 0 : index
    %133 = vector.load %arg5[%c0_177, %c0_178] : memref<72x8xf32, #tpu.memory_space<vmem>>, vector<72x8xf32>
    %cst_179 = arith.constant dense<0.000000e+00> : vector<64x8xf32>
    %134 = tpu.matmul %132, %133, %cst_179 {dimension_numbers = #tpu.dot_dimension_numbers<[1], [0], [0], [1], [0, 0, 1, 1], [], []>, precision = #tpu.contract_precision<fp32>} : vector<64x72xf32>, vector<72x8xf32>, vector<64x8xf32> -> vector<64x8xf32>
    %c0_180 = arith.constant 0 : index
    %c0_181 = arith.constant 0 : index
    %135 = vector.load %arg6[%c0_180, %c0_181] : memref<1x8xf32, #tpu.memory_space<vmem>>, vector<1x8xf32>
    %136 = vector.broadcast %135 : vector<1x8xf32> to vector<64x8xf32>
    %137 = arith.mulf %134, %136 : vector<64x8xf32>
    %c0_182 = arith.constant 0 : index
    %c0_183 = arith.constant 0 : index
    %138 = vector.load %arg7[%c0_182, %c0_183] : memref<1x8xf32, #tpu.memory_space<vmem>>, vector<1x8xf32>
    %139 = vector.broadcast %138 : vector<1x8xf32> to vector<64x8xf32>
    %140 = arith.addf %137, %139 : vector<64x8xf32>
    %cst_184 = arith.constant 0.000000e+00 : f32
    %141 = vector.broadcast %cst_184 : f32 to vector<64x8xf32>
    %142 = arith.maximumf %140, %141 : vector<64x8xf32>
    %143 = vector.shape_cast %142 : vector<64x8xf32> to vector<8x8x8xf32>
    %c1_185 = arith.constant 1 : index
    %c1_186 = arith.constant 1 : index
    %c1_187 = arith.constant 1 : index
    %c0_188 = arith.constant 0 : index
    %144 = vector.load %arg13[%c1_185, %c1_186, %c1_187, %c0_188] : memref<4x10x10x8xf32, #tpu.memory_space<vmem>>, vector<1x8x8x8xf32>
    %145 = vector.shape_cast %144 : vector<1x8x8x8xf32> to vector<8x8x8xf32>
    %146 = vector.shape_cast %143 : vector<8x8x8xf32> to vector<1x8x8x8xf32>
    tpu.vector_store %arg13[%c1_185, %c1_186, %c1_187, %c0_188], %146 {strides = array<i32>} : memref<4x10x10x8xf32, #tpu.memory_space<vmem>>, vector<1x8x8x8xf32>,
    %c2_189 = arith.constant 2 : index
    %c0_190 = arith.constant 0 : index
    %c0_191 = arith.constant 0 : index
    %c0_192 = arith.constant 0 : index
    %147 = vector.load %arg12[%c2_189, %c0_190, %c0_191, %c0_192] : memref<4x10x10x8xf32, #tpu.memory_space<vmem>>, vector<1x8x8x8xf32>
    %148 = vector.shape_cast %147 : vector<1x8x8x8xf32> to vector<8x8x8xf32>
    %149 = vector.shape_cast %148 : vector<8x8x8xf32> to vector<64x8xf32>
    %c2_193 = arith.constant 2 : index
    %c0_194 = arith.constant 0 : index
    %c1_195 = arith.constant 1 : index
    %c0_196 = arith.constant 0 : index
    %150 = vector.load %arg12[%c2_193, %c0_194, %c1_195, %c0_196] : memref<4x10x10x8xf32, #tpu.memory_space<vmem>>, vector<1x8x8x8xf32>
    %151 = vector.shape_cast %150 : vector<1x8x8x8xf32> to vector<8x8x8xf32>
    %152 = vector.shape_cast %151 : vector<8x8x8xf32> to vector<64x8xf32>
    %c2_197 = arith.constant 2 : index
    %c0_198 = arith.constant 0 : index
    %c2_199 = arith.constant 2 : index
    %c0_200 = arith.constant 0 : index
    %153 = vector.load %arg12[%c2_197, %c0_198, %c2_199, %c0_200] : memref<4x10x10x8xf32, #tpu.memory_space<vmem>>, vector<1x8x8x8xf32>
    %154 = vector.shape_cast %153 : vector<1x8x8x8xf32> to vector<8x8x8xf32>
    %155 = vector.shape_cast %154 : vector<8x8x8xf32> to vector<64x8xf32>
    %c2_201 = arith.constant 2 : index
    %c1_202 = arith.constant 1 : index
    %c0_203 = arith.constant 0 : index
    %c0_204 = arith.constant 0 : index
    %156 = vector.load %arg12[%c2_201, %c1_202, %c0_203, %c0_204] : memref<4x10x10x8xf32, #tpu.memory_space<vmem>>, vector<1x8x8x8xf32>
    %157 = vector.shape_cast %156 : vector<1x8x8x8xf32> to vector<8x8x8xf32>
    %158 = vector.shape_cast %157 : vector<8x8x8xf32> to vector<64x8xf32>
    %c2_205 = arith.constant 2 : index
    %c1_206 = arith.constant 1 : index
    %c1_207 = arith.constant 1 : index
    %c0_208 = arith.constant 0 : index
    %159 = vector.load %arg12[%c2_205, %c1_206, %c1_207, %c0_208] : memref<4x10x10x8xf32, #tpu.memory_space<vmem>>, vector<1x8x8x8xf32>
    %160 = vector.shape_cast %159 : vector<1x8x8x8xf32> to vector<8x8x8xf32>
    %161 = vector.shape_cast %160 : vector<8x8x8xf32> to vector<64x8xf32>
    %c2_209 = arith.constant 2 : index
    %c1_210 = arith.constant 1 : index
    %c2_211 = arith.constant 2 : index
    %c0_212 = arith.constant 0 : index
    %162 = vector.load %arg12[%c2_209, %c1_210, %c2_211, %c0_212] : memref<4x10x10x8xf32, #tpu.memory_space<vmem>>, vector<1x8x8x8xf32>
    %163 = vector.shape_cast %162 : vector<1x8x8x8xf32> to vector<8x8x8xf32>
    %164 = vector.shape_cast %163 : vector<8x8x8xf32> to vector<64x8xf32>
    %c2_213 = arith.constant 2 : index
    %c2_214 = arith.constant 2 : index
    %c0_215 = arith.constant 0 : index
    %c0_216 = arith.constant 0 : index
    %165 = vector.load %arg12[%c2_213, %c2_214, %c0_215, %c0_216] : memref<4x10x10x8xf32, #tpu.memory_space<vmem>>, vector<1x8x8x8xf32>
    %166 = vector.shape_cast %165 : vector<1x8x8x8xf32> to vector<8x8x8xf32>
    %167 = vector.shape_cast %166 : vector<8x8x8xf32> to vector<64x8xf32>
    %c2_217 = arith.constant 2 : index
    %c2_218 = arith.constant 2 : index
    %c1_219 = arith.constant 1 : index
    %c0_220 = arith.constant 0 : index
    %168 = vector.load %arg12[%c2_217, %c2_218, %c1_219, %c0_220] : memref<4x10x10x8xf32, #tpu.memory_space<vmem>>, vector<1x8x8x8xf32>
    %169 = vector.shape_cast %168 : vector<1x8x8x8xf32> to vector<8x8x8xf32>
    %170 = vector.shape_cast %169 : vector<8x8x8xf32> to vector<64x8xf32>
    %c2_221 = arith.constant 2 : index
    %c2_222 = arith.constant 2 : index
    %c2_223 = arith.constant 2 : index
    %c0_224 = arith.constant 0 : index
    %171 = vector.load %arg12[%c2_221, %c2_222, %c2_223, %c0_224] : memref<4x10x10x8xf32, #tpu.memory_space<vmem>>, vector<1x8x8x8xf32>
    %172 = vector.shape_cast %171 : vector<1x8x8x8xf32> to vector<8x8x8xf32>
    %173 = vector.shape_cast %172 : vector<8x8x8xf32> to vector<64x8xf32>
    %174 = tpu.concatenate %149, %152, %155, %158, %161, %164, %167, %170, %173 in 1 : vector<64x8xf32>, vector<64x8xf32>, vector<64x8xf32>, vector<64x8xf32>, vector<64x8xf32>, vector<64x8xf32>, vector<64x8xf32>, vector<64x8xf32>, vector<64x8xf32> -> vector<64x72xf32>
    %c0_225 = arith.constant 0 : index
    %c0_226 = arith.constant 0 : index
    %175 = vector.load %arg5[%c0_225, %c0_226] : memref<72x8xf32, #tpu.memory_space<vmem>>, vector<72x8xf32>
    %cst_227 = arith.constant dense<0.000000e+00> : vector<64x8xf32>
    %176 = tpu.matmul %174, %175, %cst_227 {dimension_numbers = #tpu.dot_dimension_numbers<[1], [0], [0], [1], [0, 0, 1, 1], [], []>, precision = #tpu.contract_precision<fp32>} : vector<64x72xf32>, vector<72x8xf32>, vector<64x8xf32> -> vector<64x8xf32>
    %c0_228 = arith.constant 0 : index
    %c0_229 = arith.constant 0 : index
    %177 = vector.load %arg6[%c0_228, %c0_229] : memref<1x8xf32, #tpu.memory_space<vmem>>, vector<1x8xf32>
    %178 = vector.broadcast %177 : vector<1x8xf32> to vector<64x8xf32>
    %179 = arith.mulf %176, %178 : vector<64x8xf32>
    %c0_230 = arith.constant 0 : index
    %c0_231 = arith.constant 0 : index
    %180 = vector.load %arg7[%c0_230, %c0_231] : memref<1x8xf32, #tpu.memory_space<vmem>>, vector<1x8xf32>
    %181 = vector.broadcast %180 : vector<1x8xf32> to vector<64x8xf32>
    %182 = arith.addf %179, %181 : vector<64x8xf32>
    %cst_232 = arith.constant 0.000000e+00 : f32
    %183 = vector.broadcast %cst_232 : f32 to vector<64x8xf32>
    %184 = arith.maximumf %182, %183 : vector<64x8xf32>
    %185 = vector.shape_cast %184 : vector<64x8xf32> to vector<8x8x8xf32>
    %c2_233 = arith.constant 2 : index
    %c1_234 = arith.constant 1 : index
    %c1_235 = arith.constant 1 : index
    %c0_236 = arith.constant 0 : index
    %186 = vector.load %arg13[%c2_233, %c1_234, %c1_235, %c0_236] : memref<4x10x10x8xf32, #tpu.memory_space<vmem>>, vector<1x8x8x8xf32>
    %187 = vector.shape_cast %186 : vector<1x8x8x8xf32> to vector<8x8x8xf32>
    %188 = vector.shape_cast %185 : vector<8x8x8xf32> to vector<1x8x8x8xf32>
    tpu.vector_store %arg13[%c2_233, %c1_234, %c1_235, %c0_236], %188 {strides = array<i32>} : memref<4x10x10x8xf32, #tpu.memory_space<vmem>>, vector<1x8x8x8xf32>,
    %c3_237 = arith.constant 3 : index
    %c0_238 = arith.constant 0 : index
    %c0_239 = arith.constant 0 : index
    %c0_240 = arith.constant 0 : index
    %189 = vector.load %arg12[%c3_237, %c0_238, %c0_239, %c0_240] : memref<4x10x10x8xf32, #tpu.memory_space<vmem>>, vector<1x8x8x8xf32>
    %190 = vector.shape_cast %189 : vector<1x8x8x8xf32> to vector<8x8x8xf32>
    %191 = vector.shape_cast %190 : vector<8x8x8xf32> to vector<64x8xf32>
    %c3_241 = arith.constant 3 : index
    %c0_242 = arith.constant 0 : index
    %c1_243 = arith.constant 1 : index
    %c0_244 = arith.constant 0 : index
    %192 = vector.load %arg12[%c3_241, %c0_242, %c1_243, %c0_244] : memref<4x10x10x8xf32, #tpu.memory_space<vmem>>, vector<1x8x8x8xf32>
    %193 = vector.shape_cast %192 : vector<1x8x8x8xf32> to vector<8x8x8xf32>
    %194 = vector.shape_cast %193 : vector<8x8x8xf32> to vector<64x8xf32>
    %c3_245 = arith.constant 3 : index
    %c0_246 = arith.constant 0 : index
    %c2_247 = arith.constant 2 : index
    %c0_248 = arith.constant 0 : index
    %195 = vector.load %arg12[%c3_245, %c0_246, %c2_247, %c0_248] : memref<4x10x10x8xf32, #tpu.memory_space<vmem>>, vector<1x8x8x8xf32>
    %196 = vector.shape_cast %195 : vector<1x8x8x8xf32> to vector<8x8x8xf32>
    %197 = vector.shape_cast %196 : vector<8x8x8xf32> to vector<64x8xf32>
    %c3_249 = arith.constant 3 : index
    %c1_250 = arith.constant 1 : index
    %c0_251 = arith.constant 0 : index
    %c0_252 = arith.constant 0 : index
    %198 = vector.load %arg12[%c3_249, %c1_250, %c0_251, %c0_252] : memref<4x10x10x8xf32, #tpu.memory_space<vmem>>, vector<1x8x8x8xf32>
    %199 = vector.shape_cast %198 : vector<1x8x8x8xf32> to vector<8x8x8xf32>
    %200 = vector.shape_cast %199 : vector<8x8x8xf32> to vector<64x8xf32>
    %c3_253 = arith.constant 3 : index
    %c1_254 = arith.constant 1 : index
    %c1_255 = arith.constant 1 : index
    %c0_256 = arith.constant 0 : index
    %201 = vector.load %arg12[%c3_253, %c1_254, %c1_255, %c0_256] : memref<4x10x10x8xf32, #tpu.memory_space<vmem>>, vector<1x8x8x8xf32>
    %202 = vector.shape_cast %201 : vector<1x8x8x8xf32> to vector<8x8x8xf32>
    %203 = vector.shape_cast %202 : vector<8x8x8xf32> to vector<64x8xf32>
    %c3_257 = arith.constant 3 : index
    %c1_258 = arith.constant 1 : index
    %c2_259 = arith.constant 2 : index
    %c0_260 = arith.constant 0 : index
    %204 = vector.load %arg12[%c3_257, %c1_258, %c2_259, %c0_260] : memref<4x10x10x8xf32, #tpu.memory_space<vmem>>, vector<1x8x8x8xf32>
    %205 = vector.shape_cast %204 : vector<1x8x8x8xf32> to vector<8x8x8xf32>
    %206 = vector.shape_cast %205 : vector<8x8x8xf32> to vector<64x8xf32>
    %c3_261 = arith.constant 3 : index
    %c2_262 = arith.constant 2 : index
    %c0_263 = arith.constant 0 : index
    %c0_264 = arith.constant 0 : index
    %207 = vector.load %arg12[%c3_261, %c2_262, %c0_263, %c0_264] : memref<4x10x10x8xf32, #tpu.memory_space<vmem>>, vector<1x8x8x8xf32>
    %208 = vector.shape_cast %207 : vector<1x8x8x8xf32> to vector<8x8x8xf32>
    %209 = vector.shape_cast %208 : vector<8x8x8xf32> to vector<64x8xf32>
    %c3_265 = arith.constant 3 : index
    %c2_266 = arith.constant 2 : index
    %c1_267 = arith.constant 1 : index
    %c0_268 = arith.constant 0 : index
    %210 = vector.load %arg12[%c3_265, %c2_266, %c1_267, %c0_268] : memref<4x10x10x8xf32, #tpu.memory_space<vmem>>, vector<1x8x8x8xf32>
    %211 = vector.shape_cast %210 : vector<1x8x8x8xf32> to vector<8x8x8xf32>
    %212 = vector.shape_cast %211 : vector<8x8x8xf32> to vector<64x8xf32>
    %c3_269 = arith.constant 3 : index
    %c2_270 = arith.constant 2 : index
    %c2_271 = arith.constant 2 : index
    %c0_272 = arith.constant 0 : index
    %213 = vector.load %arg12[%c3_269, %c2_270, %c2_271, %c0_272] : memref<4x10x10x8xf32, #tpu.memory_space<vmem>>, vector<1x8x8x8xf32>
    %214 = vector.shape_cast %213 : vector<1x8x8x8xf32> to vector<8x8x8xf32>
    %215 = vector.shape_cast %214 : vector<8x8x8xf32> to vector<64x8xf32>
    %216 = tpu.concatenate %191, %194, %197, %200, %203, %206, %209, %212, %215 in 1 : vector<64x8xf32>, vector<64x8xf32>, vector<64x8xf32>, vector<64x8xf32>, vector<64x8xf32>, vector<64x8xf32>, vector<64x8xf32>, vector<64x8xf32>, vector<64x8xf32> -> vector<64x72xf32>
    %c0_273 = arith.constant 0 : index
    %c0_274 = arith.constant 0 : index
    %217 = vector.load %arg5[%c0_273, %c0_274] : memref<72x8xf32, #tpu.memory_space<vmem>>, vector<72x8xf32>
    %cst_275 = arith.constant dense<0.000000e+00> : vector<64x8xf32>
    %218 = tpu.matmul %216, %217, %cst_275 {dimension_numbers = #tpu.dot_dimension_numbers<[1], [0], [0], [1], [0, 0, 1, 1], [], []>, precision = #tpu.contract_precision<fp32>} : vector<64x72xf32>, vector<72x8xf32>, vector<64x8xf32> -> vector<64x8xf32>
    %c0_276 = arith.constant 0 : index
    %c0_277 = arith.constant 0 : index
    %219 = vector.load %arg6[%c0_276, %c0_277] : memref<1x8xf32, #tpu.memory_space<vmem>>, vector<1x8xf32>
    %220 = vector.broadcast %219 : vector<1x8xf32> to vector<64x8xf32>
    %221 = arith.mulf %218, %220 : vector<64x8xf32>
    %c0_278 = arith.constant 0 : index
    %c0_279 = arith.constant 0 : index
    %222 = vector.load %arg7[%c0_278, %c0_279] : memref<1x8xf32, #tpu.memory_space<vmem>>, vector<1x8xf32>
    %223 = vector.broadcast %222 : vector<1x8xf32> to vector<64x8xf32>
    %224 = arith.addf %221, %223 : vector<64x8xf32>
    %cst_280 = arith.constant 0.000000e+00 : f32
    %225 = vector.broadcast %cst_280 : f32 to vector<64x8xf32>
    %226 = arith.maximumf %224, %225 : vector<64x8xf32>
    %227 = vector.shape_cast %226 : vector<64x8xf32> to vector<8x8x8xf32>
    %c3_281 = arith.constant 3 : index
    %c1_282 = arith.constant 1 : index
    %c1_283 = arith.constant 1 : index
    %c0_284 = arith.constant 0 : index
    %228 = vector.load %arg13[%c3_281, %c1_282, %c1_283, %c0_284] : memref<4x10x10x8xf32, #tpu.memory_space<vmem>>, vector<1x8x8x8xf32>
    %229 = vector.shape_cast %228 : vector<1x8x8x8xf32> to vector<8x8x8xf32>
    %230 = vector.shape_cast %227 : vector<8x8x8xf32> to vector<1x8x8x8xf32>
    tpu.vector_store %arg13[%c3_281, %c1_282, %c1_283, %c0_284], %230 {strides = array<i32>} : memref<4x10x10x8xf32, #tpu.memory_space<vmem>>, vector<1x8x8x8xf32>,
    %c3_285 = arith.constant 3 : index
    %c0_286 = arith.constant 0 : index
    %c0_287 = arith.constant 0 : index
    %c0_288 = arith.constant 0 : index
    %231 = vector.load %arg13[%c3_285, %c0_286, %c0_287, %c0_288] : memref<4x10x10x8xf32, #tpu.memory_space<vmem>>, vector<1x8x8x8xf32>
    %232 = vector.shape_cast %231 : vector<1x8x8x8xf32> to vector<8x8x8xf32>
    %233 = vector.shape_cast %232 : vector<8x8x8xf32> to vector<64x8xf32>
    %c2_289 = arith.constant 2 : index
    %c0_290 = arith.constant 0 : index
    %c1_291 = arith.constant 1 : index
    %c0_292 = arith.constant 0 : index
    %234 = vector.load %arg13[%c2_289, %c0_290, %c1_291, %c0_292] : memref<4x10x10x8xf32, #tpu.memory_space<vmem>>, vector<1x8x8x8xf32>
    %235 = vector.shape_cast %234 : vector<1x8x8x8xf32> to vector<8x8x8xf32>
    %236 = vector.shape_cast %235 : vector<8x8x8xf32> to vector<64x8xf32>
    %c3_293 = arith.constant 3 : index
    %c0_294 = arith.constant 0 : index
    %c1_295 = arith.constant 1 : index
    %c0_296 = arith.constant 0 : index
    %237 = vector.load %arg13[%c3_293, %c0_294, %c1_295, %c0_296] : memref<4x10x10x8xf32, #tpu.memory_space<vmem>>, vector<1x8x8x8xf32>
    %238 = vector.shape_cast %237 : vector<1x8x8x8xf32> to vector<8x8x8xf32>
    %239 = vector.shape_cast %238 : vector<8x8x8xf32> to vector<64x8xf32>
    %c1_297 = arith.constant 1 : index
    %c1_298 = arith.constant 1 : index
    %c0_299 = arith.constant 0 : index
    %c0_300 = arith.constant 0 : index
    %240 = vector.load %arg13[%c1_297, %c1_298, %c0_299, %c0_300] : memref<4x10x10x8xf32, #tpu.memory_space<vmem>>, vector<1x8x8x8xf32>
    %241 = vector.shape_cast %240 : vector<1x8x8x8xf32> to vector<8x8x8xf32>
    %242 = vector.shape_cast %241 : vector<8x8x8xf32> to vector<64x8xf32>
    %c0_301 = arith.constant 0 : index
    %c1_302 = arith.constant 1 : index
    %c1_303 = arith.constant 1 : index
    %c0_304 = arith.constant 0 : index
    %243 = vector.load %arg13[%c0_301, %c1_302, %c1_303, %c0_304] : memref<4x10x10x8xf32, #tpu.memory_space<vmem>>, vector<1x8x8x8xf32>
    %244 = vector.shape_cast %243 : vector<1x8x8x8xf32> to vector<8x8x8xf32>
    %245 = vector.shape_cast %244 : vector<8x8x8xf32> to vector<64x8xf32>
    %c1_305 = arith.constant 1 : index
    %c1_306 = arith.constant 1 : index
    %c1_307 = arith.constant 1 : index
    %c0_308 = arith.constant 0 : index
    %246 = vector.load %arg13[%c1_305, %c1_306, %c1_307, %c0_308] : memref<4x10x10x8xf32, #tpu.memory_space<vmem>>, vector<1x8x8x8xf32>
    %247 = vector.shape_cast %246 : vector<1x8x8x8xf32> to vector<8x8x8xf32>
    %248 = vector.shape_cast %247 : vector<8x8x8xf32> to vector<64x8xf32>
    %c3_309 = arith.constant 3 : index
    %c1_310 = arith.constant 1 : index
    %c0_311 = arith.constant 0 : index
    %c0_312 = arith.constant 0 : index
    %249 = vector.load %arg13[%c3_309, %c1_310, %c0_311, %c0_312] : memref<4x10x10x8xf32, #tpu.memory_space<vmem>>, vector<1x8x8x8xf32>
    %250 = vector.shape_cast %249 : vector<1x8x8x8xf32> to vector<8x8x8xf32>
    %251 = vector.shape_cast %250 : vector<8x8x8xf32> to vector<64x8xf32>
    %c2_313 = arith.constant 2 : index
    %c1_314 = arith.constant 1 : index
    %c1_315 = arith.constant 1 : index
    %c0_316 = arith.constant 0 : index
    %252 = vector.load %arg13[%c2_313, %c1_314, %c1_315, %c0_316] : memref<4x10x10x8xf32, #tpu.memory_space<vmem>>, vector<1x8x8x8xf32>
    %253 = vector.shape_cast %252 : vector<1x8x8x8xf32> to vector<8x8x8xf32>
    %254 = vector.shape_cast %253 : vector<8x8x8xf32> to vector<64x8xf32>
    %c3_317 = arith.constant 3 : index
    %c1_318 = arith.constant 1 : index
    %c1_319 = arith.constant 1 : index
    %c0_320 = arith.constant 0 : index
    %255 = vector.load %arg13[%c3_317, %c1_318, %c1_319, %c0_320] : memref<4x10x10x8xf32, #tpu.memory_space<vmem>>, vector<1x8x8x8xf32>
    %256 = vector.shape_cast %255 : vector<1x8x8x8xf32> to vector<8x8x8xf32>
    %257 = vector.shape_cast %256 : vector<8x8x8xf32> to vector<64x8xf32>
    %258 = tpu.concatenate %233, %236, %239, %242, %245, %248, %251, %254, %257 in 1 : vector<64x8xf32>, vector<64x8xf32>, vector<64x8xf32>, vector<64x8xf32>, vector<64x8xf32>, vector<64x8xf32>, vector<64x8xf32>, vector<64x8xf32>, vector<64x8xf32> -> vector<64x72xf32>
    %c0_321 = arith.constant 0 : index
    %c0_322 = arith.constant 0 : index
    %259 = vector.load %arg8[%c0_321, %c0_322] : memref<72x8xf32, #tpu.memory_space<vmem>>, vector<72x8xf32>
    %cst_323 = arith.constant dense<0.000000e+00> : vector<64x8xf32>
    %260 = tpu.matmul %258, %259, %cst_323 {dimension_numbers = #tpu.dot_dimension_numbers<[1], [0], [0], [1], [0, 0, 1, 1], [], []>, precision = #tpu.contract_precision<fp32>} : vector<64x72xf32>, vector<72x8xf32>, vector<64x8xf32> -> vector<64x8xf32>
    %c0_324 = arith.constant 0 : index
    %c0_325 = arith.constant 0 : index
    %261 = vector.load %arg9[%c0_324, %c0_325] : memref<1x8xf32, #tpu.memory_space<vmem>>, vector<1x8xf32>
    %262 = vector.broadcast %261 : vector<1x8xf32> to vector<64x8xf32>
    %263 = arith.mulf %260, %262 : vector<64x8xf32>
    %c0_326 = arith.constant 0 : index
    %c0_327 = arith.constant 0 : index
    %264 = vector.load %arg10[%c0_326, %c0_327] : memref<1x8xf32, #tpu.memory_space<vmem>>, vector<1x8xf32>
    %265 = vector.broadcast %264 : vector<1x8xf32> to vector<64x8xf32>
    %266 = arith.addf %263, %265 : vector<64x8xf32>
    %cst_328 = arith.constant 0.000000e+00 : f32
    %267 = vector.broadcast %cst_328 : f32 to vector<64x8xf32>
    %268 = arith.maximumf %266, %267 : vector<64x8xf32>
    %c2_329 = arith.constant 2 : index
    %c0_330 = arith.constant 0 : index
    %c1_331 = arith.constant 1 : index
    %c0_332 = arith.constant 0 : index
    %269 = vector.load %arg13[%c2_329, %c0_330, %c1_331, %c0_332] : memref<4x10x10x8xf32, #tpu.memory_space<vmem>>, vector<1x8x8x8xf32>
    %270 = vector.shape_cast %269 : vector<1x8x8x8xf32> to vector<8x8x8xf32>
    %271 = vector.shape_cast %270 : vector<8x8x8xf32> to vector<64x8xf32>
    %c3_333 = arith.constant 3 : index
    %c0_334 = arith.constant 0 : index
    %c1_335 = arith.constant 1 : index
    %c0_336 = arith.constant 0 : index
    %272 = vector.load %arg13[%c3_333, %c0_334, %c1_335, %c0_336] : memref<4x10x10x8xf32, #tpu.memory_space<vmem>>, vector<1x8x8x8xf32>
    %273 = vector.shape_cast %272 : vector<1x8x8x8xf32> to vector<8x8x8xf32>
    %274 = vector.shape_cast %273 : vector<8x8x8xf32> to vector<64x8xf32>
    %c2_337 = arith.constant 2 : index
    %c0_338 = arith.constant 0 : index
    %c2_339 = arith.constant 2 : index
    %c0_340 = arith.constant 0 : index
    %275 = vector.load %arg13[%c2_337, %c0_338, %c2_339, %c0_340] : memref<4x10x10x8xf32, #tpu.memory_space<vmem>>, vector<1x8x8x8xf32>
    %276 = vector.shape_cast %275 : vector<1x8x8x8xf32> to vector<8x8x8xf32>
    %277 = vector.shape_cast %276 : vector<8x8x8xf32> to vector<64x8xf32>
    %c0_341 = arith.constant 0 : index
    %c1_342 = arith.constant 1 : index
    %c1_343 = arith.constant 1 : index
    %c0_344 = arith.constant 0 : index
    %278 = vector.load %arg13[%c0_341, %c1_342, %c1_343, %c0_344] : memref<4x10x10x8xf32, #tpu.memory_space<vmem>>, vector<1x8x8x8xf32>
    %279 = vector.shape_cast %278 : vector<1x8x8x8xf32> to vector<8x8x8xf32>
    %280 = vector.shape_cast %279 : vector<8x8x8xf32> to vector<64x8xf32>
    %c1_345 = arith.constant 1 : index
    %c1_346 = arith.constant 1 : index
    %c1_347 = arith.constant 1 : index
    %c0_348 = arith.constant 0 : index
    %281 = vector.load %arg13[%c1_345, %c1_346, %c1_347, %c0_348] : memref<4x10x10x8xf32, #tpu.memory_space<vmem>>, vector<1x8x8x8xf32>
    %282 = vector.shape_cast %281 : vector<1x8x8x8xf32> to vector<8x8x8xf32>
    %283 = vector.shape_cast %282 : vector<8x8x8xf32> to vector<64x8xf32>
    %c0_349 = arith.constant 0 : index
    %c1_350 = arith.constant 1 : index
    %c2_351 = arith.constant 2 : index
    %c0_352 = arith.constant 0 : index
    %284 = vector.load %arg13[%c0_349, %c1_350, %c2_351, %c0_352] : memref<4x10x10x8xf32, #tpu.memory_space<vmem>>, vector<1x8x8x8xf32>
    %285 = vector.shape_cast %284 : vector<1x8x8x8xf32> to vector<8x8x8xf32>
    %286 = vector.shape_cast %285 : vector<8x8x8xf32> to vector<64x8xf32>
    %c2_353 = arith.constant 2 : index
    %c1_354 = arith.constant 1 : index
    %c1_355 = arith.constant 1 : index
    %c0_356 = arith.constant 0 : index
    %287 = vector.load %arg13[%c2_353, %c1_354, %c1_355, %c0_356] : memref<4x10x10x8xf32, #tpu.memory_space<vmem>>, vector<1x8x8x8xf32>
    %288 = vector.shape_cast %287 : vector<1x8x8x8xf32> to vector<8x8x8xf32>
    %289 = vector.shape_cast %288 : vector<8x8x8xf32> to vector<64x8xf32>
    %c3_357 = arith.constant 3 : index
    %c1_358 = arith.constant 1 : index
    %c1_359 = arith.constant 1 : index
    %c0_360 = arith.constant 0 : index
    %290 = vector.load %arg13[%c3_357, %c1_358, %c1_359, %c0_360] : memref<4x10x10x8xf32, #tpu.memory_space<vmem>>, vector<1x8x8x8xf32>
    %291 = vector.shape_cast %290 : vector<1x8x8x8xf32> to vector<8x8x8xf32>
    %292 = vector.shape_cast %291 : vector<8x8x8xf32> to vector<64x8xf32>
    %c2_361 = arith.constant 2 : index
    %c1_362 = arith.constant 1 : index
    %c2_363 = arith.constant 2 : index
    %c0_364 = arith.constant 0 : index
    %293 = vector.load %arg13[%c2_361, %c1_362, %c2_363, %c0_364] : memref<4x10x10x8xf32, #tpu.memory_space<vmem>>, vector<1x8x8x8xf32>
    %294 = vector.shape_cast %293 : vector<1x8x8x8xf32> to vector<8x8x8xf32>
    %295 = vector.shape_cast %294 : vector<8x8x8xf32> to vector<64x8xf32>
    %296 = tpu.concatenate %271, %274, %277, %280, %283, %286, %289, %292, %295 in 1 : vector<64x8xf32>, vector<64x8xf32>, vector<64x8xf32>, vector<64x8xf32>, vector<64x8xf32>, vector<64x8xf32>, vector<64x8xf32>, vector<64x8xf32>, vector<64x8xf32> -> vector<64x72xf32>
    %c0_365 = arith.constant 0 : index
    %c0_366 = arith.constant 0 : index
    %297 = vector.load %arg8[%c0_365, %c0_366] : memref<72x8xf32, #tpu.memory_space<vmem>>, vector<72x8xf32>
    %cst_367 = arith.constant dense<0.000000e+00> : vector<64x8xf32>
    %298 = tpu.matmul %296, %297, %cst_367 {dimension_numbers = #tpu.dot_dimension_numbers<[1], [0], [0], [1], [0, 0, 1, 1], [], []>, precision = #tpu.contract_precision<fp32>} : vector<64x72xf32>, vector<72x8xf32>, vector<64x8xf32> -> vector<64x8xf32>
    %c0_368 = arith.constant 0 : index
    %c0_369 = arith.constant 0 : index
    %299 = vector.load %arg9[%c0_368, %c0_369] : memref<1x8xf32, #tpu.memory_space<vmem>>, vector<1x8xf32>
    %300 = vector.broadcast %299 : vector<1x8xf32> to vector<64x8xf32>
    %301 = arith.mulf %298, %300 : vector<64x8xf32>
    %c0_370 = arith.constant 0 : index
    %c0_371 = arith.constant 0 : index
    %302 = vector.load %arg10[%c0_370, %c0_371] : memref<1x8xf32, #tpu.memory_space<vmem>>, vector<1x8xf32>
    %303 = vector.broadcast %302 : vector<1x8xf32> to vector<64x8xf32>
    %304 = arith.addf %301, %303 : vector<64x8xf32>
    %cst_372 = arith.constant 0.000000e+00 : f32
    %305 = vector.broadcast %cst_372 : f32 to vector<64x8xf32>
    %306 = arith.maximumf %304, %305 : vector<64x8xf32>
    %c1_373 = arith.constant 1 : index
    %c1_374 = arith.constant 1 : index
    %c0_375 = arith.constant 0 : index
    %c0_376 = arith.constant 0 : index
    %307 = vector.load %arg13[%c1_373, %c1_374, %c0_375, %c0_376] : memref<4x10x10x8xf32, #tpu.memory_space<vmem>>, vector<1x8x8x8xf32>
    %308 = vector.shape_cast %307 : vector<1x8x8x8xf32> to vector<8x8x8xf32>
    %309 = vector.shape_cast %308 : vector<8x8x8xf32> to vector<64x8xf32>
    %c0_377 = arith.constant 0 : index
    %c1_378 = arith.constant 1 : index
    %c1_379 = arith.constant 1 : index
    %c0_380 = arith.constant 0 : index
    %310 = vector.load %arg13[%c0_377, %c1_378, %c1_379, %c0_380] : memref<4x10x10x8xf32, #tpu.memory_space<vmem>>, vector<1x8x8x8xf32>
    %311 = vector.shape_cast %310 : vector<1x8x8x8xf32> to vector<8x8x8xf32>
    %312 = vector.shape_cast %311 : vector<8x8x8xf32> to vector<64x8xf32>
    %c1_381 = arith.constant 1 : index
    %c1_382 = arith.constant 1 : index
    %c1_383 = arith.constant 1 : index
    %c0_384 = arith.constant 0 : index
    %313 = vector.load %arg13[%c1_381, %c1_382, %c1_383, %c0_384] : memref<4x10x10x8xf32, #tpu.memory_space<vmem>>, vector<1x8x8x8xf32>
    %314 = vector.shape_cast %313 : vector<1x8x8x8xf32> to vector<8x8x8xf32>
    %315 = vector.shape_cast %314 : vector<8x8x8xf32> to vector<64x8xf32>
    %c3_385 = arith.constant 3 : index
    %c1_386 = arith.constant 1 : index
    %c0_387 = arith.constant 0 : index
    %c0_388 = arith.constant 0 : index
    %316 = vector.load %arg13[%c3_385, %c1_386, %c0_387, %c0_388] : memref<4x10x10x8xf32, #tpu.memory_space<vmem>>, vector<1x8x8x8xf32>
    %317 = vector.shape_cast %316 : vector<1x8x8x8xf32> to vector<8x8x8xf32>
    %318 = vector.shape_cast %317 : vector<8x8x8xf32> to vector<64x8xf32>
    %c2_389 = arith.constant 2 : index
    %c1_390 = arith.constant 1 : index
    %c1_391 = arith.constant 1 : index
    %c0_392 = arith.constant 0 : index
    %319 = vector.load %arg13[%c2_389, %c1_390, %c1_391, %c0_392] : memref<4x10x10x8xf32, #tpu.memory_space<vmem>>, vector<1x8x8x8xf32>
    %320 = vector.shape_cast %319 : vector<1x8x8x8xf32> to vector<8x8x8xf32>
    %321 = vector.shape_cast %320 : vector<8x8x8xf32> to vector<64x8xf32>
    %c3_393 = arith.constant 3 : index
    %c1_394 = arith.constant 1 : index
    %c1_395 = arith.constant 1 : index
    %c0_396 = arith.constant 0 : index
    %322 = vector.load %arg13[%c3_393, %c1_394, %c1_395, %c0_396] : memref<4x10x10x8xf32, #tpu.memory_space<vmem>>, vector<1x8x8x8xf32>
    %323 = vector.shape_cast %322 : vector<1x8x8x8xf32> to vector<8x8x8xf32>
    %324 = vector.shape_cast %323 : vector<8x8x8xf32> to vector<64x8xf32>
    %c1_397 = arith.constant 1 : index
    %c2_398 = arith.constant 2 : index
    %c0_399 = arith.constant 0 : index
    %c0_400 = arith.constant 0 : index
    %325 = vector.load %arg13[%c1_397, %c2_398, %c0_399, %c0_400] : memref<4x10x10x8xf32, #tpu.memory_space<vmem>>, vector<1x8x8x8xf32>
    %326 = vector.shape_cast %325 : vector<1x8x8x8xf32> to vector<8x8x8xf32>
    %327 = vector.shape_cast %326 : vector<8x8x8xf32> to vector<64x8xf32>
    %c0_401 = arith.constant 0 : index
    %c2_402 = arith.constant 2 : index
    %c1_403 = arith.constant 1 : index
    %c0_404 = arith.constant 0 : index
    %328 = vector.load %arg13[%c0_401, %c2_402, %c1_403, %c0_404] : memref<4x10x10x8xf32, #tpu.memory_space<vmem>>, vector<1x8x8x8xf32>
    %329 = vector.shape_cast %328 : vector<1x8x8x8xf32> to vector<8x8x8xf32>
    %330 = vector.shape_cast %329 : vector<8x8x8xf32> to vector<64x8xf32>
    %c1_405 = arith.constant 1 : index
    %c2_406 = arith.constant 2 : index
    %c1_407 = arith.constant 1 : index
    %c0_408 = arith.constant 0 : index
    %331 = vector.load %arg13[%c1_405, %c2_406, %c1_407, %c0_408] : memref<4x10x10x8xf32, #tpu.memory_space<vmem>>, vector<1x8x8x8xf32>
    %332 = vector.shape_cast %331 : vector<1x8x8x8xf32> to vector<8x8x8xf32>
    %333 = vector.shape_cast %332 : vector<8x8x8xf32> to vector<64x8xf32>
    %334 = tpu.concatenate %309, %312, %315, %318, %321, %324, %327, %330, %333 in 1 : vector<64x8xf32>, vector<64x8xf32>, vector<64x8xf32>, vector<64x8xf32>, vector<64x8xf32>, vector<64x8xf32>, vector<64x8xf32>, vector<64x8xf32>, vector<64x8xf32> -> vector<64x72xf32>
    %c0_409 = arith.constant 0 : index
    %c0_410 = arith.constant 0 : index
    %335 = vector.load %arg8[%c0_409, %c0_410] : memref<72x8xf32, #tpu.memory_space<vmem>>, vector<72x8xf32>
    %cst_411 = arith.constant dense<0.000000e+00> : vector<64x8xf32>
    %336 = tpu.matmul %334, %335, %cst_411 {dimension_numbers = #tpu.dot_dimension_numbers<[1], [0], [0], [1], [0, 0, 1, 1], [], []>, precision = #tpu.contract_precision<fp32>} : vector<64x72xf32>, vector<72x8xf32>, vector<64x8xf32> -> vector<64x8xf32>
    %c0_412 = arith.constant 0 : index
    %c0_413 = arith.constant 0 : index
    %337 = vector.load %arg9[%c0_412, %c0_413] : memref<1x8xf32, #tpu.memory_space<vmem>>, vector<1x8xf32>
    %338 = vector.broadcast %337 : vector<1x8xf32> to vector<64x8xf32>
    %339 = arith.mulf %336, %338 : vector<64x8xf32>
    %c0_414 = arith.constant 0 : index
    %c0_415 = arith.constant 0 : index
    %340 = vector.load %arg10[%c0_414, %c0_415] : memref<1x8xf32, #tpu.memory_space<vmem>>, vector<1x8xf32>
    %341 = vector.broadcast %340 : vector<1x8xf32> to vector<64x8xf32>
    %342 = arith.addf %339, %341 : vector<64x8xf32>
    %cst_416 = arith.constant 0.000000e+00 : f32
    %343 = vector.broadcast %cst_416 : f32 to vector<64x8xf32>
    %344 = arith.maximumf %342, %343 : vector<64x8xf32>
    %c0_417 = arith.constant 0 : index
    %c1_418 = arith.constant 1 : index
    %c1_419 = arith.constant 1 : index
    %c0_420 = arith.constant 0 : index
    %345 = vector.load %arg13[%c0_417, %c1_418, %c1_419, %c0_420] : memref<4x10x10x8xf32, #tpu.memory_space<vmem>>, vector<1x8x8x8xf32>
    %346 = vector.shape_cast %345 : vector<1x8x8x8xf32> to vector<8x8x8xf32>
    %347 = vector.shape_cast %346 : vector<8x8x8xf32> to vector<64x8xf32>
    %c1_421 = arith.constant 1 : index
    %c1_422 = arith.constant 1 : index
    %c1_423 = arith.constant 1 : index
    %c0_424 = arith.constant 0 : index
    %348 = vector.load %arg13[%c1_421, %c1_422, %c1_423, %c0_424] : memref<4x10x10x8xf32, #tpu.memory_space<vmem>>, vector<1x8x8x8xf32>
    %349 = vector.shape_cast %348 : vector<1x8x8x8xf32> to vector<8x8x8xf32>
    %350 = vector.shape_cast %349 : vector<8x8x8xf32> to vector<64x8xf32>
    %c0_425 = arith.constant 0 : index
    %c1_426 = arith.constant 1 : index
    %c2_427 = arith.constant 2 : index
    %c0_428 = arith.constant 0 : index
    %351 = vector.load %arg13[%c0_425, %c1_426, %c2_427, %c0_428] : memref<4x10x10x8xf32, #tpu.memory_space<vmem>>, vector<1x8x8x8xf32>
    %352 = vector.shape_cast %351 : vector<1x8x8x8xf32> to vector<8x8x8xf32>
    %353 = vector.shape_cast %352 : vector<8x8x8xf32> to vector<64x8xf32>
    %c2_429 = arith.constant 2 : index
    %c1_430 = arith.constant 1 : index
    %c1_431 = arith.constant 1 : index
    %c0_432 = arith.constant 0 : index
    %354 = vector.load %arg13[%c2_429, %c1_430, %c1_431, %c0_432] : memref<4x10x10x8xf32, #tpu.memory_space<vmem>>, vector<1x8x8x8xf32>
    %355 = vector.shape_cast %354 : vector<1x8x8x8xf32> to vector<8x8x8xf32>
    %356 = vector.shape_cast %355 : vector<8x8x8xf32> to vector<64x8xf32>
    %c3_433 = arith.constant 3 : index
    %c1_434 = arith.constant 1 : index
    %c1_435 = arith.constant 1 : index
    %c0_436 = arith.constant 0 : index
    %357 = vector.load %arg13[%c3_433, %c1_434, %c1_435, %c0_436] : memref<4x10x10x8xf32, #tpu.memory_space<vmem>>, vector<1x8x8x8xf32>
    %358 = vector.shape_cast %357 : vector<1x8x8x8xf32> to vector<8x8x8xf32>
    %359 = vector.shape_cast %358 : vector<8x8x8xf32> to vector<64x8xf32>
    %c2_437 = arith.constant 2 : index
    %c1_438 = arith.constant 1 : index
    %c2_439 = arith.constant 2 : index
    %c0_440 = arith.constant 0 : index
    %360 = vector.load %arg13[%c2_437, %c1_438, %c2_439, %c0_440] : memref<4x10x10x8xf32, #tpu.memory_space<vmem>>, vector<1x8x8x8xf32>
    %361 = vector.shape_cast %360 : vector<1x8x8x8xf32> to vector<8x8x8xf32>
    %362 = vector.shape_cast %361 : vector<8x8x8xf32> to vector<64x8xf32>
    %c0_441 = arith.constant 0 : index
    %c2_442 = arith.constant 2 : index
    %c1_443 = arith.constant 1 : index
    %c0_444 = arith.constant 0 : index
    %363 = vector.load %arg13[%c0_441, %c2_442, %c1_443, %c0_444] : memref<4x10x10x8xf32, #tpu.memory_space<vmem>>, vector<1x8x8x8xf32>
    %364 = vector.shape_cast %363 : vector<1x8x8x8xf32> to vector<8x8x8xf32>
    %365 = vector.shape_cast %364 : vector<8x8x8xf32> to vector<64x8xf32>
    %c1_445 = arith.constant 1 : index
    %c2_446 = arith.constant 2 : index
    %c1_447 = arith.constant 1 : index
    %c0_448 = arith.constant 0 : index
    %366 = vector.load %arg13[%c1_445, %c2_446, %c1_447, %c0_448] : memref<4x10x10x8xf32, #tpu.memory_space<vmem>>, vector<1x8x8x8xf32>
    %367 = vector.shape_cast %366 : vector<1x8x8x8xf32> to vector<8x8x8xf32>
    %368 = vector.shape_cast %367 : vector<8x8x8xf32> to vector<64x8xf32>
    %c0_449 = arith.constant 0 : index
    %c2_450 = arith.constant 2 : index
    %c2_451 = arith.constant 2 : index
    %c0_452 = arith.constant 0 : index
    %369 = vector.load %arg13[%c0_449, %c2_450, %c2_451, %c0_452] : memref<4x10x10x8xf32, #tpu.memory_space<vmem>>, vector<1x8x8x8xf32>
    %370 = vector.shape_cast %369 : vector<1x8x8x8xf32> to vector<8x8x8xf32>
    %371 = vector.shape_cast %370 : vector<8x8x8xf32> to vector<64x8xf32>
    %372 = tpu.concatenate %347, %350, %353, %356, %359, %362, %365, %368, %371 in 1 : vector<64x8xf32>, vector<64x8xf32>, vector<64x8xf32>, vector<64x8xf32>, vector<64x8xf32>, vector<64x8xf32>, vector<64x8xf32>, vector<64x8xf32>, vector<64x8xf32> -> vector<64x72xf32>
    %c0_453 = arith.constant 0 : index
    %c0_454 = arith.constant 0 : index
    %373 = vector.load %arg8[%c0_453, %c0_454] : memref<72x8xf32, #tpu.memory_space<vmem>>, vector<72x8xf32>
    %cst_455 = arith.constant dense<0.000000e+00> : vector<64x8xf32>
    %374 = tpu.matmul %372, %373, %cst_455 {dimension_numbers = #tpu.dot_dimension_numbers<[1], [0], [0], [1], [0, 0, 1, 1], [], []>, precision = #tpu.contract_precision<fp32>} : vector<64x72xf32>, vector<72x8xf32>, vector<64x8xf32> -> vector<64x8xf32>
    %c0_456 = arith.constant 0 : index
    %c0_457 = arith.constant 0 : index
    %375 = vector.load %arg9[%c0_456, %c0_457] : memref<1x8xf32, #tpu.memory_space<vmem>>, vector<1x8xf32>
    %376 = vector.broadcast %375 : vector<1x8xf32> to vector<64x8xf32>
    %377 = arith.mulf %374, %376 : vector<64x8xf32>
    %c0_458 = arith.constant 0 : index
    %c0_459 = arith.constant 0 : index
    %378 = vector.load %arg10[%c0_458, %c0_459] : memref<1x8xf32, #tpu.memory_space<vmem>>, vector<1x8xf32>
    %379 = vector.broadcast %378 : vector<1x8xf32> to vector<64x8xf32>
    %380 = arith.addf %377, %379 : vector<64x8xf32>
    %cst_460 = arith.constant 0.000000e+00 : f32
    %381 = vector.broadcast %cst_460 : f32 to vector<64x8xf32>
    %382 = arith.maximumf %380, %381 : vector<64x8xf32>
    %383 = tpu.concatenate %268, %306, %344, %382 in 1 : vector<64x8xf32>, vector<64x8xf32>, vector<64x8xf32>, vector<64x8xf32> -> vector<64x32xf32>
    %c0_461 = arith.constant 0 : index
    %c0_462 = arith.constant 0 : index
    %c0_463 = arith.constant 0 : index
    %384 = vector.load %arg11[%c0_461, %c0_462, %c0_463] : memref<1x64x32xf32, #tpu.memory_space<vmem>>, vector<1x64x32xf32>
    %385 = vector.shape_cast %384 : vector<1x64x32xf32> to vector<64x32xf32>
    %386 = vector.shape_cast %383 : vector<64x32xf32> to vector<1x64x32xf32>
    tpu.vector_store %arg11[%c0_461, %c0_462, %c0_463], %386 {strides = array<i32>} : memref<1x64x32xf32, #tpu.memory_space<vmem>>, vector<1x64x32xf32>,
    return
  }
  func.func @transform_0(%arg0: i32) -> (i32, i32, i32) {
    %c0_i32 = arith.constant 0 : i32
    %c0_i32_0 = arith.constant 0 : i32
    %c0_i32_1 = arith.constant 0 : i32
    return %arg0, %c0_i32, %c0_i32_0 : i32, i32, i32
  }
  func.func @transform_1(%arg0: i32) -> (i32, i32, i32, i32, i32) {
    %c0_i32 = arith.constant 0 : i32
    %c0_i32_0 = arith.constant 0 : i32
    %c0_i32_1 = arith.constant 0 : i32
    %c0_i32_2 = arith.constant 0 : i32
    %c0_i32_3 = arith.constant 0 : i32
    return %arg0, %c0_i32, %c0_i32_0, %c0_i32_1, %c0_i32_2 : i32, i32, i32, i32, i32
  }
  func.func @transform_2(%arg0: i32) -> (i32, i32) {
    %c0_i32 = arith.constant 0 : i32
    %c0_i32_0 = arith.constant 0 : i32
    %c0_i32_1 = arith.constant 0 : i32
    return %c0_i32, %c0_i32_0 : i32, i32
  }
  func.func @transform_3(%arg0: i32) -> (i32, i32) {
    %c0_i32 = arith.constant 0 : i32
    %c0_i32_0 = arith.constant 0 : i32
    %c0_i32_1 = arith.constant 0 : i32
    return %c0_i32, %c0_i32_0 : i32, i32
  }
  func.func @transform_4(%arg0: i32) -> (i32, i32) {
    %c0_i32 = arith.constant 0 : i32
    %c0_i32_0 = arith.constant 0 : i32
    %c0_i32_1 = arith.constant 0 : i32
    return %c0_i32, %c0_i32_0 : i32, i32
  }
  func.func @transform_5(%arg0: i32) -> (i32, i32) {
    %c0_i32 = arith.constant 0 : i32
    %c0_i32_0 = arith.constant 0 : i32
    %c0_i32_1 = arith.constant 0 : i32
    return %c0_i32, %c0_i32_0 : i32, i32
  }
  func.func @transform_6(%arg0: i32) -> (i32, i32) {
    %c0_i32 = arith.constant 0 : i32
    %c0_i32_0 = arith.constant 0 : i32
    %c0_i32_1 = arith.constant 0 : i32
    return %c0_i32, %c0_i32_0 : i32, i32
  }
  func.func @transform_7(%arg0: i32) -> (i32, i32) {
    %c0_i32 = arith.constant 0 : i32
    %c0_i32_0 = arith.constant 0 : i32
    %c0_i32_1 = arith.constant 0 : i32
    return %c0_i32, %c0_i32_0 : i32, i32
  }
  func.func @transform_8(%arg0: i32) -> (i32, i32) {
    %c0_i32 = arith.constant 0 : i32
    %c0_i32_0 = arith.constant 0 : i32
    %c0_i32_1 = arith.constant 0 : i32
    return %c0_i32, %c0_i32_0 : i32, i32
  }
  func.func @transform_9(%arg0: i32) -> (i32, i32) {
    %c0_i32 = arith.constant 0 : i32
    %c0_i32_0 = arith.constant 0 : i32
    %c0_i32_1 = arith.constant 0 : i32
    return %c0_i32, %c0_i32_0 : i32, i32
  }
  func.func @transform_10(%arg0: i32) -> (i32, i32, i32) {
    %c0_i32 = arith.constant 0 : i32
    %c0_i32_0 = arith.constant 0 : i32
    %c0_i32_1 = arith.constant 0 : i32
    return %arg0, %c0_i32, %c0_i32_0 : i32, i32, i32
  }
}

</mosaic_0001>

<bundles_post_ra>
// kernel: create_up_conv_block.1
= control target key start
LH: loop header
LB: loop body
LE: loop exit
PB: predicated region body
PF: predicated region fallthrough
CT: control target
= control target key end

     0   :  { %s8750_s13 = smov 0   ;;  %s14518_s0 = inlined_call_operand.vmem [shape: f32[2,64,4], index: 0, kind: input, shape index: {}]   ;;  %s14519_s1 = inlined_call_operand.vmem [shape: f32[2,4,8,8,4], index: 1, kind: input, shape index: {}]   ;;  %s14520_s2 = inlined_call_operand.vmem [shape: f32[4,16], index: 2, kind: input, shape index: {}]   ;;  %s14521_s3 = inlined_call_operand.vmem [shape: f32[1,16], index: 3, kind: input, shape index: {}]   ;;  %s14522_s4 = inlined_call_operand.vmem [shape: f32[72,8], index: 4, kind: input, shape index: {}]   ;;  %s14523_s5 = inlined_call_operand.vmem [shape: f32[1,8], index: 5, kind: input, shape index: {}]   ;;  %s14524_s6 = inlined_call_operand.vmem [shape: f32[1,8], index: 6, kind: input, shape index: {}]   ;;  %s14525_s7 = inlined_call_operand.vmem [shape: f32[72,8], index: 7, kind: input, shape index: {}]   ;;  %s14526_s8 = inlined_call_operand.vmem [shape: f32[1,8], index: 8, kind: input, shape index: {}]   ;;  %s14527_s9 = inlined_call_operand.vmem [shape: f32[1,8], index: 9, kind: input, shape index: {}]   ;;  %s14528_s10 = inlined_call_operand.vmem [shape: f32[2,64,32], index: 10, kind: output, shape index: {}]  }
   0x1 LB: > { %s8492_s14 = sadd.s32 4294967295, %s8681_s13   ;;  %p8496_p0 = scmp.ge.s32.totalorder %s8681_s13, 1  ;;  %s8681_s13 = sphi %s8750_s13, %s20_s13  }
   0x2   : > { %p322_p1 = scmp.lt.s32.totalorder %s8681_s13, 3 }
   0x4   : > { %p323_p2 = pnand %p8496_p0, %p322_p1 }
   0x6   : > { %326 = sbr.rel (%p323_p2) target bundleno = 2233 (0x8b9), region = 60 }
   0xb   : > { %v616_v0 = vld [vmem:[%s14520_s2] sm:$0xf]  ;;  %vm646_vm0 = vcmask 1043456   ;;  %p365_p3 = scmp.lt.s32.totalorder %s8492_s14, 1  ;;  %vm621_vm1 = vcmask 31744   ;;  %vm380_vm2 = vcmask 64512  }
   0xc   : > { %v648_v1 = vsel %vm646_vm0, %v616_v0, 0  ;;  %vm382_vm3 = vcmask 58368   ;;  %v8683_v63 = vmov 0.0   ;;  %s8684_s21 = smov 8   ;;  %s8685_s24 = smov 16   ;;  %vm1062_vm4 = vcmask 64544  }
   0xd   : > { %v665_v2 = vand.u32 4294901760, %v648_v1  ;;  %s15269_s14 = smov (!%p365_p3, %s8492_s14), 1  ;;  %381 = vst.msk [vmem:[#allocation2] sm:$0xff] %vm380_vm2, %v8683_v63  ;;  %s8686_s25 = smov 48   ;;  %vm1534_vm5 = vcmask 130048   ;;  %vm1543_vm6 = vcmask 195584  }
   0xe   : > { %s8529_s17 = sshll.u32 %s15269_s14, 6  ;;  %383 = vst.msk [vmem:[#allocation2 + $0x8] sm:$0x3] %vm382_vm3, %v8683_v63  ;;  %s8687_s26 = smov 124   ;;  %vm1552_vm7 = vcmask 261120   ;;  %vm1561_vm8 = vcmask 326656  }
   0xf   : > { %8532 = vmatpush.msra.mxu2 %v665_v2  ;;  %v748_v3 = vsub.f32 %v648_v1, %v665_v2  ;;  %666 = vmatpush.msra.mxu0 %v665_v2  ;;  %s8769_s20 = scalar_lea.vmem %s14518_s0, %s8529_s17  ;;  %415 = vst.msk [vmem:[#allocation2] sm:$0x3] %vm382_vm3, %v8683_v63  ;;  %s8688_s27 = smov 64   ;;  %vm1570_vm9 = vcmask 392192   ;;  %vm1588_vm10 = vcmask 523264   ;;  %vm1579_vm11 = vcmask 457728  }
  0x10   : > { %v612_v4 = vld [vmem:[%s8769_s20 + $0x20] sm:$0xff]  ;;  %v613_v6 = vld [vmem:[%s8769_s20 + $0x28] sm:$0xff]  ;;  %v614_v11 = vld [vmem:[%s8769_s20 + $0x30] sm:$0xff]  ;;  %455 = vst.msk [vmem:[#allocation2 + $0x8] sm:$0x3] %vm382_vm3, %v8683_v63  ;;  %s8689_s28 = smov 56  }
  0x11   : > { %803 = vmatpush.msrb.mxu2 %v748_v3  ;;  %v749_v5 = vand.u32 4294901760, %v748_v3  ;;  %v608_v7 = vld [vmem:[%s8769_s20] sm:$0xff]  ;;  %v635_v8 = vsel %vm621_vm1, %v612_v4, 0  ;;  %v638_v9 = vsel %vm621_vm1, %v613_v6, 0  ;;  %v609_v12 = vld [vmem:[%s8769_s20 + $0x8] sm:$0xff]  ;;  %v610_v17 = vld [vmem:[%s8769_s20 + $0x10] sm:$0xff] }
  0x12   : > { %v623_v10 = vsel %vm621_vm1, %v608_v7, 0  ;;  %v8779_v13 = vand.u32 4294901760, %v635_v8  ;;  %v8781_v15 = vand.u32 4294901760, %v638_v9  ;;  %v641_v18 = vsel %vm621_vm1, %v614_v11, 0  ;;  %v615_v33 = vld [vmem:[%s8769_s20 + $0x38] sm:$0xff]  ;;  %384 = vst.msk [vmem:[#allocation2 + $0x10] sm:$0xff] %vm380_vm2, %v8683_v63 }
  0x13   : > { %v750_v14 = vsub.f32 %v748_v3, %v749_v5  ;;  %v8783_v16 = vand.u32 4294901760, %v623_v10  ;;  %929 = vmatpush.msrb.mxu0 %v749_v5  ;;  %v626_v19 = vsel %vm621_vm1, %v609_v12, 0  ;;  %v629_v25 = vsel %vm621_vm1, %v610_v17, 0  ;;  %v611_v36 = vld [vmem:[%s8769_s20 + $0x18] sm:$0xff]  ;;  %385 = vst.msk [vmem:[#allocation2 + $0x18] sm:$0x3] %vm382_vm3, %v8683_v63 }
  0x14   : > { %v8789_v20 = vsub.f32 %v635_v8, %v8779_v13  ;;  %v8792_v22 = vsub.f32 %v638_v9, %v8781_v15  ;;  %v8795_v24 = vand.u32 4294901760, %v626_v19  ;;  %v8801_v28 = vand.u32 4294901760, %v641_v18  ;;  %386 = vst.msk [vmem:[#allocation2 + $0xa0] sm:$0xff] %vm380_vm2, %v8683_v63  ;;  %s8690_s29 = smov 120   ;;  %s8691_s30 = smov 4  }
  0x15   : > { %v751_v21 = vand.u32 4294901760, %v750_v14  ;;  %v668_v23 = vsub.f32 %v623_v10, %v8783_v16  ;;  %v683_v34 = vand.u32 4294901760, %v629_v25  ;;  %v644_v40 = vsel %vm621_vm1, %v615_v33, 0  ;;  %387 = vst.msk [vmem:[#allocation2 + $0xa8] sm:$0x3] %vm382_vm3, %v8683_v63  ;;  %s8530_s11 = sshll.u32 %s15269_s14, 8 }
  0x16   : > { %v701_v26 = vand.u32 4294901760, %v8789_v20  ;;  %v676_v29 = vsub.f32 %v626_v19, %v8795_v24  ;;  %v709_v31 = vand.u32 4294901760, %v8792_v22  ;;  %v8811_v39 = vsub.f32 %v641_v18, %v8801_v28  ;;  %388 = vst.msk [vmem:[#allocation2 + $0xb0] sm:$0xff] %vm380_vm2, %v8683_v63  ;;  %s9318_s16 = scalar_lea.vmem %s14519_s1, %s8530_s11  ;;  %s8692_s18 = smov 40  }
  0x17   : > { %8533 = vmatpush.msra.mxu3 %v751_v21  ;;  %v669_v27 = vand.u32 4294901760, %v668_v23  ;;  %752 = vmatpush.msra.mxu1 %v751_v21  ;;  %v684_v43 = vsub.f32 %v629_v25, %v683_v34  ;;  %v632_v44 = vsel %vm621_vm1, %v611_v36, 0  ;;  %v723_v45 = vand.u32 4294901760, %v644_v40  ;;  %389 = vst.msk [vmem:[#allocation2 + $0xb8] sm:$0x3] %vm382_vm3, %v8683_v63  ;;  %v1205_v0 = vld [vmem:[#allocation2 + $0x1] sm:$0xff] }
  0x18   : > { %770 = vmatmul.f32.vlgmr.msra.gmra.mxu3 %v8779_v13  ;;  %754 = vmatmul.f32.vlgmr.msra.gmra.mxu1 %v8783_v16  ;;  %v702_v30 = vsub.f32 %v8789_v20, %v701_v26  ;;  %v677_v35 = vand.u32 4294901760, %v676_v29  ;;  %v710_v41 = vsub.f32 %v8792_v22, %v709_v31  ;;  %v691_v46 = vand.u32 4294901760, %v632_v44  ;;  %390 = vst.msk [vmem:[#allocation2 + $0x140] sm:$0xff] %vm380_vm2, %v8683_v63  ;;  %v1213_v14 = vld [vmem:[#allocation2 + $0x2] sm:$0xff]  ;;  %s8693_s19 = smov 32   ;;  %s8694_s20 = smov 24  }
  0x19   : > { %861 = vmatpush.msrb.mxu3 %v665_v2  ;;  %v670_v32 = vsub.f32 %v668_v23, %v669_v27  ;;  %979 = vmatpush.msrb.mxu1 %v665_v2  ;;  %v717_v48 = vand.u32 4294901760, %v8811_v39  ;;  %v685_v50 = vand.u32 4294901760, %v684_v43  ;;  %v724_v51 = vsub.f32 %v644_v40, %v723_v45  ;;  %391 = vst.msk [vmem:[#allocation2 + $0x148] sm:$0x3] %vm382_vm3, %v8683_v63 }
  0x1a   : > { %v703_v37 = vand.u32 4294901760, %v702_v30  ;;  %v678_v42 = vsub.f32 %v676_v29, %v677_v35  ;;  %v711_v47 = vand.u32 4294901760, %v710_v41  ;;  %v692_v54 = vsub.f32 %v632_v44, %v691_v46  ;;  %1278 = vrot.lane.b32.xlu0 %v1205_v0, %s8684_s21  ;;  %392 = vst.msk [vmem:[#allocation2 + $0x150] sm:$0xff] %vm380_vm2, %v8683_v63  ;;  %1310 = vrot.lane.b32.xlu2 %v1213_v14, %s8685_s24  ;;  %v8504_v14 = vld [vmem:[%s9318_s16 + $0x48] sm:$0xff] }
  0x1b   : > { %v671_v38 = vand.u32 4294901760, %v670_v32  ;;  %v718_v52 = vsub.f32 %v8811_v39, %v717_v48  ;;  %v686_v53 = vsub.f32 %v684_v43, %v685_v50  ;;  %v725_v56 = vand.u32 4294901760, %v724_v51  ;;  %393 = vst.msk [vmem:[#allocation2 + $0x158] sm:$0x3] %vm382_vm3, %v8683_v63 }
  0x1c   : > { %704 = vmatmul.f32.vlgmr.msra.gmra.mxu2 %v703_v37  ;;  %v679_v49 = vand.u32 4294901760, %v678_v42  ;;  %v693_v58 = vand.u32 4294901760, %v692_v54  ;;  %394 = vst.msk [vmem:[#allocation2 + $0x1e0] sm:$0xff] %vm380_vm2, %v8683_v63  ;;  %vm1606_vm12 = vcmask 588800  }
  0x1d   : > { %672 = vmatmul.f32.vlgmr.msra.gmra.mxu0 %v671_v38  ;;  %v719_v55 = vand.u32 4294901760, %v718_v52  ;;  %v687_v57 = vand.u32 4294901760, %v686_v53  ;;  %v726_v59 = vsub.f32 %v724_v51, %v725_v56  ;;  %395 = vst.msk [vmem:[#allocation2 + $0x1e8] sm:$0x3] %vm382_vm3, %v8683_v63 }
  0x1e   : > { %v694_v60 = vsub.f32 %v692_v54, %v693_v58  ;;  %396 = vst.msk [vmem:[#allocation2 + $0x1f0] sm:$0xff] %vm380_vm2, %v8683_v63 }
  0x1f   : > { %v727_v61 = vand.u32 4294901760, %v726_v59  ;;  %397 = vst.msk [vmem:[#allocation2 + $0x1f8] sm:$0x3] %vm382_vm3, %v8683_v63 }
  0x20   : > { %774 = vmatmul.f32.gmra.mxu3 %v8781_v15  ;;  %758 = vmatmul.f32.gmra.mxu1 %v8795_v24  ;;  %v695_v62 = vand.u32 4294901760, %v694_v60  ;;  %399 = vst.msk [vmem:[#allocation2 + $0x80] sm:$0xff] %vm380_vm2, %v8683_v63 }
  0x21   : > { %400 = vst.msk [vmem:[#allocation2 + $0x88] sm:$0x3] %vm382_vm3, %v8683_v63 }
  0x22   : > { %401 = vst.msk [vmem:[#allocation2 + $0x90] sm:$0xff] %vm380_vm2, %v8683_v63 }
  0x23   : > { %402 = vst.msk [vmem:[#allocation2 + $0x98] sm:$0x3] %vm382_vm3, %v8683_v63 }
  0x24   : > { %712 = vmatmul.f32.gmra.mxu2 %v711_v47  ;;  %403 = vst.msk [vmem:[#allocation2 + $0x120] sm:$0xff] %vm380_vm2, %v8683_v63 }
  0x25   : > { %680 = vmatmul.f32.gmra.mxu0 %v679_v49  ;;  %404 = vst.msk [vmem:[#allocation2 + $0x128] sm:$0x3] %vm382_vm3, %v8683_v63 }
  0x26   : > { %405 = vst.msk [vmem:[#allocation2 + $0x130] sm:$0xff] %vm380_vm2, %v8683_v63 }
  0x27   : > { %406 = vst.msk [vmem:[#allocation2 + $0x138] sm:$0x3] %vm382_vm3, %v8683_v63 }
  0x28   : > { %778 = vmatmul.f32.gmra.mxu3 %v8801_v28  ;;  %762 = vmatmul.f32.gmra.mxu1 %v683_v34  ;;  %407 = vst.msk [vmem:[#allocation2 + $0x1c0] sm:$0xff] %vm380_vm2, %v8683_v63 }
  0x29   : > { %408 = vst.msk [vmem:[#allocation2 + $0x1c8] sm:$0x3] %vm382_vm3, %v8683_v63 }
  0x2a   : > { %409 = vst.msk [vmem:[#allocation2 + $0x1d0] sm:$0xff] %vm380_vm2, %v8683_v63 }
  0x2b   : > { %410 = vst.msk [vmem:[#allocation2 + $0x1d8] sm:$0x3] %vm382_vm3, %v8683_v63 }
  0x2c   : > { %720 = vmatmul.f32.gmra.mxu2 %v719_v55  ;;  %411 = vst.msk [vmem:[#allocation2 + $0x260] sm:$0xff] %vm380_vm2, %v8683_v63 }
  0x2d   : > { %688 = vmatmul.f32.gmra.mxu0 %v687_v57  ;;  %412 = vst.msk [vmem:[#allocation2 + $0x268] sm:$0x3] %vm382_vm3, %v8683_v63 }
  0x2e   : > { %413 = vst.msk [vmem:[#allocation2 + $0x270] sm:$0xff] %vm380_vm2, %v8683_v63 }
  0x2f   : > { %414 = vst.msk [vmem:[#allocation2 + $0x278] sm:$0x3] %vm382_vm3, %v8683_v63 }
  0x30   : > { %782 = vmatmul.f32.gmra.mxu3 %v723_v45  ;;  %766 = vmatmul.f32.gmra.mxu1 %v691_v46  ;;  %417 = vst.msk [vmem:[#allocation2 + $0x20] sm:$0x3] %vm382_vm3, %v8683_v63 }
  0x31   : > { %418 = vst.msk [vmem:[#allocation2 + $0x30] sm:$0x3] %vm382_vm3, %v8683_v63 }
  0x32   : > { %419 = vst.msk [vmem:[#allocation2 + $0x40] sm:$0x3] %vm382_vm3, %v8683_v63 }
  0x33   : > { %420 = vst.msk [vmem:[#allocation2 + $0x50] sm:$0x3] %vm382_vm3, %v8683_v63 }
  0x34   : > { %728 = vmatmul.f32.gmra.mxu2 %v727_v61  ;;  %421 = vst.msk [vmem:[#allocation2 + $0x60] sm:$0x3] %vm382_vm3, %v8683_v63 }
  0x35   : > { %696 = vmatmul.f32.gmra.mxu0 %v695_v62  ;;  %422 = vst.msk [vmem:[#allocation2 + $0x70] sm:$0x3] %vm382_vm3, %v8683_v63 }
  0x36   : > { %427 = vst.msk [vmem:[#allocation2 + $0xc0] sm:$0x3] %vm382_vm3, %v8683_v63 }
  0x37   : > { %428 = vst.msk [vmem:[#allocation2 + $0xd0] sm:$0x3] %vm382_vm3, %v8683_v63 }
  0x38   : > { %865 = vmatmul.f32.vlgmr.msrb.gmra.mxu3 %v669_v27  ;;  %981 = vmatmul.f32.vlgmr.msrb.gmra.mxu1 %v8783_v16  ;;  %429 = vst.msk [vmem:[#allocation2 + $0xe0] sm:$0x3] %vm382_vm3, %v8683_v63 }
  0x39   : > { %430 = vst.msk [vmem:[#allocation2 + $0xf0] sm:$0x3] %vm382_vm3, %v8683_v63 }
  0x3a   : > { %431 = vst.msk [vmem:[#allocation2 + $0x100] sm:$0x3] %vm382_vm3, %v8683_v63 }
  0x3b   : > { %432 = vst.msk [vmem:[#allocation2 + $0x110] sm:$0x3] %vm382_vm3, %v8683_v63 }
  0x3c   : > { %806 = vmatmul.f32.vlgmr.msrb.gmra.mxu2 %v668_v23  ;;  %437 = vst.msk [vmem:[#allocation2 + $0x160] sm:$0x3] %vm382_vm3, %v8683_v63 }
  0x3d   : > { %931 = vmatmul.f32.vlgmr.msrb.gmra.mxu0 %v8783_v16  ;;  %438 = vst.msk [vmem:[#allocation2 + $0x170] sm:$0x3] %vm382_vm3, %v8683_v63 }
  0x3e   : > { %439 = vst.msk [vmem:[#allocation2 + $0x180] sm:$0x3] %vm382_vm3, %v8683_v63 }
  0x3f   : > { %440 = vst.msk [vmem:[#allocation2 + $0x190] sm:$0x3] %vm382_vm3, %v8683_v63 }
  0x40   : > { %871 = vmatmul.f32.gmra.mxu3 %v677_v35  ;;  %985 = vmatmul.f32.gmra.mxu1 %v8795_v24  ;;  %441 = vst.msk [vmem:[#allocation2 + $0x1a0] sm:$0x3] %vm382_vm3, %v8683_v63 }
  0x41   : > { %442 = vst.msk [vmem:[#allocation2 + $0x1b0] sm:$0x3] %vm382_vm3, %v8683_v63 }
  0x42   : > { %447 = vst.msk [vmem:[#allocation2 + $0x200] sm:$0x3] %vm382_vm3, %v8683_v63 }
  0x43   : > { %448 = vst.msk [vmem:[#allocation2 + $0x210] sm:$0x3] %vm382_vm3, %v8683_v63 }
  0x44   : > { %811 = vmatmul.f32.gmra.mxu2 %v676_v29  ;;  %449 = vst.msk [vmem:[#allocation2 + $0x220] sm:$0x3] %vm382_vm3, %v8683_v63 }
  0x45   : > { %935 = vmatmul.f32.gmra.mxu0 %v8795_v24  ;;  %450 = vst.msk [vmem:[#allocation2 + $0x230] sm:$0x3] %vm382_vm3, %v8683_v63 }
  0x46   : > { %451 = vst.msk [vmem:[#allocation2 + $0x240] sm:$0x3] %vm382_vm3, %v8683_v63 }
  0x47   : > { %452 = vst.msk [vmem:[#allocation2 + $0x250] sm:$0x3] %vm382_vm3, %v8683_v63 }
  0x48   : > { %877 = vmatmul.f32.gmra.mxu3 %v685_v50  ;;  %989 = vmatmul.f32.gmra.mxu1 %v683_v34  ;;  %457 = vst.msk [vmem:[#allocation2 + $0x28] sm:$0x3] %vm382_vm3, %v8683_v63 }
  0x49   : > { %458 = vst.msk [vmem:[#allocation2 + $0x38] sm:$0x3] %vm382_vm3, %v8683_v63 }
  0x4a   : > { %459 = vst.msk [vmem:[#allocation2 + $0x48] sm:$0x3] %vm382_vm3, %v8683_v63 }
  0x4b   : > { %460 = vst.msk [vmem:[#allocation2 + $0x58] sm:$0x3] %vm382_vm3, %v8683_v63 }
  0x4c   : > { %816 = vmatmul.f32.gmra.mxu2 %v684_v43  ;;  %461 = vst.msk [vmem:[#allocation2 + $0x68] sm:$0x3] %vm382_vm3, %v8683_v63 }
  0x4d   : > { %939 = vmatmul.f32.gmra.mxu0 %v683_v34  ;;  %462 = vst.msk [vmem:[#allocation2 + $0x78] sm:$0x3] %vm382_vm3, %v8683_v63 }
  0x4e   : > { %467 = vst.msk [vmem:[#allocation2 + $0xc8] sm:$0x3] %vm382_vm3, %v8683_v63 }
  0x4f   : > { %468 = vst.msk [vmem:[#allocation2 + $0xd8] sm:$0x3] %vm382_vm3, %v8683_v63 }
  0x50   : > { %883 = vmatmul.f32.gmra.mxu3 %v693_v58  ;;  %993 = vmatmul.f32.gmra.mxu1 %v691_v46  ;;  %469 = vst.msk [vmem:[#allocation2 + $0xe8] sm:$0x3] %vm382_vm3, %v8683_v63 }
  0x51   : > { %470 = vst.msk [vmem:[#allocation2 + $0xf8] sm:$0x3] %vm382_vm3, %v8683_v63 }
  0x52   : > { %471 = vst.msk [vmem:[#allocation2 + $0x108] sm:$0x3] %vm382_vm3, %v8683_v63 }
  0x53   : > { %472 = vst.msk [vmem:[#allocation2 + $0x118] sm:$0x3] %vm382_vm3, %v8683_v63 }
  0x54   : > { %821 = vmatmul.f32.gmra.mxu2 %v692_v54  ;;  %477 = vst.msk [vmem:[#allocation2 + $0x168] sm:$0x3] %vm382_vm3, %v8683_v63 }
  0x55   : > { %943 = vmatmul.f32.gmra.mxu0 %v691_v46  ;;  %478 = vst.msk [vmem:[#allocation2 + $0x178] sm:$0x3] %vm382_vm3, %v8683_v63 }
  0x56   : > { %479 = vst.msk [vmem:[#allocation2 + $0x188] sm:$0x3] %vm382_vm3, %v8683_v63 }
  0x57   : > { %480 = vst.msk [vmem:[#allocation2 + $0x198] sm:$0x3] %vm382_vm3, %v8683_v63 }
  0x58   : > { %889 = vmatmul.f32.gmra.mxu3 %v701_v26  ;;  %997 = vmatmul.f32.gmra.mxu1 %v8779_v13  ;;  %481 = vst.msk [vmem:[#allocation2 + $0x1a8] sm:$0x3] %vm382_vm3, %v8683_v63 }
  0x59   : > { %482 = vst.msk [vmem:[#allocation2 + $0x1b8] sm:$0x3] %vm382_vm3, %v8683_v63 }
  0x5a   : > { %487 = vst.msk [vmem:[#allocation2 + $0x208] sm:$0x3] %vm382_vm3, %v8683_v63 }
  0x5b   : > { %488 = vst.msk [vmem:[#allocation2 + $0x218] sm:$0x3] %vm382_vm3, %v8683_v63 }
  0x5c   : > { %826 = vmatmul.f32.gmra.mxu2 %v8789_v20  ;;  %489 = vst.msk [vmem:[#allocation2 + $0x228] sm:$0x3] %vm382_vm3, %v8683_v63 }
  0x5d   : > { %947 = vmatmul.f32.gmra.mxu0 %v8779_v13  ;;  %490 = vst.msk [vmem:[#allocation2 + $0x238] sm:$0x3] %vm382_vm3, %v8683_v63 }
  0x5e   : > { %491 = vst.msk [vmem:[#allocation2 + $0x248] sm:$0x3] %vm382_vm3, %v8683_v63 }
  0x5f   : > { %492 = vst.msk [vmem:[#allocation2 + $0x258] sm:$0x3] %vm382_vm3, %v8683_v63 }
  0x60   : > { %895 = vmatmul.f32.gmra.mxu3 %v709_v31  ;;  %1001 = vmatmul.f32.gmra.mxu1 %v8781_v15  ;;  %497 = vst.msk [vmem:[#allocation3 + $0x10] sm:$0xff] %vm380_vm2, %v8683_v63 }
  0x61   : > { %498 = vst.msk [vmem:[#allocation3 + $0x18] sm:$0x3] %vm382_vm3, %v8683_v63 }
  0x62   : > { %501 = vst.msk [vmem:[#allocation3 + $0xb0] sm:$0xff] %vm380_vm2, %v8683_v63 }
  0x63   : > { %502 = vst.msk [vmem:[#allocation3 + $0xb8] sm:$0x3] %vm382_vm3, %v8683_v63 }
  0x64   : > { %831 = vmatmul.f32.gmra.mxu2 %v8792_v22  ;;  %503 = vst.msk [vmem:[#allocation3 + $0x140] sm:$0xff] %vm380_vm2, %v8683_v63 }
  0x65   : > { %951 = vmatmul.f32.gmra.mxu0 %v8781_v15  ;;  %504 = vst.msk [vmem:[#allocation3 + $0x148] sm:$0x3] %vm382_vm3, %v8683_v63  ;;  %v9176_v15 = vld [vmem:[%s14521_s3] ss:$0 sm:$0xff] }
  0x66   : > { %505 = vst.msk [vmem:[#allocation3 + $0x150] sm:$0xff] %vm380_vm2, %v8683_v63 }
  0x67   : > { %506 = vst.msk [vmem:[#allocation3 + $0x158] sm:$0x3] %vm382_vm3, %v8683_v63 }
  0x68   : > { %901 = vmatmul.f32.gmra.mxu3 %v717_v48  ;;  %1005 = vmatmul.f32.gmra.mxu1 %v8801_v28  ;;  %507 = vst.msk [vmem:[#allocation3 + $0x1e0] sm:$0xff] %vm380_vm2, %v8683_v63 }
  0x69   : > { %508 = vst.msk [vmem:[#allocation3 + $0x1e8] sm:$0x3] %vm382_vm3, %v8683_v63 }
  0x6a   : > { %509 = vst.msk [vmem:[#allocation3 + $0x1f0] sm:$0xff] %vm380_vm2, %v8683_v63 }
  0x6b   : > { %510 = vst.msk [vmem:[#allocation3 + $0x1f8] sm:$0x3] %vm382_vm3, %v8683_v63 }
  0x6c   : > { %836 = vmatmul.f32.gmra.mxu2 %v8811_v39  ;;  %512 = vst.msk [vmem:[#allocation3 + $0x80] sm:$0xff] %vm380_vm2, %v8683_v63 }
  0x6d   : > { %955 = vmatmul.f32.gmra.mxu0 %v8801_v28  ;;  %513 = vst.msk [vmem:[#allocation3 + $0x88] sm:$0x3] %vm382_vm3, %v8683_v63 }
  0x6e   : > { %514 = vst.msk [vmem:[#allocation3 + $0x90] sm:$0xff] %vm380_vm2, %v8683_v63 }
  0x6f   : > { %515 = vst.msk [vmem:[#allocation3 + $0x98] sm:$0x3] %vm382_vm3, %v8683_v63 }
  0x70   : > { %907 = vmatmul.f32.gmra.mxu3 %v725_v56  ;;  %1009 = vmatmul.f32.gmra.mxu1 %v723_v45  ;;  %516 = vst.msk [vmem:[#allocation3 + $0x120] sm:$0xff] %vm380_vm2, %v8683_v63 }
  0x71   : > { %517 = vst.msk [vmem:[#allocation3 + $0x128] sm:$0x3] %vm382_vm3, %v8683_v63 }
  0x72   : > { %518 = vst.msk [vmem:[#allocation3 + $0x130] sm:$0xff] %vm380_vm2, %v8683_v63 }
  0x73   : > { %519 = vst.msk [vmem:[#allocation3 + $0x138] sm:$0x3] %vm382_vm3, %v8683_v63 }
  0x74   : > { %841 = vmatmul.f32.gmra.mxu2 %v724_v51  ;;  %520 = vst.msk [vmem:[#allocation3 + $0x1c0] sm:$0xff] %vm380_vm2, %v8683_v63 }
  0x75   : > { %959 = vmatmul.f32.gmra.mxu0 %v723_v45  ;;  %521 = vst.msk [vmem:[#allocation3 + $0x1c8] sm:$0x3] %vm382_vm3, %v8683_v63 }
  0x76   : > { %524 = vst.msk [vmem:[#allocation3 + $0x260] sm:$0xff] %vm380_vm2, %v8683_v63 }
  0x77   : > { %525 = vst.msk [vmem:[#allocation3 + $0x268] sm:$0x3] %vm382_vm3, %v8683_v63 }
  0x78   : > { %530 = vst.msk [vmem:[#allocation3 + $0x20] sm:$0x3] %vm382_vm3, %v8683_v63 }
  0x79   : > { %531 = vst.msk [vmem:[#allocation3 + $0x30] sm:$0x3] %vm382_vm3, %v8683_v63 }
  0x7a   : > { %532 = vst.msk [vmem:[#allocation3 + $0x40] sm:$0x3] %vm382_vm3, %v8683_v63 }
  0x7b   : > { %533 = vst.msk [vmem:[#allocation3 + $0x50] sm:$0x3] %vm382_vm3, %v8683_v63 }
  0x7c   : > { %534 = vst.msk [vmem:[#allocation3 + $0x60] sm:$0x3] %vm382_vm3, %v8683_v63 }
  0x7d   : > { %535 = vst.msk [vmem:[#allocation3 + $0x70] sm:$0x3] %vm382_vm3, %v8683_v63 }
  0x7e   : > { %540 = vst.msk [vmem:[#allocation3 + $0xc0] sm:$0x3] %vm382_vm3, %v8683_v63 }
  0x7f   : > { %541 = vst.msk [vmem:[#allocation3 + $0xd0] sm:$0x3] %vm382_vm3, %v8683_v63 }
  0x80   : > { %542 = vst.msk [vmem:[#allocation3 + $0xe0] sm:$0x3] %vm382_vm3, %v8683_v63 }
  0x81   : > { %543 = vst.msk [vmem:[#allocation3 + $0xf0] sm:$0x3] %vm382_vm3, %v8683_v63 }
  0x82   : > { %544 = vst.msk [vmem:[#allocation3 + $0x100] sm:$0x3] %vm382_vm3, %v8683_v63 }
  0x83   : > { %545 = vst.msk [vmem:[#allocation3 + $0x110] sm:$0x3] %vm382_vm3, %v8683_v63 }
  0x84   : > { %550 = vst.msk [vmem:[#allocation3 + $0x160] sm:$0x3] %vm382_vm3, %v8683_v63 }
  0x85   : > { %551 = vst.msk [vmem:[#allocation3 + $0x170] sm:$0x3] %vm382_vm3, %v8683_v63 }
  0x86   : > { %552 = vst.msk [vmem:[#allocation3 + $0x180] sm:$0x3] %vm382_vm3, %v8683_v63 }
  0x87   : > { %553 = vst.msk [vmem:[#allocation3 + $0x190] sm:$0x3] %vm382_vm3, %v8683_v63 }
  0x88   : > { %554 = vst.msk [vmem:[#allocation3 + $0x1a0] sm:$0x3] %vm382_vm3, %v8683_v63 }
  0x89   : > { %555 = vst.msk [vmem:[#allocation3 + $0x1b0] sm:$0x3] %vm382_vm3, %v8683_v63 }
  0x8a   : > { %560 = vst.msk [vmem:[#allocation3 + $0x200] sm:$0x3] %vm382_vm3, %v8683_v63 }
  0x8b   : > { %561 = vst.msk [vmem:[#allocation3 + $0x210] sm:$0x3] %vm382_vm3, %v8683_v63 }
  0x8c   : > { %562 = vst.msk [vmem:[#allocation3 + $0x220] sm:$0x3] %vm382_vm3, %v8683_v63 }
  0x8d   : > { %563 = vst.msk [vmem:[#allocation3 + $0x230] sm:$0x3] %vm382_vm3, %v8683_v63 }
  0x8e   : > { %564 = vst.msk [vmem:[#allocation3 + $0x240] sm:$0x3] %vm382_vm3, %v8683_v63 }
  0x8f   : > { %565 = vst.msk [vmem:[#allocation3 + $0x250] sm:$0x3] %vm382_vm3, %v8683_v63 }
  0x90   : > { %570 = vst.msk [vmem:[#allocation3 + $0x28] sm:$0x3] %vm382_vm3, %v8683_v63 }
  0x91   : > { %571 = vst.msk [vmem:[#allocation3 + $0x38] sm:$0x3] %vm382_vm3, %v8683_v63 }
  0x92   : > { %572 = vst.msk [vmem:[#allocation3 + $0x48] sm:$0x3] %vm382_vm3, %v8683_v63 }
  0x93   : > { %573 = vst.msk [vmem:[#allocation3 + $0x58] sm:$0x3] %vm382_vm3, %v8683_v63 }
  0x94   : > { %574 = vst.msk [vmem:[#allocation3 + $0x68] sm:$0x3] %vm382_vm3, %v8683_v63 }
  0x95   : > { %v755_v4 = vpop.f32.mrf.mxu1  ;;  %575 = vst.msk [vmem:[#allocation3 + $0x78] sm:$0x3] %vm382_vm3, %v8683_v63 }
  0x96   : > { %580 = vst.msk [vmem:[#allocation3 + $0xc8] sm:$0x3] %vm382_vm3, %v8683_v63 }
  0x97   : > { %581 = vst.msk [vmem:[#allocation3 + $0xd8] sm:$0x3] %vm382_vm3, %v8683_v63 }
  0x98   : > { %582 = vst.msk [vmem:[#allocation3 + $0xe8] sm:$0x3] %vm382_vm3, %v8683_v63 }
  0x99   : > { %583 = vst.msk [vmem:[#allocation3 + $0xf8] sm:$0x3] %vm382_vm3, %v8683_v63 }
  0x9a   : > { %v673_v3 = vpop.f32.mrf.mxu0  ;;  %584 = vst.msk [vmem:[#allocation3 + $0x108] sm:$0x3] %vm382_vm3, %v8683_v63 }
  0x9b   : > { %v9099_v2 = vpop.f32.mrf.mxu3  ;;  %585 = vst.msk [vmem:[#allocation3 + $0x118] sm:$0x3] %vm382_vm3, %v8683_v63  ;;  %v674_v17 = vadd.f32 %v9176_v15, %v673_v3 }
  0x9c   : > { %590 = vst.msk [vmem:[#allocation3 + $0x168] sm:$0x3] %vm382_vm3, %v8683_v63 }
  0x9d   : > { %591 = vst.msk [vmem:[#allocation3 + $0x178] sm:$0x3] %vm382_vm3, %v8683_v63  ;;  %v9141_v8 = vpop.f32.mrf.mxu1  ;;  %v756_v20 = vadd.f32 %v755_v4, %v674_v17 }
  0x9e   : > { %592 = vst.msk [vmem:[#allocation3 + $0x188] sm:$0x3] %vm382_vm3, %v8683_v63 }
  0x9f   : > { %v9093_v1 = vpop.f32.mrf.mxu2  ;;  %593 = vst.msk [vmem:[#allocation3 + $0x198] sm:$0x3] %vm382_vm3, %v8683_v63 }
  0xa0   : > { %594 = vst.msk [vmem:[#allocation3 + $0x1a8] sm:$0x3] %vm382_vm3, %v8683_v63  ;;  %v706_v55 = vadd.f32 %v9176_v15, %v9093_v1 }
  0xa1   : > { %595 = vst.msk [vmem:[#allocation3 + $0x1b8] sm:$0x3] %vm382_vm3, %v8683_v63 }
  0xa2   : > { %v9135_v7 = vpop.f32.mrf.mxu0  ;;  %600 = vst.msk [vmem:[#allocation3 + $0x208] sm:$0x3] %vm382_vm3, %v8683_v63  ;;  %v772_v59 = vadd.f32 %v9099_v2, %v706_v55  ;;  %v9402_v55 = vpop.permute.xlu2 %1310 }
  0xa3   : > { %v9125_v6 = vpop.f32.mrf.mxu3  ;;  %601 = vst.msk [vmem:[#allocation3 + $0x218] sm:$0x3] %vm382_vm3, %v8683_v63  ;;  %v682_v32 = vadd.f32 %v9176_v15, %v9135_v7 }
  0xa4   : > { %602 = vst.msk [vmem:[#allocation3 + $0x228] sm:$0x3] %vm382_vm3, %v8683_v63 }
  0xa5   : > { %603 = vst.msk [vmem:[#allocation3 + $0x238] sm:$0x3] %vm382_vm3, %v8683_v63  ;;  %v9165_v12 = vpop.f32.mrf.mxu1  ;;  %v760_v33 = vadd.f32 %v9141_v8, %v682_v32  ;;  %v8503_v8 = vld [vmem:[%s9318_s16 + $0x40] sm:$0xff]  ;;  %v8508_v32 = vld [vmem:[%s9318_s16 + $0x68] sm:$0xff] }
  0xa6   : > { %604 = vst.msk [vmem:[#allocation3 + $0x248] sm:$0x3] %vm382_vm3, %v8683_v63 }
  0xa7   : > { %v9117_v5 = vpop.f32.mrf.mxu2  ;;  %605 = vst.msk [vmem:[#allocation3 + $0x258] sm:$0x3] %vm382_vm3, %v8683_v63 }
  0xa8   : > { %416 = vst.msk [vmem:[#allocation2 + $0x10] sm:$0x3] %vm382_vm3, %v8683_v63  ;;  %v714_v4 = vadd.f32 %v9176_v15, %v9117_v5 }
  0xa9   : > { %423 = vst.msk [vmem:[#allocation2 + $0x80] sm:$0x3] %vm382_vm3, %v8683_v63 }
  0xaa   : > { %v9159_v11 = vpop.f32.mrf.mxu0  ;;  %424 = vst.msk [vmem:[#allocation2 + $0x90] sm:$0x3] %vm382_vm3, %v8683_v63  ;;  %v776_v5 = vadd.f32 %v9125_v6, %v714_v4 }
  0xab   : > { %v9153_v10 = vpop.f32.mrf.mxu3  ;;  %425 = vst.msk [vmem:[#allocation2 + $0xa0] sm:$0x3] %vm382_vm3, %v8683_v63  ;;  %v690_v49 = vadd.f32 %v9176_v15, %v9159_v11 }
  0xac   : > { %426 = vst.msk [vmem:[#allocation2 + $0xb0] sm:$0x3] %vm382_vm3, %v8683_v63 }
  0xad   : > { %433 = vst.msk [vmem:[#allocation2 + $0x120] sm:$0x3] %vm382_vm3, %v8683_v63  ;;  %v9196_v19 = vpop.f32.mrf.mxu1  ;;  %v764_v56 = vadd.f32 %v9165_v12, %v690_v49 }
  0xae   : > { %434 = vst.msk [vmem:[#allocation2 + $0x130] sm:$0x3] %vm382_vm3, %v8683_v63 }
  0xaf   : > { %v9147_v9 = vpop.f32.mrf.mxu2  ;;  %435 = vst.msk [vmem:[#allocation2 + $0x140] sm:$0x3] %vm382_vm3, %v8683_v63 }
  0xb0   : > { %436 = vst.msk [vmem:[#allocation2 + $0x150] sm:$0x3] %vm382_vm3, %v8683_v63 }
  0xb1   : > { %443 = vst.msk [vmem:[#allocation2 + $0x1c0] sm:$0x3] %vm382_vm3, %v8683_v63  ;;  %v1253_v23 = vld [vmem:[#allocation2 + $0x90] sm:$0xff] }
  0xb2   : > { %v9190_v18 = vpop.f32.mrf.mxu0  ;;  %444 = vst.msk [vmem:[#allocation2 + $0x1d0] sm:$0x3] %vm382_vm3, %v8683_v63  ;;  %1452 = vrot.lane.b32.xlu2 %v1253_v23, %s8686_s25 }
  0xb3   : > { %v9183_v16 = vpop.f32.mrf.mxu3  ;;  %445 = vst.msk [vmem:[#allocation2 + $0x1e0] sm:$0x3] %vm382_vm3, %v8683_v63  ;;  %v698_v51 = vadd.f32 %v9176_v15, %v9190_v18 }
  0xb4   : > { %446 = vst.msk [vmem:[#allocation2 + $0x1f0] sm:$0x3] %vm382_vm3, %v8683_v63 }
  0xb5   : > { %453 = vst.msk [vmem:[#allocation2 + $0x260] sm:$0x3] %vm382_vm3, %v8683_v63  ;;  %v982_v28 = vpop.f32.mrf.mxu1  ;;  %v2196_v44 = vld [vmem:[#allocation2 + $0x130] sm:$0xff]  ;;  %v768_v57 = vadd.f32 %v9196_v19, %v698_v51 }
  0xb6   : > { %454 = vst.msk [vmem:[#allocation2 + $0x270] sm:$0x3] %vm382_vm3, %v8683_v63 }
  0xb7   : > { %v9171_v13 = vpop.f32.mrf.mxu2  ;;  %456 = vst.msk [vmem:[#allocation2 + $0x18] sm:$0x3] %vm382_vm3, %v8683_v63 }
  0xb8   : > { %463 = vst.msk [vmem:[#allocation2 + $0x88] sm:$0x3] %vm382_vm3, %v8683_v63 }
  0xb9   : > { %464 = vst.msk [vmem:[#allocation2 + $0x98] sm:$0x3] %vm382_vm3, %v8683_v63 }
  0xba   : > { %v932_v26 = vpop.f32.mrf.mxu0  ;;  %465 = vst.msk [vmem:[#allocation2 + $0xa8] sm:$0x3] %vm382_vm3, %v8683_v63 }
  0xbb   : > { %v866_v24 = vpop.f32.mrf.mxu3  ;;  %466 = vst.msk [vmem:[#allocation2 + $0xb8] sm:$0x3] %vm382_vm3, %v8683_v63 }
  0xbc   : > { %473 = vst.msk [vmem:[#allocation2 + $0x128] sm:$0x3] %vm382_vm3, %v8683_v63 }
  0xbd   : > { %474 = vst.msk [vmem:[#allocation2 + $0x138] sm:$0x3] %vm382_vm3, %v8683_v63  ;;  %v986_v40 = vpop.f32.mrf.mxu1 }
  0xbe   : > { %475 = vst.msk [vmem:[#allocation2 + $0x148] sm:$0x3] %vm382_vm3, %v8683_v63 }
  0xbf   : > { %v807_v21 = vpop.f32.mrf.mxu2  ;;  %476 = vst.msk [vmem:[#allocation2 + $0x158] sm:$0x3] %vm382_vm3, %v8683_v63 }
  0xc0   : > { %v808_v22 = vadd.f32 %v807_v21, %v756_v20  ;;  %483 = vst.msk [vmem:[#allocation2 + $0x1c8] sm:$0x3] %vm382_vm3, %v8683_v63  ;;  %v1269_v30 = vld [vmem:[#allocation2 + $0x92] sm:$0xff] }
  0xc1   : > { %v1261_v31 = vld [vmem:[#allocation2 + $0x91] sm:$0xff]  ;;  %484 = vst.msk [vmem:[#allocation2 + $0x1d8] sm:$0x3] %vm382_vm3, %v8683_v63  ;;  %1516 = vrot.lane.b32.xlu0 %v1269_v30, %s8688_s27  ;;  %v2156_v34 = vld [vmem:[#allocation2 + $0xa2] sm:$0xff] }
  0xc2   : > { %v867_v25 = vadd.f32 %v866_v24, %v808_v22  ;;  %1484 = vrot.lane.b32.xlu1 %v1261_v31, %s8689_s28  ;;  %485 = vst.msk [vmem:[#allocation2 + $0x1e8] sm:$0x3] %vm382_vm3, %v8683_v63  ;;  %v2148_v35 = vld [vmem:[#allocation2 + $0xa1] sm:$0xff]  ;;  %v936_v39 = vpop.f32.mrf.mxu0  ;;  %v8505_v20 = vld [vmem:[%s9318_s16 + $0x50] sm:$0xff]  ;;  %v722_v24 = vadd.f32 %v9176_v15, %v9147_v9 }
  0xc3   : > { %486 = vst.msk [vmem:[#allocation2 + $0x1f8] sm:$0x3] %vm382_vm3, %v8683_v63  ;;  %v872_v38 = vpop.f32.mrf.mxu3 }
  0xc4   : > { %v933_v27 = vadd.f32 %v932_v26, %v867_v25  ;;  %493 = vst.msk [vmem:[#allocation2 + $0x268] sm:$0x3] %vm382_vm3, %v8683_v63  ;;  %v8506_v26 = vld [vmem:[%s9318_s16 + $0x58] sm:$0xff]  ;;  %v780_v9 = vadd.f32 %v9153_v10, %v722_v24 }
  0xc5   : > { %494 = vst.msk [vmem:[#allocation2 + $0x278] sm:$0x3] %vm382_vm3, %v8683_v63  ;;  %v990_v48 = vpop.f32.mrf.mxu1 }
  0xc6   : > { %v9217_v29 = vadd.f32 %v982_v28, %v933_v27  ;;  %529 = vst.msk [vmem:[#allocation3 + $0x10] sm:$0x3] %vm382_vm3, %v8683_v63 }
  0xc7   : > { %v812_v36 = vpop.f32.mrf.mxu2  ;;  %536 = vst.msk [vmem:[#allocation3 + $0x80] sm:$0x3] %vm382_vm3, %v8683_v63 }
  0xc8   : > { %1115 = vrot.lane.b32.xlu2 %v9217_v29, %s8687_s26  ;;  %v813_v37 = vadd.f32 %v812_v36, %v760_v33  ;;  %537 = vst.msk [vmem:[#allocation3 + $0x90] sm:$0x3] %vm382_vm3, %v8683_v63 }
  0xc9   : > { %2253 = vrot.lane.b32.xlu0 %v2156_v34, %s8685_s24  ;;  %539 = vst.msk [vmem:[#allocation3 + $0xb0] sm:$0x3] %vm382_vm3, %v8683_v63 }
  0xca   : > { %2221 = vrot.lane.b32.xlu1 %v2148_v35, %s8684_s21  ;;  %v873_v41 = vadd.f32 %v872_v38, %v813_v37  ;;  %546 = vst.msk [vmem:[#allocation3 + $0x120] sm:$0x3] %vm382_vm3, %v8683_v63  ;;  %v940_v47 = vpop.f32.mrf.mxu0  ;;  %v8509_v38 = vld [vmem:[%s9318_s16 + $0x70] sm:$0xff] }
  0xcb   : > { %547 = vst.msk [vmem:[#allocation3 + $0x130] sm:$0x3] %vm382_vm3, %v8683_v63  ;;  %v878_v46 = vpop.f32.mrf.mxu3 }
  0xcc   : > { %v937_v42 = vadd.f32 %v936_v39, %v873_v41  ;;  %548 = vst.msk [vmem:[#allocation3 + $0x140] sm:$0x3] %vm382_vm3, %v8683_v63 }
  0xcd   : > { %549 = vst.msk [vmem:[#allocation3 + $0x150] sm:$0x3] %vm382_vm3, %v8683_v63  ;;  %v994_v54 = vpop.f32.mrf.mxu1 }
  0xce   : > { %v9268_v43 = vadd.f32 %v986_v40, %v937_v42  ;;  %556 = vst.msk [vmem:[#allocation3 + $0x1c0] sm:$0x3] %vm382_vm3, %v8683_v63  ;;  %v730_v40 = vadd.f32 %v9176_v15, %v9171_v13 }
  0xcf   : > { %v817_v45 = vpop.f32.mrf.mxu2  ;;  %558 = vst.msk [vmem:[#allocation3 + $0x1e0] sm:$0x3] %vm382_vm3, %v8683_v63 }
  0xd0   : > { %1167 = vrot.lane.b32.xlu2 %v9268_v43, %s8690_s29  ;;  %559 = vst.msk [vmem:[#allocation3 + $0x1f0] sm:$0x3] %vm382_vm3, %v8683_v63  ;;  %v818_v58 = vadd.f32 %v817_v45, %v764_v56 }
  0xd1   : > { %2395 = vrot.lane.b32.xlu0 %v2196_v44, %s8686_s25  ;;  %566 = vst.msk [vmem:[#allocation3 + $0x260] sm:$0x3] %vm382_vm3, %v8683_v63 }
  0xd2   : > { %1165 = vrot.lane.b32.xlu1 %v9217_v29, %s8690_s29  ;;  %569 = vst.msk [vmem:[#allocation3 + $0x18] sm:$0x3] %vm382_vm3, %v8683_v63  ;;  %v944_v53 = vpop.f32.mrf.mxu0  ;;  %v879_v62 = vadd.f32 %v878_v46, %v818_v58 }
  0xd3   : > { %v884_v52 = vpop.f32.mrf.mxu3  ;;  %576 = vst.msk [vmem:[#allocation3 + $0x88] sm:$0x3] %vm382_vm3, %v8683_v63 }
  0xd4   : > { %577 = vst.msk [vmem:[#allocation3 + $0x98] sm:$0x3] %vm382_vm3, %v8683_v63  ;;  %v941_v11 = vadd.f32 %v940_v47, %v879_v62  ;;  %v8510_v47 = vld [vmem:[%s9318_s16 + $0x78] sm:$0xff]  ;;  %v8520_v62 = vld [vmem:[%s9318_s16 + $0xc8] sm:$0xff] }
  0xd5   : > { %579 = vst.msk [vmem:[#allocation3 + $0xb8] sm:$0x3] %vm382_vm3, %v8683_v63  ;;  %v998_v2 = vpop.f32.mrf.mxu1 }
  0xd6   : > { %586 = vst.msk [vmem:[#allocation3 + $0x128] sm:$0x3] %vm382_vm3, %v8683_v63  ;;  %v9338_v19 = vadd.f32 %v990_v48, %v941_v11 }
  0xd7   : > { %v822_v50 = vpop.f32.mrf.mxu2  ;;  %587 = vst.msk [vmem:[#allocation3 + $0x138] sm:$0x3] %vm382_vm3, %v8683_v63 }
  0xd8   : > { %v823_v60 = vadd.f32 %v822_v50, %v768_v57  ;;  %588 = vst.msk [vmem:[#allocation3 + $0x148] sm:$0x3] %vm382_vm3, %v8683_v63 }
  0xd9   : > { %1038 = vrot.lane.b32.xlu0 %v9217_v29, %s8691_s30  ;;  %589 = vst.msk [vmem:[#allocation3 + $0x158] sm:$0x3] %vm382_vm3, %v8683_v63 }
  0xda   : > { %v948_v3 = vpop.f32.mrf.mxu0  ;;  %596 = vst.msk [vmem:[#allocation3 + $0x1c8] sm:$0x3] %vm382_vm3, %v8683_v63  ;;  %v885_v7 = vadd.f32 %v884_v52, %v823_v60 }
  0xdb   : > { %v890_v1 = vpop.f32.mrf.mxu3  ;;  %598 = vst.msk [vmem:[#allocation3 + $0x1e8] sm:$0x3] %vm382_vm3, %v8683_v63 }
  0xdc   : > { %599 = vst.msk [vmem:[#allocation3 + $0x1f8] sm:$0x3] %vm382_vm3, %v8683_v63  ;;  %v945_v17 = vadd.f32 %v944_v53, %v885_v7  ;;  %v8519_v7 = vld [vmem:[%s9318_s16 + $0xc0] sm:$0xff] }
  0xdd   : > { %606 = vst.msk [vmem:[#allocation3 + $0x268] sm:$0x3] %vm382_vm3, %v8683_v63  ;;  %v1002_v6 = vpop.f32.mrf.mxu1 }
  0xde   : > { %1081 = vst.msk [vmem:[#allocation2 + $0xb1] sm:$0xff] %vm621_vm1, %v8503_v8  ;;  %v9348_v25 = vadd.f32 %v994_v54, %v945_v17  ;;  %v1013_v8 = vld [vmem:[%s9318_s16] sm:$0xff] }
  0xdf   : > { %v827_v61 = vpop.f32.mrf.mxu2  ;;  %1089 = vst.msk [vmem:[#allocation2 + $0xb1] sm:$0xff] %vm1062_vm4, %v9217_v29  ;;  %v8507_v29 = vld [vmem:[%s9318_s16 + $0x60] sm:$0xff] }
  0xe0   : > { %v828_v0 = vadd.f32 %v827_v61, %v772_v59  ;;  %1082 = vst.msk [vmem:[#allocation2 + $0xc1] sm:$0xff] %vm621_vm1, %v8504_v14  ;;  %v8511_v59 = vld [vmem:[%s9318_s16 + $0x80] sm:$0xff]  ;;  %v1014_v14 = vld [vmem:[%s9318_s16 + $0x8] sm:$0xff] }
  0xe1   : > { %1040 = vrot.lane.b32.xlu0 %v9268_v43, %s8691_s30  ;;  %1090 = vst.msk [vmem:[#allocation2 + $0xc1] sm:$0xff] %vm1062_vm4, %v9268_v43 }
  0xe2   : > { %v891_v12 = vadd.f32 %v890_v1, %v828_v0  ;;  %v952_v63 = vpop.f32.mrf.mxu0  ;;  %1083 = vst.msk [vmem:[#allocation2 + $0xd1] sm:$0xff] %vm621_vm1, %v8505_v20  ;;  %v9425_v0 = vpop.permute.xlu0 %1278  ;;  %v8512_v20 = vld [vmem:[%s9318_s16 + $0x88] sm:$0xff] }
  0xe3   : > { %v896_v23 = vpop.f32.mrf.mxu3  ;;  %1091 = vst.msk [vmem:[#allocation2 + $0xd1] sm:$0xff] %vm1062_vm4, %v9338_v19 }
  0xe4   : > { %v949_v21 = vadd.f32 %v948_v3, %v891_v12  ;;  %1084 = vst.msk [vmem:[#allocation2 + $0xe1] sm:$0xff] %vm621_vm1, %v8506_v26 }
  0xe5   : > { %1092 = vst.msk [vmem:[#allocation2 + $0xe1] sm:$0xff] %vm1062_vm4, %v9348_v25  ;;  %v1006_v39 = vpop.f32.mrf.mxu1 }
  0xe6   : > { %v9354_v28 = vadd.f32 %v998_v2, %v949_v21  ;;  %v2157_v33 = vld [vmem:[#allocation2 + $0xb2] sm:$0xff]  ;;  %1085 = vst.msk [vmem:[#allocation2 + $0xf1] sm:$0xff] %vm621_vm1, %v8507_v29 }
  0xe7   : > { %v832_v18 = vpop.f32.mrf.mxu2  ;;  %v2172_v34 = vld [vmem:[#allocation2 + $0xb1] sm:$0xff]  ;;  %2255 = vrot.lane.b32.xlu1 %v2157_v33, %s8685_s24  ;;  %1086 = vst.msk [vmem:[#allocation2 + $0x101] sm:$0xff] %vm621_vm1, %v8508_v32 }
  0xe8   : > { %v833_v22 = vadd.f32 %v832_v18, %v776_v5  ;;  %2223 = vrot.lane.b32.xlu2 %v2172_v34, %s8684_s21  ;;  %1093 = vst.msk [vmem:[#allocation2 + $0xf1] sm:$0xff] %vm1062_vm4, %v9354_v28  ;;  %v2164_v45 = vld [vmem:[#allocation2 + $0xb0] sm:$0xff]  ;;  %v2158_v52 = vld [vmem:[#allocation2 + $0xc2] sm:$0xff]  ;;  %v8514_v29 = vld [vmem:[%s9318_s16 + $0x98] sm:$0xff] }
  0xe9   : > { %1117 = vrot.lane.b32.xlu0 %v9268_v43, %s8687_s26  ;;  %1087 = vst.msk [vmem:[#allocation2 + $0x111] sm:$0xff] %vm621_vm1, %v8509_v38  ;;  %v784_v43 = vadd.f32 %v9183_v16, %v730_v40  ;;  %v2150_v53 = vld [vmem:[#allocation2 + $0xc1] sm:$0xff]  ;;  %v1016_v38 = vld [vmem:[%s9318_s16 + $0x18] sm:$0xff] }
  0xea   : > { %v897_v27 = vadd.f32 %v896_v23, %v833_v22  ;;  %v956_v37 = vpop.f32.mrf.mxu0  ;;  %1088 = vst.msk [vmem:[#allocation2 + $0x121] sm:$0xff] %vm621_vm1, %v8510_v47  ;;  %v2165_v54 = vld [vmem:[#allocation2 + $0xc0] sm:$0xff]  ;;  %v2159_v56 = vld [vmem:[#allocation2 + $0xd2] sm:$0xff] }
  0xeb   : > { %v902_v10 = vpop.f32.mrf.mxu3  ;;  %v2174_v58 = vld [vmem:[#allocation2 + $0xd1] sm:$0xff]  ;;  %1107 = vst.msk [vmem:[#allocation2 + $0x151] sm:$0xff] %vm621_vm1, %v8511_v59  ;;  %v1017_v40 = vld [vmem:[%s9318_s16 + $0x20] sm:$0xff]  ;;  %v1018_v59 = vld [vmem:[%s9318_s16 + $0x28] sm:$0xff] }
  0xec   : > { %v953_v30 = vadd.f32 %v952_v63, %v897_v27  ;;  %v2190_v61 = vld [vmem:[#allocation2 + $0xd0] sm:$0xff]  ;;  %1158 = vst.msk [vmem:[#allocation2 + $0x201] sm:$0xff] %vm621_vm1, %v8520_v62  ;;  %v2183_v3 = vld [vmem:[#allocation2 + $0xe2] sm:$0xff] }
  0xed   : > { %v1010_v49 = vpop.f32.mrf.mxu1  ;;  %v2199_v11 = vld [vmem:[#allocation2 + $0xe1] sm:$0xff]  ;;  %1157 = vst.msk [vmem:[#allocation2 + $0x1f1] sm:$0xff] %vm621_vm1, %v8519_v7  ;;  %v1015_v63 = vld [vmem:[%s9318_s16 + $0x10] sm:$0xff] }
  0xee   : > { %v9361_v31 = vadd.f32 %v1002_v6, %v953_v30  ;;  %1022 = vst.msk [vmem:[#allocation2 + $0x11] sm:$0xff] %vm621_vm1, %v1013_v8  ;;  %v8521_v27 = vld [vmem:[%s9318_s16 + $0xd0] sm:$0xff] }
  0xef   : > { %v837_v35 = vpop.f32.mrf.mxu2  ;;  %2317 = vrot.lane.b32.xlu1 %v2172_v34, %s8693_s19  ;;  %1023 = vst.msk [vmem:[#allocation2 + $0x21] sm:$0xff] %vm621_vm1, %v1014_v14  ;;  %v2153_v21 = vld [vmem:[#allocation2 + $0xf1] sm:$0xff] }
  0xf0   : > { %v838_v36 = vadd.f32 %v837_v35, %v780_v9  ;;  %1094 = vst.msk [vmem:[#allocation2 + $0x101] sm:$0xff] %vm1062_vm4, %v9361_v31  ;;  %2285 = vrot.lane.b32.xlu2 %v2164_v45, %s8694_s20  ;;  %v2168_v6 = vld [vmem:[#allocation2 + $0xf0] sm:$0xff]  ;;  %v8523_v45 = vld [vmem:[%s9318_s16 + $0xe0] sm:$0xff] }
  0xf1   : > { %2349 = vrot.lane.b32.xlu0 %v2157_v33, %s8692_s18  ;;  %1108 = vst.msk [vmem:[#allocation2 + $0x161] sm:$0xff] %vm621_vm1, %v8512_v20  ;;  %v9474_v26 = vld [vmem:[#allocation2 + $0xf2] sm:$0xff] }
  0xf2   : > { %v903_v41 = vadd.f32 %v902_v10, %v838_v36  ;;  %v960_v48 = vpop.f32.mrf.mxu0  ;;  %1024 = vst.msk [vmem:[#allocation2 + $0x31] sm:$0xff] %vm621_vm1, %v1015_v63 }
  0xf3   : > { %v908_v15 = vpop.f32.mrf.mxu3  ;;  %1159 = vst.msk [vmem:[#allocation2 + $0x211] sm:$0xff] %vm621_vm1, %v8521_v27 }
  0xf4   : > { %v957_v42 = vadd.f32 %v956_v37, %v903_v41  ;;  %1110 = vst.msk [vmem:[#allocation2 + $0x181] sm:$0xff] %vm621_vm1, %v8514_v29 }
  0xf5   : > { %1025 = vst.msk [vmem:[#allocation2 + $0x41] sm:$0xff] %vm621_vm1, %v1016_v38 }
  0xf6   : > { %v9378_v44 = vadd.f32 %v1006_v39, %v957_v42  ;;  %1026 = vst.msk [vmem:[#allocation2 + $0x51] sm:$0xff] %vm621_vm1, %v1017_v40 }
  0xf7   : > { %v842_v46 = vpop.f32.mrf.mxu2  ;;  %1042 = vrot.lane.b32.xlu1 %v9338_v19, %s8691_s30  ;;  %v2177_v35 = vld [vmem:[#allocation2 + $0x101] sm:$0xff]  ;;  %1161 = vst.msk [vmem:[#allocation2 + $0x231] sm:$0xff] %vm621_vm1, %v8523_v45 }
  0xf8   : > { %1095 = vst.msk [vmem:[#allocation2 + $0x111] sm:$0xff] %vm1062_vm4, %v9378_v44  ;;  %v843_v13 = vadd.f32 %v842_v46, %v784_v43  ;;  %2257 = vrot.lane.b32.xlu2 %v2158_v52, %s8685_s24  ;;  %v2193_v39 = vld [vmem:[#allocation2 + $0x100] sm:$0xff] }
  0xf9   : > { %1169 = vrot.lane.b32.xlu0 %v9338_v19, %s8690_s29  ;;  %1027 = vst.msk [vmem:[#allocation2 + $0x61] sm:$0xff] %vm621_vm1, %v1018_v59 }
  0xfa   : > { %v909_v16 = vadd.f32 %v908_v15, %v843_v13 }
  0xfc   : > { %v961_v50 = vadd.f32 %v960_v48, %v909_v16 }
  0xfe   : > { %v9388_v51 = vadd.f32 %v1010_v49, %v961_v50  ;;  %v8515_v50 = vld [vmem:[%s9318_s16 + $0xa0] sm:$0xff] }
  0xff   : > { %1119 = vrot.lane.b32.xlu1 %v9338_v19, %s8687_s26  ;;  %v2191_v19 = vld [vmem:[#allocation2 + $0xe0] sm:$0xff]  ;;  %v9541_v47 = vld [vmem:[#allocation2 + $0x112] sm:$0xff]  ;;  %1111 = vst.msk [vmem:[#allocation2 + $0x191] sm:$0xff] %vm621_vm1, %v8515_v50 }
 0x100   : > { %1096 = vst.msk [vmem:[#allocation2 + $0x121] sm:$0xff] %vm1062_vm4, %v9388_v51  ;;  %2319 = vrot.lane.b32.xlu2 %v2150_v53, %s8693_s19 }
 0x101   : > { %2225 = vrot.lane.b32.xlu0 %v2150_v53, %s8684_s21 }
 0x107   : > { %2351 = vrot.lane.b32.xlu1 %v2158_v52, %s8692_s18  ;;  %v2171_v52 = vld [vmem:[#allocation2 + $0x120] sm:$0xff] }
 0x108   : > { %2381 = vrot.lane.b32.xlu2 %v2165_v54, %s8686_s25  ;;  %v9584_v14 = vld [vmem:[#allocation2 + $0x121] sm:$0xff] }
 0x109   : > { %2287 = vrot.lane.b32.xlu0 %v2165_v54, %s8694_s20  ;;  %v9598_v63 = vld [vmem:[#allocation2 + $0x122] sm:$0xff] }
 0x10c   : > { %v9408_v57 = vpop.permute.xlu2 %1452 }
 0x10d   : > { %14642 = vst [vmem:[#allocation4_spill] sm:$0xff] %v9408_v57 }
 0x10f   : > { %2413 = vrot.lane.b32.xlu1 %v2150_v53, %s8689_s28 }
 0x110   : > { %1121 = vrot.lane.b32.xlu2 %v9348_v25, %s8687_s26 }
 0x111   : > { %2259 = vrot.lane.b32.xlu0 %v2159_v56, %s8685_s24 }
 0x117   : > { %1044 = vrot.lane.b32.xlu1 %v9348_v25, %s8691_s30 }
 0x118   : > { %2353 = vrot.lane.b32.xlu2 %v2159_v56, %s8692_s18 }
 0x119   : > { %2321 = vrot.lane.b32.xlu0 %v2174_v58, %s8693_s19 }
 0x11f   : > { %1171 = vrot.lane.b32.xlu1 %v9348_v25, %s8690_s29 }
 0x120   : > { %2415 = vrot.lane.b32.xlu2 %v2174_v58, %s8689_s28 }
 0x121   : > { %2383 = vrot.lane.b32.xlu0 %v2190_v61, %s8686_s25 }
 0x122   : > { %v1116_v60 = vpop.permute.xlu2 %1115 }
 0x123   : > { %1139 = vst.msk [vmem:[#allocation2 + $0x151] sm:$0xff] %vm1062_vm4, %v1116_v60 }
 0x127   : > { %2227 = vrot.lane.b32.xlu1 %v2174_v58, %s8684_s21  ;;  %v9563_v58 = vld [vmem:[#allocation2 + $0x111] sm:$0xff] }
 0x128   : > { %1046 = vrot.lane.b32.xlu2 %v9354_v28, %s8691_s30 }
 0x129   : > { %1123 = vrot.lane.b32.xlu0 %v9354_v28, %s8687_s26 }
 0x12a   : > { %v1168_v1 = vpop.permute.xlu2 %1167 }
 0x12b   : > { %1190 = vst.msk [vmem:[#allocation2 + $0x201] sm:$0xff] %vm1062_vm4, %v1168_v1  ;;  %v2194_v1 = vld [vmem:[#allocation2 + $0x110] sm:$0xff] }
 0x12f   : > { %2289 = vrot.lane.b32.xlu1 %v2190_v61, %s8694_s20 }
 0x130   : > { %1173 = vrot.lane.b32.xlu2 %v9354_v28, %s8690_s29  ;;  %v8513_v28 = vld [vmem:[%s9318_s16 + $0x90] sm:$0xff] }
 0x131   : > { %2355 = vrot.lane.b32.xlu0 %v2183_v3, %s8692_s18  ;;  %1109 = vst.msk [vmem:[#allocation2 + $0x171] sm:$0xff] %vm621_vm1, %v8513_v28 }
 0x133   : > { %v9432_v2 = vpop.permute.xlu0 %1516 }
 0x134   : > { %14643 = vst [vmem:[#allocation5_spill] sm:$0xff] %v9432_v2  ;;  %v9434_v4 = vpop.permute.xlu1 %1484 }
 0x135   : > { %14644 = vst [vmem:[#allocation6_spill] sm:$0xff] %v9434_v4 }
 0x137   : > { %2261 = vrot.lane.b32.xlu1 %v2183_v3, %s8685_s24 }
 0x138   : > { %2229 = vrot.lane.b32.xlu2 %v2199_v11, %s8684_s21 }
 0x139   : > { %2417 = vrot.lane.b32.xlu0 %v2199_v11, %s8689_s28 }
 0x13b   : > { %v9444_v12 = vpop.permute.xlu0 %2253 }
 0x13c   : > { %14645 = vst [vmem:[#allocation7_spill] sm:$0xff] %v9444_v12  ;;  %v9446_v5 = vpop.permute.xlu1 %2221 }
 0x13d   : > { %14646 = vst [vmem:[#allocation8_spill] sm:$0xff] %v9446_v5 }
 0x13f   : > { %2323 = vrot.lane.b32.xlu1 %v2199_v11, %s8693_s19 }
 0x140   : > { %2291 = vrot.lane.b32.xlu2 %v2191_v19, %s8694_s20 }
 0x141   : > { %1175 = vrot.lane.b32.xlu0 %v9361_v31, %s8690_s29 }
 0x142   : > { %v9461_v22 = vpop.permute.xlu2 %2223 }
 0x143   : > { %v9454_v17 = vpop.permute.xlu0 %2395  ;;  %14648 = vst [vmem:[#allocation10_spill] sm:$0xff] %v9461_v22 }
 0x144   : > { %14647 = vst [vmem:[#allocation9_spill] sm:$0xff] %v9454_v17  ;;  %v1166_v18 = vpop.permute.xlu1 %1165 }
 0x145   : > { %1189 = vst.msk [vmem:[#allocation2 + $0x1f1] sm:$0xff] %vm1062_vm4, %v1166_v18  ;;  %v8524_v18 = vld [vmem:[%s9318_s16 + $0xe8] sm:$0xff] }
 0x146   : > { %1162 = vst.msk [vmem:[#allocation2 + $0x241] sm:$0xff] %vm621_vm1, %v8524_v18 }
 0x147   : > { %2385 = vrot.lane.b32.xlu1 %v2191_v19, %s8686_s25 }
 0x148   : > { %1048 = vrot.lane.b32.xlu2 %v9361_v31, %s8691_s30 }
 0x149   : > { %2231 = vrot.lane.b32.xlu0 %v2153_v21, %s8684_s21 }
 0x14a   : > { %v9470_v24 = vpop.permute.xlu2 %2285 }
 0x14b   : > { %v1039_v23 = vpop.permute.xlu0 %1038  ;;  %14649 = vst [vmem:[#allocation11_spill] sm:$0xff] %v9470_v24 }
 0x14c   : > { %1063 = vst.msk [vmem:[#allocation2 + $0x11] sm:$0xff] %vm1062_vm4, %v1039_v23 }
 0x14f   : > { %1125 = vrot.lane.b32.xlu1 %v9361_v31, %s8687_s26  ;;  %v9494_v31 = vld [vmem:[#allocation2 + $0x102] sm:$0xff] }
 0x150   : > { %2263 = vrot.lane.b32.xlu2 %v9474_v26, %s8685_s24 }
 0x151   : > { %2293 = vrot.lane.b32.xlu0 %v2168_v6, %s8694_s20 }
 0x152   : > { %v9484_v30 = vpop.permute.xlu2 %2257 }
 0x153   : > { %v1041_v25 = vpop.permute.xlu0 %1040  ;;  %14650 = vst [vmem:[#allocation12_spill] sm:$0xff] %v9484_v30  ;;  %v1229_v3 = vld [vmem:[#allocation2 + $0x11] sm:$0xff] }
 0x154   : > { %1064 = vst.msk [vmem:[#allocation2 + $0x21] sm:$0xff] %vm1062_vm4, %v1041_v25  ;;  %v9621_v40 = vld [vmem:[#allocation2 + $0x10] sm:$0xff] }
 0x157   : > { %2357 = vrot.lane.b32.xlu1 %v9474_v26, %s8692_s18 }
 0x158   : > { %2325 = vrot.lane.b32.xlu2 %v2153_v21, %s8693_s19 }
 0x159   : > { %1050 = vrot.lane.b32.xlu0 %v9378_v44, %s8691_s30  ;;  %v9496_v32 = vpop.permute.xlu1 %2255 }
 0x15a   : > { %14651 = vst [vmem:[#allocation13_spill] sm:$0xff] %v9496_v32  ;;  %v9498_v33 = vpop.permute.xlu2 %2319 }
 0x15b   : > { %v1118_v9 = vpop.permute.xlu0 %1117  ;;  %14652 = vst [vmem:[#allocation14_spill] sm:$0xff] %v9498_v33  ;;  %v1238_v19 = vld [vmem:[#allocation2 + $0x22] sm:$0xff] }
 0x15c   : > { %1140 = vst.msk [vmem:[#allocation2 + $0x161] sm:$0xff] %vm1062_vm4, %v1118_v9  ;;  %v1254_v25 = vld [vmem:[#allocation2 + $0x21] sm:$0xff] }
 0x15d   : > { %v9638_v50 = vld [vmem:[#allocation2 + $0x20] sm:$0xff] }
 0x15f   : > { %2419 = vrot.lane.b32.xlu1 %v2153_v21, %s8689_s28 }
 0x160   : > { %2387 = vrot.lane.b32.xlu2 %v2168_v6, %s8686_s25  ;;  %v8516_v6 = vld [vmem:[%s9318_s16 + $0xa8] sm:$0xff] }
 0x161   : > { %2265 = vrot.lane.b32.xlu0 %v9494_v31, %s8685_s24  ;;  %v9506_v36 = vpop.permute.xlu1 %2317  ;;  %1112 = vst.msk [vmem:[#allocation2 + $0x1a1] sm:$0xff] %vm621_vm1, %v8516_v6 }
 0x162   : > { %14654 = vst [vmem:[#allocation16_spill] sm:$0xff] %v9506_v36  ;;  %v9508_v10 = vpop.permute.xlu2 %2381 }
 0x163   : > { %v9502_v34 = vpop.permute.xlu0 %2349  ;;  %14655 = vst [vmem:[#allocation17_spill] sm:$0xff] %v9508_v10 }
 0x164   : > { %14653 = vst [vmem:[#allocation15_spill] sm:$0xff] %v9502_v34 }
 0x167   : > { %1177 = vrot.lane.b32.xlu1 %v9378_v44, %s8690_s29 }
 0x168   : > { %1127 = vrot.lane.b32.xlu2 %v9378_v44, %s8687_s26  ;;  %v8522_v44 = vld [vmem:[%s9318_s16 + $0xd8] sm:$0xff] }
 0x169   : > { %2327 = vrot.lane.b32.xlu0 %v2177_v35, %s8693_s19  ;;  %v1043_v41 = vpop.permute.xlu1 %1042  ;;  %1160 = vst.msk [vmem:[#allocation2 + $0x221] sm:$0xff] %vm621_vm1, %v8522_v44 }
 0x16a   : > { %v1122_v42 = vpop.permute.xlu2 %1121  ;;  %1065 = vst.msk [vmem:[#allocation2 + $0x31] sm:$0xff] %vm1062_vm4, %v1043_v41  ;;  %v1019_v41 = vld [vmem:[%s9318_s16 + $0x30] sm:$0xff] }
 0x16b   : > { %v1170_v37 = vpop.permute.xlu0 %1169  ;;  %1142 = vst.msk [vmem:[#allocation2 + $0x181] sm:$0xff] %vm1062_vm4, %v1122_v42 }
 0x16c   : > { %1191 = vst.msk [vmem:[#allocation2 + $0x211] sm:$0xff] %vm1062_vm4, %v1170_v37 }
 0x16d   : > { %1028 = vst.msk [vmem:[#allocation2 + $0x71] sm:$0xff] %vm621_vm1, %v1019_v41 }
 0x16f   : > { %2233 = vrot.lane.b32.xlu1 %v2177_v35, %s8684_s21 }
 0x170   : > { %2359 = vrot.lane.b32.xlu2 %v9494_v31, %s8692_s18 }
 0x171   : > { %2389 = vrot.lane.b32.xlu0 %v2193_v39, %s8686_s25  ;;  %v1120_v46 = vpop.permute.xlu1 %1119  ;;  %v1208_v9 = vld [vmem:[#allocation2 + $0x31] sm:$0xff] }
 0x172   : > { %v9531_v13 = vpop.permute.xlu2 %2353  ;;  %1141 = vst.msk [vmem:[#allocation2 + $0x171] sm:$0xff] %vm1062_vm4, %v1120_v46  ;;  %v9627_v42 = vld [vmem:[#allocation2 + $0x30] sm:$0xff] }
 0x173   : > { %v9523_v43 = vpop.permute.xlu0 %2225  ;;  %14657 = vst [vmem:[#allocation19_spill] sm:$0xff] %v9531_v13 }
 0x174   : > { %14656 = vst [vmem:[#allocation18_spill] sm:$0xff] %v9523_v43 }
 0x175   : > { %14673 = vst [vmem:[#allocation35_spill] sm:$0xff] %v9627_v42 }
 0x177   : > { %2295 = vrot.lane.b32.xlu1 %v2193_v39, %s8694_s20 }
 0x178   : > { %2421 = vrot.lane.b32.xlu2 %v2177_v35, %s8689_s28  ;;  %v8517_v35 = vld [vmem:[%s9318_s16 + $0xb0] sm:$0xff] }
 0x179   : > { %1129 = vrot.lane.b32.xlu0 %v9388_v51, %s8687_s26  ;;  %v9543_v48 = vpop.permute.xlu1 %2351  ;;  %1113 = vst.msk [vmem:[#allocation2 + $0x1b1] sm:$0xff] %vm621_vm1, %v8517_v35  ;;  %v1020_v35 = vld [vmem:[%s9318_s16 + $0x38] sm:$0xff] }
 0x17a   : > { %14659 = vst [vmem:[#allocation21_spill] sm:$0xff] %v9543_v48  ;;  %v9545_v16 = vpop.permute.xlu2 %2415 }
 0x17b   : > { %v9537_v15 = vpop.permute.xlu0 %2287  ;;  %14660 = vst [vmem:[#allocation22_spill] sm:$0xff] %v9545_v16 }
 0x17c   : > { %14658 = vst [vmem:[#allocation20_spill] sm:$0xff] %v9537_v15 }
 0x17d   : > { %1029 = vst.msk [vmem:[#allocation2 + $0x81] sm:$0xff] %vm621_vm1, %v1020_v35 }
 0x17f   : > { %1052 = vrot.lane.b32.xlu1 %v9388_v51, %s8691_s30 }
 0x180   : > { %1179 = vrot.lane.b32.xlu2 %v9388_v51, %s8690_s29  ;;  %v1214_v51 = vld [vmem:[#allocation2 + $0x12] sm:$0xff] }
 0x181   : > { %2361 = vrot.lane.b32.xlu0 %v9541_v47, %s8692_s18  ;;  %v9557_v53 = vpop.permute.xlu1 %2413 }
 0x182   : > { %14662 = vst [vmem:[#allocation24_spill] sm:$0xff] %v9557_v53  ;;  %v1047_v54 = vpop.permute.xlu2 %1046 }
 0x183   : > { %v9549_v49 = vpop.permute.xlu0 %2259  ;;  %1067 = vst.msk [vmem:[#allocation2 + $0x51] sm:$0xff] %vm1062_vm4, %v1047_v54  ;;  %v1263_v54 = vld [vmem:[#allocation2 + $0x32] sm:$0xff] }
 0x184   : > { %14661 = vst [vmem:[#allocation23_spill] sm:$0xff] %v9549_v49 }
 0x187   : > { %2267 = vrot.lane.b32.xlu1 %v9541_v47, %s8685_s24 }
 0x188   : > { %2235 = vrot.lane.b32.xlu2 %v9563_v58, %s8684_s21 }
 0x189   : > { %2299 = vrot.lane.b32.xlu0 %v2171_v52, %s8694_s20  ;;  %v1045_v60 = vpop.permute.xlu1 %1044 }
 0x18a   : > { %v1174_v61 = vpop.permute.xlu2 %1173  ;;  %1066 = vst.msk [vmem:[#allocation2 + $0x41] sm:$0xff] %vm1062_vm4, %v1045_v60 }
 0x18b   : > { %v9561_v56 = vpop.permute.xlu0 %2321  ;;  %1193 = vst.msk [vmem:[#allocation2 + $0x231] sm:$0xff] %vm1062_vm4, %v1174_v61 }
 0x18c   : > { %14663 = vst [vmem:[#allocation25_spill] sm:$0xff] %v9561_v56 }
 0x18f   : > { %2329 = vrot.lane.b32.xlu1 %v9563_v58, %s8693_s19 }
 0x190   : > { %2297 = vrot.lane.b32.xlu2 %v2194_v1, %s8694_s20 }
 0x191   : > { %1312 = vrot.lane.b32.xlu0 %v1214_v51, %s8685_s24  ;;  %v1172_v7 = vpop.permute.xlu1 %1171  ;;  %v1217_v61 = vld [vmem:[#allocation2 + $0x42] sm:$0xff] }
 0x192   : > { %v9579_v8 = vpop.permute.xlu2 %2229  ;;  %1192 = vst.msk [vmem:[#allocation2 + $0x221] sm:$0xff] %vm1062_vm4, %v1172_v7  ;;  %v1232_v18 = vld [vmem:[#allocation2 + $0x41] sm:$0xff] }
 0x193   : > { %v9574_v62 = vpop.permute.xlu0 %2383  ;;  %14665 = vst [vmem:[#allocation27_spill] sm:$0xff] %v9579_v8  ;;  %v1601_v8 = vld [vmem:[%s14522_s4 + $0x20] sm:$0xff] }
 0x194   : > { %14664 = vst [vmem:[#allocation26_spill] sm:$0xff] %v9574_v62  ;;  %v9822_v16 = vand.u32 4294901760, %v1601_v8 }
 0x196   : > { %v9845_v13 = vsub.f32 %v1601_v8, %v9822_v16 }
 0x197   : > { %2391 = vrot.lane.b32.xlu1 %v2194_v1, %s8686_s25  ;;  %v8526_v1 = vld [vmem:[%s9318_s16 + $0xf8] sm:$0xff] }
 0x198   : > { %2331 = vrot.lane.b32.xlu2 %v9584_v14, %s8693_s19  ;;  %1164 = vst.msk [vmem:[#allocation2 + $0x261] sm:$0xff] %vm621_vm1, %v8526_v1 }
 0x199   : > { %1374 = vrot.lane.b32.xlu0 %v1229_v3, %s8693_s19  ;;  %v9591_v20 = vpop.permute.xlu1 %2227 }
 0x19a   : > { %14666 = vst [vmem:[#allocation28_spill] sm:$0xff] %v9591_v20  ;;  %v9593_v21 = vpop.permute.xlu2 %2291 }
 0x19b   : > { %v1124_v11 = vpop.permute.xlu0 %1123  ;;  %14667 = vst [vmem:[#allocation29_spill] sm:$0xff] %v9593_v21 }
 0x19c   : > { %1143 = vst.msk [vmem:[#allocation2 + $0x191] sm:$0xff] %vm1062_vm4, %v1124_v11 }
 0x19f   : > { %2363 = vrot.lane.b32.xlu1 %v9598_v63, %s8692_s18 }
 0x1a0   : > { %2393 = vrot.lane.b32.xlu2 %v2171_v52, %s8686_s25  ;;  %v8525_v52 = vld [vmem:[%s9318_s16 + $0xf0] sm:$0xff] }
 0x1a1   : > { %1408 = vrot.lane.b32.xlu0 %v1238_v19, %s8692_s18  ;;  %v9605_v27 = vpop.permute.xlu1 %2289  ;;  %1163 = vst.msk [vmem:[#allocation2 + $0x251] sm:$0xff] %vm621_vm1, %v8525_v52 }
 0x1a2   : > { %14669 = vst [vmem:[#allocation31_spill] sm:$0xff] %v9605_v27  ;;  %v1049_v28 = vpop.permute.xlu2 %1048 }
 0x1a3   : > { %v9596_v23 = vpop.permute.xlu0 %2355  ;;  %1068 = vst.msk [vmem:[#allocation2 + $0x61] sm:$0xff] %vm1062_vm4, %v1049_v28  ;;  %v8518_v28 = vld [vmem:[%s9318_s16 + $0xb8] sm:$0xff] }
 0x1a4   : > { %14668 = vst [vmem:[#allocation30_spill] sm:$0xff] %v9596_v23 }
 0x1a5   : > { %1114 = vst.msk [vmem:[#allocation2 + $0x1c1] sm:$0xff] %vm621_vm1, %v8518_v28  ;;  %v1257_v28 = vld [vmem:[#allocation2 + $0x51] sm:$0xff] }
 0x1a7   : > { %1280 = vrot.lane.b32.xlu1 %v1229_v3, %s8684_s21 }
 0x1a8   : > { %1406 = vrot.lane.b32.xlu2 %v1214_v51, %s8692_s18 }
 0x1a9   : > { %1470 = vrot.lane.b32.xlu0 %v1254_v25, %s8689_s28  ;;  %v9614_v37 = vpop.permute.xlu1 %2261 }
 0x1aa   : > { %14671 = vst [vmem:[#allocation33_spill] sm:$0xff] %v9614_v37  ;;  %v9616_v38 = vpop.permute.xlu2 %2263 }
 0x1ab   : > { %v9609_v29 = vpop.permute.xlu0 %2417  ;;  %14672 = vst [vmem:[#allocation34_spill] sm:$0xff] %v9616_v38 }
 0x1ac   : > { %14670 = vst [vmem:[#allocation32_spill] sm:$0xff] %v9609_v29  ;;  %v1600_v29 = vld [vmem:[%s14522_s4 + $0x18] sm:$0xff] }
 0x1af   : > { %1342 = vrot.lane.b32.xlu1 %v9621_v40, %s8694_s20 }
 0x1b0   : > { %1282 = vrot.lane.b32.xlu2 %v1254_v25, %s8684_s21 }
 0x1b1   : > { %1284 = vrot.lane.b32.xlu0 %v1208_v9, %s8684_s21  ;;  %v9630_v44 = vpop.permute.xlu1 %2323 }
 0x1b2   : > { %14674 = vst [vmem:[#allocation36_spill] sm:$0xff] %v9630_v44  ;;  %v9632_v45 = vpop.permute.xlu2 %2325 }
 0x1b3   : > { %v1176_v39 = vpop.permute.xlu0 %1175  ;;  %14675 = vst [vmem:[#allocation37_spill] sm:$0xff] %v9632_v45 }
 0x1b4   : > { %1194 = vst.msk [vmem:[#allocation2 + $0x241] sm:$0xff] %vm1062_vm4, %v1176_v39  ;;  %v9674_v39 = vld [vmem:[#allocation2 + $0x40] sm:$0xff] }
 0x1b5   : > { %14683 = vst [vmem:[#allocation45_spill] sm:$0xff] %v9674_v39 }
 0x1b7   : > { %1314 = vrot.lane.b32.xlu1 %v1238_v19, %s8685_s24 }
 0x1b8   : > { %1344 = vrot.lane.b32.xlu2 %v9638_v50, %s8694_s20 }
 0x1b9   : > { %1346 = vrot.lane.b32.xlu0 %v9627_v42, %s8694_s20  ;;  %v9645_v51 = vpop.permute.xlu1 %2385 }
 0x1ba   : > { %14677 = vst [vmem:[#allocation39_spill] sm:$0xff] %v9645_v51  ;;  %v9647_v59 = vpop.permute.xlu2 %2387  ;;  %v9839_v51 = vand.u32 4294901760, %v1600_v29 }
 0x1bb   : > { %v9636_v46 = vpop.permute.xlu0 %2231  ;;  %14678 = vst [vmem:[#allocation40_spill] sm:$0xff] %v9647_v59  ;;  %v1602_v59 = vld [vmem:[%s14522_s4 + $0x28] sm:$0xff] }
 0x1bc   : > { %14676 = vst [vmem:[#allocation38_spill] sm:$0xff] %v9636_v46  ;;  %v9804_v37 = vand.u32 4294901760, %v1602_v59  ;;  %v9862_v8 = vsub.f32 %v1600_v29, %v9839_v51 }
 0x1be   : > { %v9819_v49 = vsub.f32 %v1602_v59, %v9804_v37  ;;  %v9880_v29 = vand.u32 4294901760, %v9862_v8 }
 0x1bf   : > { %1376 = vrot.lane.b32.xlu1 %v1254_v25, %s8693_s19 }
 0x1c0   : > { %1502 = vrot.lane.b32.xlu2 %v1238_v19, %s8688_s27  ;;  %v9837_v20 = vand.u32 4294901760, %v9819_v49 }
 0x1c1   : > { %1504 = vrot.lane.b32.xlu0 %v1263_v54, %s8688_s27  ;;  %v1126_v3 = vpop.permute.xlu1 %1125 }
 0x1c2   : > { %v1128_v7 = vpop.permute.xlu2 %1127  ;;  %1144 = vst.msk [vmem:[#allocation2 + $0x1a1] sm:$0xff] %vm1062_vm4, %v1126_v3  ;;  %v1749_v33 = vsub.f32 %v9819_v49, %v9837_v20 }
 0x1c3   : > { %v9650_v60 = vpop.permute.xlu0 %2293  ;;  %1145 = vst.msk [vmem:[#allocation2 + $0x1b1] sm:$0xff] %vm1062_vm4, %v1128_v7 }
 0x1c4   : > { %14679 = vst [vmem:[#allocation41_spill] sm:$0xff] %v9650_v60  ;;  %v9877_v30 = vand.u32 4294901760, %v1749_v33  ;;  %v1597_v33 = vld [vmem:[%s14522_s4] sm:$0xff] }
 0x1c5   : > { %v9904_v10 = vand.u32 4294901760, %v1597_v33 }
 0x1c7   : > { %1438 = vrot.lane.b32.xlu1 %v9638_v50, %s8686_s25 }
 0x1c8   : > { %1316 = vrot.lane.b32.xlu2 %v1263_v54, %s8685_s24 }
 0x1c9   : > { %1318 = vrot.lane.b32.xlu0 %v1217_v61, %s8685_s24  ;;  %v9663_v19 = vpop.permute.xlu1 %2357 }
 0x1ca   : > { %14680 = vst [vmem:[#allocation42_spill] sm:$0xff] %v9663_v19  ;;  %v9665_v6 = vpop.permute.xlu2 %2359 }
 0x1cb   : > { %v1051_v11 = vpop.permute.xlu0 %1050  ;;  %14681 = vst [vmem:[#allocation43_spill] sm:$0xff] %v9665_v6 }
 0x1cc   : > { %1069 = vst.msk [vmem:[#allocation2 + $0x71] sm:$0xff] %vm1062_vm4, %v1051_v11 }
 0x1cf   : > { %1410 = vrot.lane.b32.xlu1 %v1263_v54, %s8692_s18  ;;  %v1241_v54 = vld [vmem:[#allocation2 + $0x52] sm:$0xff] }
 0x1d0   : > { %1378 = vrot.lane.b32.xlu2 %v1208_v9, %s8693_s19 }
 0x1d1   : > { %1380 = vrot.lane.b32.xlu0 %v1232_v18, %s8693_s19  ;;  %v9677_v41 = vpop.permute.xlu1 %2419 }
 0x1d2   : > { %14684 = vst [vmem:[#allocation46_spill] sm:$0xff] %v9677_v41  ;;  %v9679_v52 = vpop.permute.xlu2 %2421 }
 0x1d3   : > { %v9668_v25 = vpop.permute.xlu0 %2265  ;;  %14685 = vst [vmem:[#allocation47_spill] sm:$0xff] %v9679_v52  ;;  %v9766_v38 = vld [vmem:[#allocation2 + $0x71] sm:$0xff] }
 0x1d4   : > { %14682 = vst [vmem:[#allocation44_spill] sm:$0xff] %v9668_v25  ;;  %v9841_v62 = vld [vmem:[#allocation2 + $0x70] sm:$0xff] }
 0x1d5   : > { %14701 = vst [vmem:[#allocation63_spill] sm:$0xff] %v9841_v62 }
 0x1d7   : > { %1472 = vrot.lane.b32.xlu1 %v1208_v9, %s8689_s28 }
 0x1d8   : > { %1440 = vrot.lane.b32.xlu2 %v9627_v42, %s8686_s25 }
 0x1d9   : > { %1442 = vrot.lane.b32.xlu0 %v9674_v39, %s8686_s25  ;;  %v1178_v3 = vpop.permute.xlu1 %1177 }
 0x1da   : > { %v1180_v7 = vpop.permute.xlu2 %1179  ;;  %1195 = vst.msk [vmem:[#allocation2 + $0x251] sm:$0xff] %vm1062_vm4, %v1178_v3  ;;  %v9705_v3 = vld [vmem:[#allocation2 + $0x61] sm:$0xff] }
 0x1db   : > { %v9684_v1 = vpop.permute.xlu0 %2327  ;;  %1196 = vst.msk [vmem:[#allocation2 + $0x261] sm:$0xff] %vm1062_vm4, %v1180_v7 }
 0x1dc   : > { %14686 = vst [vmem:[#allocation48_spill] sm:$0xff] %v9684_v1 }
 0x1df   : > { %1286 = vrot.lane.b32.xlu1 %v1232_v18, %s8684_s21 }
 0x1e0   : > { %1412 = vrot.lane.b32.xlu2 %v1217_v61, %s8692_s18 }
 0x1e1   : > { %1414 = vrot.lane.b32.xlu0 %v1241_v54, %s8692_s18  ;;  %v9696_v9 = vpop.permute.xlu1 %2233 }
 0x1e2   : > { %14688 = vst [vmem:[#allocation50_spill] sm:$0xff] %v9696_v9  ;;  %v9698_v35 = vpop.permute.xlu2 %2235 }
 0x1e3   : > { %v9692_v11 = vpop.permute.xlu0 %2389  ;;  %14689 = vst [vmem:[#allocation51_spill] sm:$0xff] %v9698_v35 }
 0x1e4   : > { %14687 = vst [vmem:[#allocation49_spill] sm:$0xff] %v9692_v11  ;;  %v1603_v11 = vld [vmem:[%s14522_s4 + $0x30] sm:$0xff] }
 0x1e5   : > { %v9786_v41 = vand.u32 4294901760, %v1603_v11 }
 0x1e7   : > { %1348 = vrot.lane.b32.xlu1 %v9674_v39, %s8694_s20  ;;  %v9801_v23 = vsub.f32 %v1603_v11, %v9786_v41 }
 0x1e8   : > { %1474 = vrot.lane.b32.xlu2 %v1232_v18, %s8689_s28 }
 0x1e9   : > { %1476 = vrot.lane.b32.xlu0 %v1257_v28, %s8689_s28  ;;  %v9707_v7 = vpop.permute.xlu1 %2295  ;;  %v9816_v11 = vand.u32 4294901760, %v9801_v23 }
 0x1ea   : > { %14690 = vst [vmem:[#allocation52_spill] sm:$0xff] %v9707_v7  ;;  %v9709_v6 = vpop.permute.xlu2 %2297 }
 0x1eb   : > { %v1130_v17 = vpop.permute.xlu0 %1129  ;;  %14691 = vst [vmem:[#allocation53_spill] sm:$0xff] %v9709_v6  ;;  %v9726_v6 = vld [vmem:[#allocation2 + $0x50] sm:$0xff]  ;;  %v1743_v59 = vsub.f32 %v9801_v23, %v9816_v11 }
 0x1ec   : > { %1146 = vst.msk [vmem:[#allocation2 + $0x1c1] sm:$0xff] %vm1062_vm4, %v1130_v17  ;;  %v9717_v17 = vld [vmem:[#allocation2 + $0x60] sm:$0xff] }
 0x1ed   : > { %14693 = vst [vmem:[#allocation55_spill] sm:$0xff] %v9717_v17  ;;  %v9857_v56 = vand.u32 4294901760, %v1743_v59  ;;  %v1598_v59 = vld [vmem:[%s14522_s4 + $0x8] sm:$0xff] }
 0x1ee   : > { %14696 = vst [vmem:[#allocation58_spill] sm:$0xff] %v9726_v6  ;;  %v9885_v22 = vand.u32 4294901760, %v1598_v59 }
 0x1ef   : > { %1506 = vrot.lane.b32.xlu1 %v1217_v61, %s8688_s27  ;;  %v1266_v61 = vld [vmem:[#allocation2 + $0x62] sm:$0xff] }
 0x1f0   : > { %1288 = vrot.lane.b32.xlu2 %v1257_v28, %s8684_s21  ;;  %v9902_v2 = vsub.f32 %v1598_v59, %v9885_v22 }
 0x1f1   : > { %1290 = vrot.lane.b32.xlu0 %v9705_v3, %s8684_s21  ;;  %v1053_v25 = vpop.permute.xlu1 %1052 }
 0x1f2   : > { %v9719_v1 = vpop.permute.xlu2 %2331  ;;  %1070 = vst.msk [vmem:[#allocation2 + $0x81] sm:$0xff] %vm1062_vm4, %v1053_v25  ;;  %v9740_v25 = vld [vmem:[#allocation2 + $0x72] sm:$0xff]  ;;  %v9919_v36 = vand.u32 4294901760, %v9902_v2 }
 0x1f3   : > { %v9713_v35 = vpop.permute.xlu0 %2361  ;;  %14694 = vst [vmem:[#allocation56_spill] sm:$0xff] %v9719_v1 }
 0x1f4   : > { %14692 = vst [vmem:[#allocation54_spill] sm:$0xff] %v9713_v35  ;;  %v1773_v12 = vsub.f32 %v9902_v2, %v9919_v36 }
 0x1f6   : > { %v9942_v5 = vand.u32 4294901760, %v1773_v12 }
 0x1f7   : > { %1320 = vrot.lane.b32.xlu1 %v1241_v54, %s8685_s24 }
 0x1f8   : > { %1350 = vrot.lane.b32.xlu2 %v9726_v6, %s8694_s20 }
 0x1f9   : > { %1352 = vrot.lane.b32.xlu0 %v9717_v17, %s8694_s20  ;;  %v9731_v35 = vpop.permute.xlu1 %2267  ;;  %v9916_v57 = vld [vmem:[#allocation2 + $0x82] sm:$0xff] }
 0x1fa   : > { %14697 = vst [vmem:[#allocation59_spill] sm:$0xff] %v9731_v35  ;;  %v9733_v9 = vpop.permute.xlu2 %2393  ;;  %v1260_v12 = vld [vmem:[#allocation2 + $0x81] sm:$0xff] }
 0x1fb   : > { %v9724_v18 = vpop.permute.xlu0 %2299  ;;  %14698 = vst [vmem:[#allocation60_spill] sm:$0xff] %v9733_v9  ;;  %v1605_v9 = vld [vmem:[%s14522_s4 + $0x40] sm:$0xff] }
 0x1fc   : > { %14695 = vst [vmem:[#allocation57_spill] sm:$0xff] %v9724_v18  ;;  %v9753_v7 = vand.u32 4294901760, %v1605_v9 }
 0x1fe   : > { %1898 = vmatpush.msra.mxu1 %v9753_v7  ;;  %1639 = vmatpush.msra.mxu2 %v9753_v7 }
 0x1ff   : > { %1382 = vrot.lane.b32.xlu1 %v1257_v28, %s8693_s19  ;;  %v9762_v28 = vsub.f32 %v1605_v9, %v9753_v7 }
 0x200   : > { %1508 = vrot.lane.b32.xlu2 %v1241_v54, %s8688_s27  ;;  %v1604_v54 = vld [vmem:[%s14522_s4 + $0x38] sm:$0xff] }
 0x201   : > { %1510 = vrot.lane.b32.xlu0 %v1266_v61, %s8688_s27  ;;  %v9742_v18 = vpop.permute.xlu1 %2329  ;;  %v9780_v9 = vand.u32 4294901760, %v9762_v28  ;;  %1824 = vmatpush.msra.mxu0 %v9762_v28 }
 0x202   : > { %14699 = vst [vmem:[#allocation61_spill] sm:$0xff] %v9742_v18  ;;  %v9744_v52 = vpop.permute.xlu2 %1406  ;;  %v9764_v18 = vand.u32 4294901760, %v1604_v54 }
 0x203   : > { %v9736_v1 = vpop.permute.xlu0 %1312  ;;  %v1731_v60 = vsub.f32 %v9762_v28, %v9780_v9 }
 0x204   : > { %v9783_v45 = vsub.f32 %v1604_v54, %v9764_v18  ;;  %1900 = vmatpush.msra.mxu1 %v9764_v18  ;;  %1641 = vmatpush.msra.mxu2 %v9764_v18 }
 0x205   : > { %v9811_v44 = vand.u32 4294901760, %v1731_v60 }
 0x206   : > { %v9798_v54 = vand.u32 4294901760, %v9783_v45  ;;  %1827 = vmatpush.msra.mxu0 %v9783_v45  ;;  %1902 = vmatpush.msra.mxu1 %v9786_v41 }
 0x207   : > { %1444 = vrot.lane.b32.xlu1 %v9726_v6, %s8686_s25  ;;  %1643 = vmatpush.msra.mxu2 %v9786_v41 }
 0x208   : > { %1322 = vrot.lane.b32.xlu2 %v1266_v61, %s8685_s24  ;;  %v1737_v21 = vsub.f32 %v9783_v45, %v9798_v54  ;;  %1830 = vmatpush.msra.mxu0 %v9801_v23 }
 0x209   : > { %1324 = vrot.lane.b32.xlu0 %v9740_v25, %s8685_s24  ;;  %v9773_v19 = vpop.permute.xlu1 %2391  ;;  %1904 = vmatpush.msra.mxu1 %v9804_v37 }
 0x20a   : > { %14700 = vst [vmem:[#allocation62_spill] sm:$0xff] %v9773_v19  ;;  %v9775_v46 = vpop.permute.xlu2 %1282  ;;  %1645 = vmatpush.msra.mxu2 %v9804_v37  ;;  %v9832_v60 = vand.u32 4294901760, %v1737_v21  ;;  %1733 = vmatpush.msra.mxu3 %v9811_v44  ;;  %v1599_v21 = vld [vmem:[%s14522_s4 + $0x10] sm:$0xff] }
 0x20b   : > { %v9748_v35 = vpop.permute.xlu0 %1374  ;;  %1833 = vmatpush.msra.mxu0 %v9819_v49  ;;  %v9864_v27 = vand.u32 4294901760, %v1599_v21  ;;  %1906 = vmatpush.msra.mxu1 %v9822_v16 }
 0x20c   : > { %1739 = vmatpush.msra.mxu3 %v9832_v60  ;;  %1647 = vmatpush.msra.mxu2 %v9822_v16 }
 0x20d   : > { %1836 = vmatpush.msra.mxu0 %v9845_v13  ;;  %v9883_v32 = vsub.f32 %v1599_v21, %v9864_v27  ;;  %1908 = vmatpush.msra.mxu1 %v9839_v51  ;;  %v1761_v21 = vsub.f32 %v9862_v8, %v9880_v29 }
 0x20e   : > { %1745 = vmatpush.msra.mxu3 %v9857_v56  ;;  %1649 = vmatpush.msra.mxu2 %v9839_v51 }
 0x20f   : > { %1416 = vrot.lane.b32.xlu1 %v1266_v61, %s8692_s18  ;;  %1839 = vmatpush.msra.mxu0 %v9862_v8  ;;  %v9899_v53 = vand.u32 4294901760, %v9883_v32  ;;  %v1762_v34 = vand.u32 4294901760, %v1761_v21 }
 0x210   : > { %1384 = vrot.lane.b32.xlu2 %v9705_v3, %s8693_s19  ;;  %1910 = vmatpush.msra.mxu1 %v9864_v27 }
 0x211   : > { %1386 = vrot.lane.b32.xlu0 %v9766_v38, %s8693_s19  ;;  %v9851_v61 = vpop.permute.xlu1 %2363  ;;  %1751 = vmatpush.msra.mxu3 %v9877_v30  ;;  %v1767_v59 = vsub.f32 %v9883_v32, %v9899_v53 }
 0x212   : > { %14702 = vst [vmem:[#allocation64_spill] sm:$0xff] %v9851_v61  ;;  %v9853_v48 = vpop.permute.xlu2 %1344  ;;  %v9869_v61 = vand.u32 4294901760, %v9845_v13  ;;  %1842 = vmatpush.msra.mxu0 %v9883_v32  ;;  %1912 = vmatpush.msra.mxu1 %v9885_v22 }
 0x213   : > { %v9793_v19 = vpop.permute.xlu0 %1408  ;;  %v1768_v21 = vand.u32 4294901760, %v1767_v59  ;;  %1651 = vmatpush.msra.mxu2 %v9864_v27 }
 0x214   : > { %v1755_v43 = vsub.f32 %v9845_v13, %v9869_v61  ;;  %1845 = vmatpush.msra.mxu0 %v9902_v2  ;;  %1914 = vmatpush.msra.mxu1 %v9904_v10 }
 0x215   : > { %1653 = vmatpush.msra.mxu2 %v9885_v22 }
 0x216   : > { %v1756_v4 = vand.u32 4294901760, %v1755_v43  ;;  %v9922_v43 = vsub.f32 %v1597_v33, %v9904_v10  ;;  %2668 = vmatpush.msrb.mxu1 %v9811_v44 }
 0x217   : > { %1478 = vrot.lane.b32.xlu1 %v9705_v3, %s8689_s28  ;;  %1655 = vmatpush.msra.mxu2 %v9904_v10 }
 0x218   : > { %1446 = vrot.lane.b32.xlu2 %v9717_v17, %s8686_s25  ;;  %1757 = vmatpush.msra.mxu3 %v1756_v4  ;;  %v9935_v17 = vand.u32 4294901760, %v9922_v43 }
 0x219   : > { %1448 = vrot.lane.b32.xlu0 %v9841_v62, %s8686_s25  ;;  %v9925_v24 = vpop.permute.xlu1 %1280  ;;  %1848 = vmatpush.msra.mxu0 %v9922_v43 }
 0x21a   : > { %v9927_v3 = vpop.permute.xlu2 %1502  ;;  %1763 = vmatpush.msra.mxu3 %v1762_v34  ;;  %v1779_v59 = vsub.f32 %v9922_v43, %v9935_v17  ;;  %2674 = vmatpush.msrb.mxu1 %v9832_v60 }
 0x21b   : > { %v9875_v15 = vpop.permute.xlu0 %1470  ;;  %2574 = vmatpush.msrb.mxu0 %v9753_v7  ;;  %1974 = vmatpush.msrb.mxu2 %v9780_v9 }
 0x21c   : > { %1769 = vmatpush.msra.mxu3 %v1768_v21  ;;  %v1780_v6 = vand.u32 4294901760, %v1779_v59  ;;  %2680 = vmatpush.msrb.mxu1 %v9857_v56  ;;  %v2205_v59 = vld [vmem:[#allocation2 + $0xc2] sm:$0xff] }
 0x21d   : > { %2576 = vmatpush.msrb.mxu0 %v9764_v18  ;;  %1978 = vmatpush.msrb.mxu2 %v9798_v54 }
 0x21e   : > { %1775 = vmatpush.msra.mxu3 %v9942_v5  ;;  %2686 = vmatpush.msrb.mxu1 %v9877_v30 }
 0x21f   : > { %1292 = vrot.lane.b32.xlu1 %v9766_v38, %s8684_s21  ;;  %2578 = vmatpush.msrb.mxu0 %v9786_v41 }
 0x220   : > { %1418 = vrot.lane.b32.xlu2 %v9740_v25, %s8692_s18  ;;  %1781 = vmatpush.msra.mxu3 %v1780_v6 }
 0x221   : > { %1420 = vrot.lane.b32.xlu0 %v9916_v57, %s8692_s18  ;;  %v1343_v39 = vpop.permute.xlu1 %1342  ;;  %2580 = vmatpush.msrb.mxu0 %v9804_v37 }
 0x222   : > { %v9956_v42 = vpop.permute.xlu2 %1316  ;;  %2048 = vmatpush.msrb.mxu3 %v9753_v7  ;;  %1982 = vmatpush.msrb.mxu2 %v9816_v11 }
 0x223   : > { %v9938_v33 = vpop.permute.xlu0 %1284  ;;  %2582 = vmatpush.msrb.mxu0 %v9822_v16  ;;  %2692 = vmatpush.msrb.mxu1 %v1756_v4 }
 0x224   : > { %2050 = vmatpush.msrb.mxu3 %v9764_v18  ;;  %1986 = vmatpush.msrb.mxu2 %v9837_v20 }
 0x225   : > { %2584 = vmatpush.msrb.mxu0 %v9839_v51  ;;  %2698 = vmatpush.msrb.mxu1 %v1762_v34 }
 0x226   : > { %2052 = vmatpush.msrb.mxu3 %v9786_v41  ;;  %1990 = vmatpush.msrb.mxu2 %v9869_v61 }
 0x227   : > { %1354 = vrot.lane.b32.xlu1 %v9841_v62, %s8694_s20  ;;  %2586 = vmatpush.msrb.mxu0 %v9864_v27 }
 0x228   : > { %1480 = vrot.lane.b32.xlu2 %v9766_v38, %s8689_s28  ;;  %2054 = vmatpush.msrb.mxu3 %v9804_v37  ;;  %v1197_v38 = vld [vmem:[#allocation2] sm:$0xff] }
 0x229   : > { %1482 = vrot.lane.b32.xlu0 %v1260_v12, %s8689_s28  ;;  %v9978_v60 = vpop.permute.xlu1 %1314  ;;  %2588 = vmatpush.msrb.mxu0 %v9885_v22  ;;  %v1526_v4 = vsel %vm380_vm2, %v1197_v38, %v9425_v0 }
 0x22a   : > { %v9980_v56 = vpop.permute.xlu2 %1378  ;;  %2056 = vmatpush.msrb.mxu3 %v9822_v16  ;;  %2704 = vmatpush.msrb.mxu1 %v1768_v21  ;;  %v1535_v0 = vsel %vm1534_vm5, %v1526_v4, %v9402_v55  ;;  %v2204_v4 = vld [vmem:[#allocation2 + $0x131] sm:$0xff] }
 0x22b   : > { %v9962_v44 = vpop.permute.xlu0 %1346  ;;  %1994 = vmatpush.msrb.mxu2 %v9880_v29  ;;  %2590 = vmatpush.msrb.mxu0 %v9904_v10 }
 0x22c   : > { %2058 = vmatpush.msrb.mxu3 %v9839_v51  ;;  %2710 = vmatpush.msrb.mxu1 %v9942_v5 }
 0x22d   : > { %1998 = vmatpush.msrb.mxu2 %v9899_v53 }
 0x22e   : > { %2060 = vmatpush.msrb.mxu3 %v9864_v27  ;;  %2716 = vmatpush.msrb.mxu1 %v1780_v6 }
 0x22f   : > { %1512 = vrot.lane.b32.xlu1 %v9740_v25, %s8688_s27  ;;  %v1544_v25 = vsel %vm1543_vm6, %v1535_v0, %v1343_v39  ;;  %2002 = vmatpush.msrb.mxu2 %v9919_v36 }
 0x230   : > { %2062 = vmatpush.msrb.mxu3 %v9885_v22  ;;  %v1553_v38 = vsel %vm1552_vm7, %v1544_v25, %v9748_v35 }
 0x231   : > { %2423 = vrot.lane.b32.xlu0 %v9563_v58, %s8689_s28  ;;  %v1228_v58 = vld [vmem:[#allocation2 + $0x80] sm:$0xff]  ;;  %v1377_v34 = vpop.permute.xlu1 %1376  ;;  %2006 = vmatpush.msrb.mxu2 %v9935_v17  ;;  %v1562_v5 = vsel %vm1561_vm8, %v1553_v38, %v9744_v52 }
 0x232   : > { %1356 = vrot.lane.b32.xlu2 %v1228_v58, %s8694_s20  ;;  %v10001_v62 = vpop.permute.xlu2 %1440  ;;  %2064 = vmatpush.msrb.mxu3 %v9904_v10 }
 0x233   : > { %v9986_v30 = vpop.permute.xlu0 %1504 }
 0x237   : > { %1388 = vrot.lane.b32.xlu1 %v1260_v12, %s8693_s19 }
 0x239   : > { %2445 = vrot.lane.b32.xlu0 %v2205_v59, %s8688_s27  ;;  %v1439_v55 = vpop.permute.xlu1 %1438  ;;  %v1527_v59 = vsel %vm380_vm2, %v9621_v40, %v9925_v24 }
 0x23a   : > { %1514 = vrot.lane.b32.xlu2 %v9916_v57, %s8688_s27  ;;  %v10022_v6 = vpop.permute.xlu2 %1412  ;;  %v1571_v39 = vsel %vm1570_vm9, %v1562_v5, %v1439_v55  ;;  %v2207_v55 = vld [vmem:[#allocation2 + $0xe2] sm:$0xff] }
 0x23b   : > { %v10010_v21 = vpop.permute.xlu0 %1318  ;;  %v1580_v57 = vsel %vm1579_vm11, %v1571_v39, %v9875_v15  ;;  %v10173_v39 = vld [vmem:[#allocation2 + $0x161] sm:$0xff] }
 0x23c   : > { %v1589_v12 = vsel %vm1588_vm10, %v1580_v57, %v9927_v3  ;;  %v1536_v3 = vsel %vm1534_vm5, %v1527_v59, %v9736_v1  ;;  %v10177_v57 = vld [vmem:[#allocation2 + $0x1a1] sm:$0xff] }
 0x23d   : > { %v1608_v52 = vsel %vm1606_vm12, %v1589_v12, 0  ;;  %v1545_v1 = vsel %vm1543_vm6, %v1536_v3, %v9853_v48 }
 0x23e   : > { %v1554_v38 = vsel %vm1552_vm7, %v1545_v1, %v1377_v34  ;;  %v10198_v1 = vld [vmem:[#allocation2 + $0x152] sm:$0xff] }
 0x23f   : > { %1450 = vrot.lane.b32.xlu1 %v1228_v58, %s8686_s25  ;;  %v1563_v48 = vsel %vm1561_vm8, %v1554_v38, %v9793_v19 }
 0x241   : > { %2451 = vrot.lane.b32.xlu0 %v9474_v26, %s8688_s27  ;;  %v10037_v26 = vand.u32 4294901760, %v1608_v52  ;;  %v10045_v0 = vpop.permute.xlu1 %1410 }
 0x242   : > { %2427 = vrot.lane.b32.xlu2 %v2204_v4, %s8689_s28  ;;  %v10047_v25 = vpop.permute.xlu2 %1474  ;;  %v10181_v4 = vld [vmem:[#allocation2 + $0x192] sm:$0xff] }
 0x243   : > { %v10029_v35 = vpop.permute.xlu0 %1380  ;;  %1783 = vmatmul.f32.vlgmr.msra.gmra.mxu3 %v10037_v26  ;;  %v1657_v15 = vsub.f32 %v1608_v52, %v10037_v26 }
 0x244   : > { %2833 = vmatpush.msra.mxu3 %v9753_v7 }
 0x245   : > { %1851 = vmatmul.f32.vlgmr.msra.gmra.mxu0 %v1657_v15  ;;  %v1658_v24 = vand.u32 4294901760, %v1657_v15 }
 0x246   : > { %2835 = vmatpush.msra.mxu3 %v9764_v18  ;;  %2909 = vmatpush.msra.mxu0 %v9780_v9  ;;  %v10067_v9 = vld [vmem:[#allocation2 + $0x151] sm:$0xff] }
 0x247   : > { %1918 = vmatmul.f32.vlgmr.msra.gmra.mxu1 %v1658_v24  ;;  %v1659_v58 = vsub.f32 %v1657_v15, %v1658_v24  ;;  %2425 = vrot.lane.b32.xlu1 %v9584_v14, %s8689_s28  ;;  %v14703_v24 = vld [vmem:[#allocation35_spill] sm:$0xff] }
 0x248   : > { %2837 = vmatpush.msra.mxu3 %v9786_v41  ;;  %2913 = vmatpush.msra.mxu0 %v9798_v54  ;;  %v1572_v54 = vsel %vm1570_vm9, %v1563_v48, %v10001_v62 }
 0x249   : > { %2457 = vrot.lane.b32.xlu0 %v9598_v63, %s8688_s27  ;;  %v1660_v63 = vand.u32 4294901760, %v1659_v58  ;;  %2983 = vmatpush.msra.mxu1 %v9753_v7  ;;  %v1473_v34 = vpop.permute.xlu1 %1472  ;;  %v3099_v58 = vld [vmem:[#allocation2 + $0x150] sm:$0xff] }
 0x24a   : > { %2449 = vrot.lane.b32.xlu2 %v2207_v55, %s8688_s27  ;;  %2839 = vmatpush.msra.mxu3 %v9804_v37  ;;  %v10072_v5 = vpop.permute.xlu2 %1288  ;;  %v1581_v14 = vsel %vm1579_vm11, %v1572_v54, %v1473_v34 }
 0x24b   : > { %v10052_v40 = vpop.permute.xlu0 %1442  ;;  %1661 = vmatmul.f32.vlgmr.msra.gmra.mxu2 %v1660_v63  ;;  %2917 = vmatpush.msra.mxu0 %v9816_v11  ;;  %v1590_v19 = vsel %vm1588_vm10, %v1581_v14, %v9986_v30  ;;  %v3083_v30 = vld [vmem:[#allocation2 + $0x141] sm:$0xff] }
 0x24c   : > { %2985 = vmatpush.msra.mxu1 %v9764_v18  ;;  %2759 = vmatpush.msra.mxu2 %v9762_v28  ;;  %v1611_v62 = vsel %vm1606_vm12, %v1590_v19, 0  ;;  %v2206_v18 = vld [vmem:[#allocation2 + $0xd2] sm:$0xff]  ;;  %v10211_v14 = vld [vmem:[#allocation2 + $0x182] sm:$0xff] }
 0x24d   : > { %2841 = vmatpush.msra.mxu3 %v9822_v16  ;;  %2921 = vmatpush.msra.mxu0 %v9837_v20  ;;  %v10089_v11 = vand.u32 4294901760, %v1611_v62  ;;  %v10215_v19 = vld [vmem:[#allocation2 + $0x180] sm:$0xff] }
 0x24e   : > { %2987 = vmatpush.msra.mxu1 %v9786_v41  ;;  %2762 = vmatpush.msra.mxu2 %v9783_v45  ;;  %v10100_v45 = vld [vmem:[#allocation2 + $0x181] sm:$0xff] }
 0x24f   : > { %2843 = vmatpush.msra.mxu3 %v9839_v51  ;;  %2925 = vmatpush.msra.mxu0 %v9869_v61  ;;  %v1665_v20 = vsub.f32 %v1611_v62, %v10089_v11 }
 0x250   : > { %2989 = vmatpush.msra.mxu1 %v9804_v37  ;;  %2765 = vmatpush.msra.mxu2 %v9801_v23 }
 0x251   : > { %3158 = vrot.lane.b32.xlu0 %v10067_v9, %s8684_s21  ;;  %2447 = vrot.lane.b32.xlu1 %v2206_v18, %s8688_s27  ;;  %v10103_v41 = vpop.permute.xlu1 %1286  ;;  %v1666_v28 = vand.u32 4294901760, %v1665_v20 }
 0x252   : > { %1787 = vmatmul.f32.gmra.mxu3 %v10089_v11  ;;  %2455 = vrot.lane.b32.xlu2 %v9541_v47, %s8688_s27  ;;  %v10105_v37 = vpop.permute.xlu2 %1350 }
 0x253   : > { %v10082_v7 = vpop.permute.xlu0 %1414  ;;  %2845 = vmatpush.msra.mxu3 %v9864_v27  ;;  %1856 = vmatmul.f32.gmra.mxu0 %v1665_v20  ;;  %v1667_v23 = vsub.f32 %v1665_v20, %v1666_v28 }
 0x254   : > { %2929 = vmatpush.msra.mxu0 %v9880_v29  ;;  %2991 = vmatpush.msra.mxu1 %v9822_v16  ;;  %v1528_v16 = vsel %vm380_vm2, %v9638_v50, %v9775_v46  ;;  %v2212_v46 = vld [vmem:[#allocation2 + $0x132] sm:$0xff] }
 0x255   : > { %1924 = vmatmul.f32.gmra.mxu1 %v1666_v28  ;;  %2768 = vmatpush.msra.mxu2 %v9819_v49  ;;  %v1668_v61 = vand.u32 4294901760, %v1667_v23  ;;  %v1537_v49 = vsel %vm1534_vm5, %v1528_v16, %v9978_v60  ;;  %v10237_v16 = vld [vmem:[#allocation2 + $0x1b2] sm:$0xff] }
 0x256   : > { %2847 = vmatpush.msra.mxu3 %v9885_v22  ;;  %2933 = vmatpush.msra.mxu0 %v9899_v53  ;;  %v10128_v53 = vld [vmem:[#allocation2 + $0x1b1] sm:$0xff] }
 0x257   : > { %2993 = vmatpush.msra.mxu1 %v9839_v51  ;;  %2771 = vmatpush.msra.mxu2 %v9845_v13 }
 0x258   : > { %2849 = vmatpush.msra.mxu3 %v9904_v10  ;;  %2937 = vmatpush.msra.mxu0 %v9919_v36  ;;  %v1546_v36 = vsel %vm1543_vm6, %v1537_v49, %v9962_v44  ;;  %v14704_v49 = vld [vmem:[#allocation45_spill] sm:$0xff] }
 0x259   : > { %3164 = vrot.lane.b32.xlu0 %v10100_v45, %s8684_s21  ;;  %2453 = vrot.lane.b32.xlu1 %v9494_v31, %s8688_s27  ;;  %v1349_v13 = vpop.permute.xlu1 %1348 }
 0x25a   : > { %1669 = vmatmul.f32.gmra.mxu2 %v1668_v61  ;;  %3156 = vrot.lane.b32.xlu2 %v3083_v30, %s8684_s21  ;;  %v10133_v51 = vpop.permute.xlu2 %1508  ;;  %v10231_v30 = vld [vmem:[#allocation2 + $0x172] sm:$0xff] }
 0x25b   : > { %v10111_v47 = vpop.permute.xlu0 %1476  ;;  %2995 = vmatpush.msra.mxu1 %v9864_v27  ;;  %2774 = vmatpush.msra.mxu2 %v9862_v8  ;;  %v1555_v27 = vsel %vm1552_vm7, %v1546_v36, %v9980_v56 }
 0x25c   : > { %2941 = vmatpush.msra.mxu0 %v9935_v17  ;;  %v1564_v50 = vsel %vm1561_vm8, %v1555_v27, %v10045_v0 }
 0x25d   : > { %2997 = vmatpush.msra.mxu1 %v9885_v22  ;;  %2777 = vmatpush.msra.mxu2 %v9883_v32  ;;  %v1573_v17 = vsel %vm1570_vm9, %v1564_v50, %v10052_v40  ;;  %v10152_v22 = vld [vmem:[#allocation2 + $0x171] sm:$0xff]  ;;  %v10157_v32 = vld [vmem:[#allocation2 + $0x162] sm:$0xff]  ;;  %v1529_v40 = vsel %vm380_vm2, %v14703_v24, %v9938_v33 }
 0x25e   : > { %v1582_v8 = vsel %vm1579_vm11, %v1573_v17, %v10047_v25  ;;  %v10191_v25 = vld [vmem:[#allocation2 + $0x191] sm:$0xff]  ;;  %v1538_v55 = vsel %vm1534_vm5, %v1529_v40, %v9956_v42  ;;  %v3091_v33 = vld [vmem:[#allocation2 + $0x142] sm:$0xff] }
 0x25f   : > { %2999 = vmatpush.msra.mxu1 %v9904_v10  ;;  %2780 = vmatpush.msra.mxu2 %v9902_v2  ;;  %v1547_v48 = vsel %vm1543_vm6, %v1538_v55, %v1349_v13  ;;  %v10246_v13 = vld [vmem:[#allocation2 + $0x1b0] sm:$0xff]  ;;  %v10282_v55 = vld [vmem:[#allocation2 + $0x1a0] sm:$0xff] }
 0x260   : > { %v1556_v34 = vsel %vm1552_vm7, %v1547_v48, %v10029_v35 }
 0x261   : > { %3170 = vrot.lane.b32.xlu0 %v10128_v53, %s8684_s21  ;;  %2459 = vrot.lane.b32.xlu1 %v2212_v46, %s8688_s27  ;;  %v1507_v10 = vpop.permute.xlu1 %1506  ;;  %v1565_v42 = vsel %vm1561_vm8, %v1556_v34, %v10022_v6 }
 0x262   : > { %2783 = vmatpush.msra.mxu2 %v9922_v43  ;;  %3162 = vrot.lane.b32.xlu2 %v10152_v22, %s8684_s21  ;;  %v10161_v29 = vpop.permute.xlu2 %1322  ;;  %v1591_v2 = vsel %vm1588_vm10, %v1582_v8, %v1507_v10 }
 0x263   : > { %v10140_v31 = vpop.permute.xlu0 %1290  ;;  %v1614_v44 = vsel %vm1606_vm12, %v1591_v2, 0  ;;  %v10255_v2 = vld [vmem:[#allocation2 + $0x1a2] sm:$0xff] }
 0x264   : > { %v10169_v43 = vand.u32 4294901760, %v1614_v44 }
 0x266   : > { %v1673_v56 = vsub.f32 %v1614_v44, %v10169_v43  ;;  %1791 = vmatmul.f32.gmra.mxu3 %v10169_v43 }
 0x268   : > { %1861 = vmatmul.f32.gmra.mxu0 %v1673_v56  ;;  %v1674_v12 = vand.u32 4294901760, %v1673_v56 }
 0x269   : > { %3192 = vrot.lane.b32.xlu0 %v10157_v32, %s8685_s24  ;;  %3160 = vrot.lane.b32.xlu1 %v10173_v39, %s8684_s21  ;;  %v10183_v52 = vpop.permute.xlu1 %1320 }
 0x26a   : > { %3168 = vrot.lane.b32.xlu2 %v10177_v57, %s8684_s21  ;;  %v10185_v59 = vpop.permute.xlu2 %1384  ;;  %1930 = vmatmul.f32.gmra.mxu1 %v1674_v12  ;;  %v1675_v15 = vsub.f32 %v1673_v56, %v1674_v12  ;;  %v10259_v56 = vld [vmem:[#allocation2 + $0x170] sm:$0xff] }
 0x26b   : > { %v10167_v60 = vpop.permute.xlu0 %1352 }
 0x26c   : > { %v1676_v0 = vand.u32 4294901760, %v1675_v15 }
 0x26e   : > { %1677 = vmatmul.f32.gmra.mxu2 %v1676_v0 }
 0x271   : > { %3198 = vrot.lane.b32.xlu0 %v10181_v4, %s8685_s24  ;;  %3166 = vrot.lane.b32.xlu1 %v10191_v25, %s8684_s21  ;;  %v1383_v38 = vpop.permute.xlu1 %1382 }
 0x272   : > { %3190 = vrot.lane.b32.xlu2 %v10198_v1, %s8685_s24  ;;  %v1447_v63 = vpop.permute.xlu2 %1446 }
 0x273   : > { %v10189_v3 = vpop.permute.xlu0 %1510 }
 0x279   : > { %3220 = vrot.lane.b32.xlu0 %v3099_v58, %s8694_s20  ;;  %3188 = vrot.lane.b32.xlu1 %v3091_v33, %s8685_s24  ;;  %v1445_v62 = vpop.permute.xlu1 %1444 }
 0x27a   : > { %3196 = vrot.lane.b32.xlu2 %v10211_v14, %s8685_s24  ;;  %v10219_v18 = vpop.permute.xlu2 %1418  ;;  %v1574_v35 = vsel %vm1570_vm9, %v1565_v42, %v1445_v62 }
 0x27b   : > { %v10206_v54 = vpop.permute.xlu0 %1324  ;;  %v1583_v20 = vsel %vm1579_vm11, %v1574_v35, %v10111_v47  ;;  %v1530_v47 = vsel %vm380_vm2, %v14704_v49, %v10103_v41  ;;  %v10292_v35 = vld [vmem:[#allocation2 + $0x190] sm:$0xff]  ;;  %v10303_v49 = vld [vmem:[#allocation2 + $0x1c1] sm:$0xff] }
 0x27c   : > { %v1592_v23 = vsel %vm1588_vm10, %v1583_v20, %v10133_v51  ;;  %v1539_v50 = vsel %vm1534_vm5, %v1530_v47, %v10010_v21  ;;  %v14705_v20 = vld [vmem:[#allocation58_spill] sm:$0xff] }
 0x27d   : > { %v1617_v61 = vsel %vm1606_vm12, %v1592_v23, 0  ;;  %v1548_v17 = vsel %vm1543_vm6, %v1539_v50, %v10105_v37  ;;  %v1531_v23 = vsel %vm380_vm2, %v14705_v20, %v10072_v5 }
 0x27e   : > { %v10233_v6 = vand.u32 4294901760, %v1617_v61  ;;  %v1557_v8 = vsel %vm1552_vm7, %v1548_v17, %v1383_v38  ;;  %v10276_v38 = vld [vmem:[#allocation2 + $0x160] sm:$0xff] }
 0x27f   : > { %v1566_v12 = vsel %vm1561_vm8, %v1557_v8, %v10082_v7  ;;  %v10317_v17 = vld [vmem:[#allocation2 + $0x1c0] sm:$0xff] }
 0x280   : > { %1795 = vmatmul.f32.gmra.mxu3 %v10233_v6  ;;  %v1681_v36 = vsub.f32 %v1617_v61, %v10233_v6  ;;  %v1575_v21 = vsel %vm1570_vm9, %v1566_v12, %v1447_v63  ;;  %v1540_v61 = vsel %vm1534_vm5, %v1531_v23, %v10183_v52 }
 0x281   : > { %3226 = vrot.lane.b32.xlu0 %v10215_v19, %s8694_s20  ;;  %3194 = vrot.lane.b32.xlu1 %v10231_v30, %s8685_s24  ;;  %v1417_v51 = vpop.permute.xlu1 %1416  ;;  %v1549_v47 = vsel %vm1543_vm6, %v1540_v61, %v10167_v60 }
 0x282   : > { %3202 = vrot.lane.b32.xlu2 %v10237_v16, %s8685_s24  ;;  %v1481_v27 = vpop.permute.xlu2 %1480  ;;  %1866 = vmatmul.f32.gmra.mxu0 %v1681_v36  ;;  %v1682_v46 = vand.u32 4294901760, %v1681_v36  ;;  %v1558_v50 = vsel %vm1552_vm7, %v1549_v47, %v10185_v59 }
 0x283   : > { %v10226_v28 = vpop.permute.xlu0 %1386  ;;  %v1567_v52 = vsel %vm1561_vm8, %v1558_v50, %v1417_v51  ;;  %v14706_v51 = vld [vmem:[#allocation63_spill] sm:$0xff] }
 0x284   : > { %1936 = vmatmul.f32.gmra.mxu1 %v1682_v46  ;;  %v1683_v10 = vsub.f32 %v1681_v36, %v1682_v46  ;;  %v14710_v50 = vld [vmem:[#allocation11_spill] sm:$0xff] }
 0x286   : > { %v1684_v44 = vand.u32 4294901760, %v1683_v10 }
 0x288   : > { %1685 = vmatmul.f32.gmra.mxu2 %v1684_v44 }
 0x289   : > { %3232 = vrot.lane.b32.xlu0 %v10246_v13, %s8694_s20  ;;  %3200 = vrot.lane.b32.xlu1 %v10255_v2, %s8685_s24  ;;  %v1479_v37 = vpop.permute.xlu1 %1478 }
 0x28a   : > { %3224 = vrot.lane.b32.xlu2 %v10259_v56, %s8694_s20  ;;  %v1584_v0 = vsel %vm1579_vm11, %v1575_v21, %v1479_v37  ;;  %v2140_v21 = vld [vmem:[#allocation2 + $0xa0] sm:$0xff] }
 0x28b   : > { %v1449_v41 = vpop.permute.xlu0 %1448  ;;  %v1593_v24 = vsel %vm1588_vm10, %v1584_v0, %v10189_v3 }
 0x28c   : > { %v1357_v15 = vpop.permute.xlu2 %1356  ;;  %v1620_v7 = vsel %vm1606_vm12, %v1593_v24, 0  ;;  %v14707_v24 = vld [vmem:[#allocation8_spill] sm:$0xff] }
 0x28d   : > { %v10274_v58 = vand.u32 4294901760, %v1620_v7 }
 0x28f   : > { %1799 = vmatmul.f32.gmra.mxu3 %v10274_v58  ;;  %v1689_v63 = vsub.f32 %v1620_v7, %v10274_v58  ;;  %v2469_v7 = vsel %vm380_vm2, %v2140_v21, %v14707_v24 }
 0x291   : > { %3254 = vrot.lane.b32.xlu0 %v10173_v39, %s8693_s19  ;;  %3222 = vrot.lane.b32.xlu1 %v10276_v38, %s8694_s20  ;;  %v1293_v3 = vpop.permute.xlu1 %1292  ;;  %v1690_v48 = vand.u32 4294901760, %v1689_v63 }
 0x292   : > { %3230 = vrot.lane.b32.xlu2 %v10282_v55, %s8694_s20  ;;  %1871 = vmatmul.f32.gmra.mxu0 %v1689_v63 }
 0x293   : > { %v10271_v40 = vpop.permute.xlu0 %1420  ;;  %1942 = vmatmul.f32.gmra.mxu1 %v1690_v48  ;;  %v1691_v34 = vsub.f32 %v1689_v63, %v1690_v48  ;;  %v14708_v63 = vld [vmem:[#allocation55_spill] sm:$0xff] }
 0x294   : > { %v10286_v33 = vpop.permute.xlu2 %1514 }
 0x295   : > { %v1692_v42 = vand.u32 4294901760, %v1691_v34 }
 0x297   : > { %1693 = vmatmul.f32.gmra.mxu2 %v1692_v42  ;;  %v14709_v42 = vld [vmem:[#allocation7_spill] sm:$0xff] }
 0x298   : > { %v2477_v20 = vsel %vm1534_vm5, %v2469_v7, %v14709_v42  ;;  %v14716_v7 = vld [vmem:[#allocation5_spill] sm:$0xff] }
 0x299   : > { %3260 = vrot.lane.b32.xlu0 %v10191_v25, %s8693_s19  ;;  %3228 = vrot.lane.b32.xlu1 %v10292_v35, %s8694_s20  ;;  %v1355_v36 = vpop.permute.xlu1 %1354 }
 0x29a   : > { %3252 = vrot.lane.b32.xlu2 %v10067_v9, %s8693_s19  ;;  %v1576_v9 = vsel %vm1570_vm9, %v1567_v52, %v1449_v41  ;;  %v1533_v41 = vsel %vm380_vm2, %v14706_v51, %v1293_v3  ;;  %v1532_v3 = vsel %vm380_vm2, %v14708_v63, %v10140_v31  ;;  %v2485_v52 = vsel %vm1543_vm6, %v2477_v20, %v14710_v50 }
 0x29b   : > { %v10290_v62 = vpop.permute.xlu0 %1482  ;;  %v1585_v10 = vsel %vm1579_vm11, %v1576_v9, %v1481_v27  ;;  %v1542_v0 = vsel %vm1534_vm5, %v1533_v41, %v10206_v54  ;;  %v1541_v31 = vsel %vm1534_vm5, %v1532_v3, %v10161_v29  ;;  %v14712_v29 = vld [vmem:[#allocation4_spill] sm:$0xff] }
 0x29c   : > { %v10307_v46 = vpop.permute.xlu2 %2427  ;;  %v1551_v54 = vsel %vm1543_vm6, %v1542_v0, %v1357_v15  ;;  %v1550_v15 = vsel %vm1543_vm6, %v1541_v31, %v1355_v36  ;;  %v14714_v0 = vld [vmem:[#allocation6_spill] sm:$0xff]  ;;  %v14717_v3 = vld [vmem:[#allocation24_spill] sm:$0xff] }
 0x29d   : > { %v1559_v36 = vsel %vm1552_vm7, %v1550_v15, %v10226_v28  ;;  %v8565_v31 = vld [vmem:[#allocation2 + $0xc0] sm:$0xff] }
 0x29e   : > { %v1568_v28 = vsel %vm1561_vm8, %v1559_v36, %v10219_v18 }
 0x2a1   : > { %3266 = vrot.lane.b32.xlu0 %v10303_v49, %s8693_s19  ;;  %3234 = vrot.lane.b32.xlu1 %v10317_v17, %s8694_s20  ;;  %v1513_v60 = vpop.permute.xlu1 %1512 }
 0x2a2   : > { %3258 = vrot.lane.b32.xlu2 %v10100_v45, %s8693_s19  ;;  %v1594_v59 = vsel %vm1588_vm10, %v1585_v10, %v1513_v60  ;;  %v14711_v10 = vld [vmem:[#allocation16_spill] sm:$0xff] }
 0x2a3   : > { %v10311_v5 = vpop.permute.xlu0 %2423  ;;  %v1623_v44 = vsel %vm1606_vm12, %v1594_v59, 0  ;;  %v2493_v59 = vsel %vm1552_vm7, %v2485_v52, %v14711_v10 }
 0x2a4   : > { %v10324_v8 = vpop.permute.xlu2 %2449  ;;  %v10332_v37 = vand.u32 4294901760, %v1623_v44 }
 0x2a6   : > { %v1697_v27 = vsub.f32 %v1623_v44, %v10332_v37  ;;  %1803 = vmatmul.f32.gmra.mxu3 %v10332_v37  ;;  %v14713_v44 = vld [vmem:[#allocation15_spill] sm:$0xff] }
 0x2a7   : > { %v2501_v21 = vsel %vm1561_vm8, %v2493_v59, %v14713_v44 }
 0x2a8   : > { %1876 = vmatmul.f32.gmra.mxu0 %v1697_v27  ;;  %v1698_v48 = vand.u32 4294901760, %v1697_v27 }
 0x2a9   : > { %3288 = vrot.lane.b32.xlu0 %v10231_v30, %s8692_s18  ;;  %3256 = vrot.lane.b32.xlu1 %v10152_v22, %s8693_s19  ;;  %v1389_v34 = vpop.permute.xlu1 %1388 }
 0x2aa   : > { %3264 = vrot.lane.b32.xlu2 %v10128_v53, %s8693_s19  ;;  %v1560_v23 = vsel %vm1552_vm7, %v1551_v54, %v1389_v34  ;;  %1948 = vmatmul.f32.gmra.mxu1 %v1698_v48  ;;  %v1699_v61 = vsub.f32 %v1697_v27, %v1698_v48 }
 0x2ab   : > { %v2446_v12 = vpop.permute.xlu0 %2445  ;;  %v1569_v9 = vsel %vm1561_vm8, %v1560_v23, %v10271_v40  ;;  %v14715_v40 = vld [vmem:[#allocation17_spill] sm:$0xff]  ;;  %v14718_v23 = vld [vmem:[#allocation18_spill] sm:$0xff] }
 0x2ac   : > { %v10355_v47 = vpop.permute.xlu2 %2455  ;;  %v1578_v51 = vsel %vm1570_vm9, %v1569_v9, %v14712_v29  ;;  %v1700_v41 = vand.u32 4294901760, %v1699_v61  ;;  %v2509_v24 = vsel %vm1570_vm9, %v2501_v21, %v14715_v40  ;;  %v2471_v61 = vsel %vm380_vm2, %v8565_v31, %v14718_v23  ;;  %v14719_v9 = vld [vmem:[#allocation10_spill] sm:$0xff]  ;;  %v14720_v29 = vld [vmem:[#allocation13_spill] sm:$0xff] }
 0x2ad   : > { %v1587_v27 = vsel %vm1579_vm11, %v1578_v51, %v14714_v0  ;;  %v2517_v48 = vsel %vm1579_vm11, %v2509_v24, %v14717_v3  ;;  %v14722_v0 = vld [vmem:[#allocation20_spill] sm:$0xff] }
 0x2ae   : > { %1701 = vmatmul.f32.gmra.mxu2 %v1700_v41  ;;  %v1596_v63 = vsel %vm1588_vm10, %v1587_v27, %v14716_v7  ;;  %v2525_v42 = vsel %vm1588_vm10, %v2517_v48, %v2446_v12  ;;  %v14721_v41 = vld [vmem:[#allocation12_spill] sm:$0xff]  ;;  %v14723_v27 = vld [vmem:[#allocation31_spill] sm:$0xff]  ;;  %v14725_v48 = vld [vmem:[#allocation25_spill] sm:$0xff] }
 0x2af   : > { %v1629_v52 = vsel %vm1606_vm12, %v1596_v63, 0  ;;  %v2543_v59 = vsel %vm1606_vm12, %v2525_v42, 0  ;;  %v14724_v63 = vld [vmem:[#allocation14_spill] sm:$0xff] }
 0x2b0   : > { %v10411_v21 = vand.u32 4294901760, %v1629_v52  ;;  %v10419_v40 = vand.u32 4294901760, %v2543_v59 }
 0x2b1   : > { %3294 = vrot.lane.b32.xlu0 %v10255_v2, %s8692_s18  ;;  %3262 = vrot.lane.b32.xlu1 %v10177_v57, %s8693_s19  ;;  %v1451_v54 = vpop.permute.xlu1 %1450 }
 0x2b2   : > { %3286 = vrot.lane.b32.xlu2 %v10157_v32, %s8692_s18  ;;  %v1577_v34 = vsel %vm1570_vm9, %v1568_v28, %v1451_v54  ;;  %v10439_v31 = vsub.f32 %v2543_v59, %v10419_v40 }
 0x2b3   : > { %v10362_v60 = vpop.permute.xlu0 %2451  ;;  %v1586_v50 = vsel %vm1579_vm11, %v1577_v34, %v10290_v62  ;;  %v2479_v62 = vsel %vm1534_vm5, %v2471_v61, %v14721_v41  ;;  %v1713_v34 = vsub.f32 %v1629_v52, %v10411_v21  ;;  %v14731_v41 = vld [vmem:[#allocation28_spill] sm:$0xff] }
 0x2b4   : > { %v10390_v20 = vpop.permute.xlu2 %3156  ;;  %v1595_v18 = vsel %vm1588_vm10, %v1586_v50, %v10286_v33  ;;  %v2487_v36 = vsel %vm1543_vm6, %v2479_v62, %v14723_v27  ;;  %v14728_v50 = vld [vmem:[#allocation19_spill] sm:$0xff]  ;;  %v2593_v62 = vand.u32 4294901760, %v10439_v31 }
 0x2b5   : > { %v1626_v10 = vsel %vm1606_vm12, %v1595_v18, 0 }
 0x2b6   : > { %v10409_v44 = vand.u32 4294901760, %v1626_v10 }
 0x2b8   : > { %1807 = vmatmul.f32.gmra.mxu3 %v10409_v44  ;;  %v1705_v24 = vsub.f32 %v1626_v10, %v10409_v44 }
 0x2b9   : > { %3316 = vrot.lane.b32.xlu0 %v10276_v38, %s8686_s25  ;;  %v8566_v38 = vld [vmem:[#allocation2 + $0xb0] sm:$0xff]  ;;  %3284 = vrot.lane.b32.xlu1 %v10198_v1, %s8692_s18  ;;  %v10425_v7 = vpop.permute.xlu1 %2425  ;;  %v2495_v1 = vsel %vm1552_vm7, %v2487_v36, %v14725_v48 }
 0x2ba   : > { %v2470_v12 = vsel %vm380_vm2, %v8566_v38, %v14719_v9  ;;  %3292 = vrot.lane.b32.xlu2 %v10181_v4, %s8692_s18  ;;  %1881 = vmatmul.f32.gmra.mxu0 %v1705_v24  ;;  %v1706_v54 = vand.u32 4294901760, %v1705_v24  ;;  %v2503_v18 = vsel %vm1561_vm8, %v2495_v1, %v14728_v50  ;;  %v14729_v38 = vld [vmem:[#allocation26_spill] sm:$0xff] }
 0x2bb   : > { %v10397_v15 = vpop.permute.xlu0 %2457  ;;  %v2478_v51 = vsel %vm1534_vm5, %v2470_v12, %v14720_v29  ;;  %v14730_v12 = vld [vmem:[#allocation39_spill] sm:$0xff]  ;;  %v1714_v29 = vand.u32 4294901760, %v1713_v34 }
 0x2bc   : > { %v2486_v33 = vsel %vm1543_vm6, %v2478_v51, %v14722_v0  ;;  %v10433_v28 = vpop.permute.xlu2 %3162  ;;  %1954 = vmatmul.f32.gmra.mxu1 %v1706_v54  ;;  %v1707_v23 = vsub.f32 %v1705_v24, %v1706_v54  ;;  %v2511_v10 = vsel %vm1570_vm9, %v2503_v18, %v14730_v12  ;;  %v8567_v51 = vld [vmem:[#allocation2 + $0xd0] sm:$0xff]  ;;  %v10455_v0 = vld [vmem:[#allocation2 + $0x1c2] sm:$0xff] }
 0x2bd   : > { %v2494_v3 = vsel %vm1552_vm7, %v2486_v33, %v14724_v63  ;;  %14726 = vst [vmem:[#allocation35_spill] sm:$0xff] %v10433_v28  ;;  %v2472_v59 = vsel %vm380_vm2, %v8567_v51, %v14731_v41  ;;  %v14732_v33 = vld [vmem:[#allocation32_spill] sm:$0xff]  ;;  %v14733_v24 = vld [vmem:[#allocation22_spill] sm:$0xff]  ;;  %v14740_v41 = vld [vmem:[#allocation33_spill] sm:$0xff] }
 0x2be   : > { %v1708_v52 = vand.u32 4294901760, %v1707_v23  ;;  %v2519_v27 = vsel %vm1579_vm11, %v2511_v10, %v14732_v33  ;;  %v1715_v23 = vsub.f32 %v1713_v34, %v1714_v29  ;;  %v14739_v10 = vld [vmem:[#allocation27_spill] sm:$0xff] }
 0x2bf   : > { %v2527_v1 = vsel %vm1588_vm10, %v2519_v27, %v10324_v8  ;;  %v2594_v8 = vsub.f32 %v10439_v31, %v2593_v62 }
 0x2c0   : > { %1709 = vmatmul.f32.gmra.mxu2 %v1708_v52  ;;  %1811 = vmatmul.f32.gmra.mxu3 %v10411_v21  ;;  %v2549_v51 = vsel %vm1606_vm12, %v2527_v1, 0  ;;  %v1716_v27 = vand.u32 4294901760, %v1715_v23 }
 0x2c1   : > { %3322 = vrot.lane.b32.xlu0 %v10292_v35, %s8686_s25  ;;  %v14727_v35 = vld [vmem:[#allocation21_spill] sm:$0xff]  ;;  %3290 = vrot.lane.b32.xlu1 %v10211_v14, %s8692_s18  ;;  %v10500_v1 = vand.u32 4294901760, %v2549_v51 }
 0x2c2   : > { %v2502_v61 = vsel %vm1561_vm8, %v2494_v3, %v14727_v35  ;;  %3298 = vrot.lane.b32.xlu2 %v10455_v0, %s8692_s18  ;;  %v14734_v3 = vld [vmem:[#allocation23_spill] sm:$0xff]  ;;  %1886 = vmatmul.f32.gmra.mxu0 %v1713_v34  ;;  %v8568_v34 = vld [vmem:[#allocation2 + $0xe0] sm:$0xff] }
 0x2c3   : > { %v10436_v42 = vpop.permute.xlu0 %3158  ;;  %v2510_v9 = vsel %vm1570_vm9, %v2502_v61, %v14729_v38  ;;  %v2448_v36 = vpop.permute.xlu1 %2447  ;;  %v2480_v48 = vsel %vm1534_vm5, %v2472_v59, %v14734_v3  ;;  %v14736_v61 = vld [vmem:[#allocation29_spill] sm:$0xff]  ;;  %v2473_v52 = vsel %vm380_vm2, %v8568_v34, %v14739_v10  ;;  %v14743_v3 = vld [vmem:[#allocation40_spill] sm:$0xff] }
 0x2c4   : > { %v2518_v63 = vsel %vm1579_vm11, %v2510_v9, %v14733_v24  ;;  %v10470_v35 = vpop.permute.xlu2 %3168  ;;  %v2488_v50 = vsel %vm1543_vm6, %v2480_v48, %v14736_v61  ;;  %1960 = vmatmul.f32.gmra.mxu1 %v1714_v29  ;;  %v2481_v59 = vsel %vm1534_vm5, %v2473_v52, %v14740_v41  ;;  %v14742_v24 = vld [vmem:[#allocation41_spill] sm:$0xff]  ;;  %v14744_v61 = vld [vmem:[#allocation46_spill] sm:$0xff]  ;;  %v10519_v52 = vsub.f32 %v2549_v51, %v10500_v1 }
 0x2c5   : > { %v2526_v54 = vsel %vm1588_vm10, %v2518_v63, %v2448_v36  ;;  %14735 = vst [vmem:[#allocation45_spill] sm:$0xff] %v10470_v35  ;;  %v14741_v36 = vld [vmem:[#allocation30_spill] sm:$0xff]  ;;  %v2489_v63 = vsel %vm1543_vm6, %v2481_v59, %v14742_v24 }
 0x2c6   : > { %v2546_v18 = vsel %vm1606_vm12, %v2526_v54, 0  ;;  %v2595_v54 = vand.u32 4294901760, %v2594_v8  ;;  %v14747_v41 = vld [vmem:[#allocation38_spill] sm:$0xff] }
 0x2c7   : > { %v10479_v12 = vand.u32 4294901760, %v2546_v18  ;;  %v14750_v51 = vld [vmem:[#allocation34_spill] sm:$0xff] }
 0x2c8   : > { %1717 = vmatmul.f32.gmra.mxu2 %v1716_v27  ;;  %2066 = vmatmul.f32.vlgmr.msrb.gmra.mxu3 %v10037_v26  ;;  %v14748_v27 = vld [vmem:[#allocation42_spill] sm:$0xff] }
 0x2c9   : > { %3328 = vrot.lane.b32.xlu0 %v10317_v17, %s8686_s25  ;;  %v14738_v17 = vld [vmem:[#allocation36_spill] sm:$0xff]  ;;  %v10490_v33 = vsub.f32 %v2546_v18, %v10479_v12  ;;  %3296 = vrot.lane.b32.xlu1 %v10237_v16, %s8692_s18  ;;  %v10834_v35 = vld [vmem:[#allocation2 + $0x212] sm:$0xff] }
 0x2ca   : > { %v2496_v9 = vsel %vm1552_vm7, %v2488_v50, %v14738_v17  ;;  %3320 = vrot.lane.b32.xlu2 %v10215_v19, %s8686_s25  ;;  %v14745_v17 = vld [vmem:[#allocation37_spill] sm:$0xff]  ;;  %2596 = vmatmul.f32.vlgmr.msrb.gmra.mxu0 %v2595_v54  ;;  %v8569_v19 = vld [vmem:[#allocation2 + $0xf0] sm:$0xff]  ;;  %v14539_v54 = vand.u32 4294901760, %v10519_v52  ;;  %14797 = vst [vmem:[#allocation29_spill] sm:$0xff] %v10834_v35 }
 0x2cb   : > { %v10475_v38 = vpop.permute.xlu0 %3164  ;;  %v2504_v29 = vsel %vm1561_vm8, %v2496_v9, %v14741_v36  ;;  %v2601_v23 = vand.u32 4294901760, %v10490_v33  ;;  %v2454_v18 = vpop.permute.xlu1 %2453  ;;  %v2497_v9 = vsel %vm1552_vm7, %v2489_v63, %v14745_v17  ;;  %v2474_v59 = vsel %vm380_vm2, %v8569_v19, %v14747_v41  ;;  %v14752_v17 = vld [vmem:[#allocation47_spill] sm:$0xff]  ;;  %v8570_v19 = vld [vmem:[#allocation2 + $0x100] sm:$0xff]  ;;  %v14755_v41 = vld [vmem:[#allocation50_spill] sm:$0xff] }
 0x2cc   : > { %14737 = vst [vmem:[#allocation58_spill] sm:$0xff] %v10475_v38  ;;  %v2512_v48 = vsel %vm1570_vm9, %v2504_v29, %v14743_v3  ;;  %v10514_v8 = vpop.permute.xlu2 %3190  ;;  %2718 = vmatmul.f32.vlgmr.msrb.gmra.mxu1 %v10419_v40  ;;  %v14749_v29 = vld [vmem:[#allocation49_spill] sm:$0xff]  ;;  %v2482_v63 = vsel %vm1534_vm5, %v2474_v59, %v14750_v51  ;;  %v2475_v59 = vsel %vm380_vm2, %v8570_v19, %v14755_v41 }
 0x2cd   : > { %v2520_v50 = vsel %vm1579_vm11, %v2512_v48, %v14744_v61  ;;  %v14751_v61 = vld [vmem:[#allocation52_spill] sm:$0xff] }
 0x2ce   : > { %v2528_v34 = vsel %vm1588_vm10, %v2520_v50, %v10362_v60  ;;  %v2505_v60 = vsel %vm1561_vm8, %v2497_v9, %v14748_v27  ;;  %v2490_v50 = vsel %vm1543_vm6, %v2482_v63, %v14751_v61  ;;  %v14756_v27 = vld [vmem:[#allocation48_spill] sm:$0xff]  ;;  %v14758_v63 = vld [vmem:[#allocation43_spill] sm:$0xff] }
 0x2cf   : > { %v2552_v36 = vsel %vm1606_vm12, %v2528_v34, 0  ;;  %v2513_v24 = vsel %vm1570_vm9, %v2505_v60, %v14749_v29  ;;  %v2498_v60 = vsel %vm1552_vm7, %v2490_v50, %v14756_v27 }
 0x2d0   : > { %v10536_v3 = vand.u32 4294901760, %v2552_v36  ;;  %2008 = vmatmul.f32.vlgmr.msrb.gmra.mxu2 %v10037_v26  ;;  %2070 = vmatmul.f32.gmra.mxu3 %v10089_v11  ;;  %v2521_v9 = vsel %vm1579_vm11, %v2513_v24, %v14752_v17  ;;  %v14757_v24 = vld [vmem:[#allocation44_spill] sm:$0xff] }
 0x2d1   : > { %3350 = vrot.lane.b32.xlu0 %v10152_v22, %s8689_s28  ;;  %v2602_v22 = vsub.f32 %v10490_v33, %v2601_v23  ;;  %3318 = vrot.lane.b32.xlu1 %v10259_v56, %s8686_s25  ;;  %v2529_v26 = vsel %vm1588_vm10, %v2521_v9, %v2454_v18  ;;  %v3139_v18 = vld [vmem:[#allocation2 + $0x1d1] sm:$0xff]  ;;  %v2483_v51 = vsel %vm1534_vm5, %v2475_v59, %v14757_v24 }
 0x2d2   : > { %3326 = vrot.lane.b32.xlu2 %v10246_v13, %s8686_s25  ;;  %v10561_v29 = vsub.f32 %v2552_v36, %v10536_v3  ;;  %v2555_v13 = vsel %vm1606_vm12, %v2529_v26, 0  ;;  %v14759_v36 = vld [vmem:[#allocation62_spill] sm:$0xff]  ;;  %v14760_v26 = vld [vmem:[#allocation53_spill] sm:$0xff] }
 0x2d3   : > { %v10516_v10 = vpop.permute.xlu0 %3170  ;;  %v2603_v48 = vand.u32 4294901760, %v2602_v22  ;;  %v10545_v34 = vpop.permute.xlu1 %2459  ;;  %v10576_v50 = vand.u32 4294901760, %v2555_v13  ;;  %v2491_v19 = vsel %vm1543_vm6, %v2483_v51, %v14760_v26  ;;  %v3131_v24 = vld [vmem:[#allocation2 + $0x1d0] sm:$0xff] }
 0x2d4   : > { %14746 = vst [vmem:[#allocation63_spill] sm:$0xff] %v10516_v10  ;;  %v10552_v56 = vpop.permute.xlu2 %3196  ;;  %2722 = vmatmul.f32.gmra.mxu1 %v10479_v12  ;;  %v14538_v9 = vand.u32 4294901760, %v10561_v29 }
 0x2d5   : > { %2604 = vmatmul.f32.gmra.mxu0 %v2603_v48  ;;  %14753 = vst [vmem:[#allocation8_spill] sm:$0xff] %v10552_v56  ;;  %v2506_v48 = vsel %vm1561_vm8, %v2498_v60, %v14758_v63  ;;  %v8571_v63 = vld [vmem:[#allocation2 + $0x110] sm:$0xff] }
 0x2d6   : > { %v2514_v61 = vsel %vm1570_vm9, %v2506_v48, %v14759_v36  ;;  %v14766_v48 = vld [vmem:[#allocation51_spill] sm:$0xff] }
 0x2d7   : > { %v2522_v41 = vsel %vm1579_vm11, %v2514_v61, %v10311_v5  ;;  %v10599_v5 = vsub.f32 %v2555_v13, %v10576_v50  ;;  %v2476_v36 = vsel %vm380_vm2, %v8571_v63, %v14766_v48  ;;  %v14767_v61 = vld [vmem:[#allocation59_spill] sm:$0xff] }
 0x2d8   : > { %2012 = vmatmul.f32.gmra.mxu2 %v10089_v11  ;;  %2074 = vmatmul.f32.gmra.mxu3 %v10169_v43  ;;  %v2530_v27 = vsel %vm1588_vm10, %v2522_v41, %v10355_v47  ;;  %v2484_v13 = vsel %vm1534_vm5, %v2476_v36, %v14767_v61  ;;  %v14774_v61 = vld [vmem:[#allocation9_spill] sm:$0xff] }
 0x2d9   : > { %3356 = vrot.lane.b32.xlu0 %v10177_v57, %s8689_s28  ;;  %v2610_v57 = vsub.f32 %v10519_v52, %v14539_v54  ;;  %3324 = vrot.lane.b32.xlu1 %v10282_v55, %s8686_s25  ;;  %v14762_v55 = vld [vmem:[#allocation61_spill] sm:$0xff]  ;;  %v2558_v47 = vsel %vm1606_vm12, %v2530_v27, 0 }
 0x2da   : > { %3348 = vrot.lane.b32.xlu2 %v10173_v39, %s8689_s28  ;;  %v2499_v11 = vsel %vm1552_vm7, %v2491_v19, %v14762_v55  ;;  %v2618_v39 = vsub.f32 %v10561_v29, %v14538_v9  ;;  %v10615_v19 = vand.u32 4294901760, %v2558_v47  ;;  %v14537_v55 = vand.u32 4294901760, %v10599_v5  ;;  %v4026_v9 = vld [vmem:[#allocation2 + $0x1e2] sm:$0xff] }
 0x2db   : > { %v10554_v22 = vpop.permute.xlu0 %3192  ;;  %v2611_v17 = vand.u32 4294901760, %v2610_v57  ;;  %v10585_v59 = vpop.permute.xlu1 %3160 }
 0x2dc   : > { %14754 = vst [vmem:[#allocation55_spill] sm:$0xff] %v10554_v22  ;;  %v10594_v60 = vpop.permute.xlu2 %3202  ;;  %2726 = vmatmul.f32.gmra.mxu1 %v10500_v1  ;;  %v2619_v41 = vand.u32 4294901760, %v2618_v39 }
 0x2dd   : > { %14761 = vst [vmem:[#allocation7_spill] sm:$0xff] %v10585_v59  ;;  %2612 = vmatmul.f32.gmra.mxu0 %v2611_v17  ;;  %v14768_v17 = vld [vmem:[#allocation60_spill] sm:$0xff] }
 0x2de   : > { %14763 = vst [vmem:[#allocation11_spill] sm:$0xff] %v10594_v60 }
 0x2e0   : > { %2016 = vmatmul.f32.gmra.mxu2 %v10169_v43  ;;  %2078 = vmatmul.f32.gmra.mxu3 %v10233_v6 }
 0x2e1   : > { %3362 = vrot.lane.b32.xlu0 %v3139_v18, %s8689_s28  ;;  %v14765_v18 = vld [vmem:[#allocation54_spill] sm:$0xff]  ;;  %3330 = vrot.lane.b32.xlu1 %v3131_v24, %s8686_s25 }
 0x2e2   : > { %v2507_v51 = vsel %vm1561_vm8, %v2499_v11, %v14765_v18  ;;  %v14769_v11 = vld [vmem:[#allocation57_spill] sm:$0xff]  ;;  %3354 = vrot.lane.b32.xlu2 %v10191_v25, %s8689_s28  ;;  %v2626_v25 = vsub.f32 %v10599_v5, %v14537_v55 }
 0x2e3   : > { %v10596_v57 = vpop.permute.xlu0 %3198  ;;  %v2515_v26 = vsel %vm1570_vm9, %v2507_v51, %v14768_v17  ;;  %v2492_v27 = vsel %vm1543_vm6, %v2484_v13, %v14769_v11  ;;  %v10624_v63 = vpop.permute.xlu1 %3166  ;;  %v14772_v51 = vld [vmem:[#allocation56_spill] sm:$0xff] }
 0x2e4   : > { %14764 = vst [vmem:[#allocation16_spill] sm:$0xff] %v10596_v57  ;;  %v2523_v18 = vsel %vm1579_vm11, %v2515_v26, %v10425_v7  ;;  %v10632_v24 = vpop.permute.xlu2 %3224  ;;  %v2500_v48 = vsel %vm1552_vm7, %v2492_v27, %v14772_v51  ;;  %v10639_v7 = vsub.f32 %v2558_v47, %v10615_v19  ;;  %2730 = vmatmul.f32.gmra.mxu1 %v10536_v3  ;;  %v2627_v47 = vand.u32 4294901760, %v2626_v25  ;;  %v10797_v55 = vld [vmem:[#allocation2 + $0x221] sm:$0xff] }
 0x2e5   : > { %14770 = vst [vmem:[#allocation4_spill] sm:$0xff] %v10624_v63  ;;  %v2531_v43 = vsel %vm1588_vm10, %v2523_v18, %v10397_v15  ;;  %2620 = vmatmul.f32.gmra.mxu0 %v2619_v41  ;;  %v10856_v63 = vld [vmem:[#allocation2 + $0x202] sm:$0xff] }
 0x2e6   : > { %14771 = vst [vmem:[#allocation15_spill] sm:$0xff] %v10632_v24  ;;  %v2561_v36 = vsel %vm1606_vm12, %v2531_v43, 0  ;;  %v14536_v26 = vand.u32 4294901760, %v10639_v7 }
 0x2e7   : > { %v10652_v17 = vand.u32 4294901760, %v2561_v36  ;;  %14788 = vst [vmem:[#allocation19_spill] sm:$0xff] %v10797_v55 }
 0x2e8   : > { %2020 = vmatmul.f32.gmra.mxu2 %v10233_v6  ;;  %2082 = vmatmul.f32.gmra.mxu3 %v10274_v58 }
 0x2e9   : > { %3384 = vrot.lane.b32.xlu0 %v10211_v14, %s8688_s27  ;;  %v14773_v14 = vld [vmem:[#allocation64_spill] sm:$0xff]  ;;  %3352 = vrot.lane.b32.xlu1 %v10100_v45, %s8689_s28  ;;  %v10672_v18 = vsub.f32 %v2561_v36, %v10652_v17  ;;  %v10707_v36 = vld [vmem:[#allocation2 + $0x211] sm:$0xff] }
 0x2ea   : > { %v2508_v15 = vsel %vm1561_vm8, %v2500_v48, %v14773_v14  ;;  %3360 = vrot.lane.b32.xlu2 %v10303_v49, %s8689_s28  ;;  %v2634_v49 = vsub.f32 %v10639_v7, %v14536_v26 }
 0x2eb   : > { %v10634_v39 = vpop.permute.xlu0 %3220  ;;  %v2516_v13 = vsel %vm1570_vm9, %v2508_v15, %v14774_v61  ;;  %v10659_v11 = vpop.permute.xlu1 %3188  ;;  %v14535_v51 = vand.u32 4294901760, %v10672_v18 }
 0x2ec   : > { %v2524_v41 = vsel %vm1579_vm11, %v2516_v13, %v10307_v46  ;;  %v10667_v6 = vpop.permute.xlu2 %3230  ;;  %2734 = vmatmul.f32.gmra.mxu1 %v10576_v50  ;;  %v2635_v43 = vand.u32 4294901760, %v2634_v49 }
 0x2ed   : > { %v2532_v45 = vsel %vm1588_vm10, %v2524_v41, %v10545_v34  ;;  %2628 = vmatmul.f32.gmra.mxu0 %v2627_v47  ;;  %14775 = vst [vmem:[#allocation6_spill] sm:$0xff] %v10667_v6  ;;  %v3147_v47 = vld [vmem:[#allocation2 + $0x1d2] sm:$0xff]  ;;  %v10727_v41 = vld [vmem:[#allocation2 + $0x241] sm:$0xff] }
 0x2ee   : > { %v2564_v46 = vsel %vm1606_vm12, %v2532_v45, 0  ;;  %v10836_v6 = vld [vmem:[#allocation2 + $0x210] sm:$0xff] }
 0x2ef   : > { %v10681_v34 = vand.u32 4294901760, %v2564_v46  ;;  %14798 = vst [vmem:[#allocation36_spill] sm:$0xff] %v10836_v6 }
 0x2f0   : > { %2024 = vmatmul.f32.gmra.mxu2 %v10274_v58  ;;  %2086 = vmatmul.f32.gmra.mxu3 %v10332_v37  ;;  %v2642_v58 = vsub.f32 %v10672_v18, %v14535_v51 }
 0x2f1   : > { %3390 = vrot.lane.b32.xlu0 %v10237_v16, %s8688_s27  ;;  %v4018_v16 = vld [vmem:[#allocation2 + $0x1e1] sm:$0xff]  ;;  %3358 = vrot.lane.b32.xlu1 %v10128_v53, %s8689_s28  ;;  %v10696_v14 = vsub.f32 %v2564_v46, %v10681_v34 }
 0x2f2   : > { %3382 = vrot.lane.b32.xlu2 %v10231_v30, %s8688_s27  ;;  %v2643_v30 = vand.u32 4294901760, %v2642_v58 }
 0x2f3   : > { %v10669_v27 = vpop.permute.xlu0 %3226  ;;  %v10686_v48 = vpop.permute.xlu1 %3194  ;;  %v14534_v15 = vand.u32 4294901760, %v10696_v14 }
 0x2f4   : > { %14776 = vst [vmem:[#allocation17_spill] sm:$0xff] %v10669_v27  ;;  %v10691_v25 = vpop.permute.xlu2 %3252  ;;  %2738 = vmatmul.f32.gmra.mxu1 %v10615_v19  ;;  %v10896_v27 = vld [vmem:[#allocation2 + $0x200] sm:$0xff] }
 0x2f5   : > { %14777 = vst [vmem:[#allocation5_spill] sm:$0xff] %v10686_v48  ;;  %2636 = vmatmul.f32.gmra.mxu0 %v2635_v43  ;;  %v10750_v43 = vpop.f32.mrf.mxu1  ;;  %v14822_v48 = vand.u32 4294901760, %v10672_v18 }
 0x2f6   : > { %14814 = vst [vmem:[#allocation50_spill] sm:$0xff] %v10896_v27 }
 0x2f8   : > { %2028 = vmatmul.f32.gmra.mxu2 %v10332_v37  ;;  %2090 = vmatmul.f32.gmra.mxu3 %v10409_v44  ;;  %v2650_v37 = vsub.f32 %v10696_v14, %v14534_v15  ;;  %v10779_v15 = vld [vmem:[#allocation2 + $0x222] sm:$0xff] }
 0x2f9   : > { %4091 = vrot.lane.b32.xlu0 %v4018_v16, %s8684_s21  ;;  %3380 = vrot.lane.b32.xlu1 %v10157_v32, %s8688_s27  ;;  %v10748_v16 = vld [vmem:[#allocation2 + $0x1f2] sm:$0xff] }
 0x2fa   : > { %3388 = vrot.lane.b32.xlu2 %v10255_v2, %s8688_s27  ;;  %v2651_v2 = vand.u32 4294901760, %v2650_v37 }
 0x2fb   : > { %v10693_v53 = vpop.permute.xlu0 %3232  ;;  %v10709_v61 = vpop.permute.xlu1 %3200 }
 0x2fc   : > { %14778 = vst [vmem:[#allocation24_spill] sm:$0xff] %v10693_v53  ;;  %v10715_v13 = vpop.permute.xlu2 %3258  ;;  %2742 = vmatmul.f32.gmra.mxu1 %v10652_v17  ;;  %v10825_v53 = vld [vmem:[#allocation2 + $0x251] sm:$0xff] }
 0x2fd   : > { %14779 = vst [vmem:[#allocation18_spill] sm:$0xff] %v10709_v61  ;;  %2644 = vmatmul.f32.gmra.mxu0 %v2643_v30  ;;  %v10766_v30 = vld [vmem:[#allocation2 + $0x1f1] sm:$0xff]  ;;  %v10781_v51 = vpop.f32.mrf.mxu1 }
 0x2fe   : > { %14780 = vst [vmem:[#allocation10_spill] sm:$0xff] %v10715_v13 }
 0x2ff   : > { %14794 = vst [vmem:[#allocation22_spill] sm:$0xff] %v10825_v53 }
 0x300   : > { %2032 = vmatmul.f32.gmra.mxu2 %v10409_v44  ;;  %2094 = vmatmul.f32.gmra.mxu3 %v10411_v21  ;;  %v10746_v44 = vld [vmem:[#allocation2 + $0x201] sm:$0xff] }
 0x301   : > { %4097 = vrot.lane.b32.xlu0 %v10707_v36, %s8684_s21  ;;  %3386 = vrot.lane.b32.xlu1 %v10181_v4, %s8688_s27  ;;  %v10739_v4 = vpop.f32.mrf.mxu0 }
 0x302   : > { %3394 = vrot.lane.b32.xlu2 %v3147_v47, %s8688_s27  ;;  %v10772_v47 = vpop.f32.mrf.mxu2 }
 0x303   : > { %v10717_v32 = vpop.permute.xlu0 %3254  ;;  %v10729_v45 = vpop.permute.xlu1 %3222 }
 0x304   : > { %v10734_v49 = vpop.permute.xlu2 %3264  ;;  %2746 = vmatmul.f32.gmra.mxu1 %v10681_v34 }
 0x305   : > { %2652 = vmatmul.f32.gmra.mxu0 %v2651_v2  ;;  %14781 = vst [vmem:[#allocation13_spill] sm:$0xff] %v10734_v49  ;;  %v10777_v2 = vld [vmem:[#allocation2 + $0x231] sm:$0xff]  ;;  %v10808_v60 = vpop.f32.mrf.mxu1 }
 0x308   : > { %2036 = vmatmul.f32.gmra.mxu2 %v10411_v21  ;;  %2853 = vmatmul.f32.vlgmr.msra.gmra.mxu3 %v2593_v62 }
 0x309   : > { %4103 = vrot.lane.b32.xlu0 %v10727_v41, %s8684_s21  ;;  %3392 = vrot.lane.b32.xlu1 %v10455_v0, %s8688_s27  ;;  %v10758_v0 = vpop.f32.mrf.mxu3  ;;  %v10768_v37 = vpop.f32.mrf.mxu0 }
 0x30a   : > { %4095 = vrot.lane.b32.xlu2 %v10746_v44, %s8684_s21 }
 0x30b   : > { %v10736_v46 = vpop.permute.xlu0 %3260  ;;  %v10752_v58 = vpop.permute.xlu1 %3228 }
 0x30c   : > { %14782 = vst [vmem:[#allocation12_spill] sm:$0xff] %v10736_v46  ;;  %v10761_v21 = vpop.permute.xlu2 %3286  ;;  %3001 = vmatmul.f32.vlgmr.msra.gmra.mxu1 %v10419_v40  ;;  %v10865_v46 = vld [vmem:[#allocation2 + $0x242] sm:$0xff] }
 0x30d   : > { %14783 = vst [vmem:[#allocation20_spill] sm:$0xff] %v10752_v58  ;;  %2943 = vmatmul.f32.vlgmr.msra.gmra.mxu0 %v10419_v40  ;;  %v10867_v58 = vld [vmem:[#allocation2 + $0x240] sm:$0xff] }
 0x30e   : > { %14805 = vst [vmem:[#allocation46_spill] sm:$0xff] %v10865_v46 }
 0x30f   : > { %14806 = vst [vmem:[#allocation37_spill] sm:$0xff] %v10867_v58 }
 0x310   : > { %2786 = vmatmul.f32.vlgmr.msra.gmra.mxu2 %v10439_v31  ;;  %2859 = vmatmul.f32.gmra.mxu3 %v2601_v23 }
 0x311   : > { %4125 = vrot.lane.b32.xlu0 %v10748_v16, %s8685_s24  ;;  %4093 = vrot.lane.b32.xlu1 %v10766_v30, %s8684_s21  ;;  %v10789_v26 = vpop.f32.mrf.mxu3  ;;  %v10799_v54 = vpop.f32.mrf.mxu0 }
 0x312   : > { %4101 = vrot.lane.b32.xlu2 %v10777_v2, %s8684_s21 }
 0x313   : > { %v10763_v62 = vpop.permute.xlu0 %3266  ;;  %v10783_v40 = vpop.permute.xlu1 %3234 }
 0x314   : > { %14784 = vst [vmem:[#allocation31_spill] sm:$0xff] %v10763_v62  ;;  %v10792_v31 = vpop.permute.xlu2 %3292  ;;  %3005 = vmatmul.f32.gmra.mxu1 %v10479_v12  ;;  %v14789_v62 = vand.u32 4294901760, %v10519_v52 }
 0x315   : > { %14785 = vst [vmem:[#allocation14_spill] sm:$0xff] %v10783_v40  ;;  %2947 = vmatmul.f32.gmra.mxu0 %v10479_v12  ;;  %v10806_v40 = vld [vmem:[#allocation2 + $0x252] sm:$0xff]  ;;  %v10815_v12 = vpop.f32.mrf.mxu2 }
 0x316   : > { %14786 = vst [vmem:[#allocation25_spill] sm:$0xff] %v10792_v31  ;;  %v14804_v31 = vand.u32 4294901760, %v10599_v5 }
 0x317   : > { %14790 = vst [vmem:[#allocation26_spill] sm:$0xff] %v10806_v40 }
 0x318   : > { %2791 = vmatmul.f32.gmra.mxu2 %v10490_v33  ;;  %2865 = vmatmul.f32.gmra.mxu3 %v14789_v62 }
 0x319   : > { %4131 = vrot.lane.b32.xlu0 %v10779_v15, %s8685_s24  ;;  %4099 = vrot.lane.b32.xlu1 %v10797_v55, %s8684_s21  ;;  %v10817_v49 = vpop.f32.mrf.mxu3  ;;  %v10827_v61 = vpop.f32.mrf.mxu0 }
 0x31a   : > { %4123 = vrot.lane.b32.xlu2 %v4026_v9, %s8685_s24  ;;  %14795 = vst [vmem:[#allocation23_spill] sm:$0xff] %v10827_v61  ;;  %v14796_v9 = vand.u32 4294901760, %v10561_v29 }
 0x31b   : > { %v10794_v23 = vpop.permute.xlu0 %3288  ;;  %v10810_v10 = vpop.permute.xlu1 %3256 }
 0x31c   : > { %14787 = vst [vmem:[#allocation21_spill] sm:$0xff] %v10794_v23  ;;  %v10820_v33 = vpop.permute.xlu2 %3298  ;;  %3009 = vmatmul.f32.gmra.mxu1 %v10500_v1  ;;  %v3472_v23 = vld [vmem:[%s14522_s4 + $0x20] sm:$0xff] }
 0x31d   : > { %14791 = vst [vmem:[#allocation39_spill] sm:$0xff] %v10810_v10  ;;  %2951 = vmatmul.f32.gmra.mxu0 %v10500_v1  ;;  %v10846_v1 = vpop.f32.mrf.mxu2  ;;  %v10992_v10 = vand.u32 4294901760, %v3472_v23 }
 0x31e   : > { %14792 = vst [vmem:[#allocation28_spill] sm:$0xff] %v10820_v33  ;;  %v10838_v33 = vpop.f32.mrf.mxu1 }
 0x31f   : > { %14799 = vst [vmem:[#allocation27_spill] sm:$0xff] %v10838_v33 }
 0x320   : > { %2796 = vmatmul.f32.gmra.mxu2 %v10519_v52  ;;  %2871 = vmatmul.f32.gmra.mxu3 %v14796_v9 }
 0x321   : > { %4137 = vrot.lane.b32.xlu0 %v10806_v40, %s8685_s24  ;;  %4105 = vrot.lane.b32.xlu1 %v10825_v53, %s8684_s21  ;;  %v10848_v52 = vpop.f32.mrf.mxu3 }
 0x322   : > { %4129 = vrot.lane.b32.xlu2 %v10834_v35, %s8685_s24 }
 0x323   : > { %v10822_v62 = vpop.permute.xlu0 %3294 }
 0x324   : > { %14793 = vst [vmem:[#allocation32_spill] sm:$0xff] %v10822_v62  ;;  %v10840_v62 = vpop.permute.xlu1 %3262  ;;  %v10851_v9 = vpop.permute.xlu2 %3320  ;;  %3013 = vmatmul.f32.gmra.mxu1 %v10536_v3 }
 0x325   : > { %14800 = vst [vmem:[#allocation33_spill] sm:$0xff] %v10840_v62  ;;  %2955 = vmatmul.f32.gmra.mxu0 %v10536_v3  ;;  %v10858_v62 = vpop.f32.mrf.mxu0  ;;  %v10877_v3 = vpop.f32.mrf.mxu2 }
 0x326   : > { %14801 = vst [vmem:[#allocation30_spill] sm:$0xff] %v10851_v9  ;;  %v10869_v56 = vpop.f32.mrf.mxu1 }
 0x327   : > { %14803 = vst [vmem:[#allocation40_spill] sm:$0xff] %v10858_v62 }
 0x328   : > { %2801 = vmatmul.f32.gmra.mxu2 %v10561_v29  ;;  %2877 = vmatmul.f32.gmra.mxu3 %v14804_v31  ;;  %14807 = vst [vmem:[#allocation38_spill] sm:$0xff] %v10869_v56  ;;  %v10887_v56 = vld [vmem:[#allocation2 + $0x232] sm:$0xff] }
 0x329   : > { %4159 = vrot.lane.b32.xlu0 %v10836_v6, %s8694_s20  ;;  %4127 = vrot.lane.b32.xlu1 %v10856_v63, %s8685_s24  ;;  %v10879_v29 = vpop.f32.mrf.mxu3 }
 0x32a   : > { %4135 = vrot.lane.b32.xlu2 %v10865_v46, %s8685_s24  ;;  %14809 = vst [vmem:[#allocation49_spill] sm:$0xff] %v10879_v29 }
 0x32b   : > { %v10853_v57 = vpop.permute.xlu0 %3316 }
 0x32c   : > { %14802 = vst [vmem:[#allocation41_spill] sm:$0xff] %v10853_v57  ;;  %v10871_v38 = vpop.permute.xlu1 %3284  ;;  %v10882_v31 = vpop.permute.xlu2 %3326  ;;  %3017 = vmatmul.f32.gmra.mxu1 %v10576_v50 }
 0x32d   : > { %14808 = vst [vmem:[#allocation42_spill] sm:$0xff] %v10871_v38  ;;  %2959 = vmatmul.f32.gmra.mxu0 %v10576_v50  ;;  %v10889_v13 = vpop.f32.mrf.mxu0  ;;  %v10906_v50 = vpop.f32.mrf.mxu2 }
 0x32e   : > { %14810 = vst [vmem:[#allocation34_spill] sm:$0xff] %v10882_v31  ;;  %v10898_v46 = vpop.f32.mrf.mxu1 }
 0x32f   : > { %14812 = vst [vmem:[#allocation47_spill] sm:$0xff] %v10889_v13 }
 0x330   : > { %2806 = vmatmul.f32.gmra.mxu2 %v10599_v5  ;;  %14815 = vst [vmem:[#allocation48_spill] sm:$0xff] %v10898_v46  ;;  %v3476_v46 = vld [vmem:[%s14522_s4 + $0x40] sm:$0xff] }
 0x331   : > { %4165 = vrot.lane.b32.xlu0 %v10867_v58, %s8694_s20  ;;  %4133 = vrot.lane.b32.xlu1 %v10887_v56, %s8685_s24  ;;  %v14813_v58 = vand.u32 4294901760, %v10639_v7  ;;  %14817 = vst [vmem:[#allocation43_spill] sm:$0xff] %v10906_v50  ;;  %v10908_v13 = vpop.f32.mrf.mxu3  ;;  %v11021_v50 = vld [vmem:[#allocation2 + $0x260] sm:$0xff] }
 0x332   : > { %4157 = vrot.lane.b32.xlu2 %v10896_v27, %s8694_s20  ;;  %14818 = vst [vmem:[#allocation62_spill] sm:$0xff] %v10908_v13  ;;  %v10919_v27 = vand.u32 4294901760, %v3476_v46 }
 0x333   : > { %v10884_v6 = vpop.permute.xlu0 %3322  ;;  %2883 = vmatmul.f32.gmra.mxu3 %v14813_v58  ;;  %14831 = vst [vmem:[#allocation65_spill] sm:$0xff] %v11021_v50 }
 0x334   : > { %14811 = vst [vmem:[#allocation52_spill] sm:$0xff] %v10884_v6  ;;  %v10900_v31 = vpop.permute.xlu1 %3290  ;;  %v10911_v5 = vpop.permute.xlu2 %3348  ;;  %3021 = vmatmul.f32.gmra.mxu1 %v10615_v19  ;;  %v4034_v6 = vld [vmem:[#allocation2 + $0x1f0] sm:$0xff]  ;;  %v10925_v13 = vsub.f32 %v3476_v46, %v10919_v27  ;;  %3509 = vmatpush.msrb.mxu2 %v10919_v27 }
 0x335   : > { %14816 = vst [vmem:[#allocation44_spill] sm:$0xff] %v10900_v31  ;;  %2963 = vmatmul.f32.gmra.mxu0 %v10615_v19  ;;  %3768 = vmatpush.msrb.mxu1 %v10919_v27  ;;  %v3474_v19 = vld [vmem:[%s14522_s4 + $0x30] sm:$0xff] }
 0x336   : > { %14819 = vst [vmem:[#allocation53_spill] sm:$0xff] %v10911_v5  ;;  %v10940_v46 = vld [vmem:[#allocation2 + $0x230] sm:$0xff]  ;;  %v14547_v62 = vand.u32 4294901760, %v10925_v13  ;;  %v10946_v9 = vand.u32 4294901760, %v3474_v19  ;;  %3694 = vmatpush.msrb.mxu0 %v10925_v13 }
 0x337   : > { %14823 = vst [vmem:[#allocation51_spill] sm:$0xff] %v10940_v46 }
 0x338   : > { %2811 = vmatmul.f32.gmra.mxu2 %v10639_v7  ;;  %v3473_v7 = vld [vmem:[%s14522_s4 + $0x28] sm:$0xff] }
 0x339   : > { %4187 = vrot.lane.b32.xlu0 %v10766_v30, %s8693_s19  ;;  %v3475_v30 = vld [vmem:[%s14522_s4 + $0x38] sm:$0xff]  ;;  %4155 = vrot.lane.b32.xlu1 %v4034_v6, %s8694_s20 }
 0x33a   : > { %v10927_v31 = vand.u32 4294901760, %v3475_v30  ;;  %4163 = vrot.lane.b32.xlu2 %v10940_v46, %s8694_s20 }
 0x33b   : > { %v10913_v58 = vpop.permute.xlu0 %3328  ;;  %2889 = vmatmul.f32.gmra.mxu3 %v14822_v48  ;;  %v10959_v48 = vpop.f32.mrf.mxu2 }
 0x33c   : > { %14820 = vst [vmem:[#allocation61_spill] sm:$0xff] %v10913_v58  ;;  %v10932_v58 = vpop.f32.mrf.mxu0  ;;  %v10944_v28 = vsub.f32 %v3475_v30, %v10927_v31  ;;  %v10948_v6 = vpop.permute.xlu1 %3296  ;;  %v3601_v30 = vsub.f32 %v10925_v13, %v14547_v62  ;;  %3770 = vmatpush.msrb.mxu1 %v10927_v31  ;;  %3511 = vmatpush.msrb.mxu2 %v10927_v31 }
 0x33d   : > { %14821 = vst [vmem:[#allocation54_spill] sm:$0xff] %v10932_v58  ;;  %v10950_v58 = vpop.f32.mrf.mxu1  ;;  %2967 = vmatmul.f32.gmra.mxu0 %v10652_v17  ;;  %v10972_v46 = vpop.permute.xlu2 %3354  ;;  %3025 = vmatmul.f32.gmra.mxu1 %v10652_v17  ;;  %v3471_v17 = vld [vmem:[%s14522_s4 + $0x18] sm:$0xff] }
 0x33e   : > { %14824 = vst [vmem:[#allocation59_spill] sm:$0xff] %v10948_v6  ;;  %v14549_v6 = vand.u32 4294901760, %v10944_v28  ;;  %v3602_v62 = vand.u32 4294901760, %v3601_v30  ;;  %3697 = vmatpush.msrb.mxu0 %v10944_v28  ;;  %3772 = vmatpush.msrb.mxu1 %v10946_v9  ;;  %v10998_v30 = vld [vmem:[#allocation2 + $0x220] sm:$0xff]  ;;  %v11003_v5 = vand.u32 4294901760, %v3471_v17 }
 0x33f   : > { %14825 = vst [vmem:[#allocation60_spill] sm:$0xff] %v10950_v58  ;;  %v10967_v58 = vsub.f32 %v3474_v19, %v10946_v9  ;;  %3513 = vmatpush.msrb.mxu2 %v10946_v9 }
 0x340   : > { %14826 = vst [vmem:[#allocation57_spill] sm:$0xff] %v10959_v48  ;;  %v10975_v48 = vand.u32 4294901760, %v3473_v7  ;;  %3603 = vmatpush.msrb.mxu3 %v3602_v62  ;;  %v11013_v62 = vsub.f32 %v3472_v23, %v10992_v10  ;;  %2816 = vmatmul.f32.gmra.mxu2 %v10672_v18 }
 0x341   : > { %4193 = vrot.lane.b32.xlu0 %v10797_v55, %s8693_s19  ;;  %v10970_v55 = vpop.f32.mrf.mxu3  ;;  %14828 = vst [vmem:[#allocation64_spill] sm:$0xff] %v10972_v46  ;;  %v14550_v46 = vand.u32 4294901760, %v10967_v58  ;;  %4161 = vrot.lane.b32.xlu1 %v10998_v30, %s8694_s20 }
 0x342   : > { %14827 = vst [vmem:[#allocation56_spill] sm:$0xff] %v10970_v55  ;;  %v3607_v55 = vsub.f32 %v10944_v28, %v14549_v6  ;;  %v10990_v33 = vsub.f32 %v3473_v7, %v10975_v48  ;;  %3700 = vmatpush.msrb.mxu0 %v10967_v58  ;;  %4169 = vrot.lane.b32.xlu2 %v11021_v50, %s8694_s20 }
 0x343   : > { %v10982_v19 = vpop.permute.xlu0 %3350  ;;  %v3613_v6 = vsub.f32 %v10967_v58, %v14550_v46  ;;  %v14830_v46 = vand.u32 4294901760, %v10696_v14  ;;  %3774 = vmatpush.msrb.mxu1 %v10975_v48  ;;  %3515 = vmatpush.msrb.mxu2 %v10975_v48 }
 0x344   : > { %v3608_v40 = vand.u32 4294901760, %v3607_v55  ;;  %v11008_v7 = vpop.f32.mrf.mxu0  ;;  %v3470_v55 = vld [vmem:[%s14522_s4 + $0x10] sm:$0xff]  ;;  %v11028_v57 = vpop.permute.xlu1 %3318  ;;  %v14833_v18 = vand.u32 4294901760, %v10990_v33  ;;  %3703 = vmatpush.msrb.mxu0 %v10990_v33 }
 0x345   : > { %14829 = vst [vmem:[#allocation9_spill] sm:$0xff] %v11008_v7  ;;  %2895 = vmatmul.f32.gmra.mxu3 %v14830_v46  ;;  %v3614_v24 = vand.u32 4294901760, %v3613_v6  ;;  %v11024_v7 = vsub.f32 %v3471_v17, %v11003_v5  ;;  %v11026_v29 = vand.u32 4294901760, %v3470_v55  ;;  %v11030_v23 = vpop.f32.mrf.mxu1  ;;  %v14555_v6 = vand.u32 4294901760, %v11013_v62  ;;  %v3469_v17 = vld [vmem:[%s14522_s4 + $0x8] sm:$0xff]  ;;  %2971 = vmatmul.f32.gmra.mxu0 %v10681_v34 }
 0x346   : > { %14832 = vst [vmem:[#allocation66_spill] sm:$0xff] %v11030_v23  ;;  %v3619_v46 = vsub.f32 %v10990_v33, %v14833_v18  ;;  %3609 = vmatpush.msrb.mxu3 %v3608_v40  ;;  %v11048_v22 = vand.u32 4294901760, %v3469_v17  ;;  %v3468_v40 = vld [vmem:[%s14522_s4] sm:$0xff]  ;;  %3029 = vmatmul.f32.gmra.mxu1 %v10681_v34 }
 0x347   : > { %v11046_v50 = vsub.f32 %v3470_v55, %v11026_v29  ;;  %v3625_v38 = vsub.f32 %v11013_v62, %v14555_v6  ;;  %v11063_v55 = vpop.permute.xlu2 %3360  ;;  %3706 = vmatpush.msrb.mxu0 %v11013_v62  ;;  %3776 = vmatpush.msrb.mxu1 %v10992_v10  ;;  %v11076_v34 = vand.u32 4294901760, %v3468_v40 }
 0x348   : > { %v3620_v18 = vand.u32 4294901760, %v3619_v46  ;;  %14836 = vst [vmem:[#allocation69_spill] sm:$0xff] %v11063_v55  ;;  %3615 = vmatpush.msrb.mxu3 %v3614_v24  ;;  %v14838_v46 = vand.u32 4294901760, %v11024_v7  ;;  %v11078_v55 = vld [vmem:[#allocation2 + $0x250] sm:$0xff]  ;;  %2821 = vmatmul.f32.gmra.mxu2 %v10696_v14 }
 0x349   : > { %4199 = vrot.lane.b32.xlu0 %v10825_v53, %s8693_s19  ;;  %v11050_v53 = vpop.f32.mrf.mxu2  ;;  %v11052_v35 = vpop.f32.mrf.mxu3  ;;  %v14556_v6 = vand.u32 4294901760, %v11046_v50  ;;  %v3626_v59 = vand.u32 4294901760, %v3625_v38  ;;  %4167 = vrot.lane.b32.xlu1 %v11078_v55, %s8694_s20 }
 0x34a   : > { %14834 = vst [vmem:[#allocation67_spill] sm:$0xff] %v11050_v53  ;;  %v11072_v53 = vsub.f32 %v3469_v17, %v11048_v22  ;;  %3621 = vmatpush.msrb.mxu3 %v3620_v18  ;;  %3709 = vmatpush.msrb.mxu0 %v11024_v7 }
 0x34b   : > { %14835 = vst [vmem:[#allocation68_spill] sm:$0xff] %v11052_v35  ;;  %v11065_v23 = vpop.permute.xlu0 %3356  ;;  %v3631_v35 = vsub.f32 %v11024_v7, %v14838_v46  ;;  %v3637_v46 = vsub.f32 %v11046_v50, %v14556_v6  ;;  %4191 = vrot.lane.b32.xlu2 %v10707_v36, %s8693_s19  ;;  %3778 = vmatpush.msrb.mxu1 %v11003_v5 }
 0x34c   : > { %14837 = vst [vmem:[#allocation70_spill] sm:$0xff] %v11065_v23  ;;  %v14557_v17 = vand.u32 4294901760, %v11072_v53  ;;  %v11087_v38 = vpop.f32.mrf.mxu0  ;;  %v11091_v23 = vsub.f32 %v3468_v40, %v11076_v34  ;;  %3627 = vmatpush.msrb.mxu3 %v3626_v59  ;;  %v11097_v6 = vpop.permute.xlu1 %3324  ;;  %v1785_v59 = vadd.f32 %v10758_v0, %v10772_v47  ;;  %3712 = vmatpush.msrb.mxu0 %v11046_v50 }
 0x34d   : > { %v3632_v24 = vand.u32 4294901760, %v3631_v35  ;;  %14839 = vst [vmem:[#allocation71_spill] sm:$0xff] %v11087_v38  ;;  %v3638_v35 = vand.u32 4294901760, %v3637_v46  ;;  %v11099_v61 = vpop.f32.mrf.mxu1  ;;  %3517 = vmatpush.msrb.mxu2 %v10992_v10  ;;  %3780 = vmatpush.msrb.mxu1 %v11026_v29 }
 0x34e   : > { %v3643_v18 = vsub.f32 %v11072_v53, %v14557_v17  ;;  %14840 = vst [vmem:[#allocation72_spill] sm:$0xff] %v11099_v61  ;;  %v14558_v40 = vand.u32 4294901760, %v11091_v23  ;;  %3715 = vmatpush.msrb.mxu0 %v11072_v53  ;;  %v1853_v47 = vadd.f32 %v10739_v4, %v1785_v59  ;;  %v1789_v4 = vadd.f32 %v10789_v26, %v10815_v12  ;;  %v11162_v12 = vld [vmem:[%s14524_s6] ss:$0 sm:$0xff] }
 0x34f   : > { %3633 = vmatpush.msrb.mxu3 %v3632_v24  ;;  %v11116_v61 = vpop.permute.xlu2 %3382  ;;  %3519 = vmatpush.msrb.mxu2 %v11003_v5  ;;  %v14841_v26 = vand.u32 4294901760, %v10925_v13  ;;  %v14842_v13 = vand.u32 4294901760, %v10944_v28  ;;  %v14843_v28 = vand.u32 4294901760, %v10967_v58 }
 0x350   : > { %v3644_v14 = vand.u32 4294901760, %v3643_v18  ;;  %v3649_v36 = vsub.f32 %v11091_v23, %v14558_v40  ;;  %3718 = vmatpush.msrb.mxu0 %v11091_v23  ;;  %3782 = vmatpush.msrb.mxu1 %v11048_v22  ;;  %v1920_v59 = vadd.f32 %v10750_v43, %v1853_v47  ;;  %v1858_v43 = vadd.f32 %v10768_v37, %v1789_v4 }
 0x351   : > { %4221 = vrot.lane.b32.xlu0 %v10856_v63, %s8692_s18  ;;  %v11109_v46 = vpop.f32.mrf.mxu2  ;;  %v2067_v17 = vpop.f32.mrf.mxu3  ;;  %3639 = vmatpush.msrb.mxu3 %v3638_v35  ;;  %v1793_v37 = vadd.f32 %v10817_v49, %v10846_v1 }
 0x352   : > { %v3650_v0 = vand.u32 4294901760, %v3649_v36  ;;  %4189 = vrot.lane.b32.xlu1 %v10746_v44, %s8693_s19  ;;  %3521 = vmatpush.msrb.mxu2 %v11026_v29 }
 0x353   : > { %v11118_v38 = vpop.permute.xlu0 %3362  ;;  %3645 = vmatpush.msrb.mxu3 %v3644_v14  ;;  %4197 = vrot.lane.b32.xlu2 %v10727_v41, %s8693_s19  ;;  %v11148_v41 = vld [vmem:[%s14523_s5] ss:$0 sm:$0xff] }
 0x354   : > { %v11127_v24 = vpop.f32.mrf.mxu0  ;;  %v11131_v35 = vpop.permute.xlu1 %3330  ;;  %3784 = vmatpush.msrb.mxu1 %v11076_v34  ;;  %3523 = vmatpush.msrb.mxu2 %v11048_v22 }
 0x355   : > { %3651 = vmatpush.msrb.mxu3 %v3650_v0  ;;  %v11133_v18 = vpop.f32.mrf.mxu1 }
 0x356   : > { %3525 = vmatpush.msrb.mxu2 %v11076_v34 }
 0x357   : > { %3918 = vmatpush.msra.mxu3 %v10919_v27 }
 0x358   : > { %3844 = vmatpush.msra.mxu2 %v14841_v26 }
 0x359   : > { %4227 = vrot.lane.b32.xlu0 %v10887_v56, %s8692_s18  ;;  %v2009_v14 = vpop.f32.mrf.mxu2  ;;  %v2071_v36 = vpop.f32.mrf.mxu3  ;;  %3920 = vmatpush.msra.mxu3 %v10927_v31 }
 0x35a   : > { %v2010_v0 = vadd.f32 %v2009_v14, %v1920_v59  ;;  %v11150_v56 = vpop.permute.xlu2 %3388  ;;  %4195 = vrot.lane.b32.xlu1 %v10777_v2, %s8693_s19  ;;  %v11170_v59 = vld [vmem:[#allocation2 + $0x262] sm:$0xff]  ;;  %3848 = vmatpush.msra.mxu2 %v14842_v13  ;;  %v1926_v14 = vadd.f32 %v10781_v51, %v1858_v43  ;;  %v1863_v51 = vadd.f32 %v10799_v54, %v1793_v37  ;;  %v8572_v43 = vld [vmem:[#allocation2 + $0x150] sm:$0xff] }
 0x35b   : > { %v11152_v40 = vpop.permute.xlu0 %3384  ;;  %3922 = vmatpush.msra.mxu3 %v10946_v9  ;;  %4219 = vrot.lane.b32.xlu2 %v10748_v16, %s8692_s18  ;;  %v14844_v16 = vand.u32 4294901760, %v10990_v33  ;;  %v3405_v58 = vsel %vm380_vm2, %v8572_v43, %v10436_v42  ;;  %v3075_v33 = vld [vmem:[#allocation2 + $0x140] sm:$0xff] }
 0x35c   : > { %v2068_v27 = vadd.f32 %v2067_v17, %v2010_v0  ;;  %v11166_v47 = vpop.f32.mrf.mxu0  ;;  %v11176_v17 = vpop.permute.xlu1 %3352  ;;  %3852 = vmatpush.msra.mxu2 %v14843_v28 }
 0x35d   : > { %v11178_v4 = vpop.f32.mrf.mxu1  ;;  %3924 = vmatpush.msra.mxu3 %v10975_v48 }
 0x35e   : > { %v2102_v31 = vmul.f32 %v11148_v41, %v2068_v27  ;;  %3856 = vmatpush.msra.mxu2 %v14844_v16 }
 0x35f   : > { %3926 = vmatpush.msra.mxu3 %v10992_v10  ;;  %v3413_v10 = vsel %vm1534_vm5, %v3405_v58, %v10514_v8  ;;  %v14852_v58 = vld [vmem:[#allocation42_spill] sm:$0xff] }
 0x360   : > { %v2114_v9 = vadd.f32 %v11162_v12, %v2102_v31  ;;  %v11200_v31 = vld [vmem:[#allocation2 + $0x261] sm:$0xff]  ;;  %v3421_v42 = vsel %vm1543_vm6, %v3413_v10, %v10729_v45  ;;  %v1797_v45 = vadd.f32 %v10848_v52, %v10877_v3 }
 0x361   : > { %4233 = vrot.lane.b32.xlu0 %v11170_v59, %s8692_s18  ;;  %v2013_v49 = vpop.f32.mrf.mxu2  ;;  %v2075_v1 = vpop.f32.mrf.mxu3  ;;  %3928 = vmatpush.msra.mxu3 %v11003_v5  ;;  %v14846_v5 = vand.u32 4294901760, %v11024_v7  ;;  %v14847_v7 = vand.u32 4294901760, %v11046_v50  ;;  %v14855_v10 = vld [vmem:[#allocation41_spill] sm:$0xff] }
 0x362   : > { %v2122_v0 = vmax.f32 %v2114_v9, 0.0  ;;  %v2014_v26 = vadd.f32 %v2013_v49, %v1926_v14  ;;  %v11189_v27 = vpop.permute.xlu2 %3394  ;;  %v14845_v9 = vand.u32 4294901760, %v11013_v62  ;;  %4201 = vrot.lane.b32.xlu1 %v11200_v31, %s8693_s19  ;;  %v3429_v62 = vsel %vm1552_vm7, %v3421_v42, %v10717_v32  ;;  %v14856_v42 = vld [vmem:[#allocation15_spill] sm:$0xff] }
 0x363   : > { %v11191_v13 = vpop.permute.xlu0 %3390  ;;  %3930 = vmatpush.msra.mxu3 %v11026_v29  ;;  %v1932_v14 = vadd.f32 %v10808_v60, %v1863_v51  ;;  %4225 = vrot.lane.b32.xlu2 %v10779_v15, %s8692_s18  ;;  %v3437_v29 = vsel %vm1561_vm8, %v3429_v62, %v10761_v21  ;;  %v3404_v60 = vsel %vm380_vm2, %v3075_v33, %v10390_v20  ;;  %v14848_v20 = vand.u32 4294901760, %v11072_v53  ;;  %v14851_v53 = vld [vmem:[#allocation7_spill] sm:$0xff]  ;;  %v14858_v62 = vld [vmem:[#allocation49_spill] sm:$0xff] }
 0x364   : > { %2131 = vst.msk [vmem:[#allocation3 + $0x11] sm:$0xff] %vm380_vm2, %v2122_v0  ;;  %v2072_v48 = vadd.f32 %v2071_v36, %v2014_v26  ;;  %3860 = vmatpush.msra.mxu2 %v14845_v9  ;;  %v11209_v54 = vpop.f32.mrf.mxu0  ;;  %v11219_v8 = vpop.permute.xlu1 %3358  ;;  %v3445_v15 = vsel %vm1570_vm9, %v3437_v29, %v11028_v57  ;;  %v3412_v52 = vsel %vm1534_vm5, %v3404_v60, %v10659_v11  ;;  %v14849_v0 = vld [vmem:[#allocation23_spill] sm:$0xff]  ;;  %v14850_v51 = vand.u32 4294901760, %v11091_v23  ;;  %v14860_v60 = vld [vmem:[#allocation26_spill] sm:$0xff] }
 0x365   : > { %v11221_v37 = vpop.f32.mrf.mxu1  ;;  %3932 = vmatpush.msra.mxu3 %v11048_v22  ;;  %v3453_v21 = vsel %vm1579_vm11, %v3445_v15, %v10982_v19  ;;  %v3420_v57 = vsel %vm1543_vm6, %v3412_v52, %v10634_v39  ;;  %v1868_v26 = vadd.f32 %v14849_v0, %v1797_v45  ;;  %v14859_v45 = vld [vmem:[#allocation53_spill] sm:$0xff]  ;;  %v14861_v15 = vld [vmem:[#allocation39_spill] sm:$0xff] }
 0x366   : > { %v2103_v36 = vmul.f32 %v11148_v41, %v2072_v48  ;;  %3864 = vmatpush.msra.mxu2 %v14846_v5  ;;  %v3461_v11 = vsel %vm1588_vm10, %v3453_v21, %v11116_v61  ;;  %v3428_v19 = vsel %vm1552_vm7, %v3420_v57, %v10691_v25  ;;  %v14853_v61 = vld [vmem:[#allocation29_spill] sm:$0xff]  ;;  %v14854_v25 = vld [vmem:[#allocation55_spill] sm:$0xff] }
 0x367   : > { %3934 = vmatpush.msra.mxu3 %v11076_v34  ;;  %v8573_v34 = vld [vmem:[#allocation2 + $0x160] sm:$0xff]  ;;  %v3436_v39 = vsel %vm1561_vm8, %v3428_v19, %v14852_v58  ;;  %v3481_v23 = vsel %vm1606_vm12, %v3461_v11, 0  ;;  %v14857_v5 = vld [vmem:[#allocation43_spill] sm:$0xff] }
 0x368   : > { %v2115_v32 = vadd.f32 %v11162_v12, %v2103_v36  ;;  %3868 = vmatpush.msra.mxu2 %v14847_v7  ;;  %v3406_v43 = vsel %vm380_vm2, %v8573_v34, %v14851_v53  ;;  %v11294_v11 = vand.u32 4294901760, %v3481_v23 }
 0x369   : > { %4255 = vrot.lane.b32.xlu0 %v10998_v30, %s8686_s25  ;;  %v2017_v30 = vpop.f32.mrf.mxu2  ;;  %v2079_v28 = vpop.f32.mrf.mxu3  ;;  %v3414_v9 = vsel %vm1534_vm5, %v3406_v43, %v14854_v25  ;;  %v14866_v25 = vld [vmem:[#allocation35_spill] sm:$0xff] }
 0x36a   : > { %v2123_v3 = vmax.f32 %v2115_v32, 0.0  ;;  %v2018_v49 = vadd.f32 %v2017_v30, %v1932_v14  ;;  %v11244_v22 = vpop.permute.xlu2 %4095  ;;  %3872 = vmatpush.msra.mxu2 %v14848_v20  ;;  %4223 = vrot.lane.b32.xlu1 %v14853_v61, %s8692_s18  ;;  %v3422_v36 = vsel %vm1543_vm6, %v3414_v9, %v14856_v42  ;;  %v1801_v14 = vadd.f32 %v14858_v62, %v14857_v5  ;;  %v14863_v20 = vld [vmem:[#allocation21_spill] sm:$0xff] }
 0x36b   : > { %v11246_v50 = vpop.permute.xlu0 %4091  ;;  %4231 = vrot.lane.b32.xlu2 %v14860_v60, %s8692_s18  ;;  %v3430_v30 = vsel %vm1552_vm7, %v3422_v36, %v14861_v15  ;;  %v14868_v62 = vld [vmem:[#allocation5_spill] sm:$0xff] }
 0x36c   : > { %2132 = vst.msk [vmem:[#allocation3 + $0x21] sm:$0xff] %vm380_vm2, %v2123_v3  ;;  %v2076_v16 = vadd.f32 %v2075_v1, %v2018_v49  ;;  %3876 = vmatpush.msra.mxu2 %v14850_v51  ;;  %v11267_v48 = vpop.f32.mrf.mxu0  ;;  %v3444_v1 = vsel %vm1570_vm9, %v3436_v39, %v14855_v10  ;;  %v3381_v32 = vpop.permute.xlu1 %3380  ;;  %v14862_v3 = vld [vmem:[#allocation27_spill] sm:$0xff]  ;;  %v3438_v57 = vsel %vm1561_vm8, %v3430_v30, %v14863_v20  ;;  %v14864_v51 = vld [vmem:[#allocation30_spill] sm:$0xff]  ;;  %v14867_v10 = vld [vmem:[#allocation40_spill] sm:$0xff] }
 0x36d   : > { %v3452_v29 = vsel %vm1579_vm11, %v3444_v1, %v14859_v45  ;;  %v11281_v7 = vpop.f32.mrf.mxu1  ;;  %v1938_v49 = vadd.f32 %v14862_v3, %v1868_v26  ;;  %v8574_v26 = vld [vmem:[#allocation2 + $0x170] sm:$0xff]  ;;  %v1873_v1 = vadd.f32 %v14867_v10, %v1801_v14  ;;  %v14873_v20 = vld [vmem:[#allocation36_spill] sm:$0xff] }
 0x36e   : > { %v2104_v33 = vmul.f32 %v11148_v41, %v2076_v16  ;;  %v3460_v21 = vsel %vm1588_vm10, %v3452_v29, %v3381_v32  ;;  %v3407_v9 = vsel %vm380_vm2, %v8574_v26, %v14866_v25  ;;  %v3535_v29 = vsub.f32 %v3481_v23, %v11294_v11  ;;  %v14869_v14 = vld [vmem:[#allocation46_spill] sm:$0xff]  ;;  %v8575_v26 = vld [vmem:[#allocation2 + $0x180] sm:$0xff] }
 0x36f   : > { %v3478_v19 = vsel %vm1606_vm12, %v3460_v21, 0  ;;  %v3415_v45 = vsel %vm1534_vm5, %v3407_v9, %v14868_v62  ;;  %v14872_v23 = vld [vmem:[#allocation38_spill] sm:$0xff]  ;;  %v14878_v10 = vld [vmem:[#allocation52_spill] sm:$0xff] }
 0x370   : > { %v2116_v52 = vadd.f32 %v11162_v12, %v2104_v33  ;;  %v11299_v53 = vand.u32 4294901760, %v3478_v19  ;;  %v14877_v25 = vld [vmem:[#allocation58_spill] sm:$0xff] }
 0x371   : > { %4261 = vrot.lane.b32.xlu0 %v11078_v55, %s8686_s25  ;;  %v2021_v0 = vpop.f32.mrf.mxu2  ;;  %v2083_v16 = vpop.f32.mrf.mxu3  ;;  %v3446_v55 = vsel %vm1570_vm9, %v3438_v57, %v14864_v51  ;;  %v14874_v57 = vld [vmem:[#allocation44_spill] sm:$0xff]  ;;  %v14876_v51 = vld [vmem:[#allocation62_spill] sm:$0xff]  ;;  %v3408_v9 = vsel %vm380_vm2, %v8575_v26, %v14877_v25 }
 0x372   : > { %v2124_v34 = vmax.f32 %v2116_v52, 0.0  ;;  %v2022_v43 = vadd.f32 %v2021_v0, %v1938_v49  ;;  %v11301_v58 = vpop.permute.xlu2 %4101  ;;  %v3454_v33 = vsel %vm1579_vm11, %v3446_v55, %v11176_v17  ;;  %v3527_v36 = vsub.f32 %v3478_v19, %v11299_v53  ;;  %3653 = vmatmul.f32.vlgmr.msrb.gmra.mxu3 %v11299_v53  ;;  %4229 = vrot.lane.b32.xlu1 %v14869_v14, %s8692_s18  ;;  %v14870_v17 = vld [vmem:[#allocation17_spill] sm:$0xff]  ;;  %v14885_v26 = vld [vmem:[#allocation12_spill] sm:$0xff] }
 0x373   : > { %14865 = vst [vmem:[#allocation23_spill] sm:$0xff] %v11301_v58  ;;  %v11303_v39 = vpop.permute.xlu0 %4097  ;;  %v3462_v42 = vsel %vm1588_vm10, %v3454_v33, %v11152_v40  ;;  %v3423_v40 = vsel %vm1543_vm6, %v3415_v45, %v14870_v17  ;;  %v1944_v49 = vadd.f32 %v14872_v23, %v1873_v1  ;;  %4253 = vrot.lane.b32.xlu2 %v14873_v20, %s8686_s25  ;;  %v14875_v0 = vld [vmem:[#allocation57_spill] sm:$0xff]  ;;  %v14882_v23 = vld [vmem:[#allocation47_spill] sm:$0xff] }
 0x374   : > { %2133 = vst.msk [vmem:[#allocation3 + $0x31] sm:$0xff] %vm380_vm2, %v2124_v34  ;;  %v2080_v5 = vadd.f32 %v2079_v28, %v2022_v43  ;;  %v11320_v32 = vpop.f32.mrf.mxu0  ;;  %v3528_v60 = vand.u32 4294901760, %v3527_v36  ;;  %3721 = vmatmul.f32.vlgmr.msrb.gmra.mxu0 %v3527_v36  ;;  %v14871_v28 = vld [vmem:[#allocation10_spill] sm:$0xff]  ;;  %v3484_v52 = vsel %vm1606_vm12, %v3462_v42, 0  ;;  %v3387_v21 = vpop.permute.xlu1 %3386  ;;  %v1805_v55 = vadd.f32 %v14876_v51, %v14875_v0 }
 0x375   : > { %v3431_v30 = vsel %vm1552_vm7, %v3423_v40, %v14871_v28  ;;  %v11328_v3 = vpop.f32.mrf.mxu1  ;;  %v14881_v28 = vld [vmem:[#allocation64_spill] sm:$0xff]  ;;  %v14884_v51 = vld [vmem:[#allocation50_spill] sm:$0xff] }
 0x376   : > { %v2105_v15 = vmul.f32 %v11148_v41, %v2080_v5  ;;  %v3439_v19 = vsel %vm1561_vm8, %v3431_v30, %v14874_v57  ;;  %v3529_v34 = vsub.f32 %v3527_v36, %v3528_v60  ;;  %3788 = vmatmul.f32.vlgmr.msrb.gmra.mxu1 %v3528_v60  ;;  %v11344_v5 = vand.u32 4294901760, %v3484_v52  ;;  %v14880_v60 = vld [vmem:[#allocation8_spill] sm:$0xff] }
 0x377   : > { %v3447_v1 = vsel %vm1570_vm9, %v3439_v19, %v14878_v10  ;;  %v1878_v20 = vadd.f32 %v14882_v23, %v1805_v55 }
 0x378   : > { %v2117_v43 = vadd.f32 %v11162_v12, %v2105_v15  ;;  %v3530_v62 = vand.u32 4294901760, %v3529_v34  ;;  %v3416_v15 = vsel %vm1534_vm5, %v3408_v9, %v14880_v60  ;;  %v3455_v30 = vsel %vm1579_vm11, %v3447_v1, %v14881_v28 }
 0x379   : > { %4283 = vrot.lane.b32.xlu0 %v10746_v44, %s8689_s28  ;;  %v2025_v33 = vpop.f32.mrf.mxu2  ;;  %v2087_v42 = vpop.f32.mrf.mxu3  ;;  %v3536_v44 = vand.u32 4294901760, %v3535_v29  ;;  %v3463_v57 = vsel %vm1588_vm10, %v3455_v30, %v3387_v21  ;;  %v3543_v25 = vsub.f32 %v3484_v52, %v11344_v5  ;;  %v14889_v52 = vld [vmem:[#allocation56_spill] sm:$0xff]  ;;  %v14891_v30 = vld [vmem:[#allocation70_spill] sm:$0xff] }
 0x37a   : > { %v2125_v45 = vmax.f32 %v2117_v43, 0.0  ;;  %v2026_v17 = vadd.f32 %v2025_v33, %v1944_v49  ;;  %v11346_v40 = vpop.permute.xlu2 %4123  ;;  %3531 = vmatmul.f32.vlgmr.msrb.gmra.mxu2 %v3530_v62  ;;  %3657 = vmatmul.f32.gmra.mxu3 %v11294_v11  ;;  %v14883_v49 = vld [vmem:[#allocation20_spill] sm:$0xff]  ;;  %v3487_v10 = vsel %vm1606_vm12, %v3463_v57, 0  ;;  %v14887_v62 = vld [vmem:[#allocation37_spill] sm:$0xff] }
 0x37b   : > { %v11348_v36 = vpop.permute.xlu0 %4103  ;;  %v3424_v0 = vsel %vm1543_vm6, %v3416_v15, %v14883_v49  ;;  %4251 = vrot.lane.b32.xlu1 %v14884_v51, %s8686_s25  ;;  %v3537_v43 = vsub.f32 %v3535_v29, %v3536_v44  ;;  %4259 = vrot.lane.b32.xlu2 %v14887_v62, %s8686_s25  ;;  %v14890_v15 = vld [vmem:[#allocation48_spill] sm:$0xff] }
 0x37c   : > { %14879 = vst [vmem:[#allocation7_spill] sm:$0xff] %v11348_v36  ;;  %v2084_v19 = vadd.f32 %v2083_v16, %v2026_v17  ;;  %v11362_v34 = vpop.f32.mrf.mxu0  ;;  %v3432_v55 = vsel %vm1552_vm7, %v3424_v0, %v14885_v26  ;;  %3726 = vmatmul.f32.gmra.mxu0 %v3535_v29  ;;  %v14886_v16 = vld [vmem:[#allocation25_spill] sm:$0xff]  ;;  %v11371_v1 = vpop.permute.xlu1 %3392  ;;  %v1950_v28 = vadd.f32 %v14890_v15, %v1878_v20  ;;  %v11387_v0 = vand.u32 4294901760, %v3487_v10 }
 0x37d   : > { %2134 = vst.msk [vmem:[#allocation3 + $0x41] sm:$0xff] %vm380_vm2, %v2125_v45  ;;  %v3440_v9 = vsel %vm1561_vm8, %v3432_v55, %v14886_v16  ;;  %v11373_v33 = vpop.f32.mrf.mxu1  ;;  %v14888_v45 = vld [vmem:[#allocation67_spill] sm:$0xff]  ;;  %v3538_v49 = vand.u32 4294901760, %v3537_v43  ;;  %v3544_v55 = vand.u32 4294901760, %v3543_v25  ;;  %v14894_v43 = vld [vmem:[#allocation54_spill] sm:$0xff] }
 0x37e   : > { %v2106_v21 = vmul.f32 %v11148_v41, %v2084_v19  ;;  %v1809_v17 = vadd.f32 %v14889_v52, %v14888_v45  ;;  %v3448_v29 = vsel %vm1570_vm9, %v3440_v9, %v11097_v6  ;;  %3794 = vmatmul.f32.gmra.mxu1 %v3536_v44  ;;  %v8576_v6 = vld [vmem:[#allocation2 + $0x190] sm:$0xff]  ;;  %v14893_v9 = vld [vmem:[#allocation16_spill] sm:$0xff] }
 0x37f   : > { %v3456_v23 = vsel %vm1579_vm11, %v3448_v29, %v14891_v30  ;;  %v4066_v29 = vld [vmem:[#allocation2 + $0x270] sm:$0xff] }
 0x380   : > { %v2118_v60 = vadd.f32 %v11162_v12, %v2106_v21  ;;  %v14892_v21 = vld [vmem:[#allocation4_spill] sm:$0xff]  ;;  %v3464_v20 = vsel %vm1588_vm10, %v3456_v23, %v11150_v56  ;;  %v1883_v45 = vadd.f32 %v14894_v43, %v1809_v17  ;;  %v3551_v23 = vsub.f32 %v3487_v10, %v11387_v0  ;;  %v14902_v43 = vld [vmem:[#allocation34_spill] sm:$0xff] }
 0x381   : > { %4289 = vrot.lane.b32.xlu0 %v10777_v2, %s8689_s28  ;;  %v2029_v57 = vpop.f32.mrf.mxu2  ;;  %v2091_v19 = vpop.f32.mrf.mxu3  ;;  %v3409_v44 = vsel %vm380_vm2, %v8576_v6, %v14892_v21  ;;  %v3490_v56 = vsel %vm1606_vm12, %v3464_v20, 0  ;;  %v14898_v6 = vld [vmem:[#allocation22_spill] sm:$0xff]  ;;  %v14899_v21 = vld [vmem:[#allocation32_spill] sm:$0xff] }
 0x382   : > { %v2126_v2 = vmax.f32 %v2118_v60, 0.0  ;;  %v2030_v51 = vadd.f32 %v2029_v57, %v1950_v28  ;;  %v11389_v26 = vpop.permute.xlu2 %4129  ;;  %v3417_v62 = vsel %vm1534_vm5, %v3409_v44, %v14893_v9  ;;  %3539 = vmatmul.f32.gmra.mxu2 %v3538_v49  ;;  %3661 = vmatmul.f32.gmra.mxu3 %v11344_v5  ;;  %v14895_v60 = vld [vmem:[#allocation6_spill] sm:$0xff]  ;;  %v14896_v28 = vld [vmem:[#allocation51_spill] sm:$0xff]  ;;  %v14897_v57 = vld [vmem:[#allocation33_spill] sm:$0xff] }
 0x383   : > { %v11391_v16 = vpop.permute.xlu0 %4125  ;;  %v3425_v15 = vsel %vm1543_vm6, %v3417_v62, %v14895_v60  ;;  %4257 = vrot.lane.b32.xlu1 %v14896_v28, %s8686_s25  ;;  %4265 = vrot.lane.b32.xlu2 %v4066_v29, %s8686_s25  ;;  %v14900_v10 = vld [vmem:[#allocation68_spill] sm:$0xff]  ;;  %v11428_v60 = vand.u32 4294901760, %v3490_v56 }
 0x384   : > { %2135 = vst.msk [vmem:[#allocation3 + $0x51] sm:$0xff] %vm380_vm2, %v2126_v2  ;;  %v2088_v52 = vadd.f32 %v2087_v42, %v2030_v51  ;;  %v11406_v30 = vpop.f32.mrf.mxu0  ;;  %3731 = vmatmul.f32.gmra.mxu0 %v3543_v25  ;;  %v3545_v42 = vsub.f32 %v3543_v25, %v3544_v55  ;;  %v3433_v49 = vsel %vm1552_vm7, %v3425_v15, %v14897_v57  ;;  %v11413_v2 = vpop.permute.xlu1 %4093  ;;  %v14901_v9 = vld [vmem:[#allocation60_spill] sm:$0xff] }
 0x385   : > { %v11415_v51 = vpop.f32.mrf.mxu1  ;;  %v3441_v44 = vsel %vm1561_vm8, %v3433_v49, %v14899_v21  ;;  %v1813_v20 = vadd.f32 %v14900_v10, %v11109_v46  ;;  %v1956_v62 = vadd.f32 %v14901_v9, %v1883_v45  ;;  %v3552_v49 = vand.u32 4294901760, %v3551_v23  ;;  %v8577_v46 = vld [vmem:[#allocation2 + $0x1a0] sm:$0xff] }
 0x386   : > { %v2107_v17 = vmul.f32 %v11148_v41, %v2088_v52  ;;  %3800 = vmatmul.f32.gmra.mxu1 %v3544_v55  ;;  %v3449_v52 = vsel %vm1570_vm9, %v3441_v44, %v14902_v43  ;;  %v14906_v44 = vld [vmem:[#allocation9_spill] sm:$0xff] }
 0x387   : > { %v3457_v45 = vsel %vm1579_vm11, %v3449_v52, %v11219_v8  ;;  %v1888_v10 = vadd.f32 %v14906_v44, %v1813_v20  ;;  %v14909_v8 = vld [vmem:[#allocation24_spill] sm:$0xff] }
 0x388   : > { %v2119_v25 = vadd.f32 %v11162_v12, %v2107_v17  ;;  %v14905_v17 = vld [vmem:[#allocation45_spill] sm:$0xff]  ;;  %v3465_v9 = vsel %vm1588_vm10, %v3457_v45, %v11191_v13 }
 0x389   : > { %4293 = vrot.lane.b32.xlu0 %v14898_v6, %s8689_s28  ;;  %v2033_v29 = vpop.f32.mrf.mxu2  ;;  %v2095_v15 = vpop.f32.mrf.mxu3  ;;  %v3546_v6 = vand.u32 4294901760, %v3545_v42  ;;  %v3410_v55 = vsel %vm380_vm2, %v8577_v46, %v14905_v17  ;;  %v14908_v46 = vld [vmem:[#allocation65_spill] sm:$0xff] }
 0x38a   : > { %v2127_v28 = vmax.f32 %v2119_v25, 0.0  ;;  %v2034_v57 = vadd.f32 %v2033_v29, %v1956_v62  ;;  %v11430_v36 = vpop.permute.xlu2 %4135  ;;  %3665 = vmatmul.f32.gmra.mxu3 %v11387_v0  ;;  %v4074_v25 = vld [vmem:[#allocation2 + $0x271] sm:$0xff]  ;;  %v3559_v29 = vsub.f32 %v3490_v56, %v11428_v60 }
 0x38b   : > { %14903 = vst [vmem:[#allocation42_spill] sm:$0xff] %v11430_v36  ;;  %v11432_v21 = vpop.permute.xlu0 %4131  ;;  %3547 = vmatmul.f32.gmra.mxu2 %v3546_v6  ;;  %v14907_v62 = vld [vmem:[#allocation18_spill] sm:$0xff]  ;;  %4263 = vrot.lane.b32.xlu1 %v14908_v46, %s8686_s25  ;;  %v3493_v6 = vsel %vm1606_vm12, %v3465_v9, 0  ;;  %v14911_v56 = vld [vmem:[#allocation19_spill] sm:$0xff] }
 0x38c   : > { %14904 = vst [vmem:[#allocation29_spill] sm:$0xff] %v11432_v21  ;;  %v2092_v42 = vadd.f32 %v2091_v19, %v2034_v57  ;;  %v3418_v43 = vsel %vm1534_vm5, %v3410_v55, %v14907_v62  ;;  %v11451_v52 = vpop.f32.mrf.mxu0  ;;  %3736 = vmatmul.f32.gmra.mxu0 %v3551_v23  ;;  %v3553_v19 = vsub.f32 %v3551_v23, %v3552_v49  ;;  %v11456_v17 = vpop.permute.xlu1 %4099  ;;  %v14912_v55 = vld [vmem:[#allocation59_spill] sm:$0xff]  ;;  %v14913_v23 = vld [vmem:[#allocation66_spill] sm:$0xff] }
 0x38d   : > { %2136 = vst.msk [vmem:[#allocation3 + $0x61] sm:$0xff] %vm380_vm2, %v2127_v28  ;;  %v3426_v20 = vsel %vm1543_vm6, %v3418_v43, %v14909_v8  ;;  %v14910_v28 = vld [vmem:[#allocation13_spill] sm:$0xff]  ;;  %4287 = vrot.lane.b32.xlu2 %v14911_v56, %s8689_s28  ;;  %v1962_v62 = vadd.f32 %v14913_v23, %v1888_v10 }
 0x38e   : > { %v2108_v13 = vmul.f32 %v11148_v41, %v2092_v42  ;;  %v3434_v57 = vsel %vm1552_vm7, %v3426_v20, %v14910_v28  ;;  %v11464_v42 = vpop.f32.mrf.mxu1  ;;  %3806 = vmatmul.f32.gmra.mxu1 %v3552_v49  ;;  %v14914_v43 = vld [vmem:[#allocation61_spill] sm:$0xff]  ;;  %v3560_v20 = vand.u32 4294901760, %v3559_v29  ;;  %v11469_v28 = vand.u32 4294901760, %v3493_v6 }
 0x38f   : > { %v3442_v45 = vsel %vm1561_vm8, %v3434_v57, %v14912_v55  ;;  %v3554_v36 = vand.u32 4294901760, %v3553_v19  ;;  %v14916_v55 = vld [vmem:[#allocation63_spill] sm:$0xff]  ;;  %v14917_v10 = vld [vmem:[#allocation69_spill] sm:$0xff] }
 0x390   : > { %v2120_v44 = vadd.f32 %v11162_v12, %v2108_v13  ;;  %v3450_v9 = vsel %vm1570_vm9, %v3442_v45, %v14914_v43  ;;  %v8578_v13 = vld [vmem:[#allocation2 + $0x1b0] sm:$0xff]  ;;  %v14918_v45 = vld [vmem:[#allocation11_spill] sm:$0xff] }
 0x391   : > { %4297 = vrot.lane.b32.xlu0 %v4074_v25, %s8689_s28  ;;  %v2037_v46 = vpop.f32.mrf.mxu2  ;;  %v2854_v8 = vpop.f32.mrf.mxu3  ;;  %v3411_v49 = vsel %vm380_vm2, %v8578_v13, %v14916_v55  ;;  %v3458_v23 = vsel %vm1579_vm11, %v3450_v9, %v14917_v10  ;;  %v3561_v13 = vsub.f32 %v3559_v29, %v3560_v20  ;;  %v14920_v9 = vld [vmem:[#allocation31_spill] sm:$0xff] }
 0x392   : > { %v2128_v56 = vmax.f32 %v2120_v44, 0.0  ;;  %v2038_v25 = vadd.f32 %v2037_v46, %v1962_v62  ;;  %v11471_v58 = vpop.permute.xlu2 %4157  ;;  %v3419_v43 = vsel %vm1534_vm5, %v3411_v49, %v14918_v45  ;;  %v3466_v21 = vsel %vm1588_vm10, %v3458_v23, %v11371_v1  ;;  %3669 = vmatmul.f32.gmra.mxu3 %v11428_v60  ;;  %v4068_v44 = vld [vmem:[#allocation2 + $0x211] sm:$0xff]  ;;  %v14924_v23 = vld [vmem:[#allocation72_spill] sm:$0xff] }
 0x393   : > { %v11473_v57 = vpop.permute.xlu0 %4137  ;;  %3555 = vmatmul.f32.gmra.mxu2 %v3554_v36  ;;  %v14919_v62 = vld [vmem:[#allocation14_spill] sm:$0xff]  ;;  %4285 = vrot.lane.b32.xlu1 %v4068_v44, %s8689_s28  ;;  %v3567_v49 = vsub.f32 %v3493_v6, %v11469_v28  ;;  %v14923_v10 = vld [vmem:[#allocation71_spill] sm:$0xff]  ;;  %v3562_v44 = vand.u32 4294901760, %v3561_v13 }
 0x394   : > { %14915 = vst [vmem:[#allocation55_spill] sm:$0xff] %v11473_v57  ;;  %v2096_v19 = vadd.f32 %v2095_v15, %v2038_v25  ;;  %v3427_v46 = vsel %vm1543_vm6, %v3419_v43, %v14919_v62  ;;  %3741 = vmatmul.f32.gmra.mxu0 %v3559_v29  ;;  %v3496_v15 = vsel %vm1606_vm12, %v3466_v21, 0  ;;  %v11495_v25 = vpop.permute.xlu1 %4105  ;;  %v2720_v45 = vadd.f32 %v14924_v23, %v14923_v10  ;;  %v2948_v6 = vpop.f32.mrf.mxu0  ;;  %v4082_v13 = vld [vmem:[#allocation2 + $0x272] sm:$0xff]  ;;  %v11699_v57 = vld [vmem:[#allocation3 + $0x21] sm:$0xff] }
 0x395   : > { %2137 = vst.msk [vmem:[#allocation3 + $0x71] sm:$0xff] %vm380_vm2, %v2128_v56  ;;  %v3435_v55 = vsel %vm1552_vm7, %v3427_v46, %v14920_v9  ;;  %v14921_v56 = vld [vmem:[#allocation28_spill] sm:$0xff]  ;;  %4315 = vrot.lane.b32.xlu2 %v10856_v63, %s8688_s27  ;;  %v11508_v63 = vand.u32 4294901760, %v3496_v15  ;;  %v3568_v9 = vand.u32 4294901760, %v3567_v49  ;;  %v2724_v23 = vadd.f32 %v11133_v18, %v11127_v24 }
 0x396   : > { %v2109_v1 = vmul.f32 %v11148_v41, %v2096_v19  ;;  %v3443_v36 = vsel %vm1561_vm8, %v3435_v55, %v14921_v56  ;;  %14922 = vst [vmem:[#allocation41_spill] sm:$0xff] %v11495_v25  ;;  %3812 = vmatmul.f32.gmra.mxu1 %v3560_v20 }
 0x397   : > { %v3451_v41 = vsel %vm1570_vm9, %v3443_v36, %v11131_v35  ;;  %v3575_v56 = vsub.f32 %v3496_v15, %v11508_v63 }
 0x398   : > { %v2121_v29 = vadd.f32 %v11162_v12, %v2109_v1  ;;  %v3459_v21 = vsel %vm1579_vm11, %v3451_v41, %v11118_v38  ;;  %v3006_v12 = vpop.f32.mrf.mxu1  ;;  %v4071_v38 = vld [vmem:[#allocation2 + $0x241] sm:$0xff] }
 0x399   : > { %4323 = vrot.lane.b32.xlu0 %v14869_v14, %s8688_s27  ;;  %v2787_v43 = vpop.f32.mrf.mxu2  ;;  %v2860_v19 = vpop.f32.mrf.mxu3  ;;  %v3467_v35 = vsel %vm1588_vm10, %v3459_v21, %v11189_v27  ;;  %v11525_v27 = vld [vmem:[%s14523_s5] ss:$0 sm:$0xff] }
 0x39a   : > { %v2129_v62 = vmax.f32 %v2121_v29, 0.0  ;;  %v2788_v14 = vadd.f32 %v2787_v43, %v2720_v45  ;;  %v11510_v46 = vpop.permute.xlu2 %4163  ;;  %3673 = vmatmul.f32.gmra.mxu3 %v11469_v28  ;;  %v3499_v1 = vsel %vm1606_vm12, %v3467_v35, 0 }
 0x39b   : > { %v11512_v55 = vpop.permute.xlu0 %4159  ;;  %3563 = vmatmul.f32.gmra.mxu2 %v3562_v44  ;;  %4291 = vrot.lane.b32.xlu1 %v4071_v38, %s8689_s28  ;;  %v11540_v45 = vand.u32 4294901760, %v3499_v1  ;;  %v3576_v44 = vand.u32 4294901760, %v3575_v56 }
 0x39c   : > { %2138 = vst.msk [vmem:[#allocation3 + $0x81] sm:$0xff] %vm380_vm2, %v2129_v62  ;;  %v2855_v20 = vadd.f32 %v2854_v8, %v2788_v14  ;;  %3746 = vmatmul.f32.gmra.mxu0 %v3567_v49  ;;  %v3569_v8 = vsub.f32 %v3567_v49, %v3568_v9  ;;  %v11527_v10 = vpop.permute.xlu1 %4127  ;;  %v2952_v18 = vpop.f32.mrf.mxu0  ;;  %v11549_v14 = vld [vmem:[#allocation3 + $0x1e1] sm:$0xff] }
 0x39d   : > { %4317 = vrot.lane.b32.xlu2 %v14853_v61, %s8688_s27  ;;  %v3583_v35 = vsub.f32 %v3499_v1, %v11540_v45 }
 0x39e   : > { %v2945_v36 = vadd.f32 %v11451_v52, %v2855_v20  ;;  %v11538_v52 = vld [vmem:[%s14524_s6] ss:$0 sm:$0xff]  ;;  %3818 = vmatmul.f32.gmra.mxu1 %v3568_v9  ;;  %v3570_v21 = vand.u32 4294901760, %v3569_v8 }
 0x3a0   : > { %v3003_v15 = vadd.f32 %v11464_v42, %v2945_v36  ;;  %v3010_v9 = vpop.f32.mrf.mxu1  ;;  %v4078_v36 = vld [vmem:[#allocation2 + $0x232] sm:$0xff] }
 0x3a1   : > { %4329 = vrot.lane.b32.xlu0 %v4082_v13, %s8688_s27  ;;  %v2792_v49 = vpop.f32.mrf.mxu2  ;;  %v2866_v41 = vpop.f32.mrf.mxu3  ;;  %v3577_v13 = vsub.f32 %v3575_v56, %v3576_v44 }
 0x3a2   : > { %v3037_v29 = vmul.f32 %v11525_v27, %v3003_v15  ;;  %v2793_v61 = vadd.f32 %v2792_v49, %v2724_v23  ;;  %v11543_v43 = vpop.permute.xlu2 %4169  ;;  %3677 = vmatmul.f32.gmra.mxu3 %v11508_v63  ;;  %v3584_v49 = vand.u32 4294901760, %v3583_v35 }
 0x3a3   : > { %14925 = vst [vmem:[#allocation15_spill] sm:$0xff] %v11543_v43  ;;  %v11545_v24 = vpop.permute.xlu0 %4165  ;;  %3571 = vmatmul.f32.gmra.mxu2 %v3570_v21  ;;  %4295 = vrot.lane.b32.xlu1 %v11200_v31, %s8689_s28 }
 0x3a4   : > { %14926 = vst [vmem:[#allocation43_spill] sm:$0xff] %v11545_v24  ;;  %v3049_v42 = vadd.f32 %v11538_v52, %v3037_v29  ;;  %v2861_v62 = vadd.f32 %v2860_v19, %v2793_v61  ;;  %3751 = vmatmul.f32.gmra.mxu0 %v3575_v56  ;;  %v11554_v8 = vpop.permute.xlu1 %4133  ;;  %v2728_v19 = vadd.f32 %v11178_v4, %v11166_v47  ;;  %v3578_v56 = vand.u32 4294901760, %v3577_v13  ;;  %v4077_v47 = vld [vmem:[#allocation2 + $0x222] sm:$0xff]  ;;  %v2956_v4 = vpop.f32.mrf.mxu0 }
 0x3a5   : > { %14927 = vst [vmem:[#allocation49_spill] sm:$0xff] %v11554_v8  ;;  %4321 = vrot.lane.b32.xlu2 %v4078_v36, %s8688_s27 }
 0x3a6   : > { %v3057_v20 = vmax.f32 %v3049_v42, 0.0  ;;  %v2949_v38 = vadd.f32 %v2948_v6, %v2861_v62  ;;  %3824 = vmatmul.f32.gmra.mxu1 %v3576_v44  ;;  %v3585_v62 = vsub.f32 %v3583_v35, %v3584_v49 }
 0x3a8   : > { %3066 = vst.msk [vmem:[#allocation3 + $0xb1] sm:$0xff] %vm380_vm2, %v3057_v20  ;;  %v3007_v31 = vadd.f32 %v3006_v12, %v2949_v38  ;;  %v3014_v20 = vpop.f32.mrf.mxu1 }
 0x3a9   : > { %5058 = vrot.lane.b32.xlu0 %v11549_v14, %s8685_s24  ;;  %v2797_v1 = vpop.f32.mrf.mxu2  ;;  %v2872_v61 = vpop.f32.mrf.mxu3 }
 0x3aa   : > { %v3038_v6 = vmul.f32 %v11525_v27, %v3007_v31  ;;  %v2798_v23 = vadd.f32 %v2797_v1, %v2728_v19  ;;  %v11563_v15 = vpop.permute.xlu2 %4191  ;;  %3681 = vmatmul.f32.gmra.mxu3 %v11540_v45 }
 0x3ab   : > { %v11565_v29 = vpop.permute.xlu0 %4187  ;;  %3579 = vmatmul.f32.gmra.mxu2 %v3578_v56  ;;  %4319 = vrot.lane.b32.xlu1 %v4077_v47, %s8688_s27  ;;  %v2736_v47 = vadd.f32 %v11281_v7, %v11267_v48 }
 0x3ac   : > { %v3050_v21 = vadd.f32 %v11538_v52, %v3038_v6  ;;  %v2867_v42 = vadd.f32 %v2866_v41, %v2798_v23  ;;  %3756 = vmatmul.f32.gmra.mxu0 %v3583_v35  ;;  %v11570_v38 = vpop.permute.xlu1 %4155  ;;  %v2732_v41 = vadd.f32 %v11221_v37, %v11209_v54 }
 0x3ad   : > { %4327 = vrot.lane.b32.xlu2 %v11170_v59, %s8688_s27  ;;  %v4080_v59 = vld [vmem:[#allocation2 + $0x252] sm:$0xff] }
 0x3ae   : > { %v3058_v12 = vmax.f32 %v3050_v21, 0.0  ;;  %v2953_v44 = vadd.f32 %v2952_v18, %v2867_v42  ;;  %3830 = vmatmul.f32.gmra.mxu1 %v3584_v49  ;;  %v3586_v18 = vand.u32 4294901760, %v3585_v62  ;;  %v2960_v49 = vpop.f32.mrf.mxu0 }
 0x3af   : > { %v4970_v56 = vld [vmem:[#allocation3 + $0xb0] sm:$0xff] }
 0x3b0   : > { %3067 = vst.msk [vmem:[#allocation3 + $0xc1] sm:$0xff] %vm380_vm2, %v3058_v12  ;;  %v3011_v13 = vadd.f32 %v3010_v9, %v2953_v44  ;;  %v3018_v12 = vpop.f32.mrf.mxu1 }
 0x3b1   : > { %v2802_v36 = vpop.f32.mrf.mxu2  ;;  %v2878_v54 = vpop.f32.mrf.mxu3 }
 0x3b2   : > { %v3039_v19 = vmul.f32 %v11525_v27, %v3011_v13  ;;  %v2803_v31 = vadd.f32 %v2802_v36, %v2732_v41  ;;  %v11578_v1 = vpop.permute.xlu2 %4197  ;;  %3936 = vmatmul.f32.vlgmr.msra.gmra.mxu3 %v11299_v53  ;;  %v4954_v41 = vld [vmem:[#allocation3 + $0x141] sm:$0xff] }
 0x3b3   : > { %14928 = vst [vmem:[#allocation53_spill] sm:$0xff] %v11578_v1  ;;  %v11580_v35 = vpop.permute.xlu0 %4193  ;;  %3587 = vmatmul.f32.gmra.mxu2 %v3586_v18  ;;  %4325 = vrot.lane.b32.xlu1 %v4080_v59, %s8688_s27  ;;  %v4411_v59 = vld [vmem:[%s14522_s4 + $0x40] sm:$0xff] }
 0x3b4   : > { %v3051_v6 = vadd.f32 %v11538_v52, %v3039_v19  ;;  %v2873_v23 = vadd.f32 %v2872_v61, %v2803_v31  ;;  %v11585_v21 = vpop.permute.xlu1 %4161 }
 0x3b5   : > { %5090 = vrot.lane.b32.xlu2 %v4970_v56, %s8694_s20 }
 0x3b6   : > { %v3059_v37 = vmax.f32 %v3051_v6, 0.0  ;;  %v2957_v9 = vadd.f32 %v2956_v4, %v2873_v23  ;;  %v2740_v6 = vadd.f32 %v11328_v3, %v11320_v32 }
 0x3b7   : > { %v4971_v42 = vld [vmem:[#allocation3 + $0xc0] sm:$0xff] }
 0x3b8   : > { %3068 = vst.msk [vmem:[#allocation3 + $0xd1] sm:$0xff] %vm380_vm2, %v3059_v37  ;;  %v3015_v61 = vadd.f32 %v3014_v20, %v2957_v9  ;;  %5092 = vrot.lane.b32.xlu0 %v4971_v42, %s8694_s20  ;;  %v11609_v37 = vand.u32 4294901760, %v4411_v59 }
 0x3b9   : > { %v2807_v44 = vpop.f32.mrf.mxu2  ;;  %v2884_v20 = vpop.f32.mrf.mxu3 }
 0x3ba   : > { %v3040_v62 = vmul.f32 %v11525_v27, %v3015_v61  ;;  %v2808_v4 = vadd.f32 %v2807_v44, %v2736_v47  ;;  %v11593_v13 = vpop.permute.xlu2 %4219  ;;  %3940 = vmatmul.f32.gmra.mxu3 %v11294_v11  ;;  %v3022_v47 = vpop.f32.mrf.mxu1  ;;  %4444 = vmatpush.msra.mxu0 %v11609_v37  ;;  %v11618_v32 = vsub.f32 %v4411_v59, %v11609_v37  ;;  %v4410_v44 = vld [vmem:[%s14522_s4 + $0x38] sm:$0xff] }
 0x3bb   : > { %v11595_v36 = vpop.permute.xlu0 %4199  ;;  %3878 = vmatmul.f32.vlgmr.msra.gmra.mxu2 %v11299_v53  ;;  %5026 = vrot.lane.b32.xlu1 %v4954_v41, %s8684_s21  ;;  %v2964_v53 = vpop.f32.mrf.mxu0 }
 0x3bc   : > { %14929 = vst [vmem:[#allocation26_spill] sm:$0xff] %v11595_v36  ;;  %v3052_v19 = vadd.f32 %v11538_v52, %v3040_v62  ;;  %v2879_v31 = vadd.f32 %v2878_v54, %v2808_v4  ;;  %v11601_v18 = vpop.permute.xlu1 %4167  ;;  %4703 = vmatpush.msrb.mxu3 %v11609_v37  ;;  %v14560_v62 = vand.u32 4294901760, %v11618_v32  ;;  %v11629_v4 = vand.u32 4294901760, %v4410_v44  ;;  %4629 = vmatpush.msrb.mxu2 %v11618_v32 }
 0x3bd   : > { %14930 = vst [vmem:[#allocation39_spill] sm:$0xff] %v11601_v18 }
 0x3be   : > { %v3060_v48 = vmax.f32 %v3052_v19, 0.0  ;;  %v2961_v7 = vadd.f32 %v2960_v49, %v2879_v31  ;;  %4446 = vmatpush.msra.mxu0 %v11629_v4  ;;  %4705 = vmatpush.msrb.mxu3 %v11629_v4 }
 0x3c0   : > { %3069 = vst.msk [vmem:[#allocation3 + $0xe1] sm:$0xff] %vm380_vm2, %v3060_v48  ;;  %v3019_v23 = vadd.f32 %v3018_v12, %v2961_v7  ;;  %v4972_v12 = vld [vmem:[#allocation3 + $0xd0] sm:$0xff]  ;;  %v4536_v48 = vsub.f32 %v11618_v32, %v14560_v62  ;;  %v11639_v7 = vsub.f32 %v4410_v44, %v11629_v4 }
 0x3c1   : > { %v2812_v54 = vpop.f32.mrf.mxu2 }
 0x3c2   : > { %v3041_v9 = vmul.f32 %v11525_v27, %v3019_v23  ;;  %v2813_v56 = vadd.f32 %v2812_v54, %v2740_v6  ;;  %v11612_v49 = vpop.permute.xlu2 %4225  ;;  %3944 = vmatmul.f32.gmra.mxu3 %v11344_v5  ;;  %v2744_v6 = vadd.f32 %v11373_v33, %v11362_v34  ;;  %4632 = vmatpush.msrb.mxu2 %v11639_v7 }
 0x3c3   : > { %v11614_v42 = vpop.permute.xlu0 %4221  ;;  %3882 = vmatmul.f32.gmra.mxu2 %v11294_v11  ;;  %5094 = vrot.lane.b32.xlu1 %v4972_v12, %s8694_s20 }
 0x3c4   : > { %v3053_v3 = vadd.f32 %v11538_v52, %v3041_v9  ;;  %v2885_v61 = vadd.f32 %v2884_v20, %v2813_v56  ;;  %v11632_v31 = vpop.permute.xlu1 %4189  ;;  %v4409_v20 = vld [vmem:[%s14522_s4 + $0x30] sm:$0xff]  ;;  %v4537_v9 = vand.u32 4294901760, %v4536_v48  ;;  %v14559_v56 = vand.u32 4294901760, %v11639_v7 }
 0x3c5   : > { %v11649_v59 = vand.u32 4294901760, %v4409_v20 }
 0x3c6   : > { %v3061_v41 = vmax.f32 %v3053_v3, 0.0  ;;  %v2965_v19 = vadd.f32 %v2964_v53, %v2885_v61  ;;  %v2890_v53 = vpop.f32.mrf.mxu3  ;;  %v4408_v3 = vld [vmem:[%s14522_s4 + $0x28] sm:$0xff]  ;;  %4538 = vmatpush.msra.mxu1 %v4537_v9  ;;  %v3026_v9 = vpop.f32.mrf.mxu1 }
 0x3c7   : > { %v4973_v11 = vld [vmem:[#allocation3 + $0xe0] sm:$0xff]  ;;  %4448 = vmatpush.msra.mxu0 %v11649_v59  ;;  %v11663_v12 = vsub.f32 %v4409_v20, %v11649_v59  ;;  %v11665_v44 = vand.u32 4294901760, %v4408_v3  ;;  %4707 = vmatpush.msrb.mxu3 %v11649_v59  ;;  %v11677_v20 = vld [vmem:[#allocation3 + $0x11] sm:$0xff] }
 0x3c8   : > { %3070 = vst.msk [vmem:[#allocation3 + $0xf1] sm:$0xff] %vm380_vm2, %v3061_v41  ;;  %v3023_v23 = vadd.f32 %v3022_v47, %v2965_v19  ;;  %5096 = vrot.lane.b32.xlu2 %v4973_v11, %s8694_s20  ;;  %v2968_v41 = vpop.f32.mrf.mxu0  ;;  %v4542_v19 = vsub.f32 %v11639_v7, %v14559_v56  ;;  %v4407_v11 = vld [vmem:[%s14522_s4 + $0x20] sm:$0xff] }
 0x3c9   : > { %v2817_v54 = vpop.f32.mrf.mxu2  ;;  %4450 = vmatpush.msra.mxu0 %v11665_v44  ;;  %4635 = vmatpush.msrb.mxu2 %v11663_v12 }
 0x3ca   : > { %v3042_v34 = vmul.f32 %v11525_v27, %v3023_v23  ;;  %v2818_v33 = vadd.f32 %v2817_v54, %v2744_v6  ;;  %v11657_v61 = vpop.permute.xlu2 %4231  ;;  %3948 = vmatmul.f32.gmra.mxu3 %v11387_v0  ;;  %v14561_v23 = vand.u32 4294901760, %v11663_v12  ;;  %v11681_v54 = vsub.f32 %v4408_v3, %v11665_v44 }
 0x3cb   : > { %14931 = vst [vmem:[#allocation27_spill] sm:$0xff] %v11657_v61  ;;  %v11659_v47 = vpop.permute.xlu0 %4227  ;;  %3886 = vmatmul.f32.gmra.mxu2 %v11344_v5  ;;  %5122 = vrot.lane.b32.xlu1 %v11677_v20, %s8693_s19  ;;  %v4543_v56 = vand.u32 4294901760, %v4542_v19  ;;  %v4406_v5 = vld [vmem:[%s14522_s4 + $0x18] sm:$0xff] }
 0x3cc   : > { %14932 = vst [vmem:[#allocation21_spill] sm:$0xff] %v11659_v47  ;;  %v3054_v48 = vadd.f32 %v11538_v52, %v3042_v34  ;;  %v2891_v6 = vadd.f32 %v2890_v53, %v2818_v33  ;;  %v11686_v34 = vand.u32 4294901760, %v4407_v11  ;;  %v4548_v3 = vsub.f32 %v11663_v12, %v14561_v23  ;;  %4709 = vmatpush.msrb.mxu3 %v11665_v44  ;;  %v11697_v19 = vpop.permute.xlu1 %4195  ;;  %v11771_v47 = vld [vmem:[#allocation3 + $0x31] sm:$0xff] }
 0x3cd   : > { %14933 = vst [vmem:[#allocation30_spill] sm:$0xff] %v11697_v19  ;;  %4544 = vmatpush.msra.mxu1 %v4543_v56  ;;  %v14934_v61 = vand.u32 4294901760, %v11681_v54  ;;  %4638 = vmatpush.msrb.mxu2 %v11681_v54 }
 0x3ce   : > { %v3062_v53 = vmax.f32 %v3054_v48, 0.0  ;;  %v2969_v33 = vadd.f32 %v2968_v41, %v2891_v6  ;;  %v11702_v25 = vsub.f32 %v4407_v11, %v11686_v34  ;;  %v11704_v41 = vand.u32 4294901760, %v4406_v5  ;;  %v4405_v48 = vld [vmem:[%s14522_s4 + $0x10] sm:$0xff]  ;;  %4452 = vmatpush.msra.mxu0 %v11686_v34  ;;  %4711 = vmatpush.msrb.mxu3 %v11686_v34 }
 0x3cf   : > { %v4974_v43 = vld [vmem:[#allocation3 + $0xf0] sm:$0xff]  ;;  %v2748_v6 = vadd.f32 %v11415_v51, %v11406_v30  ;;  %v4549_v56 = vand.u32 4294901760, %v4548_v3  ;;  %v11716_v11 = vand.u32 4294901760, %v4405_v48  ;;  %v4554_v36 = vsub.f32 %v11681_v54, %v14934_v61  ;;  %v4404_v51 = vld [vmem:[%s14522_s4 + $0x8] sm:$0xff] }
 0x3d0   : > { %3071 = vst.msk [vmem:[#allocation3 + $0x101] sm:$0xff] %vm380_vm2, %v3062_v53  ;;  %v3027_v23 = vadd.f32 %v3026_v9, %v2969_v33  ;;  %5098 = vrot.lane.b32.xlu0 %v4974_v43, %s8694_s20  ;;  %5124 = vrot.lane.b32.xlu2 %v11699_v57, %s8693_s19  ;;  %v11724_v30 = vsub.f32 %v4406_v5, %v11704_v41  ;;  %v11738_v3 = vand.u32 4294901760, %v4404_v51  ;;  %v2896_v5 = vpop.f32.mrf.mxu3  ;;  %v14936_v1 = vand.u32 4294901760, %v11702_v25 }
 0x3d1   : > { %v2822_v62 = vpop.f32.mrf.mxu2  ;;  %4550 = vmatpush.msra.mxu1 %v4549_v56  ;;  %v11736_v61 = vsub.f32 %v4405_v48, %v11716_v11  ;;  %4454 = vmatpush.msra.mxu0 %v11704_v41  ;;  %v4555_v18 = vand.u32 4294901760, %v4554_v36  ;;  %v2972_v56 = vpop.f32.mrf.mxu0 }
 0x3d2   : > { %v3043_v43 = vmul.f32 %v11525_v27, %v3027_v23  ;;  %v2823_v9 = vadd.f32 %v2822_v62, %v2748_v6  ;;  %v11731_v53 = vpop.permute.xlu2 %4253  ;;  %v4560_v24 = vsub.f32 %v11702_v25, %v14936_v1  ;;  %4641 = vmatpush.msrb.mxu2 %v11702_v25  ;;  %4713 = vmatpush.msrb.mxu3 %v11704_v41  ;;  %v4403_v23 = vld [vmem:[%s14522_s4] sm:$0xff] }
 0x3d3   : > { %v11733_v33 = vpop.permute.xlu0 %4233  ;;  %3890 = vmatmul.f32.gmra.mxu2 %v11387_v0  ;;  %3952 = vmatmul.f32.gmra.mxu3 %v11428_v60  ;;  %v14562_v36 = vand.u32 4294901760, %v11736_v61  ;;  %v11755_v1 = vsub.f32 %v4404_v51, %v11738_v3 }
 0x3d4   : > { %14935 = vst [vmem:[#allocation35_spill] sm:$0xff] %v11733_v33  ;;  %v3055_v48 = vadd.f32 %v11538_v52, %v3043_v43  ;;  %v2897_v6 = vadd.f32 %v2896_v5, %v2823_v9  ;;  %4556 = vmatpush.msra.mxu1 %v4555_v18  ;;  %v4561_v62 = vand.u32 4294901760, %v4560_v24  ;;  %v14937_v33 = vand.u32 4294901760, %v11724_v30  ;;  %4644 = vmatpush.msrb.mxu2 %v11724_v30  ;;  %v3030_v24 = vpop.f32.mrf.mxu1  ;;  %v11769_v18 = vpop.permute.xlu1 %4201 }
 0x3d5   : > { %v11761_v43 = vand.u32 4294901760, %v4403_v23  ;;  %v4572_v5 = vsub.f32 %v11736_v61, %v14562_v36  ;;  %v4577_v51 = vand.u32 4294901760, %v11755_v1  ;;  %4715 = vmatpush.msrb.mxu3 %v11716_v11  ;;  %4456 = vmatpush.msra.mxu0 %v11716_v11 }
 0x3d6   : > { %v4566_v8 = vsub.f32 %v11724_v30, %v14937_v33  ;;  %v3063_v9 = vmax.f32 %v3055_v48, 0.0  ;;  %v2973_v0 = vadd.f32 %v2972_v56, %v2897_v6  ;;  %4562 = vmatpush.msra.mxu1 %v4561_v62  ;;  %4647 = vmatpush.msrb.mxu2 %v11736_v61  ;;  %v11781_v56 = vld [vmem:[#allocation3 + $0x51] sm:$0xff] }
 0x3d7   : > { %v4975_v33 = vld [vmem:[#allocation3 + $0x100] sm:$0xff]  ;;  %v11775_v48 = vsub.f32 %v4403_v23, %v11761_v43  ;;  %v4573_v36 = vand.u32 4294901760, %v4572_v5  ;;  %4717 = vmatpush.msrb.mxu3 %v11738_v3  ;;  %4458 = vmatpush.msra.mxu0 %v11738_v3 }
 0x3d8   : > { %v4567_v19 = vand.u32 4294901760, %v4566_v8  ;;  %3072 = vst.msk [vmem:[#allocation3 + $0x111] sm:$0xff] %vm380_vm2, %v3063_v9  ;;  %v3031_v6 = vadd.f32 %v3030_v24, %v2973_v0  ;;  %5100 = vrot.lane.b32.xlu1 %v4975_v33, %s8694_s20  ;;  %5126 = vrot.lane.b32.xlu0 %v11771_v47, %s8693_s19  ;;  %v4578_v8 = vsub.f32 %v11755_v1, %v4577_v51 }
 0x3d9   : > { %5130 = vrot.lane.b32.xlu2 %v11781_v56, %s8693_s19  ;;  %v4583_v62 = vand.u32 4294901760, %v11775_v48  ;;  %4650 = vmatpush.msrb.mxu2 %v11755_v1 }
 0x3da   : > { %4568 = vmatpush.msra.mxu1 %v4567_v19  ;;  %v3044_v23 = vmul.f32 %v11525_v27, %v3031_v6  ;;  %v11790_v9 = vpop.permute.xlu2 %4259  ;;  %v4579_v5 = vand.u32 4294901760, %v4578_v8  ;;  %4719 = vmatpush.msrb.mxu3 %v11761_v43  ;;  %v11808_v6 = vld [vmem:[#allocation3 + $0x41] sm:$0xff] }
 0x3db   : > { %v11792_v0 = vpop.permute.xlu0 %4255  ;;  %v4584_v19 = vsub.f32 %v11775_v48, %v4583_v62  ;;  %3894 = vmatmul.f32.gmra.mxu2 %v11428_v60  ;;  %3956 = vmatmul.f32.gmra.mxu3 %v11469_v28  ;;  %v14939_v60 = vand.u32 4294901760, %v11639_v7  ;;  %v4010_v7 = vld [vmem:[#allocation2 + $0x1e0] sm:$0xff] }
 0x3dc   : > { %4574 = vmatpush.msra.mxu1 %v4573_v36  ;;  %v3056_v24 = vadd.f32 %v11538_v52, %v3044_v23  ;;  %4653 = vmatpush.msrb.mxu2 %v11775_v48  ;;  %v11806_v36 = vpop.permute.xlu1 %4223  ;;  %v14938_v52 = vand.u32 4294901760, %v11618_v32  ;;  %v4991_v48 = vld [vmem:[#allocation3 + $0x101] sm:$0xff] }
 0x3dd   : > { %v4585_v27 = vand.u32 4294901760, %v4584_v19  ;;  %4460 = vmatpush.msra.mxu0 %v11761_v43 }
 0x3de   : > { %4580 = vmatpush.msra.mxu1 %v4579_v5  ;;  %v3064_v33 = vmax.f32 %v3056_v24, 0.0  ;;  %v14940_v5 = vand.u32 4294901760, %v11663_v12  ;;  %v11833_v24 = vld [vmem:[#allocation3 + $0x71] sm:$0xff]  ;;  %v14942_v12 = vand.u32 4294901760, %v11702_v25  ;;  %v14943_v25 = vand.u32 4294901760, %v11724_v30 }
 0x3df   : > { %v4976_v8 = vld [vmem:[#allocation3 + $0x110] sm:$0xff]  ;;  %4779 = vmatpush.msrb.mxu0 %v14938_v52 }
 0x3e0   : > { %4586 = vmatpush.msra.mxu1 %v4585_v27  ;;  %3073 = vst.msk [vmem:[#allocation3 + $0x121] sm:$0xff] %vm380_vm2, %v3064_v33  ;;  %5128 = vrot.lane.b32.xlu1 %v11808_v6, %s8693_s19  ;;  %v14944_v27 = vand.u32 4294901760, %v11736_v61  ;;  %v4987_v33 = vld [vmem:[#allocation3 + $0xc1] sm:$0xff] }
 0x3e1   : > { %5102 = vrot.lane.b32.xlu2 %v4976_v8, %s8694_s20  ;;  %4783 = vmatpush.msrb.mxu0 %v14939_v60  ;;  %v4990_v60 = vld [vmem:[#allocation3 + $0xf1] sm:$0xff] }
 0x3e2   : > { %4853 = vmatpush.msrb.mxu1 %v11609_v37  ;;  %v11819_v23 = vpop.permute.xlu2 %4265  ;;  %v14941_v37 = vand.u32 4294901760, %v11681_v54 }
 0x3e3   : > { %4787 = vmatpush.msrb.mxu0 %v14940_v5  ;;  %3898 = vmatmul.f32.gmra.mxu2 %v11469_v28  ;;  %v11826_v32 = vpop.permute.xlu0 %4261  ;;  %v11840_v28 = vld [vmem:[#allocation3 + $0x81] sm:$0xff] }
 0x3e4   : > { %4855 = vmatpush.msrb.mxu1 %v11629_v4  ;;  %3960 = vmatmul.f32.gmra.mxu3 %v11508_v63  ;;  %v11831_v19 = vpop.permute.xlu1 %4229 }
 0x3e5   : > { %4791 = vmatpush.msrb.mxu0 %v14941_v37 }
 0x3e6   : > { %4857 = vmatpush.msrb.mxu1 %v11649_v59  ;;  %v4339_v59 = vsel %vm380_vm2, %v4010_v7, %v11246_v50 }
 0x3e7   : > { %v4977_v4 = vld [vmem:[#allocation3 + $0x120] sm:$0xff]  ;;  %4795 = vmatpush.msrb.mxu0 %v14942_v12 }
 0x3e8   : > { %4859 = vmatpush.msrb.mxu1 %v11665_v44  ;;  %5134 = vrot.lane.b32.xlu1 %v11833_v24, %s8693_s19  ;;  %v4347_v44 = vsel %vm1534_vm5, %v4339_v59, %v11346_v40  ;;  %v4989_v12 = vld [vmem:[#allocation3 + $0xe1] sm:$0xff] }
 0x3e9   : > { %5104 = vrot.lane.b32.xlu0 %v4977_v4, %s8694_s20  ;;  %5136 = vrot.lane.b32.xlu2 %v11840_v28, %s8693_s19  ;;  %v4355_v50 = vsel %vm1543_vm6, %v4347_v44, %v11570_v38  ;;  %v4993_v4 = vld [vmem:[#allocation3 + $0x121] sm:$0xff] }
 0x3ea   : > { %4861 = vmatpush.msrb.mxu1 %v11686_v34  ;;  %v11848_v54 = vpop.permute.xlu2 %4287  ;;  %4799 = vmatpush.msrb.mxu0 %v14943_v25  ;;  %v4363_v34 = vsel %vm1552_vm7, %v4355_v50, %v11565_v29  ;;  %v8579_v25 = vld [vmem:[#allocation2 + $0x1f0] sm:$0xff] }
 0x3eb   : > { %3902 = vmatmul.f32.gmra.mxu2 %v11508_v63  ;;  %v4284_v30 = vpop.permute.xlu0 %4283  ;;  %v11866_v63 = vld [vmem:[#allocation3 + $0x61] sm:$0xff]  ;;  %v4340_v44 = vsel %vm380_vm2, %v8579_v25, %v11413_v2  ;;  %v4992_v2 = vld [vmem:[#allocation3 + $0x111] sm:$0xff] }
 0x3ec   : > { %4863 = vmatpush.msrb.mxu1 %v11704_v41  ;;  %3964 = vmatmul.f32.gmra.mxu3 %v11540_v45  ;;  %v4371_v41 = vsel %vm1561_vm8, %v4363_v34, %v11593_v13 }
 0x3ed   : > { %4803 = vmatpush.msrb.mxu0 %v14944_v27  ;;  %v4252_v40 = vpop.permute.xlu1 %4251  ;;  %v4348_v27 = vsel %vm1534_vm5, %v4340_v44, %v11391_v16 }
 0x3ee   : > { %4865 = vmatpush.msrb.mxu1 %v11716_v11  ;;  %v4379_v38 = vsel %vm1570_vm9, %v4371_v41, %v4252_v40  ;;  %v4988_v11 = vld [vmem:[#allocation3 + $0xd1] sm:$0xff]  ;;  %v4356_v34 = vsel %vm1543_vm6, %v4348_v27, %v11471_v58  ;;  %v5870_v41 = vld [vmem:[#allocation3 + $0x142] sm:$0xff] }
 0x3ef   : > { %4807 = vmatpush.msrb.mxu0 %v4577_v51  ;;  %v4387_v29 = vsel %vm1579_vm11, %v4379_v38, %v4284_v30  ;;  %v4364_v30 = vsel %vm1552_vm7, %v4356_v34, %v11632_v31  ;;  %v8582_v34 = vld [vmem:[#allocation2 + $0x220] sm:$0xff] }
 0x3f0   : > { %4867 = vmatpush.msrb.mxu1 %v11738_v3  ;;  %5156 = vrot.lane.b32.xlu1 %v4987_v33, %s8692_s18  ;;  %v4372_v40 = vsel %vm1561_vm8, %v4364_v30, %v11614_v42  ;;  %v14945_v30 = vld [vmem:[#allocation29_spill] sm:$0xff] }
 0x3f1   : > { %5132 = vrot.lane.b32.xlu0 %v11866_v63, %s8693_s19  ;;  %5158 = vrot.lane.b32.xlu2 %v4988_v11, %s8692_s18 }
 0x3f2   : > { %4869 = vmatpush.msrb.mxu1 %v11761_v43  ;;  %v4316_v13 = vpop.permute.xlu2 %4315  ;;  %4811 = vmatpush.msrb.mxu0 %v4583_v62  ;;  %v4986_v43 = vld [vmem:[#allocation3 + $0xb1] sm:$0xff] }
 0x3f3   : > { %v4395_v61 = vsel %vm1588_vm10, %v4387_v29, %v4316_v13  ;;  %3906 = vmatmul.f32.gmra.mxu2 %v11540_v45  ;;  %v4290_v50 = vpop.permute.xlu0 %4289 }
 0x3f4   : > { %v4413_v3 = vsel %vm1606_vm12, %v4395_v61, 0 }
 0x3f5   : > { %v11883_v1 = vand.u32 4294901760, %v4413_v3  ;;  %v11885_v51 = vpop.permute.xlu1 %4257  ;;  %v11888_v52 = vpop.f32.mrf.mxu3 }
 0x3f7   : > { %v4462_v8 = vsub.f32 %v4413_v3, %v11883_v1  ;;  %4588 = vmatmul.f32.vlgmr.msra.gmra.mxu1 %v11883_v1 }
 0x3f8   : > { %5162 = vrot.lane.b32.xlu1 %v4990_v60, %s8692_s18 }
 0x3f9   : > { %5154 = vrot.lane.b32.xlu0 %v4986_v43, %s8692_s18  ;;  %v4463_v45 = vand.u32 4294901760, %v4462_v8  ;;  %5164 = vrot.lane.b32.xlu2 %v4991_v48, %s8692_s18  ;;  %v8580_v48 = vld [vmem:[#allocation2 + $0x210] sm:$0xff] }
 0x3fa   : > { %v4318_v11 = vpop.permute.xlu2 %4317 }
 0x3fb   : > { %v4464_v62 = vsub.f32 %v4462_v8, %v4463_v45  ;;  %4723 = vmatmul.f32.vlgmr.msrb.gmra.mxu3 %v4463_v45  ;;  %4656 = vmatmul.f32.vlgmr.msrb.gmra.mxu2 %v4462_v8  ;;  %v4342_v45 = vsel %vm380_vm2, %v8580_v48, %v11303_v39  ;;  %v8581_v39 = vld [vmem:[#allocation2 + $0x200] sm:$0xff]  ;;  %v14949_v48 = vld [vmem:[#allocation49_spill] sm:$0xff] }
 0x3fd   : > { %v4465_v5 = vand.u32 4294901760, %v4464_v62  ;;  %v11894_v37 = vpop.permute.xlu1 %4263  ;;  %v11896_v7 = vpop.f32.mrf.mxu2  ;;  %v4350_v62 = vsel %vm1534_vm5, %v4342_v45, %v11389_v26  ;;  %v4341_v26 = vsel %vm380_vm2, %v8581_v39, %v11244_v22 }
 0x3fe   : > { %v11898_v59 = vpop.f32.mrf.mxu3  ;;  %v4349_v44 = vsel %vm1534_vm5, %v4341_v26, %v11527_v10  ;;  %v14951_v26 = vld [vmem:[#allocation53_spill] sm:$0xff] }
 0x3ff   : > { %4466 = vmatmul.f32.vlgmr.msra.gmra.mxu0 %v4465_v5 }
 0x400   : > { %5168 = vrot.lane.b32.xlu1 %v4993_v4, %s8692_s18 }
 0x401   : > { %5160 = vrot.lane.b32.xlu0 %v4989_v12, %s8692_s18  ;;  %5894 = vrot.lane.b32.xlu2 %v11549_v14, %s8684_s21  ;;  %v4380_v14 = vsel %vm1570_vm9, %v4372_v40, %v11731_v53  ;;  %v11929_v53 = vpop.permute.xlu0 %4293 }
 0x402   : > { %v4322_v25 = vpop.permute.xlu2 %4321 }
 0x405   : > { %v4286_v33 = vpop.permute.xlu1 %4285  ;;  %v11916_v38 = vpop.f32.mrf.mxu2 }
 0x406   : > { %v4388_v16 = vsel %vm1579_vm11, %v4380_v14, %v4286_v33  ;;  %v11919_v29 = vpop.f32.mrf.mxu3 }
 0x407   : > { %v4396_v58 = vsel %vm1588_vm10, %v4388_v16, %v4318_v11 }
 0x408   : > { %5926 = vrot.lane.b32.xlu1 %v5870_v41, %s8685_s24  ;;  %v4416_v42 = vsel %vm1606_vm12, %v4396_v58, 0 }
 0x409   : > { %5166 = vrot.lane.b32.xlu0 %v4992_v2, %s8692_s18  ;;  %5954 = vrot.lane.b32.xlu2 %v11771_v47, %s8694_s20  ;;  %v11927_v31 = vand.u32 4294901760, %v4416_v42  ;;  %v11947_v5 = vpop.permute.xlu0 %4297 }
 0x40b   : > { %4592 = vmatmul.f32.gmra.mxu1 %v11927_v31  ;;  %v4470_v13 = vsub.f32 %v4416_v42, %v11927_v31 }
 0x40d   : > { %v4292_v61 = vpop.permute.xlu1 %4291  ;;  %4661 = vmatmul.f32.gmra.mxu2 %v4470_v13  ;;  %v4471_v8 = vand.u32 4294901760, %v4470_v13 }
 0x40e   : > { %v11933_v3 = vpop.f32.mrf.mxu2  ;;  %v11935_v60 = vpop.f32.mrf.mxu3 }
 0x40f   : > { %4729 = vmatmul.f32.gmra.mxu3 %v4471_v8  ;;  %v4472_v47 = vsub.f32 %v4470_v13, %v4471_v8 }
 0x410   : > { %5952 = vrot.lane.b32.xlu1 %v11699_v57, %s8694_s20  ;;  %v4358_v57 = vsel %vm1543_vm6, %v4350_v62, %v11585_v21 }
 0x411   : > { %5950 = vrot.lane.b32.xlu0 %v11677_v20, %s8694_s20  ;;  %5960 = vrot.lane.b32.xlu2 %v11866_v63, %s8694_s20  ;;  %v4473_v43 = vand.u32 4294901760, %v4472_v47  ;;  %v4366_v63 = vsel %vm1552_vm7, %v4358_v57, %v11580_v35  ;;  %v14948_v47 = vld [vmem:[#allocation23_spill] sm:$0xff] }
 0x412   : > { %v4374_v21 = vsel %vm1561_vm8, %v4366_v63, %v11612_v49  ;;  %v4343_v49 = vsel %vm380_vm2, %v8582_v34, %v11456_v17  ;;  %v14946_v17 = vld [vmem:[#allocation30_spill] sm:$0xff]  ;;  %v14950_v57 = vld [vmem:[#allocation43_spill] sm:$0xff] }
 0x413   : > { %4474 = vmatmul.f32.gmra.mxu0 %v4473_v43  ;;  %v4382_v35 = vsel %vm1570_vm9, %v4374_v21, %v11885_v51  ;;  %v4351_v51 = vsel %vm1534_vm5, %v4343_v49, %v14945_v30  ;;  %v8584_v49 = vld [vmem:[#allocation2 + $0x240] sm:$0xff] }
 0x414   : > { %v4390_v27 = vsel %vm1579_vm11, %v4382_v35, %v4290_v50  ;;  %v4359_v50 = vsel %vm1543_vm6, %v4351_v51, %v11510_v46  ;;  %v14947_v46 = vld [vmem:[#allocation21_spill] sm:$0xff]  ;;  %v3722_v51 = vpop.f32.mrf.mxu0 }
 0x415   : > { %v11951_v20 = vpop.permute.xlu1 %4295  ;;  %v4398_v22 = vsel %vm1588_vm10, %v4390_v27, %v4322_v25 }
 0x416   : > { %v11953_v4 = vpop.f32.mrf.mxu2  ;;  %v11957_v12 = vpop.f32.mrf.mxu3  ;;  %v4422_v41 = vsel %vm1606_vm12, %v4398_v22, 0 }
 0x417   : > { %v12006_v58 = vand.u32 4294901760, %v4422_v41 }
 0x418   : > { %5958 = vrot.lane.b32.xlu1 %v11781_v56, %s8694_s20  ;;  %v4357_v56 = vsel %vm1543_vm6, %v4349_v44, %v11512_v55 }
 0x419   : > { %5956 = vrot.lane.b32.xlu0 %v11808_v6, %s8694_s20  ;;  %v4365_v6 = vsel %vm1552_vm7, %v4357_v56, %v11563_v15 }
 0x41a   : > { %v4373_v10 = vsel %vm1561_vm8, %v4365_v6, %v11806_v36  ;;  %v4367_v36 = vsel %vm1552_vm7, %v4359_v50, %v14946_v17  ;;  %v14953_v50 = vld [vmem:[#allocation42_spill] sm:$0xff] }
 0x41b   : > { %v4381_v55 = vsel %vm1570_vm9, %v4373_v10, %v11792_v0  ;;  %v4375_v0 = vsel %vm1561_vm8, %v4367_v36, %v14947_v46  ;;  %v14952_v10 = vld [vmem:[#allocation7_spill] sm:$0xff] }
 0x41c   : > { %v4389_v15 = vsel %vm1579_vm11, %v4381_v55, %v11848_v54  ;;  %v4324_v54 = vpop.permute.xlu0 %4323  ;;  %v4383_v16 = vsel %vm1570_vm9, %v4375_v0, %v11790_v9  ;;  %v4486_v9 = vsub.f32 %v4422_v41, %v12006_v58  ;;  %v4345_v30 = vsel %vm380_vm2, %v8584_v49, %v14952_v10  ;;  %v14956_v46 = vld [vmem:[#allocation27_spill] sm:$0xff]  ;;  %v3789_v0 = vpop.f32.mrf.mxu1 }
 0x41d   : > { %v4320_v40 = vpop.permute.xlu1 %4319  ;;  %v4391_v13 = vsel %vm1579_vm11, %v4383_v16, %v4292_v61 }
 0x41e   : > { %v11990_v14 = vpop.f32.mrf.mxu2  ;;  %v4397_v33 = vsel %vm1588_vm10, %v4389_v15, %v4320_v40  ;;  %v11995_v2 = vpop.f32.mrf.mxu3  ;;  %v4487_v34 = vand.u32 4294901760, %v4486_v9  ;;  %v4353_v15 = vsel %vm1534_vm5, %v4345_v30, %v14953_v50  ;;  %v14955_v40 = vld [vmem:[#allocation26_spill] sm:$0xff] }
 0x41f   : > { %v4419_v11 = vsel %vm1606_vm12, %v4397_v33, 0 }
 0x420   : > { %5964 = vrot.lane.b32.xlu1 %v11840_v28, %s8694_s20  ;;  %v12008_v42 = vand.u32 4294901760, %v4419_v11  ;;  %v4399_v28 = vsel %vm1588_vm10, %v4391_v13, %v4324_v54  ;;  %v4488_v33 = vsub.f32 %v4486_v9, %v4487_v34 }
 0x421   : > { %5962 = vrot.lane.b32.xlu0 %v11833_v24, %s8694_s20  ;;  %v8583_v24 = vld [vmem:[#allocation2 + $0x230] sm:$0xff]  ;;  %v4425_v63 = vsel %vm1606_vm12, %v4399_v28, 0 }
 0x422   : > { %v4478_v8 = vsub.f32 %v4419_v11, %v12008_v42  ;;  %4596 = vmatmul.f32.gmra.mxu1 %v12008_v42  ;;  %v4344_v43 = vsel %vm380_vm2, %v8583_v24, %v14948_v47  ;;  %v12032_v6 = vand.u32 4294901760, %v4425_v63  ;;  %v4489_v24 = vand.u32 4294901760, %v4488_v33 }
 0x423   : > { %v4352_v45 = vsel %vm1534_vm5, %v4344_v43, %v14949_v48  ;;  %v4328_v43 = vpop.permute.xlu2 %4327  ;;  %v8585_v48 = vld [vmem:[#allocation2 + $0x250] sm:$0xff] }
 0x424   : > { %4666 = vmatmul.f32.gmra.mxu2 %v4478_v8  ;;  %v4479_v62 = vand.u32 4294901760, %v4478_v8  ;;  %v4360_v61 = vsel %vm1543_vm6, %v4352_v45, %v14950_v57  ;;  %v4494_v36 = vsub.f32 %v4425_v63, %v12032_v6  ;;  %v14957_v45 = vld [vmem:[#allocation41_spill] sm:$0xff]  ;;  %v14959_v63 = vld [vmem:[#allocation15_spill] sm:$0xff] }
 0x425   : > { %v4368_v21 = vsel %vm1552_vm7, %v4360_v61, %v14951_v26  ;;  %v4326_v56 = vpop.permute.xlu1 %4325  ;;  %v3727_v61 = vpop.f32.mrf.mxu0  ;;  %v3655_v26 = vadd.f32 %v11888_v52, %v11896_v7 }
 0x426   : > { %v12022_v39 = vpop.f32.mrf.mxu2  ;;  %v12026_v25 = vpop.f32.mrf.mxu3  ;;  %4735 = vmatmul.f32.gmra.mxu3 %v4479_v62  ;;  %v4480_v44 = vsub.f32 %v4478_v8, %v4479_v62  ;;  %v4376_v35 = vsel %vm1561_vm8, %v4368_v21, %v11831_v19  ;;  %v4495_v47 = vand.u32 4294901760, %v4494_v36 }
 0x427   : > { %v4384_v27 = vsel %vm1570_vm9, %v4376_v35, %v11826_v32  ;;  %v14954_v32 = vld [vmem:[#allocation39_spill] sm:$0xff]  ;;  %v3795_v52 = vpop.f32.mrf.mxu1  ;;  %v4330_v7 = vpop.permute.xlu0 %4329  ;;  %v3723_v30 = vadd.f32 %v3722_v51, %v3655_v26 }
 0x428   : > { %v4481_v22 = vand.u32 4294901760, %v4480_v44  ;;  %v4392_v55 = vsel %vm1579_vm11, %v4384_v27, %v11929_v53  ;;  %v4361_v41 = vsel %vm1543_vm6, %v4353_v15, %v14954_v32  ;;  %v4496_v44 = vsub.f32 %v4494_v36, %v4495_v47 }
 0x429   : > { %v4400_v19 = vsel %vm1588_vm10, %v4392_v55, %v4326_v56  ;;  %v4369_v17 = vsel %vm1552_vm7, %v4361_v41, %v14955_v40  ;;  %v3659_v32 = vadd.f32 %v11898_v59, %v11916_v38  ;;  %v12100_v38 = vld [vmem:[%s14524_s6] ss:$0 sm:$0xff] }
 0x42a   : > { %4482 = vmatmul.f32.gmra.mxu0 %v4481_v22  ;;  %4600 = vmatmul.f32.gmra.mxu1 %v12006_v58  ;;  %v4377_v53 = vsel %vm1561_vm8, %v4369_v17, %v14956_v46  ;;  %v4428_v54 = vsel %vm1606_vm12, %v4400_v19, 0  ;;  %v14960_v22 = vld [vmem:[#allocation35_spill] sm:$0xff]  ;;  %v4497_v50 = vand.u32 4294901760, %v4496_v44 }
 0x42b   : > { %v4385_v16 = vsel %vm1570_vm9, %v4377_v53, %v11894_v37  ;;  %v12058_v8 = vand.u32 4294901760, %v4428_v54  ;;  %v14958_v37 = vld [vmem:[#allocation55_spill] sm:$0xff]  ;;  %v3728_v53 = vadd.f32 %v3727_v61, %v3659_v32 }
 0x42c   : > { %4671 = vmatmul.f32.gmra.mxu2 %v4486_v9  ;;  %v4393_v28 = vsel %vm1579_vm11, %v4385_v16, %v11951_v20  ;;  %v4346_v9 = vsel %vm380_vm2, %v8585_v48, %v14957_v45 }
 0x42d   : > { %v4401_v62 = vsel %vm1588_vm10, %v4393_v28, %v4328_v43  ;;  %v4354_v57 = vsel %vm1534_vm5, %v4346_v9, %v14958_v37  ;;  %v4502_v21 = vsub.f32 %v4428_v54, %v12058_v8  ;;  %v3732_v40 = vpop.f32.mrf.mxu0  ;;  %v3663_v43 = vadd.f32 %v11919_v29, %v11933_v3 }
 0x42e   : > { %v12050_v11 = vpop.f32.mrf.mxu2  ;;  %v12054_v13 = vpop.f32.mrf.mxu3  ;;  %4741 = vmatmul.f32.gmra.mxu3 %v4487_v34  ;;  %v4362_v20 = vsel %vm1543_vm6, %v4354_v57, %v14959_v63  ;;  %v4431_v56 = vsel %vm1606_vm12, %v4401_v62, 0 }
 0x42f   : > { %v4370_v35 = vsel %vm1552_vm7, %v4362_v20, %v11769_v18  ;;  %v12080_v55 = vand.u32 4294901760, %v4431_v56  ;;  %v4503_v15 = vand.u32 4294901760, %v4502_v21  ;;  %v3801_v28 = vpop.f32.mrf.mxu1  ;;  %v3733_v20 = vadd.f32 %v3732_v40, %v3663_v43 }
 0x430   : > { %v4378_v34 = vsel %vm1561_vm8, %v4370_v35, %v14960_v22  ;;  %v3667_v35 = vadd.f32 %v11935_v60, %v11953_v4 }
 0x431   : > { %v4386_v10 = vsel %vm1570_vm9, %v4378_v34, %v11819_v23  ;;  %v3790_v23 = vadd.f32 %v3789_v0, %v3723_v30  ;;  %v4504_v41 = vsub.f32 %v4502_v21, %v4503_v15  ;;  %v4510_v51 = vsub.f32 %v4431_v56, %v12080_v55 }
 0x432   : > { %4490 = vmatmul.f32.gmra.mxu0 %v4489_v24  ;;  %4604 = vmatmul.f32.gmra.mxu1 %v12032_v6  ;;  %v4394_v18 = vsel %vm1579_vm11, %v4386_v10, %v11947_v5  ;;  %v12093_v5 = vld [vmem:[%s14523_s5] ss:$0 sm:$0xff]  ;;  %v3802_v22 = vadd.f32 %v3801_v28, %v3733_v20 }
 0x433   : > { %v4402_v19 = vsel %vm1588_vm10, %v4394_v18, %v4330_v7  ;;  %v4505_v0 = vand.u32 4294901760, %v4504_v41  ;;  %v4511_v16 = vand.u32 4294901760, %v4510_v51 }
 0x434   : > { %4676 = vmatmul.f32.gmra.mxu2 %v4494_v36  ;;  %v4434_v17 = vsel %vm1606_vm12, %v4402_v19, 0  ;;  %v3671_v19 = vadd.f32 %v11957_v12, %v11990_v14 }
 0x435   : > { %v12095_v54 = vand.u32 4294901760, %v4434_v17  ;;  %v4512_v9 = vsub.f32 %v4510_v51, %v4511_v16  ;;  %v3737_v63 = vpop.f32.mrf.mxu0 }
 0x436   : > { %v12074_v27 = vpop.f32.mrf.mxu2  ;;  %v3937_v49 = vpop.f32.mrf.mxu3  ;;  %4747 = vmatmul.f32.gmra.mxu3 %v4495_v47  ;;  %v3796_v47 = vadd.f32 %v3795_v52, %v3728_v53 }
 0x437   : > { %v4518_v48 = vsub.f32 %v4434_v17, %v12095_v54  ;;  %v3807_v3 = vpop.f32.mrf.mxu1 }
 0x439   : > { %v4519_v44 = vand.u32 4294901760, %v4518_v48 }
 0x43a   : > { %4498 = vmatmul.f32.gmra.mxu0 %v4497_v50  ;;  %4608 = vmatmul.f32.gmra.mxu1 %v12058_v8  ;;  %v3738_v50 = vadd.f32 %v3737_v63, %v3667_v35  ;;  %v3683_v35 = vadd.f32 %v12054_v13, %v12074_v27 }
 0x43b   : > { %v4520_v34 = vsub.f32 %v4518_v48, %v4519_v44 }
 0x43c   : > { %4681 = vmatmul.f32.gmra.mxu2 %v4502_v21  ;;  %v4513_v21 = vand.u32 4294901760, %v4512_v9 }
 0x43d   : > { %v4521_v60 = vand.u32 4294901760, %v4520_v34  ;;  %v3742_v4 = vpop.f32.mrf.mxu0 }
 0x43e   : > { %v3879_v36 = vpop.f32.mrf.mxu2  ;;  %v3941_v46 = vpop.f32.mrf.mxu3  ;;  %4753 = vmatmul.f32.gmra.mxu3 %v4503_v15 }
 0x43f   : > { %v3880_v33 = vadd.f32 %v3879_v36, %v3790_v23  ;;  %v3808_v23 = vadd.f32 %v3807_v3, %v3738_v50  ;;  %v3813_v41 = vpop.f32.mrf.mxu1 }
 0x441   : > { %v3938_v59 = vadd.f32 %v3937_v49, %v3880_v33 }
 0x442   : > { %4506 = vmatmul.f32.gmra.mxu0 %v4505_v0  ;;  %4612 = vmatmul.f32.gmra.mxu1 %v12080_v55  ;;  %v3675_v0 = vadd.f32 %v11995_v2, %v12022_v39 }
 0x443   : > { %v3972_v24 = vmul.f32 %v12093_v5, %v3938_v59 }
 0x444   : > { %4686 = vmatmul.f32.gmra.mxu2 %v4510_v51 }
 0x445   : > { %v3984_v45 = vadd.f32 %v12100_v38, %v3972_v24  ;;  %v3747_v59 = vpop.f32.mrf.mxu0 }
 0x446   : > { %v3883_v62 = vpop.f32.mrf.mxu2  ;;  %v3945_v61 = vpop.f32.mrf.mxu3  ;;  %4759 = vmatmul.f32.gmra.mxu3 %v4511_v16  ;;  %v3748_v9 = vadd.f32 %v3747_v59, %v3675_v0 }
 0x447   : > { %v3992_v37 = vmax.f32 %v3984_v45, 0.0  ;;  %v3884_v57 = vadd.f32 %v3883_v62, %v3796_v47  ;;  %v12202_v59 = vpop.permute.xlu2 %5090 }
 0x449   : > { %4001 = vst.msk [vmem:[#allocation3 + $0x151] sm:$0xff] %vm380_vm2, %v3992_v37  ;;  %v3942_v26 = vadd.f32 %v3941_v46, %v3884_v57  ;;  %v3743_v46 = vadd.f32 %v3742_v4, %v3671_v19  ;;  %v3679_v37 = vadd.f32 %v12026_v25, %v12050_v11 }
 0x44a   : > { %4514 = vmatmul.f32.gmra.mxu0 %v4513_v21  ;;  %4616 = vmatmul.f32.gmra.mxu1 %v12095_v54 }
 0x44b   : > { %v3973_v29 = vmul.f32 %v12093_v5, %v3942_v26  ;;  %v3814_v28 = vadd.f32 %v3813_v41, %v3743_v46 }
 0x44c   : > { %4691 = vmatmul.f32.gmra.mxu2 %v4518_v48  ;;  %v3819_v48 = vpop.f32.mrf.mxu1 }
 0x44d   : > { %v3985_v56 = vadd.f32 %v12100_v38, %v3973_v29  ;;  %v3752_v63 = vpop.f32.mrf.mxu0 }
 0x44e   : > { %v3887_v49 = vpop.f32.mrf.mxu2  ;;  %4765 = vmatmul.f32.gmra.mxu3 %v4519_v44  ;;  %v3949_v7 = vpop.f32.mrf.mxu3  ;;  %v3753_v3 = vadd.f32 %v3752_v63, %v3679_v37 }
 0x44f   : > { %v3993_v10 = vmax.f32 %v3985_v56, 0.0  ;;  %v3888_v52 = vadd.f32 %v3887_v49, %v3802_v22 }
 0x450   : > { %v12114_v30 = vld [vmem:[#allocation3 + $0x151] sm:$0xff] }
 0x451   : > { %4002 = vst.msk [vmem:[#allocation3 + $0x161] sm:$0xff] %vm380_vm2, %v3993_v10  ;;  %v3946_v15 = vadd.f32 %v3945_v61, %v3888_v52  ;;  %5028 = vrot.lane.b32.xlu2 %v12114_v30, %s8684_s21  ;;  %5218 = vrot.lane.b32.xlu1 %v12114_v30, %s8689_s28  ;;  %v12126_v36 = vld [vmem:[#allocation3 + $0x152] sm:$0xff]  ;;  %v3820_v61 = vadd.f32 %v3819_v48, %v3748_v9 }
 0x452   : > { %4522 = vmatmul.f32.gmra.mxu0 %v4521_v60  ;;  %4871 = vmatmul.f32.vlgmr.msrb.gmra.mxu1 %v11883_v1 }
 0x453   : > { %v3974_v18 = vmul.f32 %v12093_v5, %v3946_v15 }
 0x454   : > { %v3825_v25 = vpop.f32.mrf.mxu1 }
 0x455   : > { %v3986_v32 = vadd.f32 %v12100_v38, %v3974_v18  ;;  %v3826_v22 = vadd.f32 %v3825_v25, %v3753_v3 }
 0x456   : > { %v3891_v51 = vpop.f32.mrf.mxu2  ;;  %v3953_v12 = vpop.f32.mrf.mxu3 }
 0x457   : > { %v3994_v40 = vmax.f32 %v3986_v32, 0.0  ;;  %v3892_v17 = vadd.f32 %v3891_v51, %v3808_v23 }
 0x458   : > { %v12128_v33 = vld [vmem:[#allocation3 + $0x161] sm:$0xff] }
 0x459   : > { %4003 = vst.msk [vmem:[#allocation3 + $0x171] sm:$0xff] %vm380_vm2, %v3994_v40  ;;  %v3950_v53 = vadd.f32 %v3949_v7, %v3892_v17  ;;  %5928 = vrot.lane.b32.xlu2 %v12126_v36, %s8685_s24  ;;  %5030 = vrot.lane.b32.xlu0 %v12128_v33, %s8684_s21  ;;  %v3757_v7 = vpop.f32.mrf.mxu0 }
 0x45a   : > { %4813 = vmatmul.f32.vlgmr.msrb.gmra.mxu0 %v11883_v1  ;;  %4875 = vmatmul.f32.gmra.mxu1 %v11927_v31  ;;  %v12148_v1 = vld [vmem:[#allocation3 + $0x162] sm:$0xff]  ;;  %v3758_v60 = vadd.f32 %v3757_v7, %v3683_v35 }
 0x45b   : > { %v3975_v14 = vmul.f32 %v12093_v5, %v3950_v53 }
 0x45c   : > { %v3831_v27 = vpop.f32.mrf.mxu1 }
 0x45d   : > { %v3987_v16 = vadd.f32 %v12100_v38, %v3975_v14  ;;  %v3832_v18 = vadd.f32 %v3831_v27, %v3758_v60 }
 0x45e   : > { %v3895_v24 = vpop.f32.mrf.mxu2  ;;  %v3957_v39 = vpop.f32.mrf.mxu3 }
 0x45f   : > { %v3995_v47 = vmax.f32 %v3987_v16, 0.0  ;;  %v3896_v43 = vadd.f32 %v3895_v24, %v3814_v28  ;;  %v12216_v24 = vpop.permute.xlu1 %5026 }
 0x460   : > { %v12141_v45 = vld [vmem:[#allocation3 + $0x171] sm:$0xff] }
 0x461   : > { %4004 = vst.msk [vmem:[#allocation3 + $0x181] sm:$0xff] %vm380_vm2, %v3995_v47  ;;  %v3954_v62 = vadd.f32 %v3953_v12, %v3896_v43  ;;  %5220 = vrot.lane.b32.xlu2 %v12128_v33, %s8689_s28  ;;  %5032 = vrot.lane.b32.xlu1 %v12141_v45, %s8684_s21  ;;  %v12160_v29 = vld [vmem:[#allocation3 + $0x172] sm:$0xff] }
 0x462   : > { %5930 = vrot.lane.b32.xlu0 %v12148_v1, %s8685_s24  ;;  %4817 = vmatmul.f32.gmra.mxu0 %v11927_v31 }
 0x463   : > { %v3976_v2 = vmul.f32 %v12093_v5, %v3954_v62  ;;  %4879 = vmatmul.f32.gmra.mxu1 %v12008_v42 }
 0x465   : > { %v3988_v57 = vadd.f32 %v12100_v38, %v3976_v2 }
 0x466   : > { %v3899_v20 = vpop.f32.mrf.mxu2 }
 0x467   : > { %v3996_v26 = vmax.f32 %v3988_v57, 0.0  ;;  %v3900_v21 = vadd.f32 %v3899_v20, %v3820_v61  ;;  %v3961_v34 = vpop.f32.mrf.mxu3  ;;  %v12220_v9 = vpop.permute.xlu1 %5094 }
 0x468   : > { %v12158_v44 = vld [vmem:[#allocation3 + $0x181] sm:$0xff] }
 0x469   : > { %4005 = vst.msk [vmem:[#allocation3 + $0x191] sm:$0xff] %vm380_vm2, %v3996_v26  ;;  %v3958_v31 = vadd.f32 %v3957_v39, %v3900_v21  ;;  %5034 = vrot.lane.b32.xlu2 %v12158_v44, %s8684_s21  ;;  %5932 = vrot.lane.b32.xlu1 %v12160_v29, %s8685_s24  ;;  %v12175_v50 = vld [vmem:[#allocation3 + $0x182] sm:$0xff] }
 0x46a   : > { %5222 = vrot.lane.b32.xlu0 %v12141_v45, %s8689_s28  ;;  %4821 = vmatmul.f32.gmra.mxu0 %v12008_v42 }
 0x46b   : > { %v3977_v11 = vmul.f32 %v12093_v5, %v3958_v31  ;;  %4883 = vmatmul.f32.gmra.mxu1 %v12006_v58 }
 0x46d   : > { %v3989_v56 = vadd.f32 %v12100_v38, %v3977_v11 }
 0x46e   : > { %v3903_v49 = vpop.f32.mrf.mxu2 }
 0x46f   : > { %v3997_v10 = vmax.f32 %v3989_v56, 0.0  ;;  %v3904_v52 = vadd.f32 %v3903_v49, %v3826_v22  ;;  %v3965_v41 = vpop.f32.mrf.mxu3  ;;  %v12228_v57 = vpop.permute.xlu1 %5122 }
 0x470   : > { %v4959_v15 = vld [vmem:[#allocation3 + $0x191] sm:$0xff] }
 0x471   : > { %4006 = vst.msk [vmem:[#allocation3 + $0x1a1] sm:$0xff] %vm380_vm2, %v3997_v10  ;;  %v3962_v42 = vadd.f32 %v3961_v34, %v3904_v52  ;;  %5934 = vrot.lane.b32.xlu2 %v12175_v50, %s8685_s24  ;;  %5224 = vrot.lane.b32.xlu1 %v12158_v44, %s8689_s28  ;;  %v12190_v17 = vld [vmem:[#allocation3 + $0x192] sm:$0xff] }
 0x472   : > { %5036 = vrot.lane.b32.xlu0 %v4959_v15, %s8684_s21  ;;  %4825 = vmatmul.f32.gmra.mxu0 %v12006_v58  ;;  %14961 = vst [vmem:[#allocation40_spill] sm:$0xff] %v12190_v17 }
 0x473   : > { %v3978_v13 = vmul.f32 %v12093_v5, %v3962_v42  ;;  %4887 = vmatmul.f32.gmra.mxu1 %v12032_v6 }
 0x475   : > { %v3990_v4 = vadd.f32 %v12100_v38, %v3978_v13 }
 0x476   : > { %v3907_v19 = vpop.f32.mrf.mxu2 }
 0x477   : > { %v3998_v32 = vmax.f32 %v3990_v4, 0.0  ;;  %v3908_v23 = vadd.f32 %v3907_v19, %v3832_v18  ;;  %v12236_v26 = vpop.permute.xlu1 %5100 }
 0x478   : > { %v4960_v51 = vld [vmem:[#allocation3 + $0x1a1] sm:$0xff]  ;;  %14966 = vst [vmem:[#allocation38_spill] sm:$0xff] %v12236_v26  ;;  %v12515_v26 = vld [vmem:[#allocation3 + $0xb1] sm:$0xff] }
 0x479   : > { %4007 = vst.msk [vmem:[#allocation3 + $0x1b1] sm:$0xff] %vm380_vm2, %v3998_v32  ;;  %v3966_v40 = vadd.f32 %v3965_v41, %v3908_v23  ;;  %5226 = vrot.lane.b32.xlu2 %v4959_v15, %s8689_s28  ;;  %5038 = vrot.lane.b32.xlu1 %v4960_v51, %s8684_s21  ;;  %v5876_v14 = vld [vmem:[#allocation3 + $0x1a2] sm:$0xff] }
 0x47a   : > { %5936 = vrot.lane.b32.xlu0 %v12190_v17, %s8685_s24  ;;  %4829 = vmatmul.f32.gmra.mxu0 %v12032_v6  ;;  %15009 = vst [vmem:[#allocation14_spill] sm:$0xff] %v12515_v26 }
 0x47b   : > { %v3979_v58 = vmul.f32 %v12093_v5, %v3966_v40  ;;  %4891 = vmatmul.f32.gmra.mxu1 %v12058_v8  ;;  %v12208_v5 = vpop.permute.xlu2 %5096 }
 0x47c   : > { %14962 = vst [vmem:[#allocation5_spill] sm:$0xff] %v12208_v5  ;;  %v4467_v16 = vpop.f32.mrf.mxu0 }
 0x47d   : > { %v3991_v46 = vadd.f32 %v12100_v38, %v3979_v58  ;;  %v4589_v38 = vpop.f32.mrf.mxu1 }
 0x47e   : > { %v4657_v22 = vpop.f32.mrf.mxu2  ;;  %v4724_v10 = vpop.f32.mrf.mxu3  ;;  %v4590_v15 = vadd.f32 %v4589_v38, %v4467_v16  ;;  %v12278_v38 = vld [vmem:[%s14524_s6] ss:$0 sm:$0xff] }
 0x47f   : > { %v3999_v53 = vmax.f32 %v3991_v46, 0.0  ;;  %v12248_v35 = vpop.permute.xlu1 %5128 }
 0x480   : > { %v4961_v12 = vld [vmem:[#allocation3 + $0x1b1] sm:$0xff]  ;;  %14969 = vst [vmem:[#allocation57_spill] sm:$0xff] %v12248_v35  ;;  %v4658_v4 = vadd.f32 %v4657_v22, %v4590_v15 }
 0x481   : > { %4008 = vst.msk [vmem:[#allocation3 + $0x1c1] sm:$0xff] %vm380_vm2, %v3999_v53  ;;  %5040 = vrot.lane.b32.xlu2 %v4961_v12, %s8684_s21  ;;  %5938 = vrot.lane.b32.xlu1 %v5876_v14, %s8685_s24  ;;  %v5877_v6 = vld [vmem:[#allocation3 + $0x1b2] sm:$0xff]  ;;  %v12271_v53 = vld [vmem:[%s14523_s5] ss:$0 sm:$0xff] }
 0x482   : > { %5228 = vrot.lane.b32.xlu0 %v4960_v51, %s8689_s28  ;;  %4833 = vmatmul.f32.gmra.mxu0 %v12058_v8  ;;  %v4725_v23 = vadd.f32 %v4724_v10, %v4658_v4 }
 0x483   : > { %4895 = vmatmul.f32.gmra.mxu1 %v12080_v55  ;;  %v12214_v8 = vpop.permute.xlu2 %5124 }
 0x487   : > { %v12258_v7 = vpop.permute.xlu1 %5134 }
 0x488   : > { %v5009_v0 = vld [vmem:[#allocation3 + $0x1c1] sm:$0xff]  ;;  %v4593_v28 = vpop.f32.mrf.mxu1  ;;  %14971 = vst [vmem:[#allocation58_spill] sm:$0xff] %v12258_v7 }
 0x489   : > { %5940 = vrot.lane.b32.xlu2 %v5877_v6, %s8685_s24  ;;  %5230 = vrot.lane.b32.xlu1 %v4961_v12, %s8689_s28 }
 0x48a   : > { %4837 = vmatmul.f32.gmra.mxu0 %v12080_v55 }
 0x48b   : > { %4899 = vmatmul.f32.gmra.mxu1 %v12095_v54  ;;  %v12218_v47 = vpop.permute.xlu2 %5130 }
 0x48c   : > { %14963 = vst [vmem:[#allocation46_spill] sm:$0xff] %v12218_v47 }
 0x48f   : > { %v12266_v32 = vpop.permute.xlu1 %5156 }
 0x490   : > { %v4475_v43 = vpop.f32.mrf.mxu0  ;;  %v4662_v60 = vpop.f32.mrf.mxu2 }
 0x491   : > { %5232 = vrot.lane.b32.xlu2 %v5009_v0, %s8689_s28  ;;  %v4594_v41 = vadd.f32 %v4593_v28, %v4475_v43 }
 0x492   : > { %4841 = vmatmul.f32.gmra.mxu0 %v12095_v54  ;;  %v12226_v54 = vpop.permute.xlu0 %5058  ;;  %v4730_v18 = vpop.f32.mrf.mxu3 }
 0x493   : > { %v12222_v2 = vpop.permute.xlu2 %5102  ;;  %v4663_v14 = vadd.f32 %v4662_v60, %v4594_v41 }
 0x494   : > { %14964 = vst [vmem:[#allocation17_spill] sm:$0xff] %v12222_v2 }
 0x495   : > { %v4731_v43 = vadd.f32 %v4730_v18, %v4663_v14 }
 0x49a   : > { %v12238_v21 = vpop.permute.xlu0 %5092 }
 0x49b   : > { %v12230_v61 = vpop.permute.xlu2 %5136 }
 0x49c   : > { %14965 = vst [vmem:[#allocation10_spill] sm:$0xff] %v12230_v61 }
 0x49f   : > { %v4597_v48 = vpop.f32.mrf.mxu1 }
 0x4a2   : > { %v12246_v11 = vpop.permute.xlu0 %5098 }
 0x4a3   : > { %v12240_v3 = vpop.permute.xlu2 %5158  ;;  %14968 = vst [vmem:[#allocation44_spill] sm:$0xff] %v12246_v11 }
 0x4a4   : > { %14967 = vst [vmem:[#allocation36_spill] sm:$0xff] %v12240_v3  ;;  %v12650_v3 = vld [vmem:[#allocation3 + $0xc1] sm:$0xff] }
 0x4a5   : > { %15032 = vst [vmem:[#allocation75_spill] sm:$0xff] %v12650_v3 }
 0x4a7   : > { %v4483_v55 = vpop.f32.mrf.mxu0  ;;  %v4601_v62 = vpop.f32.mrf.mxu1 }
 0x4a8   : > { %v4667_v51 = vpop.f32.mrf.mxu2  ;;  %v4598_v22 = vadd.f32 %v4597_v48, %v4483_v55 }
 0x4a9   : > { %v4736_v0 = vpop.f32.mrf.mxu3 }
 0x4aa   : > { %v12256_v52 = vpop.permute.xlu0 %5126 }
 0x4ab   : > { %v12250_v56 = vpop.permute.xlu2 %5164 }
 0x4ac   : > { %14970 = vst [vmem:[#allocation62_spill] sm:$0xff] %v12250_v56 }
 0x4af   : > { %v4491_v39 = vpop.f32.mrf.mxu0  ;;  %v12224_v37 = vpop.f32.mrf.mxu1 }
 0x4b0   : > { %v4672_v41 = vpop.f32.mrf.mxu2  ;;  %v4602_v48 = vadd.f32 %v4601_v62, %v4491_v39 }
 0x4b2   : > { %v12264_v19 = vpop.permute.xlu0 %5104 }
 0x4b3   : > { %v12262_v27 = vpop.permute.xlu2 %5894  ;;  %14973 = vst [vmem:[#allocation8_spill] sm:$0xff] %v12264_v19 }
 0x4b4   : > { %14972 = vst [vmem:[#allocation52_spill] sm:$0xff] %v12262_v27  ;;  %v4742_v27 = vpop.f32.mrf.mxu3 }
 0x4b7   : > { %v12232_v63 = vpop.f32.mrf.mxu0  ;;  %v12234_v20 = vpop.f32.mrf.mxu1 }
 0x4b8   : > { %v4677_v62 = vpop.f32.mrf.mxu2 }
 0x4ba   : > { %v12281_v28 = vpop.permute.xlu0 %5132 }
 0x4bb   : > { %v12273_v12 = vpop.permute.xlu2 %5954  ;;  %14975 = vst [vmem:[#allocation47_spill] sm:$0xff] %v12281_v28 }
 0x4bc   : > { %14974 = vst [vmem:[#allocation64_spill] sm:$0xff] %v12273_v12 }
 0x4bf   : > { %v12242_v31 = vpop.f32.mrf.mxu0  ;;  %v12244_v25 = vpop.f32.mrf.mxu1 }
 0x4c3   : > { %v12287_v12 = vpop.permute.xlu2 %5960 }
 0x4c4   : > { %14977 = vst [vmem:[#allocation50_spill] sm:$0xff] %v12287_v12 }
 0x4c7   : > { %v12252_v34 = vpop.f32.mrf.mxu0  ;;  %v12254_v49 = vpop.f32.mrf.mxu1 }
 0x4cb   : > { %v12306_v39 = vpop.permute.xlu2 %5028 }
 0x4cf   : > { %v12260_v42 = vpop.f32.mrf.mxu0  ;;  %v4872_v13 = vpop.f32.mrf.mxu1 }
 0x4d7   : > { %v4814_v40 = vpop.f32.mrf.mxu0  ;;  %v4876_v58 = vpop.f32.mrf.mxu1 }
 0x4d8   : > { %v4815_v46 = vadd.f32 %v4814_v40, %v4725_v23  ;;  %v12284_v23 = vpop.permute.xlu1 %5162  ;;  %v4668_v40 = vadd.f32 %v4667_v51, %v4598_v22  ;;  %v4673_v22 = vadd.f32 %v4672_v41, %v4602_v48  ;;  %v4606_v41 = vadd.f32 %v12224_v37, %v12232_v63 }
 0x4d9   : > { %14976 = vst [vmem:[#allocation20_spill] sm:$0xff] %v12284_v23 }
 0x4da   : > { %v4873_v6 = vadd.f32 %v4872_v13, %v4815_v46  ;;  %v4737_v18 = vadd.f32 %v4736_v0, %v4668_v40 }
 0x4dc   : > { %v4907_v16 = vmul.f32 %v12271_v53, %v4873_v6 }
 0x4de   : > { %v4919_v10 = vadd.f32 %v12278_v38, %v4907_v16  ;;  %v12291_v16 = vpop.permute.xlu0 %5154 }
 0x4df   : > { %v4818_v15 = vpop.f32.mrf.mxu0 }
 0x4e0   : > { %v4880_v4 = vpop.f32.mrf.mxu1  ;;  %v4927_v60 = vmax.f32 %v4919_v10, 0.0  ;;  %v4819_v13 = vadd.f32 %v4818_v15, %v4731_v43 }
 0x4e2   : > { %4936 = vst.msk [vmem:[#allocation3 + $0x1f1] sm:$0xff] %vm380_vm2, %v4927_v60  ;;  %v4877_v46 = vadd.f32 %v4876_v58, %v4819_v13  ;;  %v12297_v58 = vpop.permute.xlu1 %5168  ;;  %v4743_v13 = vadd.f32 %v4742_v27, %v4673_v22  ;;  %v12326_v22 = vpop.permute.xlu2 %5928 }
 0x4e3   : > { %14978 = vst [vmem:[#allocation12_spill] sm:$0xff] %v12297_v58 }
 0x4e4   : > { %v4908_v6 = vmul.f32 %v12271_v53, %v4877_v46  ;;  %14981 = vst [vmem:[#allocation67_spill] sm:$0xff] %v12326_v22 }
 0x4e6   : > { %v4920_v55 = vadd.f32 %v12278_v38, %v4908_v6  ;;  %v12314_v48 = vpop.permute.xlu0 %5160 }
 0x4e7   : > { %v4822_v14 = vpop.f32.mrf.mxu0  ;;  %14979 = vst [vmem:[#allocation25_spill] sm:$0xff] %v12314_v48 }
 0x4e8   : > { %v4928_v61 = vmax.f32 %v4920_v55, 0.0  ;;  %v4823_v10 = vadd.f32 %v4822_v14, %v4737_v18  ;;  %v4884_v43 = vpop.f32.mrf.mxu1  ;;  %v4678_v55 = vadd.f32 %v4677_v62, %v4606_v41 }
 0x4e9   : > { %v12293_v15 = vld [vmem:[#allocation3 + $0x1f0] sm:$0xff] }
 0x4ea   : > { %v12295_v51 = vld [vmem:[#allocation3 + $0x1f1] sm:$0xff]  ;;  %4937 = vst.msk [vmem:[#allocation3 + $0x201] sm:$0xff] %vm380_vm2, %v4928_v61  ;;  %v4881_v60 = vadd.f32 %v4880_v4, %v4823_v10  ;;  %5186 = vrot.lane.b32.xlu2 %v12293_v15, %s8686_s25  ;;  %v4748_v4 = vpop.f32.mrf.mxu3  ;;  %v12323_v63 = vpop.permute.xlu1 %5926 }
 0x4eb   : > { %5060 = vrot.lane.b32.xlu1 %v12295_v51, %s8685_s24  ;;  %5250 = vrot.lane.b32.xlu0 %v12295_v51, %s8688_s27  ;;  %14980 = vst [vmem:[#allocation37_spill] sm:$0xff] %v12323_v63  ;;  %v4682_v10 = vpop.f32.mrf.mxu2 }
 0x4ec   : > { %v4909_v0 = vmul.f32 %v12271_v53, %v4881_v60  ;;  %v4749_v60 = vadd.f32 %v4748_v4, %v4678_v55 }
 0x4ee   : > { %v4921_v61 = vadd.f32 %v12278_v38, %v4909_v0 }
 0x4ef   : > { %v4826_v40 = vpop.f32.mrf.mxu0 }
 0x4f0   : > { %v4929_v46 = vmax.f32 %v4921_v61, 0.0  ;;  %v4827_v6 = vadd.f32 %v4826_v40, %v4743_v13  ;;  %v4888_v37 = vpop.f32.mrf.mxu1 }
 0x4f1   : > { %v12312_v18 = vld [vmem:[#allocation3 + $0x201] sm:$0xff] }
 0x4f2   : > { %4938 = vst.msk [vmem:[#allocation3 + $0x211] sm:$0xff] %vm380_vm2, %v4929_v46  ;;  %v4885_v14 = vadd.f32 %v4884_v43, %v4827_v6  ;;  %5062 = vrot.lane.b32.xlu2 %v12312_v18, %s8685_s24  ;;  %v4610_v43 = vadd.f32 %v12234_v20, %v12242_v31  ;;  %v4754_v61 = vpop.f32.mrf.mxu3  ;;  %v12338_v4 = vld [vmem:[#allocation3 + $0x200] sm:$0xff]  ;;  %v12342_v20 = vpop.permute.xlu0 %5166 }
 0x4f3   : > { %5252 = vrot.lane.b32.xlu1 %v12312_v18, %s8688_s27  ;;  %5896 = vrot.lane.b32.xlu0 %v12295_v51, %s8684_s21  ;;  %14982 = vst [vmem:[#allocation56_spill] sm:$0xff] %v12342_v20 }
 0x4f4   : > { %v4910_v27 = vmul.f32 %v12271_v53, %v4885_v14  ;;  %v4683_v46 = vadd.f32 %v4682_v10, %v4610_v43  ;;  %v12345_v14 = vpop.permute.xlu1 %5952 }
 0x4f5   : > { %14983 = vst [vmem:[#allocation48_spill] sm:$0xff] %v12345_v14 }
 0x4f6   : > { %v4922_v62 = vadd.f32 %v12278_v38, %v4910_v27  ;;  %v4755_v27 = vadd.f32 %v4754_v61, %v4683_v46 }
 0x4f7   : > { %v4830_v0 = vpop.f32.mrf.mxu0 }
 0x4f8   : > { %v4930_v13 = vmax.f32 %v4922_v62, 0.0  ;;  %v4831_v41 = vadd.f32 %v4830_v0, %v4749_v60  ;;  %v4892_v55 = vpop.f32.mrf.mxu1  ;;  %v4687_v60 = vpop.f32.mrf.mxu2 }
 0x4f9   : > { %v12331_v40 = vld [vmem:[#allocation3 + $0x211] sm:$0xff]  ;;  %v12350_v62 = vpop.permute.xlu2 %5220 }
 0x4fa   : > { %4939 = vst.msk [vmem:[#allocation3 + $0x221] sm:$0xff] %vm380_vm2, %v4930_v13  ;;  %v4889_v6 = vadd.f32 %v4888_v37, %v4831_v41  ;;  %5254 = vrot.lane.b32.xlu2 %v12331_v40, %s8688_s27  ;;  %v4614_v37 = vadd.f32 %v12244_v25, %v12252_v34  ;;  %v12352_v41 = vld [vmem:[#allocation3 + $0x210] sm:$0xff]  ;;  %v4760_v25 = vpop.f32.mrf.mxu3  ;;  %v12362_v61 = vpop.permute.xlu0 %5950 }
 0x4fb   : > { %5898 = vrot.lane.b32.xlu1 %v12312_v18, %s8684_s21  ;;  %5188 = vrot.lane.b32.xlu0 %v12338_v4, %s8686_s25  ;;  %14984 = vst [vmem:[#allocation70_spill] sm:$0xff] %v12352_v41 }
 0x4fc   : > { %v4911_v31 = vmul.f32 %v12271_v53, %v4889_v6  ;;  %v4688_v12 = vadd.f32 %v4687_v60, %v4614_v37  ;;  %14985 = vst [vmem:[#allocation4_spill] sm:$0xff] %v12362_v61 }
 0x4fe   : > { %v4923_v10 = vadd.f32 %v12278_v38, %v4911_v31  ;;  %v4761_v46 = vadd.f32 %v4760_v25, %v4688_v12  ;;  %v4618_v31 = vadd.f32 %v12254_v49, %v12260_v42 }
 0x4ff   : > { %v4834_v43 = vpop.f32.mrf.mxu0 }
 0x500   : > { %v4931_v0 = vmax.f32 %v4923_v10, 0.0  ;;  %v4835_v13 = vadd.f32 %v4834_v43, %v4755_v27  ;;  %v4896_v27 = vpop.f32.mrf.mxu1  ;;  %v12367_v10 = vpop.permute.xlu1 %5958 }
 0x501   : > { %14986 = vst [vmem:[#allocation16_spill] sm:$0xff] %v12367_v10  ;;  %v12371_v14 = vld [vmem:[#allocation3 + $0x221] sm:$0xff] }
 0x502   : > { %4940 = vst.msk [vmem:[#allocation3 + $0x231] sm:$0xff] %vm380_vm2, %v4931_v0  ;;  %v4893_v6 = vadd.f32 %v4892_v55, %v4835_v13  ;;  %5900 = vrot.lane.b32.xlu2 %v12331_v40, %s8684_s21  ;;  %v4692_v0 = vpop.f32.mrf.mxu2  ;;  %v12369_v13 = vld [vmem:[#allocation3 + $0x220] sm:$0xff]  ;;  %v4766_v42 = vpop.f32.mrf.mxu3 }
 0x503   : > { %5190 = vrot.lane.b32.xlu1 %v12352_v41, %s8686_s25  ;;  %5064 = vrot.lane.b32.xlu0 %v12331_v40, %s8685_s24  ;;  %14987 = vst [vmem:[#allocation54_spill] sm:$0xff] %v12369_v13  ;;  %v4693_v22 = vadd.f32 %v4692_v0, %v4618_v31 }
 0x504   : > { %v4912_v34 = vmul.f32 %v12271_v53, %v4893_v6  ;;  %14988 = vst [vmem:[#allocation6_spill] sm:$0xff] %v12371_v14  ;;  %v12373_v6 = vpop.permute.xlu2 %5034 }
 0x505   : > { %14989 = vst [vmem:[#allocation51_spill] sm:$0xff] %v12373_v6  ;;  %v4767_v25 = vadd.f32 %v4766_v42, %v4693_v22 }
 0x506   : > { %v4924_v55 = vadd.f32 %v12278_v38, %v4912_v34 }
 0x507   : > { %v4838_v37 = vpop.f32.mrf.mxu0 }
 0x508   : > { %v4932_v60 = vmax.f32 %v4924_v55, 0.0  ;;  %v4839_v43 = vadd.f32 %v4838_v37, %v4761_v46  ;;  %v12384_v37 = vpop.permute.xlu0 %5956 }
 0x509   : > { %14990 = vst [vmem:[#allocation33_spill] sm:$0xff] %v12384_v37  ;;  %v5344_v37 = vld [vmem:[%s14525_s7 + $0x30] sm:$0xff] }
 0x50a   : > { %4941 = vst.msk [vmem:[#allocation3 + $0x241] sm:$0xff] %vm380_vm2, %v4932_v60  ;;  %v4897_v12 = vadd.f32 %v4896_v27, %v4839_v43  ;;  %5192 = vrot.lane.b32.xlu2 %v12369_v13, %s8686_s25  ;;  %v4900_v27 = vpop.f32.mrf.mxu1  ;;  %v12386_v60 = vld [vmem:[#allocation3 + $0x231] sm:$0xff]  ;;  %v12388_v43 = vpop.permute.xlu1 %5964 }
 0x50b   : > { %5066 = vrot.lane.b32.xlu1 %v12371_v14, %s8685_s24  ;;  %5256 = vrot.lane.b32.xlu0 %v12371_v14, %s8688_s27  ;;  %14991 = vst [vmem:[#allocation22_spill] sm:$0xff] %v12386_v60 }
 0x50c   : > { %v4913_v49 = vmul.f32 %v12271_v53, %v4897_v12  ;;  %14992 = vst [vmem:[#allocation32_spill] sm:$0xff] %v12388_v43  ;;  %v12397_v22 = vpop.permute.xlu2 %5934 }
 0x50d   : > { %14993 = vst [vmem:[#allocation68_spill] sm:$0xff] %v12397_v22 }
 0x50e   : > { %v4925_v34 = vadd.f32 %v12278_v38, %v4913_v49 }
 0x50f   : > { %v4842_v46 = vpop.f32.mrf.mxu0 }
 0x510   : > { %v4933_v31 = vmax.f32 %v4925_v34, 0.0  ;;  %v4843_v55 = vadd.f32 %v4842_v46, %v4767_v25  ;;  %v12410_v46 = vld [vmem:[#allocation3 + $0x230] sm:$0xff] }
 0x511   : > { %v12401_v25 = vld [vmem:[#allocation3 + $0x241] sm:$0xff]  ;;  %14995 = vst [vmem:[#allocation34_spill] sm:$0xff] %v12410_v46 }
 0x512   : > { %4942 = vst.msk [vmem:[#allocation3 + $0x251] sm:$0xff] %vm380_vm2, %v4933_v31  ;;  %v4901_v0 = vadd.f32 %v4900_v27, %v4843_v55  ;;  %5068 = vrot.lane.b32.xlu2 %v12386_v60, %s8685_s24  ;;  %v12403_v34 = vpop.permute.xlu1 %5218  ;;  %v12412_v31 = vpop.permute.xlu0 %5962 }
 0x513   : > { %5258 = vrot.lane.b32.xlu1 %v12386_v60, %s8688_s27  ;;  %5902 = vrot.lane.b32.xlu0 %v12371_v14, %s8684_s21  ;;  %14994 = vst [vmem:[#allocation60_spill] sm:$0xff] %v12401_v25 }
 0x514   : > { %v4914_v12 = vmul.f32 %v12271_v53, %v4901_v0  ;;  %14996 = vst [vmem:[#allocation45_spill] sm:$0xff] %v12412_v31  ;;  %v12416_v53 = vpop.permute.xlu2 %5226  ;;  %v5346_v0 = vld [vmem:[%s14525_s7 + $0x40] sm:$0xff]  ;;  %v5345_v31 = vld [vmem:[%s14525_s7 + $0x38] sm:$0xff] }
 0x515   : > { %14997 = vst [vmem:[#allocation9_spill] sm:$0xff] %v12416_v53  ;;  %v12451_v22 = vand.u32 4294901760, %v5345_v31 }
 0x516   : > { %v4926_v49 = vadd.f32 %v12278_v38, %v4914_v12  ;;  %v12418_v38 = vld [vmem:[#allocation3 + $0x240] sm:$0xff] }
 0x517   : > { %14998 = vst [vmem:[#allocation18_spill] sm:$0xff] %v12418_v38  ;;  %v12465_v58 = vsub.f32 %v5345_v31, %v12451_v22 }
 0x518   : > { %v4934_v42 = vmax.f32 %v4926_v49, 0.0  ;;  %v12435_v49 = vand.u32 4294901760, %v5346_v0 }
 0x519   : > { %v12439_v43 = vld [vmem:[#allocation3 + $0x251] sm:$0xff]  ;;  %v12480_v31 = vand.u32 4294901760, %v12465_v58 }
 0x51a   : > { %4943 = vst.msk [vmem:[#allocation3 + $0x261] sm:$0xff] %vm380_vm2, %v4934_v42  ;;  %5260 = vrot.lane.b32.xlu2 %v12401_v25, %s8688_s27  ;;  %v12420_v55 = vpop.permute.xlu1 %5032  ;;  %v12426_v27 = vpop.permute.xlu0 %5030  ;;  %v12437_v42 = vld [vmem:[#allocation3 + $0x250] sm:$0xff]  ;;  %v12449_v10 = vsub.f32 %v5346_v0, %v12435_v49  ;;  %5638 = vmatpush.msra.mxu1 %v12435_v49  ;;  %v12468_v0 = vand.u32 4294901760, %v5344_v37 }
 0x51b   : > { %5904 = vrot.lane.b32.xlu1 %v12386_v60, %s8684_s21  ;;  %5194 = vrot.lane.b32.xlu0 %v12410_v46, %s8686_s25  ;;  %14999 = vst [vmem:[#allocation65_spill] sm:$0xff] %v12420_v55  ;;  %v5477_v2 = vsub.f32 %v12465_v58, %v12480_v31 }
 0x51c   : > { %v12433_v12 = vpop.permute.xlu2 %5040  ;;  %15001 = vst [vmem:[#allocation13_spill] sm:$0xff] %v12437_v42  ;;  %v12462_v63 = vand.u32 4294901760, %v12449_v10  ;;  %5564 = vmatpush.msra.mxu0 %v12449_v10  ;;  %5379 = vmatpush.msra.mxu2 %v12435_v49 }
 0x51d   : > { %15000 = vst [vmem:[#allocation24_spill] sm:$0xff] %v12433_v12  ;;  %5640 = vmatpush.msra.mxu1 %v12451_v22  ;;  %v12483_v12 = vsub.f32 %v5344_v37, %v12468_v0 }
 0x51e   : > { %15002 = vst [vmem:[#allocation19_spill] sm:$0xff] %v12439_v43  ;;  %5567 = vmatpush.msra.mxu0 %v12465_v58  ;;  %5381 = vmatpush.msra.mxu2 %v12451_v22 }
 0x51f   : > { %5642 = vmatpush.msra.mxu1 %v12468_v0  ;;  %v12498_v37 = vand.u32 4294901760, %v12483_v12 }
 0x520   : > { %5570 = vmatpush.msra.mxu0 %v12483_v12  ;;  %5383 = vmatpush.msra.mxu2 %v12468_v0 }
 0x521   : > { %v12505_v56 = vld [vmem:[#allocation3 + $0x261] sm:$0xff]  ;;  %v5483_v23 = vsub.f32 %v12483_v12, %v12498_v37 }
 0x522   : > { %5906 = vrot.lane.b32.xlu2 %v12401_v25, %s8684_s21  ;;  %v12459_v61 = vpop.permute.xlu1 %5932  ;;  %v12471_v19 = vpop.permute.xlu0 %5930  ;;  %15007 = vst [vmem:[#allocation69_spill] sm:$0xff] %v12505_v56 }
 0x523   : > { %5196 = vrot.lane.b32.xlu1 %v12418_v38, %s8686_s25  ;;  %5070 = vrot.lane.b32.xlu0 %v12401_v25, %s8685_s24  ;;  %15003 = vst [vmem:[#allocation59_spill] sm:$0xff] %v12459_v61  ;;  %v5471_v61 = vsub.f32 %v12449_v10, %v12462_v63 }
 0x524   : > { %15004 = vst [vmem:[#allocation66_spill] sm:$0xff] %v12471_v19  ;;  %v5342_v19 = vld [vmem:[%s14525_s7 + $0x20] sm:$0xff]  ;;  %v12513_v53 = vpop.permute.xlu2 %5940 }
 0x525   : > { %v12493_v7 = vand.u32 4294901760, %v5471_v61  ;;  %v12507_v28 = vand.u32 4294901760, %v5342_v19  ;;  %v5341_v61 = vld [vmem:[%s14525_s7 + $0x18] sm:$0xff]  ;;  %15008 = vst [vmem:[#allocation11_spill] sm:$0xff] %v12513_v53 }
 0x526   : > { %v12528_v46 = vand.u32 4294901760, %v5341_v61 }
 0x527   : > { %15005 = vst [vmem:[#allocation61_spill] sm:$0xff] %v12493_v7  ;;  %5473 = vmatpush.msra.mxu3 %v12493_v7  ;;  %v12534_v53 = vsub.f32 %v5342_v19, %v12507_v28 }
 0x528   : > { %v12545_v11 = vsub.f32 %v5341_v61, %v12528_v46 }
 0x529   : > { %15012 = vst [vmem:[#allocation71_spill] sm:$0xff] %v12534_v53  ;;  %v12552_v19 = vand.u32 4294901760, %v12534_v53 }
 0x52a   : > { %5198 = vrot.lane.b32.xlu2 %v12437_v42, %s8686_s25  ;;  %v5343_v42 = vld [vmem:[%s14525_s7 + $0x28] sm:$0xff]  ;;  %15014 = vst [vmem:[#allocation29_spill] sm:$0xff] %v12545_v11  ;;  %v12558_v13 = vpop.permute.xlu1 %5224  ;;  %v12563_v61 = vand.u32 4294901760, %v12545_v11  ;;  %v12572_v60 = vpop.permute.xlu0 %5222 }
 0x52b   : > { %5072 = vrot.lane.b32.xlu1 %v12439_v43, %s8685_s24  ;;  %5262 = vrot.lane.b32.xlu0 %v12439_v43, %s8688_s27  ;;  %v12486_v20 = vand.u32 4294901760, %v5343_v42  ;;  %15015 = vst [vmem:[#allocation30_spill] sm:$0xff] %v12552_v19 }
 0x52c   : > { %15016 = vst [vmem:[#allocation21_spill] sm:$0xff] %v12558_v13  ;;  %v5338_v13 = vld [vmem:[%s14525_s7] sm:$0xff] }
 0x52d   : > { %v12501_v38 = vsub.f32 %v5343_v42, %v12486_v20  ;;  %5644 = vmatpush.msra.mxu1 %v12486_v20  ;;  %v12521_v42 = vand.u32 4294901760, %v5477_v2  ;;  %v5340_v2 = vld [vmem:[%s14525_s7 + $0x10] sm:$0xff]  ;;  %5385 = vmatpush.msra.mxu2 %v12486_v20  ;;  %15018 = vst [vmem:[#allocation49_spill] sm:$0xff] %v12563_v61  ;;  %v12590_v35 = vand.u32 4294901760, %v5338_v13 }
 0x52e   : > { %15020 = vst [vmem:[#allocation53_spill] sm:$0xff] %v12572_v60  ;;  %v12601_v60 = vld [vmem:[#allocation3 + $0xd1] sm:$0xff] }
 0x52f   : > { %15006 = vst [vmem:[#allocation63_spill] sm:$0xff] %v12501_v38  ;;  %v12526_v47 = vand.u32 4294901760, %v12501_v38  ;;  %5573 = vmatpush.msra.mxu0 %v12501_v38  ;;  %5646 = vmatpush.msra.mxu1 %v12507_v28  ;;  %v12613_v55 = vsub.f32 %v5338_v13, %v12590_v35 }
 0x530   : > { %15010 = vst [vmem:[#allocation31_spill] sm:$0xff] %v12521_v42  ;;  %5479 = vmatpush.msra.mxu3 %v12521_v42  ;;  %5387 = vmatpush.msra.mxu2 %v12507_v28 }
 0x531   : > { %15011 = vst [vmem:[#allocation28_spill] sm:$0xff] %v12526_v47  ;;  %5576 = vmatpush.msra.mxu0 %v12534_v53  ;;  %5648 = vmatpush.msra.mxu1 %v12528_v46 }
 0x532   : > { %5974 = vrot.lane.b32.xlu2 %v12515_v26, %s8693_s19  ;;  %v12539_v26 = vand.u32 4294901760, %v5483_v23  ;;  %v5339_v23 = vld [vmem:[%s14525_s7 + $0x8] sm:$0xff]  ;;  %5389 = vmatpush.msra.mxu2 %v12528_v46  ;;  %15025 = vst [vmem:[#allocation27_spill] sm:$0xff] %v12601_v60 }
 0x533   : > { %5264 = vrot.lane.b32.xlu1 %v12505_v56, %s8688_s27  ;;  %5908 = vrot.lane.b32.xlu0 %v12439_v43, %s8684_s21  ;;  %v5489_v56 = vsub.f32 %v12501_v38, %v12526_v47  ;;  %v12547_v43 = vand.u32 4294901760, %v5340_v2  ;;  %v12569_v14 = vand.u32 4294901760, %v5339_v23 }
 0x534   : > { %15013 = vst [vmem:[#allocation72_spill] sm:$0xff] %v12539_v26  ;;  %5485 = vmatpush.msra.mxu3 %v12539_v26  ;;  %5579 = vmatpush.msra.mxu0 %v12545_v11 }
 0x535   : > { %v12560_v6 = vand.u32 4294901760, %v5489_v56  ;;  %v12567_v25 = vsub.f32 %v5340_v2, %v12547_v43  ;;  %v5495_v56 = vsub.f32 %v12534_v53, %v12552_v19  ;;  %v5501_v2 = vsub.f32 %v12545_v11, %v12563_v61  ;;  %5650 = vmatpush.msra.mxu1 %v12547_v43  ;;  %v12597_v53 = vld [vmem:[#allocation3 + $0xe1] sm:$0xff]  ;;  %5391 = vmatpush.msra.mxu2 %v12547_v43 }
 0x536   : > { %v12588_v48 = vsub.f32 %v5339_v23, %v12569_v14  ;;  %15024 = vst [vmem:[#allocation26_spill] sm:$0xff] %v12597_v53  ;;  %v5001_v23 = vld [vmem:[#allocation3 + $0x260] sm:$0xff] }
 0x537   : > { %15017 = vst [vmem:[#allocation23_spill] sm:$0xff] %v12560_v6  ;;  %v12584_v17 = vand.u32 4294901760, %v12567_v25  ;;  %5491 = vmatpush.msra.mxu3 %v12560_v6  ;;  %v12594_v5 = vand.u32 4294901760, %v5495_v56  ;;  %v12605_v11 = vand.u32 4294901760, %v5501_v2  ;;  %5582 = vmatpush.msra.mxu0 %v12567_v25 }
 0x538   : > { %15019 = vst [vmem:[#allocation43_spill] sm:$0xff] %v12567_v25  ;;  %v12610_v56 = vand.u32 4294901760, %v12588_v48  ;;  %5652 = vmatpush.msra.mxu1 %v12569_v14  ;;  %5393 = vmatpush.msra.mxu2 %v12569_v14 }
 0x539   : > { %15021 = vst [vmem:[#allocation7_spill] sm:$0xff] %v12584_v17  ;;  %v5507_v41 = vsub.f32 %v12567_v25, %v12584_v17  ;;  %5497 = vmatpush.msra.mxu3 %v12594_v5  ;;  %5585 = vmatpush.msra.mxu0 %v12588_v48  ;;  %v8590_v25 = vld [vmem:[#allocation3 + $0x101] sm:$0xff] }
 0x53a   : > { %15022 = vst [vmem:[#allocation42_spill] sm:$0xff] %v12588_v48  ;;  %5980 = vrot.lane.b32.xlu2 %v12597_v53, %s8693_s19  ;;  %v12617_v53 = vpop.permute.xlu2 %5232  ;;  %v5513_v2 = vsub.f32 %v12588_v48, %v12610_v56  ;;  %5654 = vmatpush.msra.mxu1 %v12590_v35  ;;  %v8589_v48 = vld [vmem:[#allocation3 + $0x111] sm:$0xff] }
 0x53b   : > { %15023 = vst [vmem:[#allocation39_spill] sm:$0xff] %v12594_v5  ;;  %5978 = vrot.lane.b32.xlu1 %v12601_v60, %s8693_s19  ;;  %5200 = vrot.lane.b32.xlu0 %v5001_v23, %s8686_s25  ;;  %v12619_v38 = vand.u32 4294901760, %v5507_v41  ;;  %v12625_v60 = vand.u32 4294901760, %v12613_v55  ;;  %v12638_v23 = vpop.permute.xlu1 %5038 }
 0x53c   : > { %15026 = vst [vmem:[#allocation41_spill] sm:$0xff] %v12605_v11  ;;  %5503 = vmatpush.msra.mxu3 %v12605_v11  ;;  %v12630_v13 = vand.u32 4294901760, %v5513_v2  ;;  %5588 = vmatpush.msra.mxu0 %v12613_v55  ;;  %v12644_v2 = vpop.permute.xlu0 %5036 }
 0x53d   : > { %15027 = vst [vmem:[#allocation55_spill] sm:$0xff] %v12610_v56  ;;  %v5519_v41 = vsub.f32 %v12613_v55, %v12625_v60  ;;  %6300 = vmatpush.msrb.mxu1 %v12493_v7  ;;  %5395 = vmatpush.msra.mxu2 %v12590_v35 }
 0x53e   : > { %15028 = vst [vmem:[#allocation15_spill] sm:$0xff] %v12617_v53  ;;  %5509 = vmatpush.msra.mxu3 %v12619_v38  ;;  %6206 = vmatpush.msrb.mxu0 %v12435_v49 }
 0x53f   : > { %15029 = vst [vmem:[#allocation35_spill] sm:$0xff] %v12619_v38  ;;  %v12640_v53 = vand.u32 4294901760, %v5519_v41  ;;  %5714 = vmatpush.msrb.mxu2 %v12462_v63  ;;  %6306 = vmatpush.msrb.mxu1 %v12521_v42 }
 0x540   : > { %15030 = vst [vmem:[#allocation73_spill] sm:$0xff] %v12625_v60  ;;  %5515 = vmatpush.msra.mxu3 %v12630_v13  ;;  %6208 = vmatpush.msrb.mxu0 %v12451_v22 }
 0x541   : > { %15031 = vst [vmem:[#allocation74_spill] sm:$0xff] %v12630_v13  ;;  %5718 = vmatpush.msrb.mxu2 %v12480_v31  ;;  %6312 = vmatpush.msrb.mxu1 %v12539_v26  ;;  %v8592_v26 = vld [vmem:[#allocation3 + $0xf1] sm:$0xff] }
 0x542   : > { %5986 = vrot.lane.b32.xlu2 %v8589_v48, %s8693_s19  ;;  %5521 = vmatpush.msra.mxu3 %v12640_v53  ;;  %v5879_v48 = vld [vmem:[#allocation3 + $0x22] sm:$0xff] }
 0x543   : > { %5984 = vrot.lane.b32.xlu1 %v8590_v25, %s8693_s19  ;;  %5976 = vrot.lane.b32.xlu0 %v12650_v3, %s8693_s19  ;;  %v5878_v25 = vld [vmem:[#allocation3 + $0x12] sm:$0xff]  ;;  %v12667_v3 = vpop.permute.xlu1 %5938 }
 0x544   : > { %v5187_v41 = vpop.permute.xlu2 %5186  ;;  %5788 = vmatpush.msrb.mxu3 %v12435_v49  ;;  %5722 = vmatpush.msrb.mxu2 %v12498_v37  ;;  %15033 = vst [vmem:[#allocation76_spill] sm:$0xff] %v12667_v3  ;;  %v12671_v42 = vpop.permute.xlu0 %5936  ;;  %v8593_v3 = vld [vmem:[#allocation3 + $0x121] sm:$0xff] }
 0x545   : > { %6318 = vmatpush.msrb.mxu1 %v12560_v6  ;;  %6210 = vmatpush.msrb.mxu0 %v12468_v0  ;;  %15034 = vst [vmem:[#allocation77_spill] sm:$0xff] %v12671_v42 }
 0x546   : > { %5790 = vmatpush.msrb.mxu3 %v12451_v22  ;;  %5726 = vmatpush.msrb.mxu2 %v12526_v47 }
 0x547   : > { %6324 = vmatpush.msrb.mxu1 %v12594_v5  ;;  %6212 = vmatpush.msrb.mxu0 %v12486_v20 }
 0x548   : > { %5792 = vmatpush.msrb.mxu3 %v12468_v0  ;;  %5730 = vmatpush.msrb.mxu2 %v12552_v19 }
 0x549   : > { %6330 = vmatpush.msrb.mxu1 %v12605_v11  ;;  %6214 = vmatpush.msrb.mxu0 %v12507_v28 }
 0x54a   : > { %6008 = vrot.lane.b32.xlu2 %v5879_v48, %s8692_s18  ;;  %5794 = vmatpush.msrb.mxu3 %v12486_v20  ;;  %v4945_v48 = vld [vmem:[#allocation3 + $0x1e0] sm:$0xff] }
 0x54b   : > { %6006 = vrot.lane.b32.xlu1 %v5878_v25, %s8692_s18  ;;  %5982 = vrot.lane.b32.xlu0 %v8592_v26, %s8693_s19  ;;  %v5274_v26 = vsel %vm380_vm2, %v4945_v48, %v12216_v24  ;;  %v5881_v25 = vld [vmem:[#allocation3 + $0x42] sm:$0xff] }
 0x54c   : > { %v12675_v7 = vpop.permute.xlu2 %5062  ;;  %5796 = vmatpush.msrb.mxu3 %v12507_v28  ;;  %5734 = vmatpush.msrb.mxu2 %v12563_v61  ;;  %v5282_v42 = vsel %vm1534_vm5, %v5274_v26, %v12226_v54  ;;  %v12704_v48 = vpop.permute.xlu0 %5228 }
 0x54d   : > { %6336 = vmatpush.msrb.mxu1 %v12619_v38  ;;  %6216 = vmatpush.msrb.mxu0 %v12528_v46  ;;  %v12698_v38 = vpop.permute.xlu1 %5230 }
 0x54e   : > { %5798 = vmatpush.msrb.mxu3 %v12528_v46  ;;  %5738 = vmatpush.msrb.mxu2 %v12584_v17 }
 0x54f   : > { %6342 = vmatpush.msrb.mxu1 %v12630_v13  ;;  %6218 = vmatpush.msrb.mxu0 %v12547_v43 }
 0x550   : > { %5800 = vmatpush.msrb.mxu3 %v12547_v43  ;;  %5742 = vmatpush.msrb.mxu2 %v12610_v56 }
 0x551   : > { %6348 = vmatpush.msrb.mxu1 %v12640_v53  ;;  %6220 = vmatpush.msrb.mxu0 %v12569_v14 }
 0x552   : > { %6030 = vrot.lane.b32.xlu2 %v12114_v30, %s8686_s25  ;;  %5802 = vmatpush.msrb.mxu3 %v12569_v14  ;;  %v5290_v30 = vsel %vm1543_vm6, %v5282_v42, %v12202_v59  ;;  %v5880_v59 = vld [vmem:[#allocation3 + $0x32] sm:$0xff] }
 0x553   : > { %6012 = vrot.lane.b32.xlu1 %v5881_v25, %s8692_s18  ;;  %5988 = vrot.lane.b32.xlu0 %v8593_v3, %s8693_s19  ;;  %v5298_v54 = vsel %vm1552_vm7, %v5290_v30, %v12228_v57 }
 0x554   : > { %v12700_v24 = vpop.permute.xlu2 %5254  ;;  %5804 = vmatpush.msrb.mxu3 %v12590_v35  ;;  %5746 = vmatpush.msrb.mxu2 %v12625_v60  ;;  %v5306_v3 = vsel %vm1561_vm8, %v5298_v54, %v12291_v16 }
 0x555   : > { %6222 = vmatpush.msrb.mxu0 %v12590_v35  ;;  %v5314_v26 = vsel %vm1570_vm9, %v5306_v3, %v5187_v41 }
 0x556   : > { %v5322_v25 = vsel %vm1579_vm11, %v5314_v26, %v12403_v34 }
 0x55a   : > { %6032 = vrot.lane.b32.xlu2 %v12128_v33, %s8686_s25 }
 0x55b   : > { %6086 = vrot.lane.b32.xlu1 %v12126_v36, %s8688_s27  ;;  %6010 = vrot.lane.b32.xlu0 %v5880_v59, %s8692_s18  ;;  %v5275_v36 = vsel %vm380_vm2, %v12293_v15, %v12306_v39  ;;  %v5276_v39 = vsel %vm380_vm2, %v12338_v4, %v12426_v27  ;;  %v5882_v4 = vld [vmem:[#allocation3 + $0x52] sm:$0xff] }
 0x55c   : > { %v12725_v42 = vpop.permute.xlu2 %5900 }
 0x55d   : > { %v5061_v57 = vpop.permute.xlu1 %5060  ;;  %v5251_v16 = vpop.permute.xlu0 %5250 }
 0x55e   : > { %v5330_v30 = vsel %vm1588_vm10, %v5322_v25, %v5251_v16  ;;  %v5283_v34 = vsel %vm1534_vm5, %v5275_v36, %v5061_v57  ;;  %v5284_v57 = vsel %vm1534_vm5, %v5276_v39, %v12675_v7 }
 0x55f   : > { %v5348_v41 = vsel %vm1606_vm12, %v5330_v30, 0 }
 0x560   : > { %v12731_v54 = vand.u32 4294901760, %v5348_v41 }
 0x562   : > { %v5397_v33 = vsub.f32 %v5348_v41, %v12731_v54  ;;  %5523 = vmatmul.f32.vlgmr.msra.gmra.mxu3 %v12731_v54  ;;  %6034 = vrot.lane.b32.xlu2 %v12141_v45, %s8686_s25  ;;  %v15035_v41 = vld [vmem:[#allocation36_spill] sm:$0xff] }
 0x563   : > { %6088 = vrot.lane.b32.xlu1 %v12148_v1, %s8688_s27  ;;  %6054 = vrot.lane.b32.xlu0 %v12295_v51, %s8689_s28  ;;  %v5291_v1 = vsel %vm1543_vm6, %v5283_v34, %v12238_v21  ;;  %v15036_v34 = vld [vmem:[#allocation63_spill] sm:$0xff] }
 0x564   : > { %v5398_v3 = vand.u32 4294901760, %v5397_v33  ;;  %5591 = vmatmul.f32.vlgmr.msra.gmra.mxu0 %v5397_v33  ;;  %v12745_v26 = vpop.permute.xlu2 %5192  ;;  %6465 = vmatpush.msra.mxu3 %v12435_v49  ;;  %v5299_v21 = vsel %vm1552_vm7, %v5291_v1, %v12214_v8 }
 0x565   : > { %v5253_v59 = vpop.permute.xlu1 %5252  ;;  %v12748_v45 = vpop.permute.xlu0 %5896  ;;  %6541 = vmatpush.msra.mxu0 %v12462_v63 }
 0x566   : > { %v5399_v15 = vsub.f32 %v5397_v33, %v5398_v3  ;;  %5658 = vmatmul.f32.vlgmr.msra.gmra.mxu1 %v5398_v3  ;;  %6467 = vmatpush.msra.mxu3 %v12451_v22 }
 0x567   : > { %6615 = vmatpush.msra.mxu1 %v12435_v49  ;;  %6545 = vmatpush.msra.mxu0 %v12480_v31 }
 0x568   : > { %v5400_v51 = vand.u32 4294901760, %v5399_v15  ;;  %6469 = vmatpush.msra.mxu3 %v12468_v0  ;;  %v15038_v15 = vld [vmem:[#allocation70_spill] sm:$0xff] }
 0x569   : > { %6617 = vmatpush.msra.mxu1 %v12451_v22  ;;  %6549 = vmatpush.msra.mxu0 %v12498_v37 }
 0x56a   : > { %5401 = vmatmul.f32.vlgmr.msra.gmra.mxu2 %v5400_v51  ;;  %6036 = vrot.lane.b32.xlu2 %v12158_v44, %s8686_s25  ;;  %v5307_v44 = vsel %vm1561_vm8, %v5299_v21, %v12266_v32 }
 0x56b   : > { %6090 = vrot.lane.b32.xlu1 %v12160_v29, %s8688_s27  ;;  %6056 = vrot.lane.b32.xlu0 %v12312_v18, %s8689_s28  ;;  %v5292_v29 = vsel %vm1543_vm6, %v5284_v57, %v12220_v9  ;;  %v15040_v57 = vld [vmem:[#allocation71_spill] sm:$0xff] }
 0x56c   : > { %v12772_v25 = vpop.permute.xlu2 %5068  ;;  %6471 = vmatpush.msra.mxu3 %v12486_v20  ;;  %6391 = vmatpush.msra.mxu2 %v12449_v10  ;;  %v5300_v27 = vsel %vm1552_vm7, %v5292_v29, %v12256_v52 }
 0x56d   : > { %v12774_v16 = vpop.permute.xlu1 %5898  ;;  %v5189_v8 = vpop.permute.xlu0 %5188  ;;  %6619 = vmatpush.msra.mxu1 %v12468_v0  ;;  %6553 = vmatpush.msra.mxu0 %v12526_v47  ;;  %v5308_v33 = vsel %vm1561_vm8, %v5300_v27, %v15035_v41  ;;  %v15045_v41 = vld [vmem:[#allocation40_spill] sm:$0xff] }
 0x56e   : > { %v5315_v7 = vsel %vm1570_vm9, %v5307_v44, %v5189_v8  ;;  %6473 = vmatpush.msra.mxu3 %v12507_v28  ;;  %6394 = vmatpush.msra.mxu2 %v12465_v58  ;;  %v15041_v8 = vld [vmem:[#allocation5_spill] sm:$0xff] }
 0x56f   : > { %v5323_v18 = vsel %vm1579_vm11, %v5315_v7, %v12350_v62  ;;  %6621 = vmatpush.msra.mxu1 %v12486_v20  ;;  %6557 = vmatpush.msra.mxu0 %v12552_v19  ;;  %v8606_v19 = vld [vmem:[#allocation3 + $0x41] sm:$0xff] }
 0x570   : > { %v5331_v32 = vsel %vm1588_vm10, %v5323_v18, %v5253_v59  ;;  %6475 = vmatpush.msra.mxu3 %v12528_v46  ;;  %6397 = vmatpush.msra.mxu2 %v12483_v12  ;;  %v15037_v59 = vld [vmem:[#allocation65_spill] sm:$0xff] }
 0x571   : > { %v5351_v9 = vsel %vm1606_vm12, %v5331_v32, 0  ;;  %6623 = vmatpush.msra.mxu1 %v12507_v28  ;;  %6561 = vmatpush.msra.mxu0 %v12563_v61  ;;  %v15042_v18 = vld [vmem:[#allocation57_spill] sm:$0xff] }
 0x572   : > { %6014 = vrot.lane.b32.xlu2 %v5882_v4, %s8692_s18  ;;  %v12800_v62 = vand.u32 4294901760, %v5351_v9  ;;  %6477 = vmatpush.msra.mxu3 %v12547_v43  ;;  %v15043_v4 = vld [vmem:[#allocation29_spill] sm:$0xff] }
 0x573   : > { %6092 = vrot.lane.b32.xlu1 %v12175_v50, %s8688_s27  ;;  %6058 = vrot.lane.b32.xlu0 %v12331_v40, %s8689_s28  ;;  %v5277_v50 = vsel %vm380_vm2, %v15038_v15, %v15037_v59  ;;  %v15039_v40 = vld [vmem:[#allocation53_spill] sm:$0xff]  ;;  %v15046_v59 = vld [vmem:[#allocation43_spill] sm:$0xff]  ;;  %v15048_v15 = vld [vmem:[#allocation6_spill] sm:$0xff] }
 0x574   : > { %5527 = vmatmul.f32.gmra.mxu3 %v12800_v62  ;;  %v12808_v30 = vpop.permute.xlu2 %5260  ;;  %v5405_v36 = vsub.f32 %v5351_v9, %v12800_v62  ;;  %6400 = vmatpush.msra.mxu2 %v15036_v34  ;;  %v13018_v47 = vld [vmem:[#allocation3 + $0x21] sm:$0xff] }
 0x575   : > { %v5191_v52 = vpop.permute.xlu1 %5190  ;;  %v5065_v1 = vpop.permute.xlu0 %5064  ;;  %6479 = vmatpush.msra.mxu3 %v12569_v14  ;;  %6625 = vmatpush.msra.mxu1 %v12528_v46  ;;  %15080 = vst [vmem:[#allocation70_spill] sm:$0xff] %v13018_v47 }
 0x576   : > { %v5316_v3 = vsel %vm1570_vm9, %v5308_v33, %v5191_v52  ;;  %v5285_v39 = vsel %vm1534_vm5, %v5277_v50, %v5065_v1  ;;  %5596 = vmatmul.f32.gmra.mxu0 %v5405_v36  ;;  %v5406_v21 = vand.u32 4294901760, %v5405_v36  ;;  %6403 = vmatpush.msra.mxu2 %v15040_v57  ;;  %v15044_v52 = vld [vmem:[#allocation25_spill] sm:$0xff] }
 0x577   : > { %v5324_v51 = vsel %vm1579_vm11, %v5316_v3, %v15039_v40  ;;  %v5293_v29 = vsel %vm1543_vm6, %v5285_v39, %v15041_v8  ;;  %6481 = vmatpush.msra.mxu3 %v12590_v35  ;;  %6627 = vmatpush.msra.mxu1 %v12547_v43 }
 0x578   : > { %v5332_v44 = vsel %vm1588_vm10, %v5324_v51, %v12700_v24  ;;  %v5301_v32 = vsel %vm1552_vm7, %v5293_v29, %v15042_v18  ;;  %5664 = vmatmul.f32.gmra.mxu1 %v5406_v21  ;;  %v5407_v9 = vsub.f32 %v5405_v36, %v5406_v21  ;;  %6406 = vmatpush.msra.mxu2 %v15043_v4  ;;  %v15047_v36 = vld [vmem:[#allocation22_spill] sm:$0xff]  ;;  %v15049_v51 = vld [vmem:[#allocation21_spill] sm:$0xff] }
 0x579   : > { %v5354_v7 = vsel %vm1606_vm12, %v5332_v44, 0  ;;  %v5309_v24 = vsel %vm1561_vm8, %v5301_v32, %v15044_v52  ;;  %6629 = vmatpush.msra.mxu1 %v12569_v14  ;;  %6565 = vmatpush.msra.mxu0 %v12584_v17  ;;  %v15050_v44 = vld [vmem:[#allocation42_spill] sm:$0xff]  ;;  %v15051_v52 = vld [vmem:[#allocation60_spill] sm:$0xff] }
 0x57a   : > { %v12834_v27 = vand.u32 4294901760, %v5354_v7  ;;  %6094 = vrot.lane.b32.xlu2 %v15045_v41, %s8688_s27  ;;  %v5408_v33 = vand.u32 4294901760, %v5407_v9  ;;  %v5317_v3 = vsel %vm1570_vm9, %v5309_v24, %v12745_v26  ;;  %6409 = vmatpush.msra.mxu2 %v15046_v59  ;;  %v15052_v24 = vld [vmem:[#allocation51_spill] sm:$0xff]  ;;  %v15053_v41 = vld [vmem:[#allocation54_spill] sm:$0xff] }
 0x57b   : > { %6062 = vrot.lane.b32.xlu1 %v15047_v36, %s8689_s28  ;;  %6060 = vrot.lane.b32.xlu0 %v15048_v15, %s8689_s28  ;;  %v5325_v39 = vsel %vm1579_vm11, %v5317_v3, %v15049_v51  ;;  %v12870_v3 = vld [vmem:[#allocation3 + $0x1a1] sm:$0xff]  ;;  %v12874_v36 = vld [vmem:[#allocation3 + $0x191] sm:$0xff] }
 0x57c   : > { %v5413_v50 = vsub.f32 %v5354_v7, %v12834_v27  ;;  %5409 = vmatmul.f32.gmra.mxu2 %v5408_v33  ;;  %5531 = vmatmul.f32.gmra.mxu3 %v12834_v27  ;;  %v12851_v1 = vpop.permute.xlu2 %5906  ;;  %v5278_v33 = vsel %vm380_vm2, %v15053_v41, %v15052_v24  ;;  %v12887_v24 = vld [vmem:[#allocation3 + $0x1b1] sm:$0xff] }
 0x57d   : > { %v5067_v40 = vpop.permute.xlu1 %5066  ;;  %v5257_v26 = vpop.permute.xlu0 %5256  ;;  %6412 = vmatpush.msra.mxu2 %v15050_v44  ;;  %6631 = vmatpush.msra.mxu1 %v12590_v35  ;;  %15056 = vst [vmem:[#allocation36_spill] sm:$0xff] %v12887_v24 }
 0x57e   : > { %v5414_v21 = vand.u32 4294901760, %v5413_v50  ;;  %v5333_v8 = vsel %vm1588_vm10, %v5325_v39, %v5257_v26  ;;  %5601 = vmatmul.f32.gmra.mxu0 %v5413_v50  ;;  %v5286_v15 = vsel %vm1534_vm5, %v5278_v33, %v5067_v40  ;;  %v5884_v40 = vld [vmem:[#allocation3 + $0x72] sm:$0xff] }
 0x57f   : > { %v5357_v29 = vsel %vm1606_vm12, %v5333_v8, 0  ;;  %6415 = vmatpush.msra.mxu2 %v12613_v55  ;;  %6569 = vmatpush.msra.mxu0 %v12610_v56  ;;  %v15054_v8 = vld [vmem:[#allocation44_spill] sm:$0xff]  ;;  %v15057_v33 = vld [vmem:[#allocation46_spill] sm:$0xff] }
 0x580   : > { %v5415_v7 = vsub.f32 %v5413_v50, %v5414_v21  ;;  %v12861_v18 = vand.u32 4294901760, %v5357_v29  ;;  %5670 = vmatmul.f32.gmra.mxu1 %v5414_v21 }
 0x581   : > { %6573 = vmatpush.msra.mxu0 %v12625_v60 }
 0x582   : > { %v5416_v32 = vand.u32 4294901760, %v5415_v7  ;;  %v5421_v9 = vsub.f32 %v5357_v29, %v12861_v18  ;;  %6064 = vrot.lane.b32.xlu2 %v15051_v52, %s8689_s28  ;;  %v5294_v29 = vsel %vm1543_vm6, %v5286_v15, %v15054_v8  ;;  %v15055_v7 = vld [vmem:[#allocation34_spill] sm:$0xff] }
 0x583   : > { %6040 = vrot.lane.b32.xlu1 %v12870_v3, %s8686_s25  ;;  %6038 = vrot.lane.b32.xlu0 %v12874_v36, %s8686_s25  ;;  %v5279_v52 = vsel %vm380_vm2, %v15055_v7, %v12644_v2  ;;  %v5302_v60 = vsel %vm1552_vm7, %v5294_v29, %v15057_v33  ;;  %v15060_v33 = vld [vmem:[#allocation9_spill] sm:$0xff] }
 0x584   : > { %5417 = vmatmul.f32.gmra.mxu2 %v5416_v32  ;;  %5535 = vmatmul.f32.gmra.mxu3 %v12861_v18  ;;  %v5199_v50 = vpop.permute.xlu2 %5198  ;;  %v5422_v39 = vand.u32 4294901760, %v5421_v9  ;;  %v5883_v32 = vld [vmem:[#allocation3 + $0x62] sm:$0xff] }
 0x585   : > { %v5259_v51 = vpop.permute.xlu1 %5258  ;;  %v12880_v26 = vpop.permute.xlu0 %5902 }
 0x586   : > { %5606 = vmatmul.f32.gmra.mxu0 %v5421_v9  ;;  %v5423_v21 = vsub.f32 %v5421_v9, %v5422_v39  ;;  %v5287_v9 = vsel %vm1534_vm5, %v5279_v52, %v12772_v25 }
 0x588   : > { %5676 = vmatmul.f32.gmra.mxu1 %v5422_v39  ;;  %v5424_v41 = vand.u32 4294901760, %v5423_v21  ;;  %v15058_v39 = vld [vmem:[#allocation20_spill] sm:$0xff]  ;;  %v15059_v21 = vld [vmem:[#allocation38_spill] sm:$0xff] }
 0x589   : > { %v5310_v8 = vsel %vm1561_vm8, %v5302_v60, %v15058_v39  ;;  %v5295_v56 = vsel %vm1543_vm6, %v5287_v9, %v15059_v21  ;;  %v8597_v39 = vld [vmem:[#allocation3 + $0x1b2] sm:$0xff]  ;;  %v8598_v9 = vld [vmem:[#allocation3 + $0x1a2] sm:$0xff] }
 0x58a   : > { %6042 = vrot.lane.b32.xlu2 %v12887_v24, %s8686_s25  ;;  %v15088_v24 = vld [vmem:[#allocation35_spill] sm:$0xff] }
 0x58b   : > { %6018 = vrot.lane.b32.xlu1 %v5884_v40, %s8692_s18  ;;  %6016 = vrot.lane.b32.xlu0 %v5883_v32, %s8692_s18  ;;  %v5885_v32 = vld [vmem:[#allocation3 + $0x82] sm:$0xff] }
 0x58c   : > { %5425 = vmatmul.f32.gmra.mxu2 %v5424_v41  ;;  %v12897_v2 = vpop.permute.xlu2 %5974  ;;  %v15061_v41 = vld [vmem:[#allocation47_spill] sm:$0xff] }
 0x58d   : > { %v12899_v15 = vpop.permute.xlu1 %5904  ;;  %v5195_v7 = vpop.permute.xlu0 %5194  ;;  %v5303_v17 = vsel %vm1552_vm7, %v5295_v56, %v15061_v41 }
 0x58e   : > { %v5318_v29 = vsel %vm1570_vm9, %v5310_v8, %v5195_v7  ;;  %v15062_v7 = vld [vmem:[#allocation62_spill] sm:$0xff] }
 0x58f   : > { %v5326_v25 = vsel %vm1579_vm11, %v5318_v29, %v15060_v33  ;;  %v5311_v21 = vsel %vm1561_vm8, %v5303_v17, %v15062_v7  ;;  %v15063_v33 = vld [vmem:[#allocation18_spill] sm:$0xff]  ;;  %v15064_v17 = vld [vmem:[#allocation17_spill] sm:$0xff] }
 0x590   : > { %v5334_v52 = vsel %vm1588_vm10, %v5326_v25, %v5259_v51  ;;  %v5280_v25 = vsel %vm380_vm2, %v15063_v33, %v12638_v23  ;;  %v15065_v7 = vld [vmem:[#allocation58_spill] sm:$0xff]  ;;  %v5893_v33 = vld [vmem:[#allocation3 + $0x1c2] sm:$0xff] }
 0x591   : > { %v5360_v40 = vsel %vm1606_vm12, %v5334_v52, 0 }
 0x592   : > { %6020 = vrot.lane.b32.xlu2 %v5885_v32, %s8692_s18  ;;  %v12913_v60 = vand.u32 4294901760, %v5360_v40 }
 0x593   : > { %6098 = vrot.lane.b32.xlu1 %v8597_v39, %s8688_s27  ;;  %6096 = vrot.lane.b32.xlu0 %v8598_v9, %s8688_s27 }
 0x594   : > { %5539 = vmatmul.f32.gmra.mxu3 %v12913_v60  ;;  %v12918_v8 = vpop.permute.xlu2 %5980  ;;  %v5429_v56 = vsub.f32 %v5360_v40, %v12913_v60 }
 0x595   : > { %v5197_v51 = vpop.permute.xlu1 %5196  ;;  %v5071_v52 = vpop.permute.xlu0 %5070 }
 0x596   : > { %v5319_v29 = vsel %vm1570_vm9, %v5311_v21, %v5197_v51  ;;  %v5288_v41 = vsel %vm1534_vm5, %v5280_v25, %v5071_v52  ;;  %5611 = vmatmul.f32.gmra.mxu0 %v5429_v56  ;;  %v5430_v39 = vand.u32 4294901760, %v5429_v56  ;;  %v15067_v52 = vld [vmem:[#allocation69_spill] sm:$0xff] }
 0x597   : > { %v5327_v32 = vsel %vm1579_vm11, %v5319_v29, %v12704_v48  ;;  %v5296_v40 = vsel %vm1543_vm6, %v5288_v41, %v15064_v17  ;;  %v15066_v48 = vld [vmem:[#allocation56_spill] sm:$0xff] }
 0x598   : > { %v5335_v9 = vsel %vm1588_vm10, %v5327_v32, %v12808_v30  ;;  %v5304_v21 = vsel %vm1552_vm7, %v5296_v40, %v15065_v7  ;;  %5682 = vmatmul.f32.gmra.mxu1 %v5430_v39  ;;  %v5431_v23 = vsub.f32 %v5429_v56, %v5430_v39  ;;  %v15068_v32 = vld [vmem:[#allocation19_spill] sm:$0xff] }
 0x599   : > { %v5363_v51 = vsel %vm1606_vm12, %v5335_v9, 0  ;;  %v5312_v29 = vsel %vm1561_vm8, %v5304_v21, %v15066_v48  ;;  %v8599_v48 = vld [vmem:[#allocation3 + $0x31] sm:$0xff] }
 0x59a   : > { %v12937_v61 = vand.u32 4294901760, %v5363_v51  ;;  %6100 = vrot.lane.b32.xlu2 %v5893_v33, %s8688_s27  ;;  %v5432_v25 = vand.u32 4294901760, %v5431_v23  ;;  %v5320_v30 = vsel %vm1570_vm9, %v5312_v29, %v5199_v50  ;;  %v15069_v29 = vld [vmem:[#allocation24_spill] sm:$0xff] }
 0x59b   : > { %6068 = vrot.lane.b32.xlu1 %v15067_v52, %s8689_s28  ;;  %6066 = vrot.lane.b32.xlu0 %v15068_v32, %s8689_s28  ;;  %v5328_v9 = vsel %vm1579_vm11, %v5320_v30, %v12698_v38  ;;  %v8600_v30 = vld [vmem:[#allocation3 + $0x21] sm:$0xff] }
 0x59c   : > { %v5437_v41 = vsub.f32 %v5363_v51, %v12937_v61  ;;  %5433 = vmatmul.f32.gmra.mxu2 %v5432_v25  ;;  %5543 = vmatmul.f32.gmra.mxu3 %v12937_v61  ;;  %v12949_v56 = vpop.permute.xlu2 %5986  ;;  %v15070_v25 = vld [vmem:[#allocation13_spill] sm:$0xff] }
 0x59d   : > { %v5073_v39 = vpop.permute.xlu1 %5072  ;;  %v5263_v17 = vpop.permute.xlu0 %5262  ;;  %v5281_v38 = vsel %vm380_vm2, %v15070_v25, %v15069_v29  ;;  %v12963_v52 = vld [vmem:[#allocation3 + $0x1c1] sm:$0xff]  ;;  %v8603_v25 = vld [vmem:[#allocation3 + $0x51] sm:$0xff] }
 0x59e   : > { %v5438_v40 = vand.u32 4294901760, %v5437_v41  ;;  %v5336_v50 = vsel %vm1588_vm10, %v5328_v9, %v5263_v17  ;;  %5616 = vmatmul.f32.gmra.mxu0 %v5437_v41  ;;  %15071 = vst [vmem:[#allocation63_spill] sm:$0xff] %v12963_v52  ;;  %v5289_v32 = vsel %vm1534_vm5, %v5281_v38, %v5073_v39  ;;  %v15073_v39 = vld [vmem:[#allocation10_spill] sm:$0xff] }
 0x59f   : > { %v5366_v7 = vsel %vm1606_vm12, %v5336_v50, 0  ;;  %v8604_v38 = vld [vmem:[#allocation3 + $0x11] sm:$0xff] }
 0x5a0   : > { %v5439_v21 = vsub.f32 %v5437_v41, %v5438_v40  ;;  %v12955_v23 = vand.u32 4294901760, %v5366_v7  ;;  %5688 = vmatmul.f32.gmra.mxu1 %v5438_v40 }
 0x5a2   : > { %v5440_v51 = vand.u32 4294901760, %v5439_v21  ;;  %v5445_v33 = vsub.f32 %v5366_v7, %v12955_v23  ;;  %6719 = vrot.lane.b32.xlu2 %v8599_v48, %s8684_s21  ;;  %v15072_v7 = vld [vmem:[#allocation8_spill] sm:$0xff] }
 0x5a3   : > { %6717 = vrot.lane.b32.xlu1 %v8600_v30, %s8684_s21  ;;  %6044 = vrot.lane.b32.xlu0 %v12963_v52, %s8686_s25  ;;  %v5297_v21 = vsel %vm1543_vm6, %v5289_v32, %v15072_v7  ;;  %v8602_v48 = vld [vmem:[#allocation3 + $0x61] sm:$0xff] }
 0x5a4   : > { %5441 = vmatmul.f32.gmra.mxu2 %v5440_v51  ;;  %5547 = vmatmul.f32.gmra.mxu3 %v12955_v23  ;;  %v12969_v41 = vpop.permute.xlu2 %6008  ;;  %v5446_v17 = vand.u32 4294901760, %v5445_v33  ;;  %v5305_v51 = vsel %vm1552_vm7, %v5297_v21, %v15073_v39  ;;  %v15074_v32 = vld [vmem:[#allocation12_spill] sm:$0xff] }
 0x5a5   : > { %v5265_v9 = vpop.permute.xlu1 %5264  ;;  %v12971_v40 = vpop.permute.xlu0 %5908  ;;  %v8605_v52 = vld [vmem:[#allocation3 + $0x81] sm:$0xff] }
 0x5a6   : > { %5621 = vmatmul.f32.gmra.mxu0 %v5445_v33  ;;  %v5447_v50 = vsub.f32 %v5445_v33, %v5446_v17 }
 0x5a8   : > { %5694 = vmatmul.f32.gmra.mxu1 %v5446_v17  ;;  %v5448_v29 = vand.u32 4294901760, %v5447_v50  ;;  %v5313_v17 = vsel %vm1561_vm8, %v5305_v51, %v15074_v32 }
 0x5aa   : > { %6725 = vrot.lane.b32.xlu2 %v8602_v48, %s8684_s21  ;;  %v15075_v48 = vld [vmem:[#allocation15_spill] sm:$0xff] }
 0x5ab   : > { %6723 = vrot.lane.b32.xlu1 %v8603_v25, %s8684_s21  ;;  %6715 = vrot.lane.b32.xlu0 %v8604_v38, %s8684_s21  ;;  %v15076_v38 = vld [vmem:[#allocation14_spill] sm:$0xff] }
 0x5ac   : > { %5449 = vmatmul.f32.gmra.mxu2 %v5448_v29  ;;  %v12980_v30 = vpop.permute.xlu2 %6030 }
 0x5ad   : > { %v12982_v33 = vpop.permute.xlu1 %5978  ;;  %v5201_v7 = vpop.permute.xlu0 %5200 }
 0x5ae   : > { %v5321_v50 = vsel %vm1570_vm9, %v5313_v17, %v5201_v7 }
 0x5af   : > { %v5329_v21 = vsel %vm1579_vm11, %v5321_v50, %v15075_v48  ;;  %v13005_v48 = vld [vmem:[#allocation3 + $0x151] sm:$0xff] }
 0x5b0   : > { %v5337_v39 = vsel %vm1588_vm10, %v5329_v21, %v5265_v9  ;;  %15077 = vst [vmem:[#allocation65_spill] sm:$0xff] %v13005_v48  ;;  %v8609_v21 = vld [vmem:[#allocation3 + $0x71] sm:$0xff] }
 0x5b1   : > { %v5369_v25 = vsel %vm1606_vm12, %v5337_v39, 0 }
 0x5b2   : > { %6739 = vrot.lane.b32.xlu2 %v15076_v38, %s8685_s24  ;;  %v12993_v29 = vand.u32 4294901760, %v5369_v25 }
 0x5b3   : > { %6729 = vrot.lane.b32.xlu1 %v8605_v52, %s8684_s21  ;;  %6721 = vrot.lane.b32.xlu0 %v8606_v19, %s8684_s21  ;;  %v8608_v52 = vld [vmem:[#allocation3 + $0x1f0] sm:$0xff] }
 0x5b4   : > { %5551 = vmatmul.f32.gmra.mxu3 %v12993_v29  ;;  %v12998_v51 = vpop.permute.xlu2 %6032  ;;  %v5453_v9 = vsub.f32 %v5369_v25, %v12993_v29 }
 0x5b5   : > { %v13000_v32 = vpop.permute.xlu1 %5984  ;;  %v13003_v17 = vpop.permute.xlu0 %5976 }
 0x5b6   : > { %5626 = vmatmul.f32.gmra.mxu0 %v5453_v9  ;;  %v5454_v7 = vand.u32 4294901760, %v5453_v9 }
 0x5b8   : > { %5700 = vmatmul.f32.gmra.mxu1 %v5454_v7  ;;  %v5455_v50 = vsub.f32 %v5453_v9, %v5454_v7  ;;  %v15078_v9 = vld [vmem:[#allocation61_spill] sm:$0xff]  ;;  %v15079_v7 = vld [vmem:[#allocation31_spill] sm:$0xff] }
 0x5ba   : > { %6787 = vrot.lane.b32.xlu2 %v13005_v48, %s8693_s19  ;;  %v5456_v19 = vand.u32 4294901760, %v5455_v50  ;;  %v15081_v50 = vld [vmem:[#allocation72_spill] sm:$0xff] }
 0x5bb   : > { %6763 = vrot.lane.b32.xlu1 %v8608_v52, %s8694_s20  ;;  %6727 = vrot.lane.b32.xlu0 %v8609_v21, %s8684_s21  ;;  %v6690_v52 = vld [vmem:[#allocation3 + $0xc0] sm:$0xff] }
 0x5bc   : > { %5457 = vmatmul.f32.gmra.mxu2 %v5456_v19  ;;  %5806 = vmatmul.f32.vlgmr.msrb.gmra.mxu3 %v12731_v54  ;;  %v13012_v39 = vpop.permute.xlu2 %6034  ;;  %v15082_v19 = vld [vmem:[#allocation75_spill] sm:$0xff] }
 0x5bd   : > { %v6007_v25 = vpop.permute.xlu1 %6006  ;;  %v13014_v38 = vpop.permute.xlu0 %5982  ;;  %7121 = vmatpush.msrb.mxu3 %v15078_v9 }
 0x5bf   : > { %7127 = vmatpush.msrb.mxu3 %v15079_v7 }
 0x5c1   : > { %7133 = vmatpush.msrb.mxu3 %v15081_v50  ;;  %v13047_v50 = vld [vmem:[#allocation3 + $0x1f1] sm:$0xff] }
 0x5c2   : > { %6875 = vrot.lane.b32.xlu2 %v13018_v47, %s8689_s28  ;;  %v13042_v47 = vld [vmem:[#allocation3 + $0x161] sm:$0xff]  ;;  %15086 = vst [vmem:[#allocation5_spill] sm:$0xff] %v13047_v50 }
 0x5c3   : > { %6843 = vrot.lane.b32.xlu1 %v6690_v52, %s8686_s25  ;;  %6741 = vrot.lane.b32.xlu0 %v15082_v19, %s8685_s24  ;;  %v15084_v52 = vld [vmem:[#allocation52_spill] sm:$0xff]  ;;  %15085 = vst [vmem:[#allocation71_spill] sm:$0xff] %v13042_v47 }
 0x5c4   : > { %5748 = vmatmul.f32.vlgmr.msrb.gmra.mxu2 %v12731_v54  ;;  %5810 = vmatmul.f32.gmra.mxu3 %v12800_v62  ;;  %v13028_v21 = vpop.permute.xlu2 %6036  ;;  %v8610_v54 = vld [vmem:[#allocation3 + $0x141] sm:$0xff] }
 0x5c5   : > { %v13030_v7 = vpop.permute.xlu1 %6012  ;;  %v13032_v9 = vpop.permute.xlu0 %5988  ;;  %7139 = vmatpush.msrb.mxu3 %v12560_v6  ;;  %7027 = vmatpush.msrb.mxu2 %v12435_v49  ;;  %v6110_v19 = vsel %vm380_vm2, %v8610_v54, %v15084_v52  ;;  %v8612_v6 = vld [vmem:[#allocation3 + $0x200] sm:$0xff]  ;;  %v15087_v52 = vld [vmem:[#allocation37_spill] sm:$0xff] }
 0x5c6   : > { %15083 = vst [vmem:[#allocation53_spill] sm:$0xff] %v13032_v9 }
 0x5c7   : > { %7145 = vmatpush.msrb.mxu3 %v12594_v5  ;;  %7029 = vmatpush.msrb.mxu2 %v12451_v22  ;;  %v6118_v5 = vsel %vm1534_vm5, %v6110_v19, %v15087_v52  ;;  %v13070_v52 = vld [vmem:[#allocation3 + $0x31] sm:$0xff] }
 0x5c8   : > { %15090 = vst [vmem:[#allocation57_spill] sm:$0xff] %v13070_v52 }
 0x5c9   : > { %7151 = vmatpush.msrb.mxu3 %v12605_v11  ;;  %7031 = vmatpush.msrb.mxu2 %v12468_v0 }
 0x5ca   : > { %6789 = vrot.lane.b32.xlu2 %v13042_v47, %s8693_s19 }
 0x5cb   : > { %6765 = vrot.lane.b32.xlu1 %v8612_v6, %s8694_s20  ;;  %6811 = vrot.lane.b32.xlu0 %v13047_v50, %s8692_s18  ;;  %v15089_v6 = vld [vmem:[#allocation4_spill] sm:$0xff]  ;;  %v6111_v50 = vsel %vm380_vm2, %v13005_v48, %v12748_v45 }
 0x5cc   : > { %5752 = vmatmul.f32.gmra.mxu2 %v12800_v62  ;;  %5814 = vmatmul.f32.gmra.mxu3 %v12834_v27  ;;  %v13053_v11 = vpop.permute.xlu2 %6014  ;;  %v6126_v62 = vsel %vm1543_vm6, %v6118_v5, %v15089_v6  ;;  %v13077_v5 = vld [vmem:[#allocation3 + $0xc1] sm:$0xff]  ;;  %v15092_v6 = vld [vmem:[#allocation67_spill] sm:$0xff] }
 0x5cd   : > { %v6087_v54 = vpop.permute.xlu1 %6086  ;;  %v13057_v9 = vpop.permute.xlu0 %6010  ;;  %7157 = vmatpush.msrb.mxu3 %v15088_v24  ;;  %7033 = vmatpush.msrb.mxu2 %v12486_v20  ;;  %v6134_v19 = vsel %vm1552_vm7, %v6126_v62, %v12897_v2  ;;  %v6691_v24 = vld [vmem:[#allocation3 + $0xd0] sm:$0xff]  ;;  %15091 = vst [vmem:[#allocation29_spill] sm:$0xff] %v13077_v5  ;;  %v6119_v45 = vsel %vm1534_vm5, %v6111_v50, %v15092_v6 }
 0x5cf   : > { %7163 = vmatpush.msrb.mxu3 %v12630_v13  ;;  %7035 = vmatpush.msrb.mxu2 %v12507_v28  ;;  %v6142_v13 = vsel %vm1561_vm8, %v6134_v19, %v6007_v25 }
 0x5d0   : > { %v6150_v62 = vsel %vm1570_vm9, %v6142_v13, %v12980_v30  ;;  %v8614_v30 = vld [vmem:[#allocation3 + $0x210] sm:$0xff] }
 0x5d1   : > { %7169 = vmatpush.msrb.mxu3 %v12640_v53  ;;  %7037 = vmatpush.msrb.mxu2 %v12528_v46 }
 0x5d2   : > { %6877 = vrot.lane.b32.xlu2 %v13070_v52, %s8689_s28  ;;  %v15093_v52 = vld [vmem:[#allocation48_spill] sm:$0xff] }
 0x5d3   : > { %6845 = vrot.lane.b32.xlu1 %v6691_v24, %s8686_s25  ;;  %6907 = vrot.lane.b32.xlu0 %v13077_v5, %s8688_s27  ;;  %v6127_v50 = vsel %vm1543_vm6, %v6119_v45, %v15093_v52  ;;  %v15094_v52 = vld [vmem:[#allocation27_spill] sm:$0xff]  ;;  %v13113_v45 = vld [vmem:[#allocation3 + $0x201] sm:$0xff] }
 0x5d4   : > { %5756 = vmatmul.f32.gmra.mxu2 %v12834_v27  ;;  %5818 = vmatmul.f32.gmra.mxu3 %v12861_v18  ;;  %v13086_v2 = vpop.permute.xlu2 %6094  ;;  %v6135_v6 = vsel %vm1552_vm7, %v6127_v50, %v13003_v17  ;;  %v6112_v17 = vsel %vm380_vm2, %v13042_v47, %v12774_v16  ;;  %15095 = vst [vmem:[#allocation25_spill] sm:$0xff] %v13113_v45  ;;  %v15096_v50 = vld [vmem:[#allocation66_spill] sm:$0xff]  ;;  %v6692_v47 = vld [vmem:[#allocation3 + $0xe0] sm:$0xff] }
 0x5d5   : > { %v6089_v25 = vpop.permute.xlu1 %6088  ;;  %v6055_v19 = vpop.permute.xlu0 %6054  ;;  %7039 = vmatpush.msrb.mxu2 %v12547_v43  ;;  %v6143_v13 = vsel %vm1561_vm8, %v6135_v6, %v12969_v41 }
 0x5d6   : > { %v6158_v24 = vsel %vm1579_vm11, %v6150_v62, %v6055_v19 }
 0x5d7   : > { %v6166_v27 = vsel %vm1588_vm10, %v6158_v24, %v6087_v54  ;;  %7041 = vmatpush.msrb.mxu2 %v12569_v14  ;;  %v6120_v24 = vsel %vm1534_vm5, %v6112_v17, %v15096_v50 }
 0x5d8   : > { %v6175_v48 = vsel %vm1606_vm12, %v6166_v27, 0 }
 0x5d9   : > { %v13099_v5 = vand.u32 4294901760, %v6175_v48  ;;  %7043 = vmatpush.msrb.mxu2 %v12590_v35 }
 0x5da   : > { %6767 = vrot.lane.b32.xlu2 %v8614_v30, %s8694_s20 }
 0x5db   : > { %v13109_v54 = vsub.f32 %v6175_v48, %v13099_v5  ;;  %6743 = vrot.lane.b32.xlu1 %v15094_v52, %s8685_s24  ;;  %6813 = vrot.lane.b32.xlu0 %v13113_v45, %s8692_s18  ;;  %v6151_v48 = vsel %vm1570_vm9, %v6143_v13, %v12998_v51  ;;  %v15097_v52 = vld [vmem:[#allocation64_spill] sm:$0xff] }
 0x5dc   : > { %6350 = vmatmul.f32.vlgmr.msrb.gmra.mxu1 %v13099_v5  ;;  %5760 = vmatmul.f32.gmra.mxu2 %v12861_v18  ;;  %v13119_v41 = vpop.permute.xlu2 %6064  ;;  %v6128_v51 = vsel %vm1543_vm6, %v6120_v24, %v15097_v52 }
 0x5dd   : > { %v6225_v62 = vand.u32 4294901760, %v13109_v54  ;;  %5822 = vmatmul.f32.gmra.mxu3 %v12913_v60  ;;  %v6091_v16 = vpop.permute.xlu1 %6090  ;;  %v6057_v19 = vpop.permute.xlu0 %6056  ;;  %7286 = vmatpush.msrb.mxu1 %v12435_v49  ;;  %v6136_v17 = vsel %vm1552_vm7, %v6128_v51, %v12982_v33 }
 0x5de   : > { %v6159_v6 = vsel %vm1579_vm11, %v6151_v48, %v6057_v19  ;;  %v13143_v48 = vld [vmem:[#allocation3 + $0xd1] sm:$0xff]  ;;  %v6144_v50 = vsel %vm1561_vm8, %v6136_v17, %v13057_v9 }
 0x5df   : > { %v6226_v18 = vsub.f32 %v13109_v54, %v6225_v62  ;;  %v6167_v27 = vsel %vm1588_vm10, %v6159_v6, %v6089_v25  ;;  %7288 = vmatpush.msrb.mxu1 %v12451_v22  ;;  %v13145_v25 = vld [vmem:[#allocation3 + $0x171] sm:$0xff] }
 0x5e0   : > { %v6178_v30 = vsel %vm1606_vm12, %v6167_v27, 0  ;;  %v6113_v19 = vsel %vm380_vm2, %v13145_v25, %v12725_v42  ;;  %v13155_v6 = vld [vmem:[#allocation3 + $0x211] sm:$0xff]  ;;  %v6152_v27 = vsel %vm1570_vm9, %v6144_v50, %v13012_v39 }
 0x5e1   : > { %v6227_v13 = vand.u32 4294901760, %v6226_v18  ;;  %v13137_v45 = vand.u32 4294901760, %v6178_v30  ;;  %7290 = vmatpush.msrb.mxu1 %v12468_v0  ;;  %v15098_v9 = vld [vmem:[#allocation59_spill] sm:$0xff] }
 0x5e2   : > { %6847 = vrot.lane.b32.xlu2 %v6692_v47, %s8686_s25  ;;  %v6121_v18 = vsel %vm1534_vm5, %v6113_v19, %v15098_v9 }
 0x5e3   : > { %v13153_v24 = vsub.f32 %v6178_v30, %v13137_v45  ;;  %6815 = vrot.lane.b32.xlu1 %v13155_v6, %s8692_s18  ;;  %6909 = vrot.lane.b32.xlu0 %v13143_v48, %s8688_s27 }
 0x5e4   : > { %6228 = vmatmul.f32.vlgmr.msrb.gmra.mxu0 %v6227_v13  ;;  %6354 = vmatmul.f32.gmra.mxu1 %v13137_v45  ;;  %v13162_v47 = vpop.permute.xlu2 %6042  ;;  %v15099_v13 = vld [vmem:[#allocation33_spill] sm:$0xff] }
 0x5e5   : > { %5764 = vmatmul.f32.gmra.mxu2 %v12913_v60  ;;  %5826 = vmatmul.f32.gmra.mxu3 %v12937_v61  ;;  %v6093_v42 = vpop.permute.xlu1 %6092  ;;  %v6233_v33 = vand.u32 4294901760, %v13153_v24  ;;  %v6059_v30 = vpop.permute.xlu0 %6058  ;;  %v6129_v39 = vsel %vm1543_vm6, %v6121_v18, %v15099_v13 }
 0x5e6   : > { %7292 = vmatpush.msrb.mxu1 %v12486_v20  ;;  %7212 = vmatpush.msrb.mxu0 %v12449_v10  ;;  %v6160_v52 = vsel %vm1579_vm11, %v6152_v27, %v6059_v30  ;;  %v6137_v50 = vsel %vm1552_vm7, %v6129_v39, %v12918_v8  ;;  %v15100_v27 = vld [vmem:[#allocation26_spill] sm:$0xff]  ;;  %v13189_v30 = vld [vmem:[#allocation3 + $0xe1] sm:$0xff] }
 0x5e7   : > { %v6234_v60 = vsub.f32 %v13153_v24, %v6233_v33  ;;  %v6168_v51 = vsel %vm1588_vm10, %v6160_v52, %v6091_v16  ;;  %v6145_v16 = vsel %vm1561_vm8, %v6137_v50, %v13030_v7  ;;  %v13206_v7 = vld [vmem:[#allocation3 + $0x181] sm:$0xff] }
 0x5e8   : > { %7294 = vmatpush.msrb.mxu1 %v12507_v28  ;;  %7215 = vmatpush.msrb.mxu0 %v12465_v58  ;;  %v6181_v17 = vsel %vm1606_vm12, %v6168_v51, 0  ;;  %15101 = vst [vmem:[#allocation40_spill] sm:$0xff] %v13206_v7  ;;  %v6153_v51 = vsel %vm1570_vm9, %v6145_v16, %v13028_v21  ;;  %v13228_v16 = vld [vmem:[#allocation3 + $0x221] sm:$0xff] }
 0x5e9   : > { %v6235_v19 = vand.u32 4294901760, %v6234_v60  ;;  %v13185_v9 = vand.u32 4294901760, %v6181_v17  ;;  %v6114_v60 = vsel %vm380_vm2, %v13206_v7, %v12880_v26  ;;  %v15102_v26 = vld [vmem:[#allocation68_spill] sm:$0xff]  ;;  %15103 = vst [vmem:[#allocation43_spill] sm:$0xff] %v13228_v16 }
 0x5ea   : > { %6745 = vrot.lane.b32.xlu2 %v15100_v27, %s8685_s24  ;;  %7296 = vmatpush.msrb.mxu1 %v12528_v46  ;;  %v6122_v21 = vsel %vm1534_vm5, %v6114_v60, %v15102_v26  ;;  %v15104_v60 = vld [vmem:[#allocation16_spill] sm:$0xff] }
 0x5eb   : > { %6911 = vrot.lane.b32.xlu1 %v13189_v30, %s8688_s27  ;;  %6791 = vrot.lane.b32.xlu0 %v13145_v25, %s8693_s19  ;;  %v13199_v8 = vsub.f32 %v6181_v17, %v13185_v9 }
 0x5ec   : > { %6236 = vmatmul.f32.gmra.mxu0 %v6235_v19  ;;  %6358 = vmatmul.f32.gmra.mxu1 %v13185_v9  ;;  %v13202_v18 = vpop.permute.xlu2 %6020 }
 0x5ed   : > { %5768 = vmatmul.f32.gmra.mxu2 %v12937_v61  ;;  %5830 = vmatmul.f32.gmra.mxu3 %v12955_v23  ;;  %v6063_v52 = vpop.permute.xlu1 %6062  ;;  %v6061_v13 = vpop.permute.xlu0 %6060  ;;  %v14622_v39 = vand.u32 4294901760, %v13199_v8 }
 0x5ee   : > { %7218 = vmatpush.msrb.mxu0 %v12483_v12  ;;  %7298 = vmatpush.msrb.mxu1 %v12547_v43  ;;  %v6161_v61 = vsel %vm1579_vm11, %v6153_v51, %v6061_v13  ;;  %v6130_v13 = vsel %vm1543_vm6, %v6122_v21, %v15104_v60 }
 0x5ef   : > { %v6169_v17 = vsel %vm1588_vm10, %v6161_v61, %v6093_v42  ;;  %v6242_v19 = vsub.f32 %v13199_v8, %v14622_v39  ;;  %v13232_v42 = vld [vmem:[#allocation3 + $0x41] sm:$0xff] }
 0x5f0   : > { %7221 = vmatpush.msrb.mxu0 %v15036_v34  ;;  %7300 = vmatpush.msrb.mxu1 %v12569_v14  ;;  %v6184_v50 = vsel %vm1606_vm12, %v6169_v17, 0 }
 0x5f1   : > { %v13226_v27 = vand.u32 4294901760, %v6184_v50  ;;  %v6243_v51 = vand.u32 4294901760, %v6242_v19  ;;  %v6138_v19 = vsel %vm1552_vm7, %v6130_v13, %v13014_v38  ;;  %v6115_v38 = vsel %vm380_vm2, %v12874_v36, %v12899_v15  ;;  %v13267_v13 = vld [vmem:[#allocation3 + $0xf1] sm:$0xff] }
 0x5f2   : > { %6817 = vrot.lane.b32.xlu2 %v13228_v16, %s8692_s18  ;;  %7224 = vmatpush.msrb.mxu0 %v15040_v57  ;;  %v6146_v39 = vsel %vm1561_vm8, %v6138_v19, %v13053_v11  ;;  %15105 = vst [vmem:[#allocation22_spill] sm:$0xff] %v13267_v13 }
 0x5f3   : > { %6793 = vrot.lane.b32.xlu1 %v13206_v7, %s8693_s19  ;;  %6879 = vrot.lane.b32.xlu0 %v13232_v42, %s8689_s28  ;;  %v13242_v61 = vsub.f32 %v6184_v50, %v13226_v27  ;;  %v15128_v7 = vld [vmem:[#allocation55_spill] sm:$0xff] }
 0x5f4   : > { %6244 = vmatmul.f32.gmra.mxu0 %v6243_v51  ;;  %6362 = vmatmul.f32.gmra.mxu1 %v13226_v27  ;;  %v13245_v17 = vpop.permute.xlu2 %6100 }
 0x5f5   : > { %5772 = vmatmul.f32.gmra.mxu2 %v12955_v23  ;;  %5834 = vmatmul.f32.gmra.mxu3 %v12993_v29  ;;  %v6041_v26 = vpop.permute.xlu1 %6040  ;;  %v6039_v21 = vpop.permute.xlu0 %6038  ;;  %v14623_v50 = vand.u32 4294901760, %v13242_v61 }
 0x5f6   : > { %7302 = vmatpush.msrb.mxu1 %v12590_v35  ;;  %7227 = vmatpush.msrb.mxu0 %v15043_v4  ;;  %v6154_v51 = vsel %vm1570_vm9, %v6146_v39, %v6039_v21  ;;  %v13272_v39 = vld [vmem:[#allocation3 + $0x51] sm:$0xff] }
 0x5f7   : > { %v6162_v23 = vsel %vm1579_vm11, %v6154_v51, %v6063_v52  ;;  %v6250_v60 = vsub.f32 %v13242_v61, %v14623_v50  ;;  %15106 = vst [vmem:[#allocation6_spill] sm:$0xff] %v13272_v39  ;;  %v15107_v52 = vld [vmem:[#allocation77_spill] sm:$0xff]  ;;  %v8620_v51 = vld [vmem:[#allocation3 + $0x220] sm:$0xff] }
 0x5f8   : > { %7230 = vmatpush.msrb.mxu0 %v15046_v59  ;;  %v6170_v11 = vsel %vm1588_vm10, %v6162_v23, %v13086_v2  ;;  %v6123_v21 = vsel %vm1534_vm5, %v6115_v38, %v15107_v52  ;;  %v15108_v38 = vld [vmem:[#allocation50_spill] sm:$0xff] }
 0x5f9   : > { %v6187_v19 = vsel %vm1606_vm12, %v6170_v11, 0  ;;  %v6251_v15 = vand.u32 4294901760, %v6250_v60  ;;  %v6131_v52 = vsel %vm1543_vm6, %v6123_v21, %v15108_v38  ;;  %v8621_v38 = vld [vmem:[#allocation3 + $0x230] sm:$0xff] }
 0x5fa   : > { %6913 = vrot.lane.b32.xlu2 %v13267_v13, %s8688_s27  ;;  %7233 = vmatpush.msrb.mxu0 %v15050_v44  ;;  %v13280_v2 = vand.u32 4294901760, %v6187_v19 }
 0x5fb   : > { %6881 = vrot.lane.b32.xlu1 %v13272_v39, %s8689_s28  ;;  %6769 = vrot.lane.b32.xlu0 %v8620_v51, %s8694_s20  ;;  %v15127_v39 = vld [vmem:[#allocation7_spill] sm:$0xff] }
 0x5fc   : > { %6252 = vmatmul.f32.gmra.mxu0 %v6251_v15  ;;  %v13282_v23 = vpop.permute.xlu2 %6719  ;;  %6366 = vmatmul.f32.gmra.mxu1 %v13280_v2  ;;  %v13287_v11 = vsub.f32 %v6187_v19, %v13280_v2  ;;  %v6139_v15 = vsel %vm1552_vm7, %v6131_v52, %v13000_v32  ;;  %v6116_v32 = vsel %vm380_vm2, %v12870_v3, %v12851_v1 }
 0x5fd   : > { %5776 = vmatmul.f32.gmra.mxu2 %v12993_v29  ;;  %v6019_v60 = vpop.permute.xlu1 %6018  ;;  %6485 = vmatmul.f32.vlgmr.msra.gmra.mxu3 %v6225_v62  ;;  %v6017_v51 = vpop.permute.xlu0 %6016  ;;  %v6693_v62 = vld [vmem:[#allocation3 + $0xf0] sm:$0xff] }
 0x5fe   : > { %7236 = vmatpush.msrb.mxu0 %v12613_v55  ;;  %v14624_v29 = vand.u32 4294901760, %v13287_v11  ;;  %7436 = vmatpush.msra.mxu3 %v12435_v49  ;;  %v6147_v50 = vsel %vm1561_vm8, %v6139_v15, %v6017_v51  ;;  %v15110_v15 = vld [vmem:[#allocation76_spill] sm:$0xff] }
 0x5ff   : > { %v6155_v21 = vsel %vm1570_vm9, %v6147_v50, %v6041_v26 }
 0x600   : > { %v6258_v19 = vsub.f32 %v13287_v11, %v14624_v29  ;;  %7438 = vmatpush.msra.mxu3 %v12451_v22  ;;  %v6124_v29 = vsel %vm1534_vm5, %v6116_v32, %v15110_v15  ;;  %v6163_v1 = vsel %vm1579_vm11, %v6155_v21, %v13119_v41  ;;  %v6694_v21 = vld [vmem:[#allocation3 + $0x100] sm:$0xff] }
 0x602   : > { %6795 = vrot.lane.b32.xlu2 %v12874_v36, %s8693_s19  ;;  %v6259_v52 = vand.u32 4294901760, %v6258_v19  ;;  %7440 = vmatpush.msra.mxu3 %v12468_v0 }
 0x603   : > { %6771 = vrot.lane.b32.xlu1 %v8621_v38, %s8694_s20  ;;  %6849 = vrot.lane.b32.xlu0 %v6693_v62, %s8686_s25 }
 0x604   : > { %v13311_v51 = vpop.permute.xlu2 %6725  ;;  %6260 = vmatmul.f32.gmra.mxu0 %v6259_v52  ;;  %7442 = vmatpush.msra.mxu3 %v12486_v20 }
 0x605   : > { %15109 = vst [vmem:[#allocation21_spill] sm:$0xff] %v13311_v51  ;;  %6418 = vmatmul.f32.vlgmr.msra.gmra.mxu2 %v13109_v54  ;;  %v6099_v36 = vpop.permute.xlu1 %6098  ;;  %6491 = vmatmul.f32.gmra.mxu3 %v6233_v33  ;;  %v6097_v26 = vpop.permute.xlu0 %6096  ;;  %v15111_v54 = vld [vmem:[#allocation45_spill] sm:$0xff] }
 0x606   : > { %7362 = vmatpush.msra.mxu2 %v12462_v63  ;;  %v6171_v50 = vsel %vm1588_vm10, %v6163_v1, %v6097_v26  ;;  %v6132_v62 = vsel %vm1543_vm6, %v6124_v29, %v15111_v54  ;;  %v13330_v33 = vld [vmem:[#allocation3 + $0x61] sm:$0xff]  ;;  %7444 = vmatpush.msra.mxu3 %v12507_v28  ;;  %v13344_v29 = vld [vmem:[#allocation3 + $0xf1] sm:$0xff] }
 0x607   : > { %v6190_v19 = vsel %vm1606_vm12, %v6171_v50, 0  ;;  %15112 = vst [vmem:[#allocation42_spill] sm:$0xff] %v13330_v33  ;;  %v6140_v41 = vsel %vm1552_vm7, %v6132_v62, %v12949_v56  ;;  %v15114_v1 = vld [vmem:[#allocation36_spill] sm:$0xff]  ;;  %v15115_v50 = vand.u32 4294901760, %v13199_v8  ;;  %v15143_v51 = vld [vmem:[#allocation61_spill] sm:$0xff] }
 0x608   : > { %7366 = vmatpush.msra.mxu2 %v12480_v31  ;;  %v13328_v32 = vand.u32 4294901760, %v6190_v19  ;;  %v6148_v38 = vsel %vm1561_vm8, %v6140_v41, %v6019_v60  ;;  %15113 = vst [vmem:[#allocation60_spill] sm:$0xff] %v13344_v29  ;;  %7446 = vmatpush.msra.mxu3 %v12528_v46  ;;  %v6117_v26 = vsel %vm380_vm2, %v15114_v1, %v12971_v40  ;;  %v15116_v62 = vld [vmem:[#allocation28_spill] sm:$0xff]  ;;  %v15117_v40 = vld [vmem:[#allocation30_spill] sm:$0xff] }
 0x60a   : > { %6883 = vrot.lane.b32.xlu2 %v13330_v33, %s8689_s28  ;;  %7370 = vmatpush.msra.mxu2 %v12498_v37  ;;  %v13340_v52 = vsub.f32 %v6190_v19, %v13328_v32  ;;  %v6156_v19 = vsel %vm1570_vm9, %v6148_v38, %v13162_v47  ;;  %v13370_v33 = vpop.f32.mrf.mxu2 }
 0x60b   : > { %6370 = vmatmul.f32.gmra.mxu1 %v13328_v32  ;;  %6851 = vrot.lane.b32.xlu1 %v6694_v21, %s8686_s25  ;;  %15119 = vst [vmem:[#allocation51_spill] sm:$0xff] %v13370_v33 }
 0x60c   : > { %6747 = vrot.lane.b32.xlu0 %v13344_v29, %s8685_s24  ;;  %v13348_v56 = vpop.permute.xlu2 %6739  ;;  %v14627_v60 = vand.u32 4294901760, %v13340_v52  ;;  %7374 = vmatpush.msra.mxu2 %v15116_v62  ;;  %v15118_v29 = vld [vmem:[#allocation11_spill] sm:$0xff] }
 0x60d   : > { %6423 = vmatmul.f32.gmra.mxu2 %v13153_v24  ;;  %v6069_v15 = vpop.permute.xlu1 %6068  ;;  %6497 = vmatmul.f32.gmra.mxu3 %v15115_v50  ;;  %v6067_v54 = vpop.permute.xlu0 %6066  ;;  %v6125_v50 = vsel %vm1534_vm5, %v6117_v26, %v15118_v29  ;;  %v15122_v29 = vld [vmem:[#allocation32_spill] sm:$0xff] }
 0x60e   : > { %v6164_v41 = vsel %vm1579_vm11, %v6156_v19, %v6067_v54  ;;  %v6266_v24 = vsub.f32 %v13340_v52, %v14627_v60  ;;  %7448 = vmatpush.msra.mxu3 %v12547_v43  ;;  %7378 = vmatpush.msra.mxu2 %v15117_v40  ;;  %v8623_v54 = vld [vmem:[#allocation3 + $0x240] sm:$0xff]  ;;  %v15120_v60 = vld [vmem:[#allocation49_spill] sm:$0xff]  ;;  %v6133_v26 = vsel %vm1543_vm6, %v6125_v50, %v15122_v29  ;;  %v13400_v50 = vpop.f32.mrf.mxu3  ;;  %v15126_v29 = vand.u32 4294901760, %v13242_v61 }
 0x60f   : > { %v6172_v21 = vsel %vm1588_vm10, %v6164_v41, %v6099_v36  ;;  %v13378_v36 = vld [vmem:[#allocation3 + $0x101] sm:$0xff]  ;;  %15125 = vst [vmem:[#allocation34_spill] sm:$0xff] %v13400_v50 }
 0x610   : > { %v6193_v47 = vsel %vm1606_vm12, %v6172_v21, 0  ;;  %v6267_v38 = vand.u32 4294901760, %v6266_v24  ;;  %7450 = vmatpush.msra.mxu3 %v12569_v14  ;;  %7382 = vmatpush.msra.mxu2 %v15120_v60  ;;  %15121 = vst [vmem:[#allocation54_spill] sm:$0xff] %v13378_v36  ;;  %v13387_v24 = vld [vmem:[#allocation3 + $0x231] sm:$0xff] }
 0x611   : > { %v13374_v19 = vand.u32 4294901760, %v6193_v47  ;;  %15123 = vst [vmem:[#allocation44_spill] sm:$0xff] %v13387_v24 }
 0x612   : > { %6773 = vrot.lane.b32.xlu2 %v8623_v54, %s8694_s20  ;;  %6268 = vmatmul.f32.gmra.mxu0 %v6267_v38  ;;  %v15124_v38 = vld [vmem:[#allocation53_spill] sm:$0xff]  ;;  %v13412_v50 = vpop.f32.mrf.mxu2 }
 0x613   : > { %6749 = vrot.lane.b32.xlu1 %v13378_v36, %s8685_s24  ;;  %v13385_v41 = vsub.f32 %v6193_v47, %v13374_v19  ;;  %6374 = vmatmul.f32.gmra.mxu1 %v13374_v19  ;;  %v6141_v54 = vsel %vm1552_vm7, %v6133_v26, %v15124_v38  ;;  %15129 = vst [vmem:[#allocation46_spill] sm:$0xff] %v13412_v50 }
 0x614   : > { %6819 = vrot.lane.b32.xlu0 %v13387_v24, %s8692_s18  ;;  %v13392_v21 = vpop.permute.xlu2 %6787  ;;  %7452 = vmatpush.msra.mxu3 %v12590_v35  ;;  %v6149_v47 = vsel %vm1561_vm8, %v6141_v54, %v13202_v18  ;;  %v6695_v54 = vld [vmem:[#allocation3 + $0x110] sm:$0xff] }
 0x615   : > { %6428 = vmatmul.f32.gmra.mxu2 %v13199_v8  ;;  %v13397_v33 = vpop.permute.xlu1 %6717  ;;  %6503 = vmatmul.f32.gmra.mxu3 %v15126_v29  ;;  %v6045_v24 = vpop.permute.xlu0 %6044  ;;  %v6273_v36 = vand.u32 4294901760, %v13385_v41 }
 0x616   : > { %7386 = vmatpush.msra.mxu2 %v15127_v39  ;;  %v6157_v26 = vsel %vm1570_vm9, %v6149_v47, %v6045_v24  ;;  %v13416_v29 = vpop.f32.mrf.mxu0  ;;  %v15131_v24 = vld [vmem:[#allocation73_spill] sm:$0xff] }
 0x617   : > { %v6165_v8 = vsel %vm1579_vm11, %v6157_v26, %v6069_v15  ;;  %v6274_v38 = vsub.f32 %v13385_v41, %v6273_v36  ;;  %15130 = vst [vmem:[#allocation20_spill] sm:$0xff] %v13416_v29  ;;  %v13421_v15 = vld [vmem:[#allocation3 + $0x241] sm:$0xff]  ;;  %v13447_v29 = vpop.f32.mrf.mxu1 }
 0x618   : > { %7390 = vmatpush.msra.mxu2 %v15128_v7  ;;  %v6173_v18 = vsel %vm1588_vm10, %v6165_v8, %v13245_v17  ;;  %15132 = vst [vmem:[#allocation38_spill] sm:$0xff] %v13421_v15  ;;  %v13425_v47 = vld [vmem:[#allocation3 + $0x101] sm:$0xff] }
 0x619   : > { %v6196_v13 = vsel %vm1606_vm12, %v6173_v18, 0  ;;  %v6275_v16 = vand.u32 4294901760, %v6274_v38  ;;  %15133 = vst [vmem:[#allocation9_spill] sm:$0xff] %v13425_v47  ;;  %v13440_v18 = vpop.f32.mrf.mxu3 }
 0x61a   : > { %6853 = vrot.lane.b32.xlu2 %v6695_v54, %s8686_s25  ;;  %7394 = vmatpush.msra.mxu2 %v15131_v24  ;;  %v13427_v26 = vand.u32 4294901760, %v6196_v13  ;;  %15134 = vst [vmem:[#allocation47_spill] sm:$0xff] %v13440_v18  ;;  %v15135_v54 = vand.u32 4294901760, %v13287_v11  ;;  %v13458_v18 = vpop.f32.mrf.mxu2 }
 0x61b   : > { %6821 = vrot.lane.b32.xlu1 %v13421_v15, %s8692_s18  ;;  %6276 = vmatmul.f32.gmra.mxu0 %v6275_v16  ;;  %15136 = vst [vmem:[#allocation62_spill] sm:$0xff] %v13447_v29 }
 0x61c   : > { %6915 = vrot.lane.b32.xlu0 %v13425_v47, %s8688_s27  ;;  %v13431_v17 = vpop.permute.xlu2 %6875  ;;  %6378 = vmatmul.f32.gmra.mxu1 %v13427_v26  ;;  %v13438_v38 = vsub.f32 %v6196_v13, %v13427_v26  ;;  %v13456_v13 = vld [vmem:[#allocation3 + $0x111] sm:$0xff]  ;;  %15140 = vst [vmem:[#allocation56_spill] sm:$0xff] %v13458_v18 }
 0x61d   : > { %6433 = vmatmul.f32.gmra.mxu2 %v13242_v61  ;;  %v13435_v8 = vpop.permute.xlu1 %6723  ;;  %6509 = vmatmul.f32.gmra.mxu3 %v15135_v54  ;;  %v13444_v50 = vpop.permute.xlu0 %6715  ;;  %v13452_v61 = vld [vmem:[#allocation3 + $0x111] sm:$0xff]  ;;  %15139 = vst [vmem:[#allocation58_spill] sm:$0xff] %v13456_v13 }
 0x61e   : > { %v6281_v16 = vand.u32 4294901760, %v13438_v38  ;;  %v13450_v15 = vpop.f32.mrf.mxu0  ;;  %15138 = vst [vmem:[#allocation17_spill] sm:$0xff] %v13452_v61 }
 0x61f   : > { %15137 = vst [vmem:[#allocation18_spill] sm:$0xff] %v13450_v15 }
 0x620   : > { %v6282_v47 = vsub.f32 %v13438_v38, %v6281_v16 }
 0x622   : > { %6751 = vrot.lane.b32.xlu2 %v13452_v61, %s8685_s24  ;;  %v6283_v54 = vand.u32 4294901760, %v6282_v47  ;;  %v15142_v61 = vand.u32 4294901760, %v13340_v52  ;;  %v13475_v47 = vpop.f32.mrf.mxu3 }
 0x623   : > { %6917 = vrot.lane.b32.xlu1 %v13456_v13, %s8688_s27  ;;  %15144 = vst [vmem:[#allocation19_spill] sm:$0xff] %v13475_v47  ;;  %v13477_v13 = vpop.f32.mrf.mxu1  ;;  %v15153_v47 = vld [vmem:[#allocation39_spill] sm:$0xff] }
 0x624   : > { %6797 = vrot.lane.b32.xlu0 %v12870_v3, %s8693_s19  ;;  %v13464_v29 = vpop.permute.xlu2 %6789  ;;  %6284 = vmatmul.f32.gmra.mxu0 %v6283_v54  ;;  %15145 = vst [vmem:[#allocation24_spill] sm:$0xff] %v13477_v13  ;;  %v15146_v3 = vld [vmem:[#allocation31_spill] sm:$0xff] }
 0x625   : > { %6438 = vmatmul.f32.gmra.mxu2 %v13287_v11  ;;  %v13467_v15 = vpop.permute.xlu1 %6729  ;;  %6515 = vmatmul.f32.gmra.mxu3 %v15142_v61  ;;  %v13472_v18 = vpop.permute.xlu0 %6721  ;;  %v13480_v54 = vld [vmem:[#allocation3 + $0x251] sm:$0xff]  ;;  %v15148_v61 = vld [vmem:[#allocation72_spill] sm:$0xff] }
 0x626   : > { %15141 = vst [vmem:[#allocation69_spill] sm:$0xff] %v13467_v15  ;;  %6633 = vmatmul.f32.vlgmr.msra.gmra.mxu1 %v13099_v5  ;;  %v13486_v11 = vld [vmem:[#allocation3 + $0x71] sm:$0xff]  ;;  %v13489_v15 = vpop.f32.mrf.mxu0 }
 0x627   : > { %7908 = vmatpush.msra.mxu1 %v15143_v51  ;;  %15147 = vst [vmem:[#allocation13_spill] sm:$0xff] %v13480_v54 }
 0x628   : > { %15149 = vst [vmem:[#allocation8_spill] sm:$0xff] %v13489_v15  ;;  %v13504_v15 = vld [vmem:[#allocation3 + $0x121] sm:$0xff] }
 0x629   : > { %7914 = vmatpush.msra.mxu1 %v15146_v3  ;;  %v13495_v3 = vpop.f32.mrf.mxu2  ;;  %15152 = vst [vmem:[#allocation12_spill] sm:$0xff] %v13504_v15 }
 0x62a   : > { %6823 = vrot.lane.b32.xlu2 %v13480_v54, %s8692_s18  ;;  %15150 = vst [vmem:[#allocation10_spill] sm:$0xff] %v13495_v3  ;;  %v13508_v3 = vpop.f32.mrf.mxu3 }
 0x62b   : > { %6799 = vrot.lane.b32.xlu1 %v15114_v1, %s8693_s19  ;;  %7920 = vmatpush.msra.mxu1 %v15148_v61  ;;  %v15151_v61 = vld [vmem:[#allocation23_spill] sm:$0xff]  ;;  %15154 = vst [vmem:[#allocation15_spill] sm:$0xff] %v13508_v3 }
 0x62c   : > { %6885 = vrot.lane.b32.xlu0 %v13486_v11, %s8689_s28  ;;  %v13493_v51 = vpop.permute.xlu2 %6877  ;;  %6575 = vmatmul.f32.vlgmr.msra.gmra.mxu0 %v13099_v5  ;;  %v13512_v5 = vld [vmem:[#allocation3 + $0x81] sm:$0xff] }
 0x62d   : > { %6443 = vmatmul.f32.gmra.mxu2 %v13340_v52  ;;  %v6764_v13 = vpop.permute.xlu1 %6763  ;;  %6521 = vmatmul.f32.gmra.mxu3 %v6273_v36  ;;  %v13500_v1 = vpop.permute.xlu0 %6727  ;;  %15155 = vst [vmem:[#allocation14_spill] sm:$0xff] %v13512_v5  ;;  %v15157_v36 = vld [vmem:[#allocation41_spill] sm:$0xff] }
 0x62e   : > { %6637 = vmatmul.f32.gmra.mxu1 %v13137_v45  ;;  %7814 = vmatpush.msra.mxu0 %v12435_v49  ;;  %v13514_v52 = vpop.f32.mrf.mxu1 }
 0x62f   : > { %7926 = vmatpush.msra.mxu1 %v15151_v61  ;;  %15156 = vst [vmem:[#allocation75_spill] sm:$0xff] %v13514_v52  ;;  %v8629_v61 = vld [vmem:[#allocation3 + $0x250] sm:$0xff] }
 0x630   : > { %7816 = vmatpush.msra.mxu0 %v12451_v22 }
 0x631   : > { %7932 = vmatpush.msra.mxu1 %v15153_v47  ;;  %v13523_v3 = vpop.f32.mrf.mxu2 }
 0x632   : > { %6919 = vrot.lane.b32.xlu2 %v13504_v15, %s8688_s27  ;;  %7818 = vmatpush.msra.mxu0 %v12468_v0  ;;  %15158 = vst [vmem:[#allocation52_spill] sm:$0xff] %v13523_v3  ;;  %v15161_v3 = vld [vmem:[#allocation74_spill] sm:$0xff] }
 0x633   : > { %6887 = vrot.lane.b32.xlu1 %v13512_v5, %s8689_s28  ;;  %7938 = vmatpush.msra.mxu1 %v15157_v36  ;;  %v13528_v5 = vpop.f32.mrf.mxu0  ;;  %v15160_v36 = vld [vmem:[#allocation35_spill] sm:$0xff] }
 0x634   : > { %6775 = vrot.lane.b32.xlu0 %v8629_v61, %s8694_s20  ;;  %v13520_v47 = vpop.permute.xlu2 %6767  ;;  %6579 = vmatmul.f32.gmra.mxu0 %v13137_v45  ;;  %15159 = vst [vmem:[#allocation37_spill] sm:$0xff] %v13528_v5  ;;  %v8630_v61 = vld [vmem:[#allocation3 + $0xb0] sm:$0xff]  ;;  %v13536_v45 = vpop.f32.mrf.mxu3  ;;  %v8631_v5 = vld [vmem:[#allocation3 + $0x260] sm:$0xff] }
 0x635   : > { %6448 = vmatmul.f32.gmra.mxu2 %v13385_v41  ;;  %v6844_v15 = vpop.permute.xlu1 %6843  ;;  %6527 = vmatmul.f32.gmra.mxu3 %v6281_v16  ;;  %v6742_v52 = vpop.permute.xlu0 %6741  ;;  %v6931_v54 = vsel %vm380_vm2, %v8630_v61, %v13444_v50  ;;  %15162 = vst [vmem:[#allocation4_spill] sm:$0xff] %v13536_v45  ;;  %v15163_v41 = vld [vmem:[#allocation63_spill] sm:$0xff] }
 0x636   : > { %6641 = vmatmul.f32.gmra.mxu1 %v13185_v9  ;;  %7820 = vmatpush.msra.mxu0 %v12486_v20  ;;  %v6939_v16 = vsel %vm1534_vm5, %v6931_v54, %v13348_v56  ;;  %v13549_v61 = vpop.f32.mrf.mxu1 }
 0x637   : > { %7944 = vmatpush.msra.mxu1 %v15160_v36  ;;  %v6696_v36 = vld [vmem:[#allocation3 + $0x120] sm:$0xff]  ;;  %v6947_v50 = vsel %vm1543_vm6, %v6939_v16, %v6764_v13  ;;  %15164 = vst [vmem:[#allocation67_spill] sm:$0xff] %v13549_v61 }
 0x638   : > { %7822 = vmatpush.msra.mxu0 %v12507_v28 }
 0x639   : > { %7950 = vmatpush.msra.mxu1 %v15161_v3  ;;  %v13557_v13 = vpop.f32.mrf.mxu2 }
 0x63a   : > { %6801 = vrot.lane.b32.xlu2 %v15163_v41, %s8693_s19  ;;  %7824 = vmatpush.msra.mxu0 %v12528_v46  ;;  %15166 = vst [vmem:[#allocation27_spill] sm:$0xff] %v13557_v13  ;;  %v13561_v41 = vld [vmem:[#allocation3 + $0x91] sm:$0xff] }
 0x63b   : > { %6777 = vrot.lane.b32.xlu1 %v8631_v5, %s8694_s20  ;;  %7956 = vmatpush.msra.mxu1 %v12640_v53  ;;  %v13555_v53 = vpop.f32.mrf.mxu0  ;;  %v6955_v5 = vsel %vm1552_vm7, %v6947_v50, %v13392_v21  ;;  %v8634_v13 = vld [vmem:[#allocation3 + $0x12] sm:$0xff] }
 0x63c   : > { %6855 = vrot.lane.b32.xlu0 %v6696_v36, %s8686_s25  ;;  %v13546_v3 = vpop.permute.xlu2 %6847  ;;  %6583 = vmatmul.f32.gmra.mxu0 %v13185_v9  ;;  %15165 = vst [vmem:[#allocation48_spill] sm:$0xff] %v13555_v53  ;;  %v13570_v36 = vpop.f32.mrf.mxu3  ;;  %v13572_v53 = vld [vmem:[#allocation3 + $0x121] sm:$0xff] }
 0x63d   : > { %6453 = vmatmul.f32.gmra.mxu2 %v13438_v38  ;;  %v6766_v56 = vpop.permute.xlu1 %6765  ;;  %v6812_v54 = vpop.permute.xlu0 %6811  ;;  %7826 = vmatpush.msra.mxu0 %v12547_v43  ;;  %v6697_v38 = vld [vmem:[#allocation3 + $0x130] sm:$0xff]  ;;  %15167 = vst [vmem:[#allocation66_spill] sm:$0xff] %v13570_v36 }
 0x63e   : > { %6645 = vmatmul.f32.gmra.mxu1 %v13226_v27  ;;  %v6963_v16 = vsel %vm1561_vm8, %v6955_v5, %v6812_v54  ;;  %v13578_v50 = vpop.f32.mrf.mxu1 }
 0x63f   : > { %7828 = vmatpush.msra.mxu0 %v12569_v14  ;;  %v6971_v9 = vsel %vm1570_vm9, %v6963_v16, %v6844_v15  ;;  %15168 = vst [vmem:[#allocation64_spill] sm:$0xff] %v13578_v50  ;;  %v8633_v50 = vld [vmem:[#allocation3 + $0xc0] sm:$0xff] }
 0x640   : > { %v6979_v15 = vsel %vm1579_vm11, %v6971_v9, %v13431_v17 }
 0x641   : > { %7830 = vmatpush.msra.mxu0 %v12590_v35  ;;  %v13588_v45 = vpop.f32.mrf.mxu2 }
 0x642   : > { %6889 = vrot.lane.b32.xlu2 %v13561_v41, %s8689_s28  ;;  %15170 = vst [vmem:[#allocation33_spill] sm:$0xff] %v13588_v45  ;;  %v13626_v45 = vld [vmem:[#allocation3 + $0x131] sm:$0xff] }
 0x643   : > { %6857 = vrot.lane.b32.xlu1 %v6697_v38, %s8686_s25  ;;  %v13586_v61 = vpop.f32.mrf.mxu0 }
 0x644   : > { %6753 = vrot.lane.b32.xlu0 %v13572_v53, %s8685_s24  ;;  %v13576_v21 = vpop.permute.xlu2 %6745  ;;  %6587 = vmatmul.f32.gmra.mxu0 %v13226_v27  ;;  %15169 = vst [vmem:[#allocation59_spill] sm:$0xff] %v13586_v61  ;;  %v6932_v27 = vsel %vm380_vm2, %v8633_v50, %v13397_v33  ;;  %v13611_v50 = vpop.f32.mrf.mxu3  ;;  %v8637_v61 = vld [vmem:[#allocation3 + $0x152] sm:$0xff] }
 0x645   : > { %v6846_v54 = vpop.permute.xlu1 %6845  ;;  %v6908_v5 = vpop.permute.xlu0 %6907  ;;  %v6940_v17 = vsel %vm1534_vm5, %v6932_v27, %v6742_v52  ;;  %15171 = vst [vmem:[#allocation26_spill] sm:$0xff] %v13611_v50 }
 0x646   : > { %6649 = vmatmul.f32.gmra.mxu1 %v13280_v2  ;;  %v6987_v16 = vsel %vm1588_vm10, %v6979_v15, %v6908_v5  ;;  %v8635_v15 = vld [vmem:[#allocation3 + $0xb1] sm:$0xff]  ;;  %v6948_v5 = vsel %vm1543_vm6, %v6940_v17, %v6766_v56  ;;  %v13615_v56 = vpop.f32.mrf.mxu1 }
 0x647   : > { %v6996_v38 = vsel %vm1606_vm12, %v6987_v16, 0  ;;  %v13602_v16 = vld [vmem:[#allocation3 + $0x261] sm:$0xff]  ;;  %15172 = vst [vmem:[#allocation68_spill] sm:$0xff] %v13615_v56  ;;  %v6956_v17 = vsel %vm1552_vm7, %v6948_v5, %v13464_v29 }
 0x648   : > { %v13590_v36 = vand.u32 4294901760, %v6996_v38  ;;  %v15175_v29 = vld [vmem:[#allocation5_spill] sm:$0xff] }
 0x64a   : > { %7542 = vrot.lane.b32.xlu2 %v8634_v13, %s8685_s24  ;;  %v13597_v9 = vsub.f32 %v6996_v38, %v13590_v36  ;;  %7171 = vmatmul.f32.vlgmr.msrb.gmra.mxu3 %v13590_v36 }
 0x64b   : > { %7518 = vrot.lane.b32.xlu1 %v8635_v15, %s8684_s21  ;;  %8073 = vmatpush.msrb.mxu3 %v12435_v49  ;;  %v13630_v56 = vpop.f32.mrf.mxu0 }
 0x64c   : > { %6825 = vrot.lane.b32.xlu0 %v13602_v16, %s8692_s18  ;;  %v13606_v33 = vpop.permute.xlu2 %6817  ;;  %v14641_v52 = vand.u32 4294901760, %v13597_v9  ;;  %6591 = vmatmul.f32.gmra.mxu0 %v13280_v2  ;;  %v13624_v2 = vpop.f32.mrf.mxu2  ;;  %15174 = vst [vmem:[#allocation77_spill] sm:$0xff] %v13630_v56  ;;  %v8656_v56 = vld [vmem:[#allocation3 + $0x1a1] sm:$0xff] }
 0x64d   : > { %v6744_v13 = vpop.permute.xlu1 %6743  ;;  %v6814_v38 = vpop.permute.xlu0 %6813  ;;  %8075 = vmatpush.msrb.mxu3 %v12451_v22  ;;  %15173 = vst [vmem:[#allocation16_spill] sm:$0xff] %v13624_v2  ;;  %v15213_v2 = vld [vmem:[#allocation38_spill] sm:$0xff] }
 0x64e   : > { %6653 = vmatmul.f32.gmra.mxu1 %v13328_v32  ;;  %v7047_v27 = vsub.f32 %v13597_v9, %v14641_v52  ;;  %v6964_v15 = vsel %vm1561_vm8, %v6956_v17, %v6814_v38  ;;  %v13642_v38 = vpop.f32.mrf.mxu3 }
 0x64f   : > { %8077 = vmatpush.msrb.mxu3 %v12468_v0  ;;  %v6972_v52 = vsel %vm1570_vm9, %v6964_v15, %v6846_v54  ;;  %15176 = vst [vmem:[#allocation50_spill] sm:$0xff] %v13642_v38  ;;  %v7510_v15 = vld [vmem:[#allocation3 + $0x22] sm:$0xff] }
 0x650   : > { %v7048_v50 = vand.u32 4294901760, %v7047_v27  ;;  %v6980_v54 = vsel %vm1579_vm11, %v6972_v52, %v13493_v51 }
 0x651   : > { %8079 = vmatpush.msrb.mxu3 %v12486_v20 }
 0x652   : > { %7614 = vrot.lane.b32.xlu2 %v8637_v61, %s8692_s18  ;;  %7049 = vmatmul.f32.vlgmr.msrb.gmra.mxu2 %v7048_v50 }
 0x653   : > { %7590 = vrot.lane.b32.xlu1 %v15175_v29, %s8693_s19  ;;  %7999 = vmatpush.msrb.mxu2 %v12449_v10  ;;  %v13661_v52 = vpop.f32.mrf.mxu0 }
 0x654   : > { %6921 = vrot.lane.b32.xlu0 %v13626_v45, %s8688_s27  ;;  %v13637_v5 = vpop.permute.xlu2 %6913  ;;  %6595 = vmatmul.f32.gmra.mxu0 %v13328_v32  ;;  %v13652_v32 = vpop.f32.mrf.mxu1  ;;  %15178 = vst [vmem:[#allocation45_spill] sm:$0xff] %v13661_v52 }
 0x655   : > { %v6816_v61 = vpop.permute.xlu1 %6815  ;;  %8081 = vmatpush.msrb.mxu3 %v12507_v28  ;;  %v6910_v50 = vpop.permute.xlu0 %6909  ;;  %8002 = vmatpush.msrb.mxu2 %v12465_v58  ;;  %15177 = vst [vmem:[#allocation76_spill] sm:$0xff] %v13652_v32  ;;  %v8638_v58 = vld [vmem:[#allocation3 + $0xd0] sm:$0xff] }
 0x656   : > { %6657 = vmatmul.f32.gmra.mxu1 %v13374_v19  ;;  %v6988_v27 = vsel %vm1588_vm10, %v6980_v54, %v6910_v50  ;;  %v6933_v51 = vsel %vm380_vm2, %v8638_v58, %v13282_v23  ;;  %v13663_v29 = vpop.f32.mrf.mxu2  ;;  %v15180_v54 = vld [vmem:[#allocation29_spill] sm:$0xff] }
 0x657   : > { %8083 = vmatpush.msrb.mxu3 %v12528_v46  ;;  %v6999_v10 = vsel %vm1606_vm12, %v6988_v27, 0  ;;  %8005 = vmatpush.msrb.mxu2 %v12483_v12  ;;  %15179 = vst [vmem:[#allocation36_spill] sm:$0xff] %v13663_v29  ;;  %v6941_v50 = vsel %vm1534_vm5, %v6933_v51, %v6744_v13  ;;  %v13686_v51 = vpop.f32.mrf.mxu3  ;;  %v7515_v29 = vld [vmem:[#allocation3 + $0x72] sm:$0xff] }
 0x658   : > { %v13654_v17 = vand.u32 4294901760, %v6999_v10  ;;  %v6949_v13 = vsel %vm1543_vm6, %v6941_v50, %v13520_v47  ;;  %15182 = vst [vmem:[#allocation28_spill] sm:$0xff] %v13686_v51  ;;  %v8639_v47 = vld [vmem:[#allocation3 + $0x22] sm:$0xff] }
 0x659   : > { %8085 = vmatpush.msrb.mxu3 %v12547_v43  ;;  %8008 = vmatpush.msrb.mxu2 %v15036_v34  ;;  %v15181_v34 = vld [vmem:[#allocation65_spill] sm:$0xff] }
 0x65a   : > { %7694 = vrot.lane.b32.xlu2 %v7510_v15, %s8688_s27  ;;  %v13666_v12 = vsub.f32 %v6999_v10, %v13654_v17  ;;  %7175 = vmatmul.f32.gmra.mxu3 %v13654_v17 }
 0x65b   : > { %7662 = vrot.lane.b32.xlu1 %v15180_v54, %s8689_s28  ;;  %8087 = vmatpush.msrb.mxu3 %v12569_v14 }
 0x65c   : > { %7566 = vrot.lane.b32.xlu0 %v15181_v34, %s8694_s20  ;;  %v13674_v27 = vpop.permute.xlu2 %6795  ;;  %6599 = vmatmul.f32.gmra.mxu0 %v13374_v19  ;;  %v7054_v10 = vand.u32 4294901760, %v13666_v12  ;;  %v13689_v54 = vpop.f32.mrf.mxu1 }
 0x65d   : > { %v6912_v23 = vpop.permute.xlu1 %6911  ;;  %8011 = vmatpush.msrb.mxu2 %v15040_v57  ;;  %v6792_v15 = vpop.permute.xlu0 %6791  ;;  %8089 = vmatpush.msrb.mxu3 %v12590_v35  ;;  %15183 = vst [vmem:[#allocation30_spill] sm:$0xff] %v13689_v54  ;;  %v15184_v57 = vld [vmem:[#allocation71_spill] sm:$0xff] }
 0x65e   : > { %6661 = vmatmul.f32.gmra.mxu1 %v13427_v26  ;;  %v7055_v58 = vsub.f32 %v13666_v12, %v7054_v10  ;;  %v6957_v19 = vsel %vm1552_vm7, %v6949_v13, %v6792_v15  ;;  %v13703_v15 = vpop.f32.mrf.mxu2 }
 0x65f   : > { %8014 = vmatpush.msrb.mxu2 %v15043_v4  ;;  %v6965_v52 = vsel %vm1561_vm8, %v6957_v19, %v6816_v61  ;;  %v15185_v4 = vld [vmem:[#allocation70_spill] sm:$0xff]  ;;  %15186 = vst [vmem:[#allocation11_spill] sm:$0xff] %v13703_v15  ;;  %v15187_v61 = vand.u32 4294901760, %v13597_v9 }
 0x660   : > { %v7056_v34 = vand.u32 4294901760, %v7055_v58  ;;  %v6973_v13 = vsel %vm1570_vm9, %v6965_v52, %v13546_v3  ;;  %v15189_v3 = vld [vmem:[#allocation57_spill] sm:$0xff]  ;;  %v8661_v15 = vld [vmem:[#allocation3 + $0x1b2] sm:$0xff] }
 0x661   : > { %8017 = vmatpush.msrb.mxu2 %v15046_v59  ;;  %v13695_v32 = vpop.f32.mrf.mxu0  ;;  %v8641_v52 = vld [vmem:[#allocation3 + $0xc1] sm:$0xff] }
 0x662   : > { %7568 = vrot.lane.b32.xlu2 %v15184_v57, %s8694_s20  ;;  %7057 = vmatmul.f32.gmra.mxu2 %v7056_v34  ;;  %v13718_v57 = vpop.f32.mrf.mxu3 }
 0x663   : > { %7544 = vrot.lane.b32.xlu1 %v8639_v47, %s8685_s24  ;;  %8020 = vmatpush.msrb.mxu2 %v15050_v44  ;;  %15188 = vst [vmem:[#allocation49_spill] sm:$0xff] %v13718_v57 }
 0x664   : > { %7638 = vrot.lane.b32.xlu0 %v15185_v4, %s8686_s25  ;;  %v13700_v50 = vpop.permute.xlu2 %6883  ;;  %6603 = vmatmul.f32.gmra.mxu0 %v13427_v26  ;;  %v13714_v34 = vpop.f32.mrf.mxu1 }
 0x665   : > { %v6794_v59 = vpop.permute.xlu1 %6793  ;;  %v6880_v58 = vpop.permute.xlu0 %6879  ;;  %8023 = vmatpush.msrb.mxu2 %v12613_v55  ;;  %v8640_v55 = vld [vmem:[#allocation3 + $0x162] sm:$0xff] }
 0x666   : > { %7306 = vmatmul.f32.vlgmr.msrb.gmra.mxu1 %v15187_v61  ;;  %v6981_v19 = vsel %vm1579_vm11, %v6973_v13, %v6880_v58  ;;  %v8642_v61 = vld [vmem:[#allocation3 + $0xe0] sm:$0xff] }
 0x667   : > { %8223 = vmatpush.msrb.mxu1 %v12435_v49  ;;  %v6989_v44 = vsel %vm1588_vm10, %v6981_v19, %v6912_v23 }
 0x668   : > { %v7002_v26 = vsel %vm1606_vm12, %v6989_v44, 0  ;;  %v13740_v44 = vpop.f32.mrf.mxu2 }
 0x669   : > { %8225 = vmatpush.msrb.mxu1 %v12451_v22  ;;  %v13720_v47 = vand.u32 4294901760, %v7002_v26  ;;  %v13731_v23 = vpop.f32.mrf.mxu0  ;;  %15190 = vst [vmem:[#allocation32_spill] sm:$0xff] %v13740_v44  ;;  %v8664_v44 = vld [vmem:[#allocation3 + $0x1c1] sm:$0xff] }
 0x66a   : > { %7640 = vrot.lane.b32.xlu2 %v15189_v3, %s8686_s25 }
 0x66b   : > { %7616 = vrot.lane.b32.xlu1 %v8640_v55, %s8692_s18  ;;  %8227 = vmatpush.msrb.mxu1 %v12468_v0  ;;  %v7061_v49 = vsub.f32 %v7002_v26, %v13720_v47  ;;  %v6934_v0 = vsel %vm380_vm2, %v8642_v61, %v13472_v18  ;;  %v7511_v18 = vld [vmem:[#allocation3 + $0x32] sm:$0xff] }
 0x66c   : > { %7520 = vrot.lane.b32.xlu0 %v8641_v52, %s8684_s21  ;;  %7179 = vmatmul.f32.gmra.mxu3 %v13720_v47  ;;  %v13729_v22 = vpop.permute.xlu2 %6773  ;;  %v6942_v19 = vsel %vm1534_vm5, %v6934_v0, %v13576_v21  ;;  %v8644_v61 = vld [vmem:[#allocation3 + $0xf0] sm:$0xff] }
 0x66d   : > { %7239 = vmatmul.f32.vlgmr.msrb.gmra.mxu0 %v13597_v9  ;;  %v6882_v4 = vpop.permute.xlu1 %6881  ;;  %8229 = vmatpush.msrb.mxu1 %v12486_v20  ;;  %v6770_v13 = vpop.permute.xlu0 %6769  ;;  %v7062_v58 = vand.u32 4294901760, %v7061_v49  ;;  %v8643_v20 = vld [vmem:[#allocation3 + $0xd1] sm:$0xff] }
 0x66e   : > { %7312 = vmatmul.f32.gmra.mxu1 %v7054_v10  ;;  %8149 = vmatpush.msrb.mxu0 %v12462_v63  ;;  %v6950_v9 = vsel %vm1543_vm6, %v6942_v19, %v6770_v13  ;;  %v13748_v63 = vpop.f32.mrf.mxu1 }
 0x66f   : > { %8231 = vmatpush.msrb.mxu1 %v12507_v28  ;;  %v7063_v26 = vsub.f32 %v7061_v49, %v7062_v58  ;;  %v6958_v21 = vsel %vm1552_vm7, %v6950_v9, %v6794_v59  ;;  %v13753_v28 = vpop.f32.mrf.mxu3 }
 0x670   : > { %8153 = vmatpush.msrb.mxu0 %v12480_v31  ;;  %15191 = vst [vmem:[#allocation53_spill] sm:$0xff] %v13753_v28  ;;  %v15192_v31 = vld [vmem:[#allocation25_spill] sm:$0xff] }
 0x671   : > { %8233 = vmatpush.msrb.mxu1 %v12528_v46  ;;  %v7064_v10 = vand.u32 4294901760, %v7063_v26  ;;  %v15217_v28 = vld [vmem:[#allocation13_spill] sm:$0xff] }
 0x672   : > { %7522 = vrot.lane.b32.xlu2 %v8643_v20, %s8684_s21  ;;  %8157 = vmatpush.msrb.mxu0 %v12498_v37  ;;  %v6966_v37 = vsel %vm1561_vm8, %v6958_v21, %v13606_v33 }
 0x673   : > { %7696 = vrot.lane.b32.xlu1 %v7511_v18, %s8688_s27  ;;  %8235 = vmatpush.msrb.mxu1 %v12547_v43  ;;  %v13764_v43 = vpop.f32.mrf.mxu0  ;;  %v8646_v18 = vld [vmem:[#allocation3 + $0x42] sm:$0xff] }
 0x674   : > { %7592 = vrot.lane.b32.xlu0 %v15192_v31, %s8693_s19  ;;  %7065 = vmatmul.f32.gmra.mxu2 %v7064_v10  ;;  %v13757_v46 = vpop.permute.xlu2 %6853  ;;  %v8647_v31 = vld [vmem:[#allocation3 + $0xe1] sm:$0xff] }
 0x675   : > { %7244 = vmatmul.f32.gmra.mxu0 %v13666_v12  ;;  %v6772_v3 = vpop.permute.xlu1 %6771  ;;  %8237 = vmatpush.msrb.mxu1 %v12569_v14  ;;  %v6850_v59 = vpop.permute.xlu0 %6849 }
 0x676   : > { %7318 = vmatmul.f32.gmra.mxu1 %v7062_v58  ;;  %8161 = vmatpush.msrb.mxu0 %v15116_v62  ;;  %v6974_v55 = vsel %vm1570_vm9, %v6966_v37, %v6850_v59  ;;  %v13770_v12 = vpop.f32.mrf.mxu2 }
 0x677   : > { %8239 = vmatpush.msrb.mxu1 %v12590_v35  ;;  %v6982_v52 = vsel %vm1579_vm11, %v6974_v55, %v6882_v4  ;;  %15193 = vst [vmem:[#allocation7_spill] sm:$0xff] %v13770_v12  ;;  %v15216_v12 = vld [vmem:[#allocation17_spill] sm:$0xff] }
 0x678   : > { %8165 = vmatpush.msrb.mxu0 %v15117_v40  ;;  %v6990_v14 = vsel %vm1588_vm10, %v6982_v52, %v13637_v5  ;;  %v13787_v40 = vpop.f32.mrf.mxu1  ;;  %v13791_v5 = vpop.f32.mrf.mxu3 }
 0x679   : > { %v7005_v33 = vsel %vm1606_vm12, %v6990_v14, 0  ;;  %15194 = vst [vmem:[#allocation55_spill] sm:$0xff] %v13791_v5 }
 0x67a   : > { %7594 = vrot.lane.b32.xlu2 %v13155_v6, %s8693_s19  ;;  %8169 = vmatpush.msrb.mxu0 %v15120_v60  ;;  %v13780_v35 = vand.u32 4294901760, %v7005_v33 }
 0x67b   : > { %7570 = vrot.lane.b32.xlu1 %v13145_v25, %s8694_s20 }
 0x67c   : > { %7664 = vrot.lane.b32.xlu0 %v13143_v48, %s8689_s28  ;;  %v13784_v62 = vpop.permute.xlu2 %6751  ;;  %8173 = vmatpush.msrb.mxu0 %v15127_v39  ;;  %v7069_v60 = vsub.f32 %v7005_v33, %v13780_v35  ;;  %v6935_v48 = vsel %vm380_vm2, %v8644_v61, %v13435_v8  ;;  %v13797_v39 = vpop.f32.mrf.mxu0  ;;  %v8645_v8 = vld [vmem:[#allocation3 + $0x32] sm:$0xff]  ;;  %v8650_v61 = vld [vmem:[#allocation3 + $0x100] sm:$0xff] }
 0x67d   : > { %7183 = vmatmul.f32.gmra.mxu3 %v13780_v35  ;;  %7249 = vmatmul.f32.gmra.mxu0 %v7061_v49  ;;  %v6852_v6 = vpop.permute.xlu1 %6851 }
 0x67e   : > { %v6748_v25 = vpop.permute.xlu0 %6747  ;;  %8177 = vmatpush.msrb.mxu0 %v15128_v7  ;;  %v7070_v4 = vand.u32 4294901760, %v7069_v60  ;;  %v13802_v13 = vpop.f32.mrf.mxu2 }
 0x67f   : > { %v6943_v0 = vsel %vm1534_vm5, %v6935_v48, %v6748_v25  ;;  %15195 = vst [vmem:[#allocation73_spill] sm:$0xff] %v13802_v13  ;;  %v15199_v48 = vld [vmem:[#allocation21_spill] sm:$0xff] }
 0x680   : > { %8181 = vmatpush.msrb.mxu0 %v15131_v24  ;;  %7324 = vmatmul.f32.gmra.mxu1 %v7070_v4  ;;  %v7071_v49 = vsub.f32 %v7069_v60, %v7070_v4  ;;  %v6951_v58 = vsel %vm1543_vm6, %v6943_v0, %v6772_v3  ;;  %v13810_v26 = vpop.f32.mrf.mxu1  ;;  %v13814_v20 = vpop.f32.mrf.mxu3  ;;  %v8648_v3 = vld [vmem:[#allocation3 + $0x172] sm:$0xff]  ;;  %v8649_v4 = vld [vmem:[#allocation3 + $0x182] sm:$0xff]  ;;  %v6936_v0 = vsel %vm380_vm2, %v8650_v61, %v15199_v48 }
 0x681   : > { %15196 = vst [vmem:[#allocation61_spill] sm:$0xff] %v13814_v20 }
 0x682   : > { %7666 = vrot.lane.b32.xlu2 %v13189_v30, %s8689_s28  ;;  %v7072_v7 = vand.u32 4294901760, %v7071_v49  ;;  %v6959_v30 = vsel %vm1552_vm7, %v6951_v58, %v13674_v27  ;;  %v7512_v58 = vld [vmem:[#allocation3 + $0x42] sm:$0xff] }
 0x683   : > { %7642 = vrot.lane.b32.xlu1 %v13232_v42, %s8686_s25 }
 0x684   : > { %7546 = vrot.lane.b32.xlu0 %v8645_v8, %s8685_s24  ;;  %v13808_v24 = vpop.permute.xlu2 %6823  ;;  %7073 = vmatmul.f32.gmra.mxu2 %v7072_v7  ;;  %v13818_v10 = vpop.f32.mrf.mxu0  ;;  %v15200_v7 = vld [vmem:[#allocation43_spill] sm:$0xff] }
 0x685   : > { %7254 = vmatmul.f32.gmra.mxu0 %v7069_v60  ;;  %v6750_v19 = vpop.permute.xlu1 %6749 }
 0x686   : > { %v6820_v9 = vpop.permute.xlu0 %6819  ;;  %v13825_v27 = vpop.f32.mrf.mxu2  ;;  %v6944_v8 = vsel %vm1534_vm5, %v6936_v0, %v6750_v19 }
 0x687   : > { %v6967_v42 = vsel %vm1561_vm8, %v6959_v30, %v6820_v9  ;;  %15197 = vst [vmem:[#allocation31_spill] sm:$0xff] %v13825_v27 }
 0x688   : > { %v6975_v21 = vsel %vm1570_vm9, %v6967_v42, %v6852_v6  ;;  %v13831_v6 = vpop.f32.mrf.mxu1  ;;  %v13835_v25 = vpop.f32.mrf.mxu3 }
 0x689   : > { %v6983_v55 = vsel %vm1579_vm11, %v6975_v21, %v13700_v50  ;;  %15198 = vst [vmem:[#allocation72_spill] sm:$0xff] %v13835_v25 }
 0x68a   : > { %7548 = vrot.lane.b32.xlu2 %v8646_v18, %s8685_s24 }
 0x68b   : > { %7524 = vrot.lane.b32.xlu1 %v8647_v31, %s8684_s21  ;;  %v6952_v31 = vsel %vm1543_vm6, %v6944_v8, %v13729_v22  ;;  %v15204_v22 = vld [vmem:[#allocation40_spill] sm:$0xff] }
 0x68c   : > { %7618 = vrot.lane.b32.xlu0 %v8648_v3, %s8692_s18  ;;  %v13823_v37 = vpop.permute.xlu2 %6919 }
 0x68d   : > { %v6822_v59 = vpop.permute.xlu1 %6821 }
 0x68e   : > { %v6916_v52 = vpop.permute.xlu0 %6915  ;;  %v13850_v21 = vpop.f32.mrf.mxu2 }
 0x68f   : > { %v6991_v14 = vsel %vm1588_vm10, %v6983_v55, %v6916_v52  ;;  %v13841_v49 = vpop.f32.mrf.mxu0  ;;  %15201 = vst [vmem:[#allocation23_spill] sm:$0xff] %v13850_v21 }
 0x690   : > { %v7008_v33 = vsel %vm1606_vm12, %v6991_v14, 0  ;;  %v13855_v52 = vpop.f32.mrf.mxu1  ;;  %v7513_v14 = vld [vmem:[#allocation3 + $0x52] sm:$0xff]  ;;  %v13861_v61 = vpop.f32.mrf.mxu3 }
 0x691   : > { %v13833_v60 = vand.u32 4294901760, %v7008_v33  ;;  %15203 = vst [vmem:[#allocation39_spill] sm:$0xff] %v13861_v61 }
 0x692   : > { %7620 = vrot.lane.b32.xlu2 %v8649_v4, %s8692_s18  ;;  %v15202_v4 = vld [vmem:[#allocation22_spill] sm:$0xff] }
 0x693   : > { %v7077_v50 = vsub.f32 %v7008_v33, %v13833_v60  ;;  %7187 = vmatmul.f32.gmra.mxu3 %v13833_v60  ;;  %7596 = vrot.lane.b32.xlu1 %v15200_v7, %s8693_s19 }
 0x694   : > { %7698 = vrot.lane.b32.xlu0 %v7512_v58, %s8688_s27  ;;  %v13848_v9 = vpop.permute.xlu2 %6801 }
 0x695   : > { %7259 = vmatmul.f32.gmra.mxu0 %v7077_v50  ;;  %v6918_v30 = vpop.permute.xlu1 %6917  ;;  %v7078_v42 = vand.u32 4294901760, %v7077_v50 }
 0x696   : > { %v6798_v18 = vpop.permute.xlu0 %6797 }
 0x697   : > { %7330 = vmatmul.f32.gmra.mxu1 %v7078_v42  ;;  %v7079_v3 = vsub.f32 %v7077_v50, %v7078_v42  ;;  %v6960_v55 = vsel %vm1552_vm7, %v6952_v31, %v6798_v18  ;;  %v13873_v42 = vpop.f32.mrf.mxu2 }
 0x698   : > { %v6968_v33 = vsel %vm1561_vm8, %v6960_v55, %v6822_v59  ;;  %v13867_v0 = vpop.f32.mrf.mxu0  ;;  %15205 = vst [vmem:[#allocation41_spill] sm:$0xff] %v13873_v42  ;;  %v13879_v55 = vpop.f32.mrf.mxu1 }
 0x699   : > { %v7080_v19 = vand.u32 4294901760, %v7079_v3  ;;  %v6976_v7 = vsel %vm1570_vm9, %v6968_v33, %v13757_v46  ;;  %v8651_v3 = vld [vmem:[#allocation3 + $0x191] sm:$0xff] }
 0x69a   : > { %7700 = vrot.lane.b32.xlu2 %v7513_v14, %s8688_s27  ;;  %v15206_v46 = vld [vmem:[#allocation6_spill] sm:$0xff] }
 0x69b   : > { %7081 = vmatmul.f32.gmra.mxu2 %v7080_v19  ;;  %7668 = vrot.lane.b32.xlu1 %v15202_v4, %s8689_s28  ;;  %v8652_v19 = vld [vmem:[#allocation3 + $0x52] sm:$0xff] }
 0x69c   : > { %7572 = vrot.lane.b32.xlu0 %v15204_v22, %s8694_s20  ;;  %v13865_v48 = vpop.permute.xlu2 %6889  ;;  %v8653_v4 = vld [vmem:[#allocation3 + $0x110] sm:$0xff] }
 0x69d   : > { %v6800_v50 = vpop.permute.xlu1 %6799  ;;  %v6937_v22 = vsel %vm380_vm2, %v8653_v4, %v13500_v1  ;;  %v8654_v4 = vld [vmem:[#allocation3 + $0x192] sm:$0xff] }
 0x69e   : > { %v6886_v58 = vpop.permute.xlu0 %6885 }
 0x69f   : > { %v6984_v59 = vsel %vm1579_vm11, %v6976_v7, %v6886_v58  ;;  %v13890_v7 = vpop.f32.mrf.mxu3  ;;  %v13899_v54 = vpop.f32.mrf.mxu2 }
 0x6a0   : > { %v6992_v8 = vsel %vm1588_vm10, %v6984_v59, %v6918_v30  ;;  %15207 = vst [vmem:[#allocation35_spill] sm:$0xff] %v13890_v7  ;;  %v15209_v7 = vld [vmem:[#allocation60_spill] sm:$0xff] }
 0x6a1   : > { %v7011_v18 = vsel %vm1606_vm12, %v6992_v8, 0  ;;  %v6945_v8 = vsel %vm1534_vm5, %v6937_v22, %v13784_v62  ;;  %v13905_v62 = vpop.f32.mrf.mxu1 }
 0x6a2   : > { %v13876_v31 = vand.u32 4294901760, %v7011_v18  ;;  %7574 = vrot.lane.b32.xlu2 %v8651_v3, %s8694_s20  ;;  %v13894_v3 = vpop.f32.mrf.mxu0 }
 0x6a3   : > { %7550 = vrot.lane.b32.xlu1 %v8652_v19, %s8685_s24 }
 0x6a4   : > { %7644 = vrot.lane.b32.xlu0 %v15206_v46, %s8686_s25  ;;  %7191 = vmatmul.f32.gmra.mxu3 %v13876_v31  ;;  %v13885_v30 = vpop.permute.xlu2 %7542  ;;  %v7085_v14 = vsub.f32 %v7011_v18, %v13876_v31  ;;  %v15208_v18 = vld [vmem:[#allocation42_spill] sm:$0xff] }
 0x6a5   : > { %v6888_v33 = vpop.permute.xlu1 %6887 }
 0x6a6   : > { %7264 = vmatmul.f32.gmra.mxu0 %v7085_v14  ;;  %v6776_v58 = vpop.permute.xlu0 %6775  ;;  %v7086_v59 = vand.u32 4294901760, %v7085_v14 }
 0x6a7   : > { %v6953_v19 = vsel %vm1543_vm6, %v6945_v8, %v6776_v58 }
 0x6a8   : > { %7336 = vmatmul.f32.gmra.mxu1 %v7086_v59  ;;  %v7087_v46 = vsub.f32 %v7085_v14, %v7086_v59  ;;  %v6961_v1 = vsel %vm1552_vm7, %v6953_v19, %v6800_v50 }
 0x6a9   : > { %v6969_v14 = vsel %vm1561_vm8, %v6961_v1, %v13808_v24  ;;  %v15211_v1 = vld [vmem:[#allocation44_spill] sm:$0xff] }
 0x6aa   : > { %7646 = vrot.lane.b32.xlu2 %v15208_v18, %s8686_s25  ;;  %v7088_v42 = vand.u32 4294901760, %v7087_v46  ;;  %v13912_v46 = vpop.f32.mrf.mxu3  ;;  %v13915_v19 = vpop.f32.mrf.mxu0  ;;  %v15210_v18 = vld [vmem:[#allocation54_spill] sm:$0xff] }
 0x6ab   : > { %7622 = vrot.lane.b32.xlu1 %v8654_v4, %s8692_s18  ;;  %v7514_v4 = vld [vmem:[#allocation3 + $0x62] sm:$0xff] }
 0x6ac   : > { %7526 = vrot.lane.b32.xlu0 %v15209_v7, %s8684_s21  ;;  %7089 = vmatmul.f32.gmra.mxu2 %v7088_v42  ;;  %v13907_v58 = vpop.permute.xlu2 %7614 }
 0x6ad   : > { %v6778_v22 = vpop.permute.xlu1 %6777 }
 0x6ae   : > { %v6856_v59 = vpop.permute.xlu0 %6855 }
 0x6af   : > { %v6977_v8 = vsel %vm1570_vm9, %v6969_v14, %v6856_v59  ;;  %v13927_v14 = vpop.f32.mrf.mxu2 }
 0x6b0   : > { %v6985_v50 = vsel %vm1579_vm11, %v6977_v8, %v6888_v33  ;;  %v13931_v8 = vpop.f32.mrf.mxu1 }
 0x6b1   : > { %v6993_v42 = vsel %vm1588_vm10, %v6985_v50, %v13823_v37 }
 0x6b2   : > { %v7014_v7 = vsel %vm1606_vm12, %v6993_v42, 0  ;;  %7528 = vrot.lane.b32.xlu2 %v15210_v18, %s8684_s21  ;;  %v8655_v42 = vld [vmem:[#allocation3 + $0x120] sm:$0xff]  ;;  %v15212_v18 = vld [vmem:[#allocation69_spill] sm:$0xff]  ;;  %v13938_v38 = vpop.f32.mrf.mxu3 }
 0x6b3   : > { %7702 = vrot.lane.b32.xlu1 %v7514_v4, %s8688_s27  ;;  %v13923_v24 = vand.u32 4294901760, %v7014_v7  ;;  %v6938_v4 = vsel %vm380_vm2, %v8655_v42, %v15212_v18  ;;  %v15214_v42 = vld [vmem:[#allocation9_spill] sm:$0xff] }
 0x6b4   : > { %7598 = vrot.lane.b32.xlu0 %v15211_v1, %s8693_s19  ;;  %v13935_v61 = vpop.permute.xlu2 %7694 }
 0x6b5   : > { %7195 = vmatmul.f32.gmra.mxu3 %v13923_v24  ;;  %v6858_v33 = vpop.permute.xlu1 %6857  ;;  %v7093_v37 = vsub.f32 %v7014_v7, %v13923_v24  ;;  %v13942_v7 = vpop.f32.mrf.mxu0 }
 0x6b6   : > { %v6754_v59 = vpop.permute.xlu0 %6753 }
 0x6b7   : > { %7269 = vmatmul.f32.gmra.mxu0 %v7093_v37  ;;  %v7094_v50 = vand.u32 4294901760, %v7093_v37  ;;  %v6946_v1 = vsel %vm1534_vm5, %v6938_v4, %v6754_v59 }
 0x6b8   : > { %v6954_v13 = vsel %vm1543_vm6, %v6946_v1, %v6778_v22  ;;  %v13953_v4 = vpop.f32.mrf.mxu1  ;;  %v8657_v22 = vld [vmem:[#allocation3 + $0x62] sm:$0xff] }
 0x6b9   : > { %7342 = vmatmul.f32.gmra.mxu1 %v7094_v50  ;;  %v7095_v21 = vsub.f32 %v7093_v37, %v7094_v50  ;;  %v13948_v37 = vpop.f32.mrf.mxu2  ;;  %v6962_v50 = vsel %vm1552_vm7, %v6954_v13, %v13848_v9 }
 0x6ba   : > { %7600 = vrot.lane.b32.xlu2 %v15213_v2, %s8693_s19 }
 0x6bb   : > { %7576 = vrot.lane.b32.xlu1 %v8656_v56, %s8694_s20  ;;  %v7096_v20 = vand.u32 4294901760, %v7095_v21  ;;  %v15215_v56 = vld [vmem:[#allocation58_spill] sm:$0xff] }
 0x6bc   : > { %7670 = vrot.lane.b32.xlu0 %v15214_v42, %s8689_s28  ;;  %v13955_v5 = vpop.permute.xlu2 %7568 }
 0x6bd   : > { %7097 = vmatmul.f32.gmra.mxu2 %v7096_v20  ;;  %v7519_v59 = vpop.permute.xlu1 %7518  ;;  %v13962_v20 = vpop.f32.mrf.mxu3 }
 0x6be   : > { %v6826_v18 = vpop.permute.xlu0 %6825  ;;  %v13965_v13 = vpop.f32.mrf.mxu0 }
 0x6bf   : > { %v6970_v2 = vsel %vm1561_vm8, %v6962_v50, %v6826_v18 }
 0x6c0   : > { %v6978_v21 = vsel %vm1570_vm9, %v6970_v2, %v6858_v33 }
 0x6c1   : > { %v6986_v42 = vsel %vm1579_vm11, %v6978_v21, %v13865_v48  ;;  %v13971_v33 = vpop.f32.mrf.mxu2  ;;  %v8659_v48 = vld [vmem:[#allocation3 + $0x11] sm:$0xff] }
 0x6c2   : > { %7672 = vrot.lane.b32.xlu2 %v15215_v56, %s8689_s28  ;;  %v13976_v56 = vpop.f32.mrf.mxu1  ;;  %v7718_v21 = vsel %vm380_vm2, %v8659_v48, %v7519_v59 }
 0x6c3   : > { %7648 = vrot.lane.b32.xlu1 %v13486_v11, %s8686_s25  ;;  %v8658_v11 = vld [vmem:[#allocation3 + $0x72] sm:$0xff]  ;;  %v7726_v57 = vsel %vm1534_vm5, %v7718_v21, %v13885_v30  ;;  %v6352_v21 = vadd.f32 %v13714_v34, %v13695_v32  ;;  %v15218_v32 = vld [vmem:[#allocation12_spill] sm:$0xff] }
 0x6c4   : > { %7552 = vrot.lane.b32.xlu0 %v8657_v22, %s8685_s24  ;;  %v8662_v34 = vld [vmem:[#allocation3 + $0x1b1] sm:$0xff] }
 0x6c5   : > { %v7591_v9 = vpop.permute.xlu1 %7590  ;;  %v13986_v25 = vpop.f32.mrf.mxu3 }
 0x6c6   : > { %v6922_v1 = vpop.permute.xlu0 %6921 }
 0x6c7   : > { %v6994_v18 = vsel %vm1588_vm10, %v6986_v42, %v6922_v1  ;;  %v13983_v1 = vpop.permute.xlu2 %7640  ;;  %v8660_v42 = vld [vmem:[#allocation3 + $0x1a2] sm:$0xff] }
 0x6c8   : > { %v7017_v50 = vsel %vm1606_vm12, %v6994_v18, 0 }
 0x6c9   : > { %v13973_v2 = vand.u32 4294901760, %v7017_v50 }
 0x6ca   : > { %7554 = vrot.lane.b32.xlu2 %v8658_v11, %s8685_s24  ;;  %v14001_v30 = vpop.f32.mrf.mxu1 }
 0x6cb   : > { %v7101_v22 = vsub.f32 %v7017_v50, %v13973_v2  ;;  %7199 = vmatmul.f32.gmra.mxu3 %v13973_v2  ;;  %7530 = vrot.lane.b32.xlu1 %v15216_v12, %s8684_s21  ;;  %v13988_v50 = vpop.f32.mrf.mxu0 }
 0x6cc   : > { %7624 = vrot.lane.b32.xlu0 %v8660_v42, %s8692_s18  ;;  %v13994_v42 = vpop.f32.mrf.mxu2 }
 0x6cd   : > { %7274 = vmatmul.f32.gmra.mxu0 %v7101_v22  ;;  %v7663_v18 = vpop.permute.xlu1 %7662  ;;  %v7102_v11 = vand.u32 4294901760, %v7101_v22 }
 0x6ce   : > { %v7567_v27 = vpop.permute.xlu0 %7566 }
 0x6cf   : > { %7348 = vmatmul.f32.gmra.mxu1 %v7102_v11  ;;  %v7103_v12 = vsub.f32 %v7101_v22, %v7102_v11  ;;  %v7734_v59 = vsel %vm1543_vm6, %v7726_v57, %v7567_v27  ;;  %v14003_v27 = vpop.permute.xlu2 %7522  ;;  %v14010_v11 = vpop.f32.mrf.mxu3 }
 0x6d0   : > { %v7742_v51 = vsel %vm1552_vm7, %v7734_v59, %v7591_v9  ;;  %v7516_v59 = vld [vmem:[#allocation3 + $0x82] sm:$0xff] }
 0x6d1   : > { %v7104_v48 = vand.u32 4294901760, %v7103_v12 }
 0x6d2   : > { %7626 = vrot.lane.b32.xlu2 %v8661_v15, %s8692_s18  ;;  %v7750_v15 = vsel %vm1561_vm8, %v7742_v51, %v13907_v58 }
 0x6d3   : > { %7105 = vmatmul.f32.gmra.mxu2 %v7104_v48  ;;  %7454 = vmatmul.f32.vlgmr.msra.gmra.mxu3 %v13590_v36  ;;  %v14013_v12 = vpop.f32.mrf.mxu0  ;;  %v6420_v48 = vadd.f32 %v13899_v54, %v6352_v21  ;;  %v6364_v21 = vadd.f32 %v13810_v26, %v13797_v39 }
 0x6d4   : > { %7602 = vrot.lane.b32.xlu1 %v15217_v28, %s8693_s19  ;;  %7704 = vrot.lane.b32.xlu0 %v7515_v29, %s8688_s27 }
 0x6d5   : > { %v7545_v57 = vpop.permute.xlu1 %7544 }
 0x6d6   : > { %v7639_v22 = vpop.permute.xlu0 %7638 }
 0x6d7   : > { %v7758_v9 = vsel %vm1570_vm9, %v7750_v15, %v7639_v22  ;;  %v6487_v15 = vadd.f32 %v13912_v46, %v6420_v48  ;;  %v6360_v46 = vadd.f32 %v13787_v40, %v13764_v43  ;;  %v6435_v48 = vadd.f32 %v13971_v33, %v6364_v21  ;;  %v15219_v43 = vld [vmem:[#allocation14_spill] sm:$0xff] }
 0x6d8   : > { %v7766_v28 = vsel %vm1579_vm11, %v7758_v9, %v7663_v18  ;;  %v14032_v9 = vpop.f32.mrf.mxu1 }
 0x6d9   : > { %v7774_v29 = vsel %vm1588_vm10, %v7766_v28, %v13935_v61  ;;  %v6444_v61 = vpop.f32.mrf.mxu2  ;;  %v6577_v28 = vadd.f32 %v13915_v19, %v6487_v15  ;;  %v6430_v19 = vadd.f32 %v13948_v37, %v6360_v46  ;;  %v6505_v40 = vadd.f32 %v13986_v25, %v6435_v48 }
 0x6da   : > { %v7783_v51 = vsel %vm1606_vm12, %v7774_v29, 0  ;;  %7706 = vrot.lane.b32.xlu2 %v7516_v59, %s8688_s27  ;;  %v14038_v29 = vpop.permute.xlu2 %7594  ;;  %v8663_v59 = vld [vmem:[#allocation3 + $0x21] sm:$0xff]  ;;  %v6356_v46 = vadd.f32 %v13748_v63, %v13731_v23  ;;  %v6372_v25 = vadd.f32 %v13855_v52, %v13841_v49 }
 0x6db   : > { %v14020_v58 = vand.u32 4294901760, %v7783_v51  ;;  %7396 = vmatmul.f32.vlgmr.msra.gmra.mxu2 %v13590_v36  ;;  %7458 = vmatmul.f32.gmra.mxu3 %v13654_v17  ;;  %v6596_v39 = vpop.f32.mrf.mxu0  ;;  %v6635_v15 = vadd.f32 %v13931_v8, %v6577_v28  ;;  %v6376_v8 = vadd.f32 %v13879_v55, %v13867_v0  ;;  %v6499_v28 = vadd.f32 %v13962_v20, %v6430_v19  ;;  %v14077_v0 = vld [vmem:[%s14527_s9] ss:$0 sm:$0xff] }
 0x6dc   : > { %7674 = vrot.lane.b32.xlu1 %v15218_v32, %s8689_s28  ;;  %7578 = vrot.lane.b32.xlu0 %v8662_v34, %s8694_s20  ;;  %v6516_v34 = vpop.f32.mrf.mxu3  ;;  %v6445_v23 = vadd.f32 %v6444_v61, %v6372_v25  ;;  %v8667_v25 = vld [vmem:[#allocation3 + $0x31] sm:$0xff] }
 0x6dd   : > { %v14028_v18 = vsub.f32 %v7783_v51, %v14020_v58  ;;  %7958 = vmatmul.f32.vlgmr.msra.gmra.mxu1 %v14020_v58  ;;  %v7617_v54 = vpop.permute.xlu1 %7616  ;;  %v6585_v55 = vadd.f32 %v13965_v13, %v6499_v28  ;;  %v8666_v13 = vld [vmem:[#allocation3 + $0x1c2] sm:$0xff] }
 0x6de   : > { %v7521_v22 = vpop.permute.xlu0 %7520 }
 0x6df   : > { %v7833_v36 = vand.u32 4294901760, %v14028_v18  ;;  %v7719_v51 = vsel %vm380_vm2, %v8663_v59, %v7521_v22  ;;  %v8665_v59 = vld [vmem:[#allocation3 + $0x82] sm:$0xff]  ;;  %v6643_v61 = vadd.f32 %v13976_v56, %v6585_v55 }
 0x6e0   : > { %v7727_v22 = vsel %vm1534_vm5, %v7719_v51, %v7545_v57  ;;  %v6589_v51 = vadd.f32 %v13988_v50, %v6505_v40  ;;  %v6654_v48 = vpop.f32.mrf.mxu1  ;;  %v6425_v50 = vadd.f32 %v13927_v14, %v6356_v46 }
 0x6e1   : > { %v7834_v32 = vsub.f32 %v14028_v18, %v7833_v36  ;;  %v6449_v33 = vpop.f32.mrf.mxu2  ;;  %v7735_v57 = vsel %vm1543_vm6, %v7727_v22, %v13955_v5  ;;  %v6517_v22 = vadd.f32 %v6516_v34, %v6445_v23 }
 0x6e2   : > { %7580 = vrot.lane.b32.xlu2 %v8664_v44, %s8694_s20  ;;  %v6450_v5 = vadd.f32 %v6449_v33, %v6376_v8  ;;  %v14080_v20 = vpop.permute.xlu2 %7666 }
 0x6e3   : > { %7400 = vmatmul.f32.gmra.mxu2 %v13654_v17  ;;  %7462 = vmatmul.f32.gmra.mxu3 %v13720_v47  ;;  %v7835_v26 = vand.u32 4294901760, %v7834_v32  ;;  %v14059_v17 = vld [vmem:[%s14526_s8] ss:$0 sm:$0xff] }
 0x6e4   : > { %7556 = vrot.lane.b32.xlu1 %v8665_v59, %s8685_s24  ;;  %7650 = vrot.lane.b32.xlu0 %v15219_v43, %s8686_s25  ;;  %v6665_v21 = vmul.f32 %v14059_v17, %v6635_v15  ;;  %v6522_v52 = vpop.f32.mrf.mxu3  ;;  %v6493_v15 = vadd.f32 %v13938_v38, %v6425_v50  ;;  %v6667_v33 = vmul.f32 %v14059_v17, %v6643_v61 }
 0x6e5   : > { %7836 = vmatmul.f32.vlgmr.msra.gmra.mxu0 %v7835_v26  ;;  %v7697_v44 = vpop.permute.xlu1 %7696  ;;  %v6647_v26 = vadd.f32 %v14001_v30, %v6589_v51  ;;  %v6597_v38 = vadd.f32 %v6596_v39, %v6517_v22  ;;  %v6380_v50 = vadd.f32 %v13905_v62, %v13894_v3 }
 0x6e6   : > { %v7593_v37 = vpop.permute.xlu0 %7592  ;;  %v6673_v49 = vadd.f32 %v14077_v0, %v6665_v21  ;;  %v6581_v56 = vadd.f32 %v13942_v7, %v6493_v15  ;;  %v6675_v39 = vadd.f32 %v14077_v0, %v6667_v33 }
 0x6e7   : > { %v7743_v32 = vsel %vm1552_vm7, %v7735_v57, %v7593_v37  ;;  %v6668_v59 = vmul.f32 %v14059_v17, %v6647_v26  ;;  %v6368_v37 = vadd.f32 %v13831_v6, %v13818_v10  ;;  %v6655_v28 = vadd.f32 %v6654_v48, %v6597_v38 }
 0x6e8   : > { %v7751_v63 = vsel %vm1561_vm8, %v7743_v32, %v7617_v54  ;;  %v6523_v54 = vadd.f32 %v6522_v52, %v6450_v5  ;;  %v6658_v21 = vpop.f32.mrf.mxu1  ;;  %v7720_v5 = vsel %vm380_vm2, %v8667_v25, %v14003_v27  ;;  %v6683_v27 = vmax.f32 %v6675_v39, 0.0 }
 0x6e9   : > { %v6440_v57 = vadd.f32 %v13994_v42, %v6368_v37  ;;  %v6676_v10 = vadd.f32 %v14077_v0, %v6668_v59  ;;  %v6639_v42 = vadd.f32 %v13953_v4, %v6581_v56  ;;  %v6454_v23 = vpop.f32.mrf.mxu2 }
 0x6ea   : > { %7652 = vrot.lane.b32.xlu2 %v13561_v41, %s8686_s25  ;;  %v6600_v41 = vpop.f32.mrf.mxu0  ;;  %v14112_v7 = vpop.permute.xlu2 %7548  ;;  %v6455_v26 = vadd.f32 %v6454_v23, %v6380_v50 }
 0x6eb   : > { %7404 = vmatmul.f32.gmra.mxu2 %v13720_v47  ;;  %7466 = vmatmul.f32.gmra.mxu3 %v13780_v35  ;;  %v7759_v47 = vsel %vm1570_vm9, %v7751_v63, %v13983_v1  ;;  %v6601_v43 = vadd.f32 %v6600_v41, %v6523_v54  ;;  %v7517_v1 = vld [vmem:[#allocation3 + $0x92] sm:$0xff]  ;;  %v6511_v46 = vadd.f32 %v14010_v11, %v6440_v57 }
 0x6ec   : > { %7628 = vrot.lane.b32.xlu1 %v8666_v13, %s8692_s18  ;;  %7532 = vrot.lane.b32.xlu0 %v13572_v53, %s8684_s21  ;;  %v6681_v53 = vmax.f32 %v6673_v49, 0.0  ;;  %v6666_v48 = vmul.f32 %v14059_v17, %v6639_v42  ;;  %v6670_v49 = vmul.f32 %v14059_v17, %v6655_v28  ;;  %v8668_v42 = vld [vmem:[#allocation3 + $0x41] sm:$0xff] }
 0x6ed   : > { %v7571_v14 = vpop.permute.xlu1 %7570  ;;  %v6659_v6 = vadd.f32 %v6658_v21, %v6601_v43  ;;  %v6593_v11 = vadd.f32 %v14013_v12, %v6511_v46 }
 0x6ee   : > { %v7665_v19 = vpop.permute.xlu0 %7664  ;;  %v6674_v13 = vadd.f32 %v14077_v0, %v6666_v48 }
 0x6ef   : > { %v7767_v30 = vsel %vm1579_vm11, %v7759_v47, %v7665_v19  ;;  %v6671_v55 = vmul.f32 %v14059_v17, %v6659_v6  ;;  %v6651_v41 = vadd.f32 %v14032_v9, %v6593_v11  ;;  %v6528_v47 = vpop.f32.mrf.mxu3 }
 0x6f0   : > { %v7775_v40 = vsel %vm1588_vm10, %v7767_v30, %v7697_v44  ;;  %v6529_v15 = vadd.f32 %v6528_v47, %v6455_v26 }
 0x6f1   : > { %v7786_v8 = vsel %vm1606_vm12, %v7775_v40, 0  ;;  %v6679_v3 = vadd.f32 %v14077_v0, %v6671_v55  ;;  %v6669_v30 = vmul.f32 %v14059_v17, %v6651_v41  ;;  %v6682_v40 = vmax.f32 %v6674_v13, 0.0  ;;  %v8669_v41 = vld [vmem:[#allocation3 + $0x51] sm:$0xff] }
 0x6f2   : > { %v14105_v34 = vand.u32 4294901760, %v7786_v8  ;;  %8305 = vrot.lane.b32.xlu2 %v6681_v53, %s8684_s21  ;;  %v7621_v61 = vpop.permute.xlu2 %7620  ;;  %v6604_v19 = vpop.f32.mrf.mxu0 }
 0x6f3   : > { %7408 = vmatmul.f32.gmra.mxu2 %v13780_v35  ;;  %7470 = vmatmul.f32.gmra.mxu3 %v13833_v60  ;;  %v6687_v22 = vmax.f32 %v6679_v3, 0.0  ;;  %v6605_v59 = vadd.f32 %v6604_v19, %v6529_v15  ;;  %v6677_v37 = vadd.f32 %v14077_v0, %v6669_v30 }
 0x6f4   : > { %v14115_v44 = vsub.f32 %v7786_v8, %v14105_v34  ;;  %7708 = vrot.lane.b32.xlu1 %v7517_v1, %s8688_s27  ;;  %7604 = vrot.lane.b32.xlu0 %v13602_v16, %s8693_s19  ;;  %v6684_v16 = vmax.f32 %v6676_v10, 0.0  ;;  %s14425_s19 = scalar_lea.vmem %s14528_s10, %s8529_s17 }
 0x6f5   : > { %7962 = vmatmul.f32.gmra.mxu1 %v14105_v34  ;;  %v7643_v35 = vpop.permute.xlu1 %7642  ;;  %v6685_v10 = vmax.f32 %v6677_v37, 0.0 }
 0x6f6   : > { %v7547_v51 = vpop.permute.xlu0 %7546  ;;  %v7841_v32 = vand.u32 4294901760, %v14115_v44 }
 0x6f7   : > { %v7728_v63 = vsel %vm1534_vm5, %v7720_v5, %v7547_v51  ;;  %v14182_v23 = vpop.f32.mrf.mxu3 }
 0x6f8   : > { %v7842_v4 = vsub.f32 %v14115_v44, %v7841_v32  ;;  %v7736_v62 = vsel %vm1543_vm6, %v7728_v63, %v7571_v14 }
 0x6f9   : > { %v7744_v14 = vsel %vm1552_vm7, %v7736_v62, %v14038_v29  ;;  %v6662_v29 = vpop.f32.mrf.mxu1 }
 0x6fa   : > { %8311 = vrot.lane.b32.xlu2 %v6684_v16, %s8684_s21  ;;  %v7843_v52 = vand.u32 4294901760, %v7842_v4  ;;  %v6663_v56 = vadd.f32 %v6662_v29, %v6605_v59  ;;  %v7701_v38 = vpop.permute.xlu2 %7700 }
 0x6fb   : > { %7412 = vmatmul.f32.gmra.mxu2 %v13833_v60  ;;  %7474 = vmatmul.f32.gmra.mxu3 %v13876_v31  ;;  %v6678_v60 = vadd.f32 %v14077_v0, %v6670_v49 }
 0x6fc   : > { %7676 = vrot.lane.b32.xlu0 %v13626_v45, %s8689_s28  ;;  %8309 = vrot.lane.b32.xlu1 %v6683_v27, %s8684_s21  ;;  %v6672_v21 = vmul.f32 %v14059_v17, %v6663_v56 }
 0x6fd   : > { %7844 = vmatmul.f32.gmra.mxu0 %v7843_v52  ;;  %v7525_v12 = vpop.permute.xlu1 %7524  ;;  %v6686_v43 = vmax.f32 %v6678_v60, 0.0  ;;  %v14193_v52 = vpop.f32.mrf.mxu2 }
 0x6fe   : > { %v7619_v54 = vpop.permute.xlu0 %7618  ;;  %v6680_v28 = vadd.f32 %v14077_v0, %v6672_v21 }
 0x6ff   : > { %v7752_v45 = vsel %vm1561_vm8, %v7744_v14, %v7619_v54 }
 0x700   : > { %v7760_v9 = vsel %vm1570_vm9, %v7752_v45, %v7643_v35  ;;  %v6688_v16 = vmax.f32 %v6680_v28, 0.0 }
 0x701   : > { %v7768_v8 = vsel %vm1579_vm11, %v7760_v9, %v14080_v20  ;;  %v7721_v20 = vsel %vm380_vm2, %v8668_v42, %v7525_v12  ;;  %v14197_v12 = vpop.f32.mrf.mxu3 }
 0x702   : > { %8317 = vrot.lane.b32.xlu2 %v6687_v22, %s8684_s21  ;;  %v7729_v46 = vsel %vm1534_vm5, %v7721_v20, %v14112_v7  ;;  %v7575_v55 = vpop.permute.xlu2 %7574 }
 0x703   : > { %7416 = vmatmul.f32.gmra.mxu2 %v13876_v31  ;;  %7478 = vmatmul.f32.gmra.mxu3 %v13923_v24 }
 0x704   : > { %8315 = vrot.lane.b32.xlu1 %v6686_v43, %s8684_s21  ;;  %8307 = vrot.lane.b32.xlu0 %v6682_v40, %s8684_s21 }
 0x705   : > { %v7597_v53 = vpop.permute.xlu1 %7596  ;;  %v14202_v54 = vpop.f32.mrf.mxu2 }
 0x706   : > { %v7699_v1 = vpop.permute.xlu0 %7698 }
 0x707   : > { %v7776_v33 = vsel %vm1588_vm10, %v7768_v8, %v7699_v1 }
 0x708   : > { %v7789_v31 = vsel %vm1606_vm12, %v7776_v33, 0 }
 0x709   : > { %v14163_v57 = vand.u32 4294901760, %v7789_v31  ;;  %v14204_v15 = vpop.f32.mrf.mxu3 }
 0x70b   : > { %v7848_v6 = vsub.f32 %v7789_v31, %v14163_v57  ;;  %7420 = vmatmul.f32.gmra.mxu2 %v13923_v24  ;;  %7482 = vmatmul.f32.gmra.mxu3 %v13973_v2 }
 0x70c   : > { %7966 = vmatmul.f32.gmra.mxu1 %v14163_v57  ;;  %8313 = vrot.lane.b32.xlu0 %v6685_v10, %s8684_s21 }
 0x70d   : > { %v7669_v35 = vpop.permute.xlu1 %7668  ;;  %v7849_v39 = vand.u32 4294901760, %v7848_v6  ;;  %v14209_v59 = vpop.f32.mrf.mxu2 }
 0x70e   : > { %v7573_v51 = vpop.permute.xlu0 %7572 }
 0x70f   : > { %v7850_v25 = vsub.f32 %v7848_v6, %v7849_v39  ;;  %v7737_v24 = vsel %vm1543_vm6, %v7729_v46, %v7573_v51 }
 0x710   : > { %v7745_v4 = vsel %vm1552_vm7, %v7737_v24, %v7597_v53 }
 0x711   : > { %v7851_v5 = vand.u32 4294901760, %v7850_v25  ;;  %v7753_v48 = vsel %vm1561_vm8, %v7745_v4, %v7621_v61  ;;  %v14212_v9 = vpop.f32.mrf.mxu3 }
 0x713   : > { %7424 = vmatmul.f32.gmra.mxu2 %v13973_v2  ;;  %7852 = vmatmul.f32.gmra.mxu0 %v7851_v5 }
 0x714   : > { %8093 = vmatmul.f32.vlgmr.msrb.gmra.mxu3 %v7833_v36  ;;  %8319 = vrot.lane.b32.xlu0 %v6688_v16, %s8684_s21  ;;  %v7647_v36 = vpop.permute.xlu2 %7646 }
 0x715   : > { %v7551_v50 = vpop.permute.xlu1 %7550 }
 0x716   : > { %v7645_v7 = vpop.permute.xlu0 %7644 }
 0x717   : > { %v7761_v63 = vsel %vm1570_vm9, %v7753_v48, %v7645_v7 }
 0x718   : > { %v7769_v11 = vsel %vm1579_vm11, %v7761_v63, %v7669_v35 }
 0x719   : > { %v7777_v49 = vsel %vm1588_vm10, %v7769_v11, %v7701_v38  ;;  %v14221_v38 = vpop.f32.mrf.mxu2  ;;  %v14223_v10 = vpop.f32.mrf.mxu3 }
 0x71a   : > { %v7792_v2 = vsel %vm1606_vm12, %v7777_v49, 0 }
 0x71b   : > { %8026 = vmatmul.f32.vlgmr.msrb.gmra.mxu2 %v14028_v18  ;;  %v14189_v27 = vand.u32 4294901760, %v7792_v2 }
 0x71c   : > { %8099 = vmatmul.f32.gmra.mxu3 %v7841_v32  ;;  %v7529_v19 = vpop.permute.xlu2 %7528 }
 0x71d   : > { %7970 = vmatmul.f32.gmra.mxu1 %v14189_v27  ;;  %v7623_v26 = vpop.permute.xlu1 %7622  ;;  %v7856_v3 = vsub.f32 %v7792_v2, %v14189_v27 }
 0x71e   : > { %v7527_v62 = vpop.permute.xlu0 %7526 }
 0x71f   : > { %v7857_v13 = vand.u32 4294901760, %v7856_v3  ;;  %v7722_v18 = vsel %vm380_vm2, %v8669_v41, %v7527_v62  ;;  %v8671_v62 = vld [vmem:[#allocation3 + $0x71] sm:$0xff] }
 0x720   : > { %v7730_v32 = vsel %vm1534_vm5, %v7722_v18, %v7551_v50 }
 0x721   : > { %v7858_v60 = vsub.f32 %v7856_v3, %v7857_v13  ;;  %v7738_v45 = vsel %vm1543_vm6, %v7730_v32, %v7575_v55  ;;  %v14228_v25 = vpop.f32.mrf.mxu2 }
 0x723   : > { %8031 = vmatmul.f32.gmra.mxu2 %v14115_v44  ;;  %v7859_v61 = vand.u32 4294901760, %v7858_v60 }
 0x724   : > { %8105 = vmatmul.f32.gmra.mxu3 %v7849_v39  ;;  %v7601_v53 = vpop.permute.xlu2 %7600 }
 0x725   : > { %7860 = vmatmul.f32.gmra.mxu0 %v7859_v61  ;;  %v7703_v47 = vpop.permute.xlu1 %7702 }
 0x726   : > { %v7599_v14 = vpop.permute.xlu0 %7598 }
 0x727   : > { %v7746_v22 = vsel %vm1552_vm7, %v7738_v45, %v7599_v14  ;;  %v14230_v5 = vpop.f32.mrf.mxu3 }
 0x728   : > { %v7754_v30 = vsel %vm1561_vm8, %v7746_v22, %v7623_v26 }
 0x729   : > { %v7762_v43 = vsel %vm1570_vm9, %v7754_v30, %v7647_v36  ;;  %v7240_v30 = vpop.f32.mrf.mxu0 }
 0x72b   : > { %8036 = vmatmul.f32.gmra.mxu2 %v7848_v6  ;;  %v8670_v6 = vld [vmem:[#allocation3 + $0x61] sm:$0xff] }
 0x72c   : > { %8111 = vmatmul.f32.gmra.mxu3 %v7857_v13  ;;  %v7723_v42 = vsel %vm380_vm2, %v8670_v6, %v7529_v19  ;;  %v7673_v39 = vpop.permute.xlu2 %7672 }
 0x72d   : > { %v7577_v44 = vpop.permute.xlu1 %7576 }
 0x72e   : > { %v7671_v40 = vpop.permute.xlu0 %7670 }
 0x72f   : > { %v7770_v29 = vsel %vm1579_vm11, %v7762_v43, %v7671_v40  ;;  %v14235_v48 = vpop.f32.mrf.mxu2 }
 0x730   : > { %v7778_v37 = vsel %vm1588_vm10, %v7770_v29, %v7703_v47 }
 0x731   : > { %v7795_v56 = vsel %vm1606_vm12, %v7778_v37, 0 }
 0x732   : > { %v14217_v8 = vand.u32 4294901760, %v7795_v56 }
 0x733   : > { %8041 = vmatmul.f32.gmra.mxu2 %v7856_v3 }
 0x734   : > { %v7864_v1 = vsub.f32 %v7795_v56, %v14217_v8  ;;  %7974 = vmatmul.f32.gmra.mxu1 %v14217_v8  ;;  %v7555_v50 = vpop.permute.xlu2 %7554  ;;  %v7173_v56 = vadd.f32 %v14182_v23, %v14193_v52 }
 0x735   : > { %v7649_v33 = vpop.permute.xlu1 %7648 }
 0x736   : > { %v7553_v31 = vpop.permute.xlu0 %7552  ;;  %v7865_v21 = vand.u32 4294901760, %v7864_v1  ;;  %v7241_v6 = vadd.f32 %v7240_v30, %v7173_v56  ;;  %v7185_v56 = vadd.f32 %v14212_v9, %v14221_v38 }
 0x737   : > { %v7731_v35 = vsel %vm1534_vm5, %v7723_v42, %v7553_v31  ;;  %v7307_v31 = vpop.f32.mrf.mxu1 }
 0x738   : > { %8117 = vmatmul.f32.gmra.mxu3 %v7865_v21  ;;  %v7866_v20 = vsub.f32 %v7864_v1, %v7865_v21  ;;  %v7739_v51 = vsel %vm1543_vm6, %v7731_v35, %v7577_v44  ;;  %v14238_v11 = vpop.f32.mrf.mxu3 }
 0x739   : > { %v7747_v55 = vsel %vm1552_vm7, %v7739_v51, %v7601_v53 }
 0x73a   : > { %v7867_v28 = vand.u32 4294901760, %v7866_v20 }
 0x73b   : > { %8046 = vmatmul.f32.gmra.mxu2 %v7864_v1 }
 0x73c   : > { %7868 = vmatmul.f32.gmra.mxu0 %v7867_v28  ;;  %v7627_v18 = vpop.permute.xlu2 %7626 }
 0x73d   : > { %v7531_v46 = vpop.permute.xlu1 %7530 }
 0x73e   : > { %v7625_v24 = vpop.permute.xlu0 %7624  ;;  %v7724_v13 = vsel %vm380_vm2, %v8671_v62, %v7531_v46  ;;  %v7308_v46 = vadd.f32 %v7307_v31, %v7241_v6 }
 0x73f   : > { %v7755_v16 = vsel %vm1561_vm8, %v7747_v55, %v7625_v24  ;;  %v7732_v32 = vsel %vm1534_vm5, %v7724_v13, %v7555_v50  ;;  %v7177_v55 = vadd.f32 %v14197_v12, %v14202_v54  ;;  %v7181_v12 = vadd.f32 %v14204_v15, %v14209_v59 }
 0x740   : > { %v7763_v4 = vsel %vm1570_vm9, %v7755_v16, %v7649_v33  ;;  %v14247_v61 = vpop.f32.mrf.mxu2 }
 0x741   : > { %v7771_v7 = vsel %vm1579_vm11, %v7763_v4, %v7673_v39  ;;  %v7245_v39 = vpop.f32.mrf.mxu0  ;;  %v8672_v4 = vld [vmem:[#allocation3 + $0x81] sm:$0xff] }
 0x744   : > { %v7707_v1 = vpop.permute.xlu2 %7706 }
 0x746   : > { %v7705_v63 = vpop.permute.xlu0 %7704  ;;  %v7603_v49 = vpop.permute.xlu1 %7602 }
 0x747   : > { %v7779_v2 = vsel %vm1588_vm10, %v7771_v7, %v7705_v63  ;;  %v7246_v63 = vadd.f32 %v7245_v39, %v7177_v55 }
 0x748   : > { %v7798_v36 = vsel %vm1606_vm12, %v7779_v2, 0  ;;  %v7313_v2 = vpop.f32.mrf.mxu1 }
 0x749   : > { %v14242_v26 = vand.u32 4294901760, %v7798_v36  ;;  %v7250_v54 = vpop.f32.mrf.mxu0 }
 0x74b   : > { %v7872_v3 = vsub.f32 %v7798_v36, %v14242_v26  ;;  %7978 = vmatmul.f32.gmra.mxu1 %v14242_v26 }
 0x74c   : > { %v7581_v36 = vpop.permute.xlu2 %7580 }
 0x74d   : > { %8051 = vmatmul.f32.gmra.mxu2 %v7872_v3  ;;  %v7873_v41 = vand.u32 4294901760, %v7872_v3 }
 0x74e   : > { %v7579_v60 = vpop.permute.xlu0 %7578  ;;  %v14250_v47 = vpop.f32.mrf.mxu3 }
 0x74f   : > { %8123 = vmatmul.f32.gmra.mxu3 %v7873_v41  ;;  %v7874_v19 = vsub.f32 %v7872_v3, %v7873_v41  ;;  %v7740_v14 = vsel %vm1543_vm6, %v7732_v32, %v7579_v60  ;;  %v7675_v45 = vpop.permute.xlu1 %7674  ;;  %v7314_v32 = vadd.f32 %v7313_v2, %v7246_v63 }
 0x750   : > { %v7748_v44 = vsel %vm1552_vm7, %v7740_v14, %v7603_v49  ;;  %v7319_v59 = vpop.f32.mrf.mxu1 }
 0x751   : > { %v7875_v22 = vand.u32 4294901760, %v7874_v19  ;;  %v7756_v43 = vsel %vm1561_vm8, %v7748_v44, %v7627_v18 }
 0x753   : > { %7876 = vmatmul.f32.gmra.mxu0 %v7875_v22 }
 0x756   : > { %v7651_v40 = vpop.permute.xlu0 %7650  ;;  %v14256_v53 = vpop.f32.mrf.mxu2 }
 0x757   : > { %v7764_v29 = vsel %vm1570_vm9, %v7756_v43, %v7651_v40  ;;  %v7455_v37 = vpop.f32.mrf.mxu3  ;;  %v7557_v20 = vpop.permute.xlu1 %7556  ;;  %v7251_v43 = vadd.f32 %v7250_v54, %v7181_v12 }
 0x758   : > { %v7772_v33 = vsel %vm1579_vm11, %v7764_v29, %v7675_v45 }
 0x759   : > { %v7780_v21 = vsel %vm1588_vm10, %v7772_v33, %v7707_v1 }
 0x75a   : > { %v7801_v42 = vsel %vm1606_vm12, %v7780_v21, 0  ;;  %v7320_v21 = vadd.f32 %v7319_v59, %v7251_v43 }
 0x75b   : > { %v14263_v35 = vand.u32 4294901760, %v7801_v42 }
 0x75d   : > { %7982 = vmatmul.f32.gmra.mxu1 %v14263_v35  ;;  %v7880_v28 = vsub.f32 %v7801_v42, %v14263_v35 }
 0x75e   : > { %v7533_v51 = vpop.permute.xlu0 %7532  ;;  %v7397_v23 = vpop.f32.mrf.mxu2 }
 0x75f   : > { %v7459_v52 = vpop.f32.mrf.mxu3  ;;  %8056 = vmatmul.f32.gmra.mxu2 %v7880_v28  ;;  %v7881_v24 = vand.u32 4294901760, %v7880_v28  ;;  %v7398_v16 = vadd.f32 %v7397_v23, %v7308_v46  ;;  %v7725_v50 = vsel %vm380_vm2, %v8672_v4, %v7533_v51  ;;  %v7629_v41 = vpop.permute.xlu1 %7628 }
 0x760   : > { %v7733_v62 = vsel %vm1534_vm5, %v7725_v50, %v7557_v20  ;;  %v7255_v46 = vpop.f32.mrf.mxu0  ;;  %v7325_v4 = vpop.f32.mrf.mxu1  ;;  %v7189_v50 = vadd.f32 %v14223_v10, %v14228_v25  ;;  %v7193_v25 = vadd.f32 %v14230_v5, %v14235_v48  ;;  %v7197_v5 = vadd.f32 %v14238_v11, %v14247_v61 }
 0x761   : > { %8129 = vmatmul.f32.gmra.mxu3 %v7881_v24  ;;  %v7882_v7 = vsub.f32 %v7880_v28, %v7881_v24  ;;  %v7456_v49 = vadd.f32 %v7455_v37, %v7398_v16  ;;  %v7741_v19 = vsel %vm1543_vm6, %v7733_v62, %v7581_v36  ;;  %v7653_v37 = vpop.permute.xlu2 %7652  ;;  %v7256_v24 = vadd.f32 %v7255_v46, %v7185_v56 }
 0x762   : > { %v7201_v11 = vadd.f32 %v14250_v47, %v14256_v53 }
 0x763   : > { %v7883_v3 = vand.u32 4294901760, %v7882_v7  ;;  %v7486_v13 = vmul.f32 %v14059_v17, %v7456_v49  ;;  %v7326_v63 = vadd.f32 %v7325_v4, %v7256_v24 }
 0x765   : > { %7884 = vmatmul.f32.gmra.mxu0 %v7883_v3  ;;  %v7494_v18 = vadd.f32 %v14077_v0, %v7486_v13 }
 0x766   : > { %v7605_v60 = vpop.permute.xlu0 %7604  ;;  %v7401_v14 = vpop.f32.mrf.mxu2 }
 0x767   : > { %v7463_v45 = vpop.f32.mrf.mxu3  ;;  %v7502_v22 = vmax.f32 %v7494_v18, 0.0  ;;  %v7749_v30 = vsel %vm1552_vm7, %v7741_v19, %v7605_v60  ;;  %v7402_v44 = vadd.f32 %v7401_v14, %v7314_v32  ;;  %v7709_v6 = vpop.permute.xlu1 %7708 }
 0x768   : > { %v7757_v29 = vsel %vm1561_vm8, %v7749_v30, %v7629_v41  ;;  %v7260_v13 = vpop.f32.mrf.mxu0  ;;  %v7331_v10 = vpop.f32.mrf.mxu1 }
 0x769   : > { %v7460_v40 = vadd.f32 %v7459_v52, %v7402_v44  ;;  %8337 = vrot.lane.b32.xlu1 %v7502_v22, %s8685_s24  ;;  %v7765_v33 = vsel %vm1570_vm9, %v7757_v29, %v7653_v37  ;;  %v7261_v41 = vadd.f32 %v7260_v13, %v7189_v50 }
 0x76b   : > { %v7487_v15 = vmul.f32 %v14059_v17, %v7460_v40  ;;  %v7332_v19 = vadd.f32 %v7331_v10, %v7261_v41 }
 0x76d   : > { %v7495_v1 = vadd.f32 %v14077_v0, %v7487_v15 }
 0x76e   : > { %v7677_v31 = vpop.permute.xlu0 %7676  ;;  %v7405_v20 = vpop.f32.mrf.mxu2 }
 0x76f   : > { %v7773_v42 = vsel %vm1579_vm11, %v7765_v33, %v7677_v31  ;;  %v7503_v39 = vmax.f32 %v7495_v1, 0.0  ;;  %v7406_v51 = vadd.f32 %v7405_v20, %v7320_v21  ;;  %v7467_v52 = vpop.f32.mrf.mxu3 }
 0x770   : > { %v7781_v28 = vsel %vm1588_vm10, %v7773_v42, %v7709_v6  ;;  %v7265_v30 = vpop.f32.mrf.mxu0  ;;  %v7337_v29 = vpop.f32.mrf.mxu1 }
 0x771   : > { %v7804_v23 = vsel %vm1606_vm12, %v7781_v28, 0  ;;  %v7464_v38 = vadd.f32 %v7463_v45, %v7406_v51  ;;  %8339 = vrot.lane.b32.xlu2 %v7503_v39, %s8685_s24  ;;  %v7266_v44 = vadd.f32 %v7265_v30, %v7193_v25 }
 0x772   : > { %v14287_v9 = vand.u32 4294901760, %v7804_v23 }
 0x773   : > { %v7488_v55 = vmul.f32 %v14059_v17, %v7464_v38  ;;  %v7338_v59 = vadd.f32 %v7337_v29, %v7266_v44 }
 0x774   : > { %7986 = vmatmul.f32.gmra.mxu1 %v14287_v9  ;;  %v7888_v16 = vsub.f32 %v7804_v23, %v14287_v9 }
 0x775   : > { %v7496_v7 = vadd.f32 %v14077_v0, %v7488_v55 }
 0x776   : > { %8061 = vmatmul.f32.gmra.mxu2 %v7888_v16  ;;  %v7889_v49 = vand.u32 4294901760, %v7888_v16  ;;  %v7409_v2 = vpop.f32.mrf.mxu2 }
 0x777   : > { %v7504_v36 = vmax.f32 %v7496_v7, 0.0  ;;  %v7410_v3 = vadd.f32 %v7409_v2, %v7326_v63  ;;  %v7471_v18 = vpop.f32.mrf.mxu3 }
 0x778   : > { %8135 = vmatmul.f32.gmra.mxu3 %v7889_v49  ;;  %v7890_v62 = vsub.f32 %v7888_v16, %v7889_v49  ;;  %v7270_v33 = vpop.f32.mrf.mxu0  ;;  %v7343_v6 = vpop.f32.mrf.mxu1 }
 0x779   : > { %v7468_v12 = vadd.f32 %v7467_v52, %v7410_v3  ;;  %8341 = vrot.lane.b32.xlu0 %v7504_v36, %s8685_s24  ;;  %v7271_v31 = vadd.f32 %v7270_v33, %v7197_v5 }
 0x77a   : > { %v7891_v54 = vand.u32 4294901760, %v7890_v62 }
 0x77b   : > { %v7489_v60 = vmul.f32 %v14059_v17, %v7468_v12  ;;  %v7344_v42 = vadd.f32 %v7343_v6, %v7271_v31 }
 0x77c   : > { %7892 = vmatmul.f32.gmra.mxu0 %v7891_v54  ;;  %8241 = vmatmul.f32.vlgmr.msrb.gmra.mxu1 %v14020_v58 }
 0x77d   : > { %v7497_v32 = vadd.f32 %v14077_v0, %v7489_v60 }
 0x77e   : > { %v7413_v14 = vpop.f32.mrf.mxu2 }
 0x77f   : > { %v7505_v45 = vmax.f32 %v7497_v32, 0.0  ;;  %v7414_v22 = vadd.f32 %v7413_v14, %v7332_v19  ;;  %v7475_v15 = vpop.f32.mrf.mxu3 }
 0x780   : > { %v7275_v46 = vpop.f32.mrf.mxu0  ;;  %v7349_v24 = vpop.f32.mrf.mxu1 }
 0x781   : > { %v7472_v43 = vadd.f32 %v7471_v18, %v7414_v22  ;;  %8343 = vrot.lane.b32.xlu1 %v7505_v45, %s8685_s24  ;;  %v7276_v23 = vadd.f32 %v7275_v46, %v7201_v11 }
 0x783   : > { %v7490_v40 = vmul.f32 %v14059_v17, %v7472_v43  ;;  %v7350_v53 = vadd.f32 %v7349_v24, %v7276_v23 }
 0x784   : > { %8183 = vmatmul.f32.vlgmr.msrb.gmra.mxu0 %v14020_v58  ;;  %8245 = vmatmul.f32.gmra.mxu1 %v14105_v34 }
 0x785   : > { %v7498_v48 = vadd.f32 %v14077_v0, %v7490_v40 }
 0x786   : > { %v7417_v37 = vpop.f32.mrf.mxu2 }
 0x787   : > { %v7506_v56 = vmax.f32 %v7498_v48, 0.0  ;;  %v7418_v1 = vadd.f32 %v7417_v37, %v7338_v59  ;;  %v7479_v20 = vpop.f32.mrf.mxu3 }
 0x788   : > { %v7837_v49 = vpop.f32.mrf.mxu0 }
 0x789   : > { %v7476_v21 = vadd.f32 %v7475_v15, %v7418_v1  ;;  %8345 = vrot.lane.b32.xlu2 %v7506_v56, %s8685_s24 }
 0x78b   : > { %v7491_v58 = vmul.f32 %v14059_v17, %v7476_v21 }
 0x78c   : > { %8187 = vmatmul.f32.gmra.mxu0 %v14105_v34  ;;  %8249 = vmatmul.f32.gmra.mxu1 %v14163_v57 }
 0x78d   : > { %v7499_v61 = vadd.f32 %v14077_v0, %v7491_v58 }
 0x78e   : > { %v7421_v39 = vpop.f32.mrf.mxu2 }
 0x78f   : > { %v7507_v28 = vmax.f32 %v7499_v61, 0.0  ;;  %v7422_v51 = vadd.f32 %v7421_v39, %v7344_v42  ;;  %v7483_v4 = vpop.f32.mrf.mxu3 }
 0x790   : > { %v7845_v36 = vpop.f32.mrf.mxu0 }
 0x791   : > { %v7480_v52 = vadd.f32 %v7479_v20, %v7422_v51  ;;  %8347 = vrot.lane.b32.xlu0 %v7507_v28, %s8685_s24 }
 0x793   : > { %v7492_v34 = vmul.f32 %v14059_v17, %v7480_v52 }
 0x794   : > { %8191 = vmatmul.f32.gmra.mxu0 %v14163_v57  ;;  %8253 = vmatmul.f32.gmra.mxu1 %v14189_v27 }
 0x795   : > { %v7500_v47 = vadd.f32 %v14077_v0, %v7492_v34 }
 0x796   : > { %v7425_v38 = vpop.f32.mrf.mxu2 }
 0x797   : > { %v7508_v55 = vmax.f32 %v7500_v47, 0.0  ;;  %v7426_v16 = vadd.f32 %v7425_v38, %v7350_v53  ;;  %v8094_v25 = vpop.f32.mrf.mxu3 }
 0x798   : > { %v7853_v62 = vpop.f32.mrf.mxu0 }
 0x799   : > { %v7484_v50 = vadd.f32 %v7483_v4, %v7426_v16  ;;  %8349 = vrot.lane.b32.xlu1 %v7508_v55, %s8685_s24 }
 0x79b   : > { %v7493_v7 = vmul.f32 %v14059_v17, %v7484_v50 }
 0x79c   : > { %8195 = vmatmul.f32.gmra.mxu0 %v14189_v27  ;;  %8257 = vmatmul.f32.gmra.mxu1 %v14217_v8  ;;  %v7959_v27 = vpop.f32.mrf.mxu1 }
 0x79d   : > { %v7501_v57 = vadd.f32 %v14077_v0, %v7493_v7  ;;  %v7960_v32 = vadd.f32 %v7959_v27, %v7837_v49 }
 0x79e   : > { %v8027_v60 = vpop.f32.mrf.mxu2 }
 0x79f   : > { %v7509_v63 = vmax.f32 %v7501_v57, 0.0  ;;  %v8028_v45 = vadd.f32 %v8027_v60, %v7960_v32  ;;  %v8100_v29 = vpop.f32.mrf.mxu3 }
 0x7a1   : > { %8351 = vrot.lane.b32.xlu2 %v7509_v63, %s8685_s24  ;;  %v8095_v22 = vadd.f32 %v8094_v25, %v8028_v45 }
 0x7a4   : > { %8199 = vmatmul.f32.gmra.mxu0 %v14217_v8  ;;  %8261 = vmatmul.f32.gmra.mxu1 %v14242_v26  ;;  %v7963_v2 = vpop.f32.mrf.mxu1  ;;  %v7861_v8 = vpop.f32.mrf.mxu0 }
 0x7a5   : > { %v7964_v44 = vadd.f32 %v7963_v2, %v7845_v36 }
 0x7a6   : > { %v8032_v14 = vpop.f32.mrf.mxu2 }
 0x7a7   : > { %v8033_v15 = vadd.f32 %v8032_v14, %v7964_v44  ;;  %v8106_v61 = vpop.f32.mrf.mxu3 }
 0x7a9   : > { %v8101_v56 = vadd.f32 %v8100_v29, %v8033_v15 }
 0x7ac   : > { %8203 = vmatmul.f32.gmra.mxu0 %v14242_v26  ;;  %8265 = vmatmul.f32.gmra.mxu1 %v14263_v35  ;;  %v7967_v3 = vpop.f32.mrf.mxu1 }
 0x7ad   : > { %v7968_v33 = vadd.f32 %v7967_v3, %v7853_v62 }
 0x7ae   : > { %v8037_v48 = vpop.f32.mrf.mxu2 }
 0x7af   : > { %v8038_v6 = vadd.f32 %v8037_v48, %v7968_v33  ;;  %v8112_v38 = vpop.f32.mrf.mxu3 }
 0x7b1   : > { %v8107_v28 = vadd.f32 %v8106_v61, %v8038_v6 }
 0x7b4   : > { %8207 = vmatmul.f32.gmra.mxu0 %v14263_v35  ;;  %8269 = vmatmul.f32.gmra.mxu1 %v14287_v9  ;;  %v7971_v13 = vpop.f32.mrf.mxu1 }
 0x7b5   : > { %v7972_v46 = vadd.f32 %v7971_v13, %v7861_v8 }
 0x7b6   : > { %v8042_v20 = vpop.f32.mrf.mxu2 }
 0x7b7   : > { %v8043_v24 = vadd.f32 %v8042_v20, %v7972_v46  ;;  %v14370_v46 = vld [vmem:[%s14526_s8] ss:$0 sm:$0xff] }
 0x7b9   : > { %v7869_v12 = vpop.f32.mrf.mxu0  ;;  %v8113_v16 = vadd.f32 %v8112_v38, %v8043_v24  ;;  %v15220_v38 = vld [vmem:[#allocation56_spill] sm:$0xff] }
 0x7bb   : > { %v8118_v3 = vpop.f32.mrf.mxu3 }
 0x7bc   : > { %8211 = vmatmul.f32.gmra.mxu0 %v14287_v9  ;;  %v7975_v41 = vpop.f32.mrf.mxu1 }
 0x7bd   : > { %v7976_v7 = vadd.f32 %v7975_v41, %v7869_v12 }
 0x7be   : > { %v8047_v4 = vpop.f32.mrf.mxu2 }
 0x7bf   : > { %v8048_v27 = vadd.f32 %v8047_v4, %v7976_v7  ;;  %v8310_v4 = vpop.permute.xlu1 %8309  ;;  %v15222_v7 = vld [vmem:[#allocation8_spill] sm:$0xff] }
 0x7c1   : > { %v8119_v8 = vadd.f32 %v8118_v3, %v8048_v27  ;;  %v15224_v27 = vld [vmem:[#allocation34_spill] sm:$0xff]  ;;  %v15226_v3 = vld [vmem:[#allocation32_spill] sm:$0xff] }
 0x7c8   : > { %v7979_v54 = vpop.f32.mrf.mxu1 }
 0x7d0   : > { %v7877_v26 = vpop.f32.mrf.mxu0 }
 0x7d1   : > { %v7980_v62 = vadd.f32 %v7979_v54, %v7877_v26 }
 0x7d2   : > { %v8124_v45 = vpop.f32.mrf.mxu3 }
 0x7da   : > { %v14334_v18 = vpop.f32.mrf.mxu1 }
 0x7e2   : > { %v14336_v35 = vpop.f32.mrf.mxu0 }
 0x7e3   : > { %v7984_v44 = vadd.f32 %v14334_v18, %v14336_v35 }
 0x7f1   : > { %v14338_v10 = vpop.f32.mrf.mxu1 }
 0x7f9   : > { %v14340_v9 = vpop.f32.mrf.mxu0  ;;  %v8242_v19 = vpop.f32.mrf.mxu1 }
 0x801   : > { %v8184_v30 = vpop.f32.mrf.mxu0  ;;  %v8246_v40 = vpop.f32.mrf.mxu1 }
 0x802   : > { %v8185_v43 = vadd.f32 %v8184_v30, %v8095_v22 }
 0x804   : > { %v8243_v5 = vadd.f32 %v8242_v19, %v8185_v43  ;;  %v8052_v19 = vpop.f32.mrf.mxu2 }
 0x805   : > { %v8053_v14 = vadd.f32 %v8052_v19, %v7980_v62  ;;  %v15228_v19 = vld [vmem:[#allocation53_spill] sm:$0xff] }
 0x806   : > { %v8273_v59 = vmul.f32 %v14059_v17, %v8243_v5 }
 0x807   : > { %v8125_v30 = vadd.f32 %v8124_v45, %v8053_v14 }
 0x808   : > { %v8281_v37 = vadd.f32 %v14077_v0, %v8273_v59  ;;  %v8130_v59 = vpop.f32.mrf.mxu3 }
 0x809   : > { %v8188_v1 = vpop.f32.mrf.mxu0  ;;  %v8250_v58 = vpop.f32.mrf.mxu1 }
 0x80a   : > { %v8289_v31 = vmax.f32 %v8281_v37, 0.0  ;;  %v8189_v21 = vadd.f32 %v8188_v1, %v8101_v56  ;;  %v7988_v56 = vadd.f32 %v14338_v10, %v14340_v9 }
 0x80c   : > { %v8247_v11 = vadd.f32 %v8246_v40, %v8189_v21  ;;  %8369 = vrot.lane.b32.xlu0 %v8289_v31, %s8694_s20  ;;  %v8057_v29 = vpop.f32.mrf.mxu2 }
 0x80d   : > { %v8058_v15 = vadd.f32 %v8057_v29, %v7984_v44  ;;  %v15232_v44 = vld [vmem:[#allocation36_spill] sm:$0xff] }
 0x80e   : > { %v8274_v42 = vmul.f32 %v14059_v17, %v8247_v11 }
 0x80f   : > { %v8131_v37 = vadd.f32 %v8130_v59, %v8058_v15 }
 0x810   : > { %v8282_v39 = vadd.f32 %v14077_v0, %v8274_v42  ;;  %v8136_v61 = vpop.f32.mrf.mxu3 }
 0x811   : > { %v8192_v51 = vpop.f32.mrf.mxu0  ;;  %v8254_v34 = vpop.f32.mrf.mxu1 }
 0x812   : > { %v8290_v23 = vmax.f32 %v8282_v39, 0.0  ;;  %v8193_v52 = vadd.f32 %v8192_v51, %v8107_v28 }
 0x814   : > { %v8251_v47 = vadd.f32 %v8250_v58, %v8193_v52  ;;  %8371 = vrot.lane.b32.xlu1 %v8290_v23, %s8694_s20  ;;  %v8062_v21 = vpop.f32.mrf.mxu2  ;;  %v8306_v52 = vpop.permute.xlu2 %8305 }
 0x815   : > { %v8063_v58 = vadd.f32 %v8062_v21, %v7988_v56 }
 0x816   : > { %v8275_v53 = vmul.f32 %v14059_v17, %v8251_v47  ;;  %v14377_v47 = vpop.permute.xlu0 %8307 }
 0x817   : > { %v8137_v42 = vadd.f32 %v8136_v61, %v8063_v58  ;;  %v15238_v58 = vld [vmem:[#allocation11_spill] sm:$0xff] }
 0x818   : > { %v8283_v55 = vadd.f32 %v14077_v0, %v8275_v53  ;;  %v15239_v61 = vld [vmem:[#allocation59_spill] sm:$0xff] }
 0x819   : > { %v8196_v50 = vpop.f32.mrf.mxu0  ;;  %v8258_v2 = vpop.f32.mrf.mxu1 }
 0x81a   : > { %v8291_v57 = vmax.f32 %v8283_v55, 0.0  ;;  %v8197_v63 = vadd.f32 %v8196_v50, %v8113_v16  ;;  %v15221_v55 = vld [vmem:[#allocation19_spill] sm:$0xff] }
 0x81b   : > { %v5533_v16 = vadd.f32 %v15221_v55, %v15220_v38  ;;  %v15241_v38 = vld [vmem:[#allocation10_spill] sm:$0xff]  ;;  %v15242_v55 = vld [vmem:[#allocation15_spill] sm:$0xff] }
 0x81c   : > { %v8255_v49 = vadd.f32 %v8254_v34, %v8197_v63  ;;  %8373 = vrot.lane.b32.xlu2 %v8291_v57, %s8694_s20  ;;  %v14375_v24 = vpop.permute.xlu2 %8311 }
 0x81d   : > { %v5603_v57 = vadd.f32 %v15222_v7, %v5533_v16  ;;  %v5537_v16 = vadd.f32 %v15242_v55, %v15241_v38 }
 0x81e   : > { %v8276_v36 = vmul.f32 %v14059_v17, %v8255_v49  ;;  %v14383_v50 = vpop.permute.xlu0 %8313 }
 0x820   : > { %v8284_v13 = vadd.f32 %v14077_v0, %v8276_v36 }
 0x821   : > { %v8200_v60 = vpop.f32.mrf.mxu0  ;;  %v8262_v22 = vpop.f32.mrf.mxu1 }
 0x822   : > { %v8292_v25 = vmax.f32 %v8284_v13, 0.0  ;;  %v8201_v32 = vadd.f32 %v8200_v60, %v8119_v8  ;;  %v15227_v13 = vld [vmem:[#allocation20_spill] sm:$0xff]  ;;  %v14391_v60 = vpop.permute.xlu1 %8315 }
 0x824   : > { %v8259_v41 = vadd.f32 %v8258_v2, %v8201_v32  ;;  %8375 = vrot.lane.b32.xlu0 %v8292_v25, %s8694_s20  ;;  %v14379_v53 = vpop.permute.xlu2 %8317  ;;  %v15225_v2 = vld [vmem:[#allocation75_spill] sm:$0xff] }
 0x825   : > { %v5672_v36 = vadd.f32 %v15225_v2, %v5603_v57  ;;  %v15245_v2 = vld [vmem:[#allocation37_spill] sm:$0xff] }
 0x826   : > { %v8277_v12 = vmul.f32 %v14059_v17, %v8259_v41  ;;  %v14393_v25 = vpop.permute.xlu0 %8319  ;;  %v15229_v41 = vld [vmem:[#allocation46_spill] sm:$0xff] }
 0x827   : > { %v5758_v62 = vadd.f32 %v15226_v3, %v5672_v36  ;;  %v5608_v36 = vadd.f32 %v15245_v2, %v5537_v16  ;;  %v15258_v16 = vld [vmem:[#allocation77_spill] sm:$0xff] }
 0x828   : > { %v8285_v54 = vadd.f32 %v14077_v0, %v8277_v12  ;;  %v15230_v12 = vld [vmem:[#allocation47_spill] sm:$0xff] }
 0x829   : > { %v8204_v26 = vpop.f32.mrf.mxu0  ;;  %v8266_v18 = vpop.f32.mrf.mxu1  ;;  %v5816_v14 = vadd.f32 %v15228_v19, %v5758_v62  ;;  %v5529_v45 = vadd.f32 %v15230_v12, %v15229_v41  ;;  %v15246_v19 = vld [vmem:[#allocation72_spill] sm:$0xff] }
 0x82a   : > { %v8293_v43 = vmax.f32 %v8285_v54, 0.0  ;;  %v8205_v40 = vadd.f32 %v8204_v26, %v8125_v30  ;;  %v8338_v29 = vpop.permute.xlu1 %8337 }
 0x82b   : > { %v5844_v26 = vmul.f32 %v14370_v46, %v5816_v14 }
 0x82c   : > { %v8263_v5 = vadd.f32 %v8262_v22, %v8205_v40  ;;  %8377 = vrot.lane.b32.xlu1 %v8293_v43, %s8694_s20  ;;  %v8340_v63 = vpop.permute.xlu2 %8339  ;;  %v15231_v22 = vld [vmem:[#allocation62_spill] sm:$0xff] }
 0x82d   : > { %v15233_v43 = vld [vmem:[#allocation18_spill] sm:$0xff] }
 0x82e   : > { %v8278_v48 = vmul.f32 %v14059_v17, %v8263_v5  ;;  %v5598_v40 = vadd.f32 %v15233_v43, %v5529_v45  ;;  %v8342_v15 = vpop.permute.xlu0 %8341  ;;  %v15247_v45 = vld [vmem:[#allocation52_spill] sm:$0xff] }
 0x830   : > { %v8286_v1 = vadd.f32 %v14077_v0, %v8278_v48  ;;  %v15234_v48 = vld [vmem:[#allocation28_spill] sm:$0xff] }
 0x831   : > { %v8208_v35 = vpop.f32.mrf.mxu0  ;;  %v8270_v9 = vpop.f32.mrf.mxu1 }
 0x832   : > { %v8294_v33 = vmax.f32 %v8286_v1, 0.0  ;;  %v8209_v31 = vadd.f32 %v8208_v35, %v8131_v37  ;;  %v14410_v37 = vld [vmem:[%s14527_s9] ss:$0 sm:$0xff]  ;;  %v15235_v1 = vld [vmem:[#allocation27_spill] sm:$0xff] }
 0x833   : > { %v5856_v56 = vadd.f32 %v14410_v37, %v5844_v26  ;;  %v15250_v26 = vld [vmem:[#allocation7_spill] sm:$0xff] }
 0x834   : > { %v8267_v6 = vadd.f32 %v8266_v18, %v8209_v31  ;;  %8379 = vrot.lane.b32.xlu2 %v8294_v33, %s8694_s20  ;;  %v14395_v32 = vpop.permute.xlu2 %8345  ;;  %v15236_v18 = vld [vmem:[#allocation66_spill] sm:$0xff]  ;;  %v15237_v33 = vld [vmem:[#allocation24_spill] sm:$0xff] }
 0x835   : > { %v5545_v35 = vadd.f32 %v15236_v18, %v15235_v1  ;;  %v5666_v31 = vadd.f32 %v15237_v33, %v5598_v40  ;;  %v15252_v1 = vld [vmem:[#allocation55_spill] sm:$0xff] }
 0x836   : > { %v8279_v11 = vmul.f32 %v14059_v17, %v8267_v6 }
 0x837   : > { %v5754_v6 = vadd.f32 %v15238_v58, %v5666_v31  ;;  %v15253_v31 = vld [vmem:[#allocation64_spill] sm:$0xff] }
 0x838   : > { %v8287_v20 = vadd.f32 %v14077_v0, %v8279_v11  ;;  %v5864_v11 = vmax.f32 %v5856_v56, 0.0 }
 0x839   : > { %v8212_v39 = vpop.f32.mrf.mxu0 }
 0x83a   : > { %v8295_v28 = vmax.f32 %v8287_v20, 0.0  ;;  %v8213_v10 = vadd.f32 %v8212_v39, %v8137_v42  ;;  %v5618_v42 = vadd.f32 %v15239_v61, %v5545_v35  ;;  %v8395_v20 = vsel %vm380_vm2, %v5864_v11, %v8310_v4  ;;  %v8344_v39 = vpop.permute.xlu1 %8343  ;;  %v15243_v4 = vld [vmem:[#allocation68_spill] sm:$0xff] }
 0x83c   : > { %v8271_v51 = vadd.f32 %v8270_v9, %v8213_v10  ;;  %8381 = vrot.lane.b32.xlu0 %v8295_v28, %s8694_s20  ;;  %v14404_v5 = vpop.permute.xlu2 %8351  ;;  %v8403_v28 = vsel %vm1534_vm5, %v8395_v20, %v8342_v15  ;;  %v8348_v10 = vpop.permute.xlu0 %8347  ;;  %v5690_v7 = vadd.f32 %v15243_v4, %v5618_v42  ;;  %v15255_v20 = vld [vmem:[#allocation61_spill] sm:$0xff] }
 0x83e   : > { %v8280_v23 = vmul.f32 %v14370_v46, %v8271_v51  ;;  %v15240_v51 = vld [vmem:[#allocation49_spill] sm:$0xff] }
 0x840   : > { %v8288_v17 = vadd.f32 %v14077_v0, %v8280_v23  ;;  %v15223_v0 = vld [vmem:[#allocation51_spill] sm:$0xff]  ;;  %v5812_v23 = vadd.f32 %v15240_v51, %v5754_v6  ;;  %v15254_v6 = vld [vmem:[#allocation73_spill] sm:$0xff] }
 0x841   : > { %v5525_v49 = vadd.f32 %v15224_v27, %v15223_v0  ;;  %v15244_v0 = vld [vmem:[#allocation31_spill] sm:$0xff] }
 0x842   : > { %v8296_v34 = vmax.f32 %v8288_v17, 0.0  ;;  %v5843_v57 = vmul.f32 %v14370_v46, %v5812_v23  ;;  %v5770_v27 = vadd.f32 %v15244_v0, %v5690_v7  ;;  %v15256_v23 = vld [vmem:[#allocation33_spill] sm:$0xff] }
 0x843   : > { %v5593_v8 = vadd.f32 %v15227_v13, %v5525_v49  ;;  %v8350_v13 = vpop.permute.xlu1 %8349 }
 0x844   : > { %8383 = vrot.lane.b32.xlu1 %v8296_v34, %s8694_s20  ;;  %v5828_v14 = vadd.f32 %v15246_v19, %v5770_v27  ;;  %v5855_v41 = vadd.f32 %v14410_v37, %v5843_v57  ;;  %v15259_v27 = vld [vmem:[#allocation16_spill] sm:$0xff] }
 0x845   : > { %v5660_v30 = vadd.f32 %v15231_v22, %v5593_v8  ;;  %v15248_v22 = vld [vmem:[#allocation4_spill] sm:$0xff] }
 0x846   : > { %v5847_v43 = vmul.f32 %v14370_v46, %v5828_v14  ;;  %v5863_v40 = vmax.f32 %v5855_v41, 0.0  ;;  %v15263_v14 = vld [vmem:[#allocation45_spill] sm:$0xff] }
 0x847   : > { %v5750_v54 = vadd.f32 %v15232_v44, %v5660_v30  ;;  %v5541_v30 = vadd.f32 %v15248_v22, %v15247_v45  ;;  %v15249_v44 = vld [vmem:[#allocation67_spill] sm:$0xff] }
 0x848   : > { %v5859_v35 = vadd.f32 %v14410_v37, %v5847_v43  ;;  %v15264_v45 = vld [vmem:[#allocation39_spill] sm:$0xff] }
 0x849   : > { %v5808_v59 = vadd.f32 %v15234_v48, %v5750_v54  ;;  %v5678_v54 = vadd.f32 %v15249_v44, %v5608_v36  ;;  %v8394_v48 = vsel %vm380_vm2, %v5863_v40, %v14377_v47  ;;  %v15261_v36 = vld [vmem:[#allocation76_spill] sm:$0xff]  ;;  %v15265_v44 = vld [vmem:[#allocation30_spill] sm:$0xff]  ;;  %v15267_v40 = vld [vmem:[#allocation35_spill] sm:$0xff] }
 0x84a   : > { %v5867_v61 = vmax.f32 %v5859_v35, 0.0 }
 0x84b   : > { %v5842_v21 = vmul.f32 %v14370_v46, %v5808_v59  ;;  %v8402_v59 = vsel %vm1534_vm5, %v8394_v48, %v8340_v63 }
 0x84c   : > { %v8398_v47 = vsel %vm380_vm2, %v5867_v61, %v14391_v60 }
 0x84d   : > { %v5854_v17 = vadd.f32 %v14410_v37, %v5842_v21  ;;  %v8406_v63 = vsel %vm1534_vm5, %v8398_v47, %v8348_v10 }
 0x84f   : > { %v5862_v49 = vmax.f32 %v5854_v17, 0.0  ;;  %v15257_v17 = vld [vmem:[#allocation26_spill] sm:$0xff] }
 0x851   : > { %v8393_v3 = vsel %vm380_vm2, %v5862_v49, %v8306_v52  ;;  %v5762_v52 = vadd.f32 %v15250_v26, %v5678_v54  ;;  %v15260_v49 = vld [vmem:[#allocation50_spill] sm:$0xff] }
 0x852   : > { %v8401_v62 = vsel %vm1534_vm5, %v8393_v3, %v8338_v29  ;;  %v15251_v29 = vld [vmem:[#allocation48_spill] sm:$0xff]  ;;  %v5553_v2 = vadd.f32 %v15260_v49, %v15259_v27 }
 0x853   : > { %v5613_v15 = vadd.f32 %v15251_v29, %v5541_v30  ;;  %v5820_v18 = vadd.f32 %v15252_v1, %v5762_v52  ;;  %v15266_v52 = vld [vmem:[#allocation41_spill] sm:$0xff] }
 0x855   : > { %v5684_v21 = vadd.f32 %v15253_v31, %v5613_v15  ;;  %v5845_v58 = vmul.f32 %v14370_v46, %v5820_v18 }
 0x857   : > { %v5766_v11 = vadd.f32 %v15254_v6, %v5684_v21 }
 0x876   : > { %v8374_v9 = vpop.permute.xlu2 %8373 }
 0x877   : > { %v8411_v34 = vsel %vm1543_vm6, %v8403_v28, %v8374_v9  ;;  %v5824_v28 = vadd.f32 %v15255_v20, %v5766_v11  ;;  %v5857_v9 = vadd.f32 %v14410_v37, %v5845_v58 }
 0x878   : > { %8419 = vst.msk [vmem:[%s14425_s19 + $0x10] sm:$0xff] %vm1552_vm7, %v8411_v34  ;;  %v5549_v34 = vadd.f32 %v15257_v17, %v15256_v23 }
 0x879   : > { %v5846_v38 = vmul.f32 %v14370_v46, %v5824_v28  ;;  %v5865_v55 = vmax.f32 %v5857_v9, 0.0 }
 0x87a   : > { %v5623_v60 = vadd.f32 %v15258_v16, %v5549_v34 }
 0x87b   : > { %v8396_v10 = vsel %vm380_vm2, %v5865_v55, %v14375_v24  ;;  %v5858_v57 = vadd.f32 %v14410_v37, %v5846_v38  ;;  %v5628_v24 = vadd.f32 %v15263_v14, %v5553_v2 }
 0x87c   : > { %v8404_v4 = vsel %vm1534_vm5, %v8396_v10, %v8344_v39  ;;  %v5696_v3 = vadd.f32 %v15261_v36, %v5623_v60 }
 0x87d   : > { %v5866_v19 = vmax.f32 %v5858_v57, 0.0  ;;  %v5702_v54 = vadd.f32 %v15265_v44, %v5628_v24 }
 0x87e   : > { %v8370_v8 = vpop.permute.xlu0 %8369 }
 0x87f   : > { %v8409_v12 = vsel %vm1543_vm6, %v8401_v62, %v8370_v8  ;;  %v15262_v62 = vld [vmem:[#allocation23_spill] sm:$0xff]  ;;  %v8397_v39 = vsel %vm380_vm2, %v5866_v19, %v14383_v50  ;;  %v5778_v43 = vadd.f32 %v15266_v52, %v5702_v54 }
 0x880   : > { %8417 = vst.msk [vmem:[%s14425_s19] sm:$0xff] %vm1552_vm7, %v8409_v12  ;;  %v5774_v8 = vadd.f32 %v15262_v62, %v5696_v3  ;;  %v8405_v41 = vsel %vm1534_vm5, %v8397_v39, %v14395_v32 }
 0x881   : > { %v5836_v50 = vadd.f32 %v15267_v40, %v5778_v43 }
 0x882   : > { %v5832_v22 = vadd.f32 %v15264_v45, %v5774_v8 }
 0x883   : > { %v5849_v32 = vmul.f32 %v14370_v46, %v5836_v50 }
 0x884   : > { %v5848_v26 = vmul.f32 %v14370_v46, %v5832_v22 }
 0x885   : > { %v5861_v1 = vadd.f32 %v14410_v37, %v5849_v32 }
 0x886   : > { %v8372_v56 = vpop.permute.xlu1 %8371  ;;  %v5860_v29 = vadd.f32 %v14410_v37, %v5848_v26 }
 0x887   : > { %v8410_v33 = vsel %vm1543_vm6, %v8402_v59, %v8372_v56  ;;  %v5869_v35 = vmax.f32 %v5861_v1, 0.0 }
 0x888   : > { %8418 = vst.msk [vmem:[%s14425_s19 + $0x8] sm:$0xff] %vm1552_vm7, %v8410_v33  ;;  %v5868_v15 = vmax.f32 %v5860_v29, 0.0 }
 0x889   : > { %v8400_v33 = vsel %vm380_vm2, %v5869_v35, %v14393_v25 }
 0x88a   : > { %v8399_v48 = vsel %vm380_vm2, %v5868_v15, %v14379_v53  ;;  %v8408_v46 = vsel %vm1534_vm5, %v8400_v33, %v14404_v5 }
 0x88b   : > { %v8407_v59 = vsel %vm1534_vm5, %v8399_v48, %v8350_v13 }
 0x88e   : > { %v8380_v42 = vpop.permute.xlu2 %8379 }
 0x88f   : > { %v8414_v51 = vsel %vm1543_vm6, %v8406_v63, %v8380_v42 }
 0x890   : > { %8422 = vst.msk [vmem:[%s14425_s19 + $0x28] sm:$0xff] %vm1552_vm7, %v8414_v51 }
 0x896   : > { %v8376_v7 = vpop.permute.xlu0 %8375 }
 0x897   : > { %v8412_v0 = vsel %vm1543_vm6, %v8404_v4, %v8376_v7 }
 0x898   : > { %8420 = vst.msk [vmem:[%s14425_s19 + $0x18] sm:$0xff] %vm1552_vm7, %v8412_v0 }
 0x89e   : > { %v8378_v12 = vpop.permute.xlu1 %8377 }
 0x89f   : > { %v8413_v30 = vsel %vm1543_vm6, %v8405_v41, %v8378_v12 }
 0x8a0   : > { %8421 = vst.msk [vmem:[%s14425_s19 + $0x20] sm:$0xff] %vm1552_vm7, %v8413_v30 }
 0x8ae   : > { %v8382_v56 = vpop.permute.xlu0 %8381 }
 0x8af   : > { %v8415_v18 = vsel %vm1543_vm6, %v8407_v59, %v8382_v56 }
 0x8b0   : > { %8423 = vst.msk [vmem:[%s14425_s19 + $0x30] sm:$0xff] %vm1552_vm7, %v8415_v18 }
 0x8b6   : > { %v8384_v31 = vpop.permute.xlu1 %8383 }
 0x8b7   : > { %v8416_v21 = vsel %vm1543_vm6, %v8408_v46, %v8384_v31 }
 0x8b8   : > { %8424 = vst.msk [vmem:[%s14425_s19 + $0x38] sm:$0xff] %vm1552_vm7, %v8416_v21 }
 0x8b9 PF: > { %s20_s13 = sadd.s32 1, %s8681_s13  }
 0x8ba   : > { %p17_p4 = scmp.ge.s32.totalorder %s20_s13, 4  }
 0x8bc   :  { %19 = sbr.rel (!%p17_p4) target bundleno = 1 (0x1), region = 117 }

</bundles_post_ra>
